<compile_context>
chip_gen: v5e
topology: v5e:2x2
jax: 0.10.0
libtpu: 0.0.40
codegen_flags: <defaults>
</compile_context>

<pallas_src>
import jax
import jax.numpy as jnp
import numpy as np
from jax.experimental import pallas as pl
from jax.experimental.pallas import tpu as pltpu

EPS = 1e-5  # PyTorch InstanceNorm2d default eps


def _reflect_pad(p, H, W):
    """ReflectionPad2d(1) on one (H, W) plane -> (H+2, W+2). Pure slicing in VMEM."""
    p = jnp.concatenate([p[:, 1:2], p, p[:, W - 2:W - 1]], axis=1)   # (H, W+2)
    p = jnp.concatenate([p[1:2, :], p, p[H - 2:H - 1, :]], axis=0)   # (H+2, W+2)
    return p


def _conv3x3(pad_planes, w_ref, C, H, W):
    """3x3 'valid' conv on reflection-padded planes.

    pad_planes: list of C (H+2, W+2) f32 values.
    w_ref: SMEM ref, flat (C*C*9,), OIHW order.  Bias intentionally omitted
    (cancelled exactly by the following affine=False InstanceNorm).
    Each shifted window is sliced ONCE and accumulated into all C outputs.
    """
    accs = [jnp.zeros((H, W), jnp.float32) for _ in range(C)]
    for ci in range(C):
        for kh in range(3):
            for kw in range(3):
                win = pad_planes[ci][kh:kh + H, kw:kw + W]          # one slice
                for co in range(C):
                    wv = w_ref[((co * C + ci) * 3 + kh) * 3 + kw]   # SMEM scalar
                    accs[co] = accs[co] + wv * win
    return accs  # list of C (H, W)


def _instance_norm(p, H, W):
    """InstanceNorm2d (affine=False) on one (H, W) plane, one-pass statistics."""
    inv_hw = 1.0 / (H * W)
    s = jnp.sum(jnp.sum(p, axis=1, keepdims=True), axis=0, keepdims=True)        # (1,1)
    ss = jnp.sum(jnp.sum(p * p, axis=1, keepdims=True), axis=0, keepdims=True)   # (1,1)
    mean = s * inv_hw
    var = ss * inv_hw - mean * mean
    return (p - mean) * jax.lax.rsqrt(var + EPS)


def _resnet_block_kernel(x_ref, w1_ref, w2_ref, o_ref):
    _, C, H, W = o_ref.shape
    x_planes = [x_ref[0, ci].astype(jnp.float32) for ci in range(C)]

    # --- stage 1: reflect-pad -> conv3x3 -> instance-norm -> ReLU (-> Dropout=id) ---
    xpad = [_reflect_pad(p, H, W) for p in x_planes]
    y1 = _conv3x3(xpad, w1_ref, C, H, W)
    h = [jnp.maximum(_instance_norm(p, H, W), 0.0) for p in y1]

    # --- stage 2: reflect-pad -> conv3x3 -> instance-norm -> residual add ---
    hpad = [_reflect_pad(p, H, W) for p in h]
    y2 = _conv3x3(hpad, w2_ref, C, H, W)
    for co in range(C):
        out = x_planes[co] + _instance_norm(y2[co], H, W)
        o_ref[0, co] = out.astype(o_ref.dtype)


def resnet_block(x, w1, b1, w2, b2):
    """x: (N, C, H, W).  w1, w2: (C, C, 3, 3) OIHW.  b1, b2: (C,) (cancelled by norm)."""
    del b1, b2  # per-channel constants are exactly removed by affine=False InstanceNorm
    N, C, H, W = x.shape
    smem_spec = pl.BlockSpec(memory_space=pltpu.MemorySpace.SMEM)
    img_spec = pl.BlockSpec((1, C, H, W), lambda n: (n, 0, 0, 0))

    return pl.pallas_call(
        _resnet_block_kernel,
        grid=(N,),
        in_specs=[img_spec, smem_spec, smem_spec],
        out_specs=img_spec,
        out_shape=jax.ShapeDtypeStruct((N, C, H, W), x.dtype),
        compiler_params=pltpu.CompilerParams(dimension_semantics=("parallel",)),
    )(x, w1.reshape(-1), w2.reshape(-1))


def resnet_block_ref(x, w1, b1, w2, b2):
    """Pure-JAX reference mirroring the PyTorch module (eval mode, with conv bias)."""
    def conv(z, w, b):
        zp = jnp.pad(z, ((0, 0), (0, 0), (1, 1), (1, 1)), mode="reflect")
        y = jax.lax.conv_general_dilated(
            zp, w, window_strides=(1, 1), padding="VALID",
            dimension_numbers=("NCHW", "OIHW", "NCHW"))
        return y + b[None, :, None, None]

    def inorm(z):
        m = jnp.mean(z, axis=(2, 3), keepdims=True)
        v = jnp.mean((z - m) ** 2, axis=(2, 3), keepdims=True)
        return (z - m) * jax.lax.rsqrt(v + EPS)

    h = jnp.maximum(inorm(conv(x, w1, b1)), 0.0)
    return x + inorm(conv(h, w2, b2))


if __name__ == "__main__":
    N, C, H, W = 2, 4, 16, 16  # dim = 4

    key = jax.random.PRNGKey(0)
    kx, kw1, kb1, kw2, kb2 = jax.random.split(key, 5)
    x = jax.random.normal(kx, (N, C, H, W), jnp.float32)
    w1 = jax.random.normal(kw1, (C, C, 3, 3), jnp.float32) * 0.1
    b1 = jax.random.normal(kb1, (C,), jnp.float32) * 0.1
    w2 = jax.random.normal(kw2, (C, C, 3, 3), jnp.float32) * 0.1
    b2 = jax.random.normal(kb2, (C,), jnp.float32) * 0.1

    out = jax.block_until_ready(resnet_block(x, w1, b1, w2, b2))
    ref = jax.block_until_ready(resnet_block_ref(x, w1, b1, w2, b2))

    assert out.shape == (N, C, H, W) and out.dtype == jnp.float32
    np.testing.assert_allclose(np.asarray(out), np.asarray(ref), atol=1e-4, rtol=1e-4)
    print("KERNEL_OK")
</pallas_src>

<mosaic_0001>
module attributes {stable_mosaic.version = 11 : i64} {
  func.func @_resnet_block_kernel(%arg0: i32, %arg1: memref<1x4x16x16xf32, #tpu.memory_space<vmem>>, %arg2: memref<144xf32, #tpu.memory_space<smem>>, %arg3: memref<144xf32, #tpu.memory_space<smem>>, %arg4: memref<1x4x16x16xf32, #tpu.memory_space<vmem>>) attributes {dimension_semantics = [#tpu.dimension_semantics<parallel>], iteration_bounds = array<i64: 2>, scalar_prefetch = 0 : i64, scratch_operands = 0 : i64, tpu.core_type = #tpu.core_type<tc>, window_params = [{transform_indices = @transform_0, window_bounds = array<i64: 1, 4, 16, 16>}, {transform_indices = @transform_1, window_bounds = array<i64: 144>}, {transform_indices = @transform_2, window_bounds = array<i64: 144>}, {transform_indices = @transform_3, window_bounds = array<i64: 1, 4, 16, 16>}]} {
    %c0 = arith.constant 0 : index
    %c0_0 = arith.constant 0 : index
    %c0_1 = arith.constant 0 : index
    %c0_2 = arith.constant 0 : index
    %0 = vector.load %arg1[%c0, %c0_0, %c0_1, %c0_2] : memref<1x4x16x16xf32, #tpu.memory_space<vmem>>, vector<1x1x16x16xf32>
    %1 = vector.shape_cast %0 : vector<1x1x16x16xf32> to vector<16x16xf32>
    %c0_3 = arith.constant 0 : index
    %c1 = arith.constant 1 : index
    %c0_4 = arith.constant 0 : index
    %c0_5 = arith.constant 0 : index
    %2 = vector.load %arg1[%c0_3, %c1, %c0_4, %c0_5] : memref<1x4x16x16xf32, #tpu.memory_space<vmem>>, vector<1x1x16x16xf32>
    %3 = vector.shape_cast %2 : vector<1x1x16x16xf32> to vector<16x16xf32>
    %c0_6 = arith.constant 0 : index
    %c2 = arith.constant 2 : index
    %c0_7 = arith.constant 0 : index
    %c0_8 = arith.constant 0 : index
    %4 = vector.load %arg1[%c0_6, %c2, %c0_7, %c0_8] : memref<1x4x16x16xf32, #tpu.memory_space<vmem>>, vector<1x1x16x16xf32>
    %5 = vector.shape_cast %4 : vector<1x1x16x16xf32> to vector<16x16xf32>
    %c0_9 = arith.constant 0 : index
    %c3 = arith.constant 3 : index
    %c0_10 = arith.constant 0 : index
    %c0_11 = arith.constant 0 : index
    %6 = vector.load %arg1[%c0_9, %c3, %c0_10, %c0_11] : memref<1x4x16x16xf32, #tpu.memory_space<vmem>>, vector<1x1x16x16xf32>
    %7 = vector.shape_cast %6 : vector<1x1x16x16xf32> to vector<16x16xf32>
    %8 = vector.extract_strided_slice %1 {offsets = [0, 1], sizes = [16, 1], strides = [1, 1]} : vector<16x16xf32> to vector<16x1xf32>
    %9 = vector.extract_strided_slice %1 {offsets = [0, 14], sizes = [16, 1], strides = [1, 1]} : vector<16x16xf32> to vector<16x1xf32>
    %10 = tpu.concatenate %8, %1, %9 in 1 : vector<16x1xf32>, vector<16x16xf32>, vector<16x1xf32> -> vector<16x18xf32>
    %11 = vector.extract_strided_slice %10 {offsets = [1, 0], sizes = [1, 18], strides = [1, 1]} : vector<16x18xf32> to vector<1x18xf32>
    %12 = vector.extract_strided_slice %10 {offsets = [14, 0], sizes = [1, 18], strides = [1, 1]} : vector<16x18xf32> to vector<1x18xf32>
    %13 = tpu.concatenate %11, %10, %12 in 0 : vector<1x18xf32>, vector<16x18xf32>, vector<1x18xf32> -> vector<18x18xf32>
    %14 = vector.extract_strided_slice %3 {offsets = [0, 1], sizes = [16, 1], strides = [1, 1]} : vector<16x16xf32> to vector<16x1xf32>
    %15 = vector.extract_strided_slice %3 {offsets = [0, 14], sizes = [16, 1], strides = [1, 1]} : vector<16x16xf32> to vector<16x1xf32>
    %16 = tpu.concatenate %14, %3, %15 in 1 : vector<16x1xf32>, vector<16x16xf32>, vector<16x1xf32> -> vector<16x18xf32>
    %17 = vector.extract_strided_slice %16 {offsets = [1, 0], sizes = [1, 18], strides = [1, 1]} : vector<16x18xf32> to vector<1x18xf32>
    %18 = vector.extract_strided_slice %16 {offsets = [14, 0], sizes = [1, 18], strides = [1, 1]} : vector<16x18xf32> to vector<1x18xf32>
    %19 = tpu.concatenate %17, %16, %18 in 0 : vector<1x18xf32>, vector<16x18xf32>, vector<1x18xf32> -> vector<18x18xf32>
    %20 = vector.extract_strided_slice %5 {offsets = [0, 1], sizes = [16, 1], strides = [1, 1]} : vector<16x16xf32> to vector<16x1xf32>
    %21 = vector.extract_strided_slice %5 {offsets = [0, 14], sizes = [16, 1], strides = [1, 1]} : vector<16x16xf32> to vector<16x1xf32>
    %22 = tpu.concatenate %20, %5, %21 in 1 : vector<16x1xf32>, vector<16x16xf32>, vector<16x1xf32> -> vector<16x18xf32>
    %23 = vector.extract_strided_slice %22 {offsets = [1, 0], sizes = [1, 18], strides = [1, 1]} : vector<16x18xf32> to vector<1x18xf32>
    %24 = vector.extract_strided_slice %22 {offsets = [14, 0], sizes = [1, 18], strides = [1, 1]} : vector<16x18xf32> to vector<1x18xf32>
    %25 = tpu.concatenate %23, %22, %24 in 0 : vector<1x18xf32>, vector<16x18xf32>, vector<1x18xf32> -> vector<18x18xf32>
    %26 = vector.extract_strided_slice %7 {offsets = [0, 1], sizes = [16, 1], strides = [1, 1]} : vector<16x16xf32> to vector<16x1xf32>
    %27 = vector.extract_strided_slice %7 {offsets = [0, 14], sizes = [16, 1], strides = [1, 1]} : vector<16x16xf32> to vector<16x1xf32>
    %28 = tpu.concatenate %26, %7, %27 in 1 : vector<16x1xf32>, vector<16x16xf32>, vector<16x1xf32> -> vector<16x18xf32>
    %29 = vector.extract_strided_slice %28 {offsets = [1, 0], sizes = [1, 18], strides = [1, 1]} : vector<16x18xf32> to vector<1x18xf32>
    %30 = vector.extract_strided_slice %28 {offsets = [14, 0], sizes = [1, 18], strides = [1, 1]} : vector<16x18xf32> to vector<1x18xf32>
    %31 = tpu.concatenate %29, %28, %30 in 0 : vector<1x18xf32>, vector<16x18xf32>, vector<1x18xf32> -> vector<18x18xf32>
    %cst = arith.constant 0.000000e+00 : f32
    %32 = vector.broadcast %cst : f32 to vector<16x16xf32>
    %cst_12 = arith.constant 0.000000e+00 : f32
    %33 = vector.broadcast %cst_12 : f32 to vector<16x16xf32>
    %cst_13 = arith.constant 0.000000e+00 : f32
    %34 = vector.broadcast %cst_13 : f32 to vector<16x16xf32>
    %cst_14 = arith.constant 0.000000e+00 : f32
    %35 = vector.broadcast %cst_14 : f32 to vector<16x16xf32>
    %36 = vector.extract_strided_slice %13 {offsets = [0, 0], sizes = [16, 16], strides = [1, 1]} : vector<18x18xf32> to vector<16x16xf32>
    %c0_15 = arith.constant 0 : index
    %37 = memref.load %arg2[%c0_15] : memref<144xf32, #tpu.memory_space<smem>>
    %38 = vector.broadcast %37 : f32 to vector<16x16xf32>
    %39 = arith.mulf %38, %36 : vector<16x16xf32>
    %40 = arith.addf %32, %39 : vector<16x16xf32>
    %c36 = arith.constant 36 : index
    %41 = memref.load %arg2[%c36] : memref<144xf32, #tpu.memory_space<smem>>
    %42 = vector.broadcast %41 : f32 to vector<16x16xf32>
    %43 = arith.mulf %42, %36 : vector<16x16xf32>
    %44 = arith.addf %33, %43 : vector<16x16xf32>
    %c72 = arith.constant 72 : index
    %45 = memref.load %arg2[%c72] : memref<144xf32, #tpu.memory_space<smem>>
    %46 = vector.broadcast %45 : f32 to vector<16x16xf32>
    %47 = arith.mulf %46, %36 : vector<16x16xf32>
    %48 = arith.addf %34, %47 : vector<16x16xf32>
    %c108 = arith.constant 108 : index
    %49 = memref.load %arg2[%c108] : memref<144xf32, #tpu.memory_space<smem>>
    %50 = vector.broadcast %49 : f32 to vector<16x16xf32>
    %51 = arith.mulf %50, %36 : vector<16x16xf32>
    %52 = arith.addf %35, %51 : vector<16x16xf32>
    %53 = vector.extract_strided_slice %13 {offsets = [0, 1], sizes = [16, 16], strides = [1, 1]} : vector<18x18xf32> to vector<16x16xf32>
    %c1_16 = arith.constant 1 : index
    %54 = memref.load %arg2[%c1_16] : memref<144xf32, #tpu.memory_space<smem>>
    %55 = vector.broadcast %54 : f32 to vector<16x16xf32>
    %56 = arith.mulf %55, %53 : vector<16x16xf32>
    %57 = arith.addf %40, %56 : vector<16x16xf32>
    %c37 = arith.constant 37 : index
    %58 = memref.load %arg2[%c37] : memref<144xf32, #tpu.memory_space<smem>>
    %59 = vector.broadcast %58 : f32 to vector<16x16xf32>
    %60 = arith.mulf %59, %53 : vector<16x16xf32>
    %61 = arith.addf %44, %60 : vector<16x16xf32>
    %c73 = arith.constant 73 : index
    %62 = memref.load %arg2[%c73] : memref<144xf32, #tpu.memory_space<smem>>
    %63 = vector.broadcast %62 : f32 to vector<16x16xf32>
    %64 = arith.mulf %63, %53 : vector<16x16xf32>
    %65 = arith.addf %48, %64 : vector<16x16xf32>
    %c109 = arith.constant 109 : index
    %66 = memref.load %arg2[%c109] : memref<144xf32, #tpu.memory_space<smem>>
    %67 = vector.broadcast %66 : f32 to vector<16x16xf32>
    %68 = arith.mulf %67, %53 : vector<16x16xf32>
    %69 = arith.addf %52, %68 : vector<16x16xf32>
    %70 = vector.extract_strided_slice %13 {offsets = [0, 2], sizes = [16, 16], strides = [1, 1]} : vector<18x18xf32> to vector<16x16xf32>
    %c2_17 = arith.constant 2 : index
    %71 = memref.load %arg2[%c2_17] : memref<144xf32, #tpu.memory_space<smem>>
    %72 = vector.broadcast %71 : f32 to vector<16x16xf32>
    %73 = arith.mulf %72, %70 : vector<16x16xf32>
    %74 = arith.addf %57, %73 : vector<16x16xf32>
    %c38 = arith.constant 38 : index
    %75 = memref.load %arg2[%c38] : memref<144xf32, #tpu.memory_space<smem>>
    %76 = vector.broadcast %75 : f32 to vector<16x16xf32>
    %77 = arith.mulf %76, %70 : vector<16x16xf32>
    %78 = arith.addf %61, %77 : vector<16x16xf32>
    %c74 = arith.constant 74 : index
    %79 = memref.load %arg2[%c74] : memref<144xf32, #tpu.memory_space<smem>>
    %80 = vector.broadcast %79 : f32 to vector<16x16xf32>
    %81 = arith.mulf %80, %70 : vector<16x16xf32>
    %82 = arith.addf %65, %81 : vector<16x16xf32>
    %c110 = arith.constant 110 : index
    %83 = memref.load %arg2[%c110] : memref<144xf32, #tpu.memory_space<smem>>
    %84 = vector.broadcast %83 : f32 to vector<16x16xf32>
    %85 = arith.mulf %84, %70 : vector<16x16xf32>
    %86 = arith.addf %69, %85 : vector<16x16xf32>
    %87 = vector.extract_strided_slice %13 {offsets = [1, 0], sizes = [16, 16], strides = [1, 1]} : vector<18x18xf32> to vector<16x16xf32>
    %c3_18 = arith.constant 3 : index
    %88 = memref.load %arg2[%c3_18] : memref<144xf32, #tpu.memory_space<smem>>
    %89 = vector.broadcast %88 : f32 to vector<16x16xf32>
    %90 = arith.mulf %89, %87 : vector<16x16xf32>
    %91 = arith.addf %74, %90 : vector<16x16xf32>
    %c39 = arith.constant 39 : index
    %92 = memref.load %arg2[%c39] : memref<144xf32, #tpu.memory_space<smem>>
    %93 = vector.broadcast %92 : f32 to vector<16x16xf32>
    %94 = arith.mulf %93, %87 : vector<16x16xf32>
    %95 = arith.addf %78, %94 : vector<16x16xf32>
    %c75 = arith.constant 75 : index
    %96 = memref.load %arg2[%c75] : memref<144xf32, #tpu.memory_space<smem>>
    %97 = vector.broadcast %96 : f32 to vector<16x16xf32>
    %98 = arith.mulf %97, %87 : vector<16x16xf32>
    %99 = arith.addf %82, %98 : vector<16x16xf32>
    %c111 = arith.constant 111 : index
    %100 = memref.load %arg2[%c111] : memref<144xf32, #tpu.memory_space<smem>>
    %101 = vector.broadcast %100 : f32 to vector<16x16xf32>
    %102 = arith.mulf %101, %87 : vector<16x16xf32>
    %103 = arith.addf %86, %102 : vector<16x16xf32>
    %104 = vector.extract_strided_slice %13 {offsets = [1, 1], sizes = [16, 16], strides = [1, 1]} : vector<18x18xf32> to vector<16x16xf32>
    %c4 = arith.constant 4 : index
    %105 = memref.load %arg2[%c4] : memref<144xf32, #tpu.memory_space<smem>>
    %106 = vector.broadcast %105 : f32 to vector<16x16xf32>
    %107 = arith.mulf %106, %104 : vector<16x16xf32>
    %108 = arith.addf %91, %107 : vector<16x16xf32>
    %c40 = arith.constant 40 : index
    %109 = memref.load %arg2[%c40] : memref<144xf32, #tpu.memory_space<smem>>
    %110 = vector.broadcast %109 : f32 to vector<16x16xf32>
    %111 = arith.mulf %110, %104 : vector<16x16xf32>
    %112 = arith.addf %95, %111 : vector<16x16xf32>
    %c76 = arith.constant 76 : index
    %113 = memref.load %arg2[%c76] : memref<144xf32, #tpu.memory_space<smem>>
    %114 = vector.broadcast %113 : f32 to vector<16x16xf32>
    %115 = arith.mulf %114, %104 : vector<16x16xf32>
    %116 = arith.addf %99, %115 : vector<16x16xf32>
    %c112 = arith.constant 112 : index
    %117 = memref.load %arg2[%c112] : memref<144xf32, #tpu.memory_space<smem>>
    %118 = vector.broadcast %117 : f32 to vector<16x16xf32>
    %119 = arith.mulf %118, %104 : vector<16x16xf32>
    %120 = arith.addf %103, %119 : vector<16x16xf32>
    %121 = vector.extract_strided_slice %13 {offsets = [1, 2], sizes = [16, 16], strides = [1, 1]} : vector<18x18xf32> to vector<16x16xf32>
    %c5 = arith.constant 5 : index
    %122 = memref.load %arg2[%c5] : memref<144xf32, #tpu.memory_space<smem>>
    %123 = vector.broadcast %122 : f32 to vector<16x16xf32>
    %124 = arith.mulf %123, %121 : vector<16x16xf32>
    %125 = arith.addf %108, %124 : vector<16x16xf32>
    %c41 = arith.constant 41 : index
    %126 = memref.load %arg2[%c41] : memref<144xf32, #tpu.memory_space<smem>>
    %127 = vector.broadcast %126 : f32 to vector<16x16xf32>
    %128 = arith.mulf %127, %121 : vector<16x16xf32>
    %129 = arith.addf %112, %128 : vector<16x16xf32>
    %c77 = arith.constant 77 : index
    %130 = memref.load %arg2[%c77] : memref<144xf32, #tpu.memory_space<smem>>
    %131 = vector.broadcast %130 : f32 to vector<16x16xf32>
    %132 = arith.mulf %131, %121 : vector<16x16xf32>
    %133 = arith.addf %116, %132 : vector<16x16xf32>
    %c113 = arith.constant 113 : index
    %134 = memref.load %arg2[%c113] : memref<144xf32, #tpu.memory_space<smem>>
    %135 = vector.broadcast %134 : f32 to vector<16x16xf32>
    %136 = arith.mulf %135, %121 : vector<16x16xf32>
    %137 = arith.addf %120, %136 : vector<16x16xf32>
    %138 = vector.extract_strided_slice %13 {offsets = [2, 0], sizes = [16, 16], strides = [1, 1]} : vector<18x18xf32> to vector<16x16xf32>
    %c6 = arith.constant 6 : index
    %139 = memref.load %arg2[%c6] : memref<144xf32, #tpu.memory_space<smem>>
    %140 = vector.broadcast %139 : f32 to vector<16x16xf32>
    %141 = arith.mulf %140, %138 : vector<16x16xf32>
    %142 = arith.addf %125, %141 : vector<16x16xf32>
    %c42 = arith.constant 42 : index
    %143 = memref.load %arg2[%c42] : memref<144xf32, #tpu.memory_space<smem>>
    %144 = vector.broadcast %143 : f32 to vector<16x16xf32>
    %145 = arith.mulf %144, %138 : vector<16x16xf32>
    %146 = arith.addf %129, %145 : vector<16x16xf32>
    %c78 = arith.constant 78 : index
    %147 = memref.load %arg2[%c78] : memref<144xf32, #tpu.memory_space<smem>>
    %148 = vector.broadcast %147 : f32 to vector<16x16xf32>
    %149 = arith.mulf %148, %138 : vector<16x16xf32>
    %150 = arith.addf %133, %149 : vector<16x16xf32>
    %c114 = arith.constant 114 : index
    %151 = memref.load %arg2[%c114] : memref<144xf32, #tpu.memory_space<smem>>
    %152 = vector.broadcast %151 : f32 to vector<16x16xf32>
    %153 = arith.mulf %152, %138 : vector<16x16xf32>
    %154 = arith.addf %137, %153 : vector<16x16xf32>
    %155 = vector.extract_strided_slice %13 {offsets = [2, 1], sizes = [16, 16], strides = [1, 1]} : vector<18x18xf32> to vector<16x16xf32>
    %c7 = arith.constant 7 : index
    %156 = memref.load %arg2[%c7] : memref<144xf32, #tpu.memory_space<smem>>
    %157 = vector.broadcast %156 : f32 to vector<16x16xf32>
    %158 = arith.mulf %157, %155 : vector<16x16xf32>
    %159 = arith.addf %142, %158 : vector<16x16xf32>
    %c43 = arith.constant 43 : index
    %160 = memref.load %arg2[%c43] : memref<144xf32, #tpu.memory_space<smem>>
    %161 = vector.broadcast %160 : f32 to vector<16x16xf32>
    %162 = arith.mulf %161, %155 : vector<16x16xf32>
    %163 = arith.addf %146, %162 : vector<16x16xf32>
    %c79 = arith.constant 79 : index
    %164 = memref.load %arg2[%c79] : memref<144xf32, #tpu.memory_space<smem>>
    %165 = vector.broadcast %164 : f32 to vector<16x16xf32>
    %166 = arith.mulf %165, %155 : vector<16x16xf32>
    %167 = arith.addf %150, %166 : vector<16x16xf32>
    %c115 = arith.constant 115 : index
    %168 = memref.load %arg2[%c115] : memref<144xf32, #tpu.memory_space<smem>>
    %169 = vector.broadcast %168 : f32 to vector<16x16xf32>
    %170 = arith.mulf %169, %155 : vector<16x16xf32>
    %171 = arith.addf %154, %170 : vector<16x16xf32>
    %172 = vector.extract_strided_slice %13 {offsets = [2, 2], sizes = [16, 16], strides = [1, 1]} : vector<18x18xf32> to vector<16x16xf32>
    %c8 = arith.constant 8 : index
    %173 = memref.load %arg2[%c8] : memref<144xf32, #tpu.memory_space<smem>>
    %174 = vector.broadcast %173 : f32 to vector<16x16xf32>
    %175 = arith.mulf %174, %172 : vector<16x16xf32>
    %176 = arith.addf %159, %175 : vector<16x16xf32>
    %c44 = arith.constant 44 : index
    %177 = memref.load %arg2[%c44] : memref<144xf32, #tpu.memory_space<smem>>
    %178 = vector.broadcast %177 : f32 to vector<16x16xf32>
    %179 = arith.mulf %178, %172 : vector<16x16xf32>
    %180 = arith.addf %163, %179 : vector<16x16xf32>
    %c80 = arith.constant 80 : index
    %181 = memref.load %arg2[%c80] : memref<144xf32, #tpu.memory_space<smem>>
    %182 = vector.broadcast %181 : f32 to vector<16x16xf32>
    %183 = arith.mulf %182, %172 : vector<16x16xf32>
    %184 = arith.addf %167, %183 : vector<16x16xf32>
    %c116 = arith.constant 116 : index
    %185 = memref.load %arg2[%c116] : memref<144xf32, #tpu.memory_space<smem>>
    %186 = vector.broadcast %185 : f32 to vector<16x16xf32>
    %187 = arith.mulf %186, %172 : vector<16x16xf32>
    %188 = arith.addf %171, %187 : vector<16x16xf32>
    %189 = vector.extract_strided_slice %19 {offsets = [0, 0], sizes = [16, 16], strides = [1, 1]} : vector<18x18xf32> to vector<16x16xf32>
    %c9 = arith.constant 9 : index
    %190 = memref.load %arg2[%c9] : memref<144xf32, #tpu.memory_space<smem>>
    %191 = vector.broadcast %190 : f32 to vector<16x16xf32>
    %192 = arith.mulf %191, %189 : vector<16x16xf32>
    %193 = arith.addf %176, %192 : vector<16x16xf32>
    %c45 = arith.constant 45 : index
    %194 = memref.load %arg2[%c45] : memref<144xf32, #tpu.memory_space<smem>>
    %195 = vector.broadcast %194 : f32 to vector<16x16xf32>
    %196 = arith.mulf %195, %189 : vector<16x16xf32>
    %197 = arith.addf %180, %196 : vector<16x16xf32>
    %c81 = arith.constant 81 : index
    %198 = memref.load %arg2[%c81] : memref<144xf32, #tpu.memory_space<smem>>
    %199 = vector.broadcast %198 : f32 to vector<16x16xf32>
    %200 = arith.mulf %199, %189 : vector<16x16xf32>
    %201 = arith.addf %184, %200 : vector<16x16xf32>
    %c117 = arith.constant 117 : index
    %202 = memref.load %arg2[%c117] : memref<144xf32, #tpu.memory_space<smem>>
    %203 = vector.broadcast %202 : f32 to vector<16x16xf32>
    %204 = arith.mulf %203, %189 : vector<16x16xf32>
    %205 = arith.addf %188, %204 : vector<16x16xf32>
    %206 = vector.extract_strided_slice %19 {offsets = [0, 1], sizes = [16, 16], strides = [1, 1]} : vector<18x18xf32> to vector<16x16xf32>
    %c10 = arith.constant 10 : index
    %207 = memref.load %arg2[%c10] : memref<144xf32, #tpu.memory_space<smem>>
    %208 = vector.broadcast %207 : f32 to vector<16x16xf32>
    %209 = arith.mulf %208, %206 : vector<16x16xf32>
    %210 = arith.addf %193, %209 : vector<16x16xf32>
    %c46 = arith.constant 46 : index
    %211 = memref.load %arg2[%c46] : memref<144xf32, #tpu.memory_space<smem>>
    %212 = vector.broadcast %211 : f32 to vector<16x16xf32>
    %213 = arith.mulf %212, %206 : vector<16x16xf32>
    %214 = arith.addf %197, %213 : vector<16x16xf32>
    %c82 = arith.constant 82 : index
    %215 = memref.load %arg2[%c82] : memref<144xf32, #tpu.memory_space<smem>>
    %216 = vector.broadcast %215 : f32 to vector<16x16xf32>
    %217 = arith.mulf %216, %206 : vector<16x16xf32>
    %218 = arith.addf %201, %217 : vector<16x16xf32>
    %c118 = arith.constant 118 : index
    %219 = memref.load %arg2[%c118] : memref<144xf32, #tpu.memory_space<smem>>
    %220 = vector.broadcast %219 : f32 to vector<16x16xf32>
    %221 = arith.mulf %220, %206 : vector<16x16xf32>
    %222 = arith.addf %205, %221 : vector<16x16xf32>
    %223 = vector.extract_strided_slice %19 {offsets = [0, 2], sizes = [16, 16], strides = [1, 1]} : vector<18x18xf32> to vector<16x16xf32>
    %c11 = arith.constant 11 : index
    %224 = memref.load %arg2[%c11] : memref<144xf32, #tpu.memory_space<smem>>
    %225 = vector.broadcast %224 : f32 to vector<16x16xf32>
    %226 = arith.mulf %225, %223 : vector<16x16xf32>
    %227 = arith.addf %210, %226 : vector<16x16xf32>
    %c47 = arith.constant 47 : index
    %228 = memref.load %arg2[%c47] : memref<144xf32, #tpu.memory_space<smem>>
    %229 = vector.broadcast %228 : f32 to vector<16x16xf32>
    %230 = arith.mulf %229, %223 : vector<16x16xf32>
    %231 = arith.addf %214, %230 : vector<16x16xf32>
    %c83 = arith.constant 83 : index
    %232 = memref.load %arg2[%c83] : memref<144xf32, #tpu.memory_space<smem>>
    %233 = vector.broadcast %232 : f32 to vector<16x16xf32>
    %234 = arith.mulf %233, %223 : vector<16x16xf32>
    %235 = arith.addf %218, %234 : vector<16x16xf32>
    %c119 = arith.constant 119 : index
    %236 = memref.load %arg2[%c119] : memref<144xf32, #tpu.memory_space<smem>>
    %237 = vector.broadcast %236 : f32 to vector<16x16xf32>
    %238 = arith.mulf %237, %223 : vector<16x16xf32>
    %239 = arith.addf %222, %238 : vector<16x16xf32>
    %240 = vector.extract_strided_slice %19 {offsets = [1, 0], sizes = [16, 16], strides = [1, 1]} : vector<18x18xf32> to vector<16x16xf32>
    %c12 = arith.constant 12 : index
    %241 = memref.load %arg2[%c12] : memref<144xf32, #tpu.memory_space<smem>>
    %242 = vector.broadcast %241 : f32 to vector<16x16xf32>
    %243 = arith.mulf %242, %240 : vector<16x16xf32>
    %244 = arith.addf %227, %243 : vector<16x16xf32>
    %c48 = arith.constant 48 : index
    %245 = memref.load %arg2[%c48] : memref<144xf32, #tpu.memory_space<smem>>
    %246 = vector.broadcast %245 : f32 to vector<16x16xf32>
    %247 = arith.mulf %246, %240 : vector<16x16xf32>
    %248 = arith.addf %231, %247 : vector<16x16xf32>
    %c84 = arith.constant 84 : index
    %249 = memref.load %arg2[%c84] : memref<144xf32, #tpu.memory_space<smem>>
    %250 = vector.broadcast %249 : f32 to vector<16x16xf32>
    %251 = arith.mulf %250, %240 : vector<16x16xf32>
    %252 = arith.addf %235, %251 : vector<16x16xf32>
    %c120 = arith.constant 120 : index
    %253 = memref.load %arg2[%c120] : memref<144xf32, #tpu.memory_space<smem>>
    %254 = vector.broadcast %253 : f32 to vector<16x16xf32>
    %255 = arith.mulf %254, %240 : vector<16x16xf32>
    %256 = arith.addf %239, %255 : vector<16x16xf32>
    %257 = vector.extract_strided_slice %19 {offsets = [1, 1], sizes = [16, 16], strides = [1, 1]} : vector<18x18xf32> to vector<16x16xf32>
    %c13 = arith.constant 13 : index
    %258 = memref.load %arg2[%c13] : memref<144xf32, #tpu.memory_space<smem>>
    %259 = vector.broadcast %258 : f32 to vector<16x16xf32>
    %260 = arith.mulf %259, %257 : vector<16x16xf32>
    %261 = arith.addf %244, %260 : vector<16x16xf32>
    %c49 = arith.constant 49 : index
    %262 = memref.load %arg2[%c49] : memref<144xf32, #tpu.memory_space<smem>>
    %263 = vector.broadcast %262 : f32 to vector<16x16xf32>
    %264 = arith.mulf %263, %257 : vector<16x16xf32>
    %265 = arith.addf %248, %264 : vector<16x16xf32>
    %c85 = arith.constant 85 : index
    %266 = memref.load %arg2[%c85] : memref<144xf32, #tpu.memory_space<smem>>
    %267 = vector.broadcast %266 : f32 to vector<16x16xf32>
    %268 = arith.mulf %267, %257 : vector<16x16xf32>
    %269 = arith.addf %252, %268 : vector<16x16xf32>
    %c121 = arith.constant 121 : index
    %270 = memref.load %arg2[%c121] : memref<144xf32, #tpu.memory_space<smem>>
    %271 = vector.broadcast %270 : f32 to vector<16x16xf32>
    %272 = arith.mulf %271, %257 : vector<16x16xf32>
    %273 = arith.addf %256, %272 : vector<16x16xf32>
    %274 = vector.extract_strided_slice %19 {offsets = [1, 2], sizes = [16, 16], strides = [1, 1]} : vector<18x18xf32> to vector<16x16xf32>
    %c14 = arith.constant 14 : index
    %275 = memref.load %arg2[%c14] : memref<144xf32, #tpu.memory_space<smem>>
    %276 = vector.broadcast %275 : f32 to vector<16x16xf32>
    %277 = arith.mulf %276, %274 : vector<16x16xf32>
    %278 = arith.addf %261, %277 : vector<16x16xf32>
    %c50 = arith.constant 50 : index
    %279 = memref.load %arg2[%c50] : memref<144xf32, #tpu.memory_space<smem>>
    %280 = vector.broadcast %279 : f32 to vector<16x16xf32>
    %281 = arith.mulf %280, %274 : vector<16x16xf32>
    %282 = arith.addf %265, %281 : vector<16x16xf32>
    %c86 = arith.constant 86 : index
    %283 = memref.load %arg2[%c86] : memref<144xf32, #tpu.memory_space<smem>>
    %284 = vector.broadcast %283 : f32 to vector<16x16xf32>
    %285 = arith.mulf %284, %274 : vector<16x16xf32>
    %286 = arith.addf %269, %285 : vector<16x16xf32>
    %c122 = arith.constant 122 : index
    %287 = memref.load %arg2[%c122] : memref<144xf32, #tpu.memory_space<smem>>
    %288 = vector.broadcast %287 : f32 to vector<16x16xf32>
    %289 = arith.mulf %288, %274 : vector<16x16xf32>
    %290 = arith.addf %273, %289 : vector<16x16xf32>
    %291 = vector.extract_strided_slice %19 {offsets = [2, 0], sizes = [16, 16], strides = [1, 1]} : vector<18x18xf32> to vector<16x16xf32>
    %c15 = arith.constant 15 : index
    %292 = memref.load %arg2[%c15] : memref<144xf32, #tpu.memory_space<smem>>
    %293 = vector.broadcast %292 : f32 to vector<16x16xf32>
    %294 = arith.mulf %293, %291 : vector<16x16xf32>
    %295 = arith.addf %278, %294 : vector<16x16xf32>
    %c51 = arith.constant 51 : index
    %296 = memref.load %arg2[%c51] : memref<144xf32, #tpu.memory_space<smem>>
    %297 = vector.broadcast %296 : f32 to vector<16x16xf32>
    %298 = arith.mulf %297, %291 : vector<16x16xf32>
    %299 = arith.addf %282, %298 : vector<16x16xf32>
    %c87 = arith.constant 87 : index
    %300 = memref.load %arg2[%c87] : memref<144xf32, #tpu.memory_space<smem>>
    %301 = vector.broadcast %300 : f32 to vector<16x16xf32>
    %302 = arith.mulf %301, %291 : vector<16x16xf32>
    %303 = arith.addf %286, %302 : vector<16x16xf32>
    %c123 = arith.constant 123 : index
    %304 = memref.load %arg2[%c123] : memref<144xf32, #tpu.memory_space<smem>>
    %305 = vector.broadcast %304 : f32 to vector<16x16xf32>
    %306 = arith.mulf %305, %291 : vector<16x16xf32>
    %307 = arith.addf %290, %306 : vector<16x16xf32>
    %308 = vector.extract_strided_slice %19 {offsets = [2, 1], sizes = [16, 16], strides = [1, 1]} : vector<18x18xf32> to vector<16x16xf32>
    %c16 = arith.constant 16 : index
    %309 = memref.load %arg2[%c16] : memref<144xf32, #tpu.memory_space<smem>>
    %310 = vector.broadcast %309 : f32 to vector<16x16xf32>
    %311 = arith.mulf %310, %308 : vector<16x16xf32>
    %312 = arith.addf %295, %311 : vector<16x16xf32>
    %c52 = arith.constant 52 : index
    %313 = memref.load %arg2[%c52] : memref<144xf32, #tpu.memory_space<smem>>
    %314 = vector.broadcast %313 : f32 to vector<16x16xf32>
    %315 = arith.mulf %314, %308 : vector<16x16xf32>
    %316 = arith.addf %299, %315 : vector<16x16xf32>
    %c88 = arith.constant 88 : index
    %317 = memref.load %arg2[%c88] : memref<144xf32, #tpu.memory_space<smem>>
    %318 = vector.broadcast %317 : f32 to vector<16x16xf32>
    %319 = arith.mulf %318, %308 : vector<16x16xf32>
    %320 = arith.addf %303, %319 : vector<16x16xf32>
    %c124 = arith.constant 124 : index
    %321 = memref.load %arg2[%c124] : memref<144xf32, #tpu.memory_space<smem>>
    %322 = vector.broadcast %321 : f32 to vector<16x16xf32>
    %323 = arith.mulf %322, %308 : vector<16x16xf32>
    %324 = arith.addf %307, %323 : vector<16x16xf32>
    %325 = vector.extract_strided_slice %19 {offsets = [2, 2], sizes = [16, 16], strides = [1, 1]} : vector<18x18xf32> to vector<16x16xf32>
    %c17 = arith.constant 17 : index
    %326 = memref.load %arg2[%c17] : memref<144xf32, #tpu.memory_space<smem>>
    %327 = vector.broadcast %326 : f32 to vector<16x16xf32>
    %328 = arith.mulf %327, %325 : vector<16x16xf32>
    %329 = arith.addf %312, %328 : vector<16x16xf32>
    %c53 = arith.constant 53 : index
    %330 = memref.load %arg2[%c53] : memref<144xf32, #tpu.memory_space<smem>>
    %331 = vector.broadcast %330 : f32 to vector<16x16xf32>
    %332 = arith.mulf %331, %325 : vector<16x16xf32>
    %333 = arith.addf %316, %332 : vector<16x16xf32>
    %c89 = arith.constant 89 : index
    %334 = memref.load %arg2[%c89] : memref<144xf32, #tpu.memory_space<smem>>
    %335 = vector.broadcast %334 : f32 to vector<16x16xf32>
    %336 = arith.mulf %335, %325 : vector<16x16xf32>
    %337 = arith.addf %320, %336 : vector<16x16xf32>
    %c125 = arith.constant 125 : index
    %338 = memref.load %arg2[%c125] : memref<144xf32, #tpu.memory_space<smem>>
    %339 = vector.broadcast %338 : f32 to vector<16x16xf32>
    %340 = arith.mulf %339, %325 : vector<16x16xf32>
    %341 = arith.addf %324, %340 : vector<16x16xf32>
    %342 = vector.extract_strided_slice %25 {offsets = [0, 0], sizes = [16, 16], strides = [1, 1]} : vector<18x18xf32> to vector<16x16xf32>
    %c18 = arith.constant 18 : index
    %343 = memref.load %arg2[%c18] : memref<144xf32, #tpu.memory_space<smem>>
    %344 = vector.broadcast %343 : f32 to vector<16x16xf32>
    %345 = arith.mulf %344, %342 : vector<16x16xf32>
    %346 = arith.addf %329, %345 : vector<16x16xf32>
    %c54 = arith.constant 54 : index
    %347 = memref.load %arg2[%c54] : memref<144xf32, #tpu.memory_space<smem>>
    %348 = vector.broadcast %347 : f32 to vector<16x16xf32>
    %349 = arith.mulf %348, %342 : vector<16x16xf32>
    %350 = arith.addf %333, %349 : vector<16x16xf32>
    %c90 = arith.constant 90 : index
    %351 = memref.load %arg2[%c90] : memref<144xf32, #tpu.memory_space<smem>>
    %352 = vector.broadcast %351 : f32 to vector<16x16xf32>
    %353 = arith.mulf %352, %342 : vector<16x16xf32>
    %354 = arith.addf %337, %353 : vector<16x16xf32>
    %c126 = arith.constant 126 : index
    %355 = memref.load %arg2[%c126] : memref<144xf32, #tpu.memory_space<smem>>
    %356 = vector.broadcast %355 : f32 to vector<16x16xf32>
    %357 = arith.mulf %356, %342 : vector<16x16xf32>
    %358 = arith.addf %341, %357 : vector<16x16xf32>
    %359 = vector.extract_strided_slice %25 {offsets = [0, 1], sizes = [16, 16], strides = [1, 1]} : vector<18x18xf32> to vector<16x16xf32>
    %c19 = arith.constant 19 : index
    %360 = memref.load %arg2[%c19] : memref<144xf32, #tpu.memory_space<smem>>
    %361 = vector.broadcast %360 : f32 to vector<16x16xf32>
    %362 = arith.mulf %361, %359 : vector<16x16xf32>
    %363 = arith.addf %346, %362 : vector<16x16xf32>
    %c55 = arith.constant 55 : index
    %364 = memref.load %arg2[%c55] : memref<144xf32, #tpu.memory_space<smem>>
    %365 = vector.broadcast %364 : f32 to vector<16x16xf32>
    %366 = arith.mulf %365, %359 : vector<16x16xf32>
    %367 = arith.addf %350, %366 : vector<16x16xf32>
    %c91 = arith.constant 91 : index
    %368 = memref.load %arg2[%c91] : memref<144xf32, #tpu.memory_space<smem>>
    %369 = vector.broadcast %368 : f32 to vector<16x16xf32>
    %370 = arith.mulf %369, %359 : vector<16x16xf32>
    %371 = arith.addf %354, %370 : vector<16x16xf32>
    %c127 = arith.constant 127 : index
    %372 = memref.load %arg2[%c127] : memref<144xf32, #tpu.memory_space<smem>>
    %373 = vector.broadcast %372 : f32 to vector<16x16xf32>
    %374 = arith.mulf %373, %359 : vector<16x16xf32>
    %375 = arith.addf %358, %374 : vector<16x16xf32>
    %376 = vector.extract_strided_slice %25 {offsets = [0, 2], sizes = [16, 16], strides = [1, 1]} : vector<18x18xf32> to vector<16x16xf32>
    %c20 = arith.constant 20 : index
    %377 = memref.load %arg2[%c20] : memref<144xf32, #tpu.memory_space<smem>>
    %378 = vector.broadcast %377 : f32 to vector<16x16xf32>
    %379 = arith.mulf %378, %376 : vector<16x16xf32>
    %380 = arith.addf %363, %379 : vector<16x16xf32>
    %c56 = arith.constant 56 : index
    %381 = memref.load %arg2[%c56] : memref<144xf32, #tpu.memory_space<smem>>
    %382 = vector.broadcast %381 : f32 to vector<16x16xf32>
    %383 = arith.mulf %382, %376 : vector<16x16xf32>
    %384 = arith.addf %367, %383 : vector<16x16xf32>
    %c92 = arith.constant 92 : index
    %385 = memref.load %arg2[%c92] : memref<144xf32, #tpu.memory_space<smem>>
    %386 = vector.broadcast %385 : f32 to vector<16x16xf32>
    %387 = arith.mulf %386, %376 : vector<16x16xf32>
    %388 = arith.addf %371, %387 : vector<16x16xf32>
    %c128 = arith.constant 128 : index
    %389 = memref.load %arg2[%c128] : memref<144xf32, #tpu.memory_space<smem>>
    %390 = vector.broadcast %389 : f32 to vector<16x16xf32>
    %391 = arith.mulf %390, %376 : vector<16x16xf32>
    %392 = arith.addf %375, %391 : vector<16x16xf32>
    %393 = vector.extract_strided_slice %25 {offsets = [1, 0], sizes = [16, 16], strides = [1, 1]} : vector<18x18xf32> to vector<16x16xf32>
    %c21 = arith.constant 21 : index
    %394 = memref.load %arg2[%c21] : memref<144xf32, #tpu.memory_space<smem>>
    %395 = vector.broadcast %394 : f32 to vector<16x16xf32>
    %396 = arith.mulf %395, %393 : vector<16x16xf32>
    %397 = arith.addf %380, %396 : vector<16x16xf32>
    %c57 = arith.constant 57 : index
    %398 = memref.load %arg2[%c57] : memref<144xf32, #tpu.memory_space<smem>>
    %399 = vector.broadcast %398 : f32 to vector<16x16xf32>
    %400 = arith.mulf %399, %393 : vector<16x16xf32>
    %401 = arith.addf %384, %400 : vector<16x16xf32>
    %c93 = arith.constant 93 : index
    %402 = memref.load %arg2[%c93] : memref<144xf32, #tpu.memory_space<smem>>
    %403 = vector.broadcast %402 : f32 to vector<16x16xf32>
    %404 = arith.mulf %403, %393 : vector<16x16xf32>
    %405 = arith.addf %388, %404 : vector<16x16xf32>
    %c129 = arith.constant 129 : index
    %406 = memref.load %arg2[%c129] : memref<144xf32, #tpu.memory_space<smem>>
    %407 = vector.broadcast %406 : f32 to vector<16x16xf32>
    %408 = arith.mulf %407, %393 : vector<16x16xf32>
    %409 = arith.addf %392, %408 : vector<16x16xf32>
    %410 = vector.extract_strided_slice %25 {offsets = [1, 1], sizes = [16, 16], strides = [1, 1]} : vector<18x18xf32> to vector<16x16xf32>
    %c22 = arith.constant 22 : index
    %411 = memref.load %arg2[%c22] : memref<144xf32, #tpu.memory_space<smem>>
    %412 = vector.broadcast %411 : f32 to vector<16x16xf32>
    %413 = arith.mulf %412, %410 : vector<16x16xf32>
    %414 = arith.addf %397, %413 : vector<16x16xf32>
    %c58 = arith.constant 58 : index
    %415 = memref.load %arg2[%c58] : memref<144xf32, #tpu.memory_space<smem>>
    %416 = vector.broadcast %415 : f32 to vector<16x16xf32>
    %417 = arith.mulf %416, %410 : vector<16x16xf32>
    %418 = arith.addf %401, %417 : vector<16x16xf32>
    %c94 = arith.constant 94 : index
    %419 = memref.load %arg2[%c94] : memref<144xf32, #tpu.memory_space<smem>>
    %420 = vector.broadcast %419 : f32 to vector<16x16xf32>
    %421 = arith.mulf %420, %410 : vector<16x16xf32>
    %422 = arith.addf %405, %421 : vector<16x16xf32>
    %c130 = arith.constant 130 : index
    %423 = memref.load %arg2[%c130] : memref<144xf32, #tpu.memory_space<smem>>
    %424 = vector.broadcast %423 : f32 to vector<16x16xf32>
    %425 = arith.mulf %424, %410 : vector<16x16xf32>
    %426 = arith.addf %409, %425 : vector<16x16xf32>
    %427 = vector.extract_strided_slice %25 {offsets = [1, 2], sizes = [16, 16], strides = [1, 1]} : vector<18x18xf32> to vector<16x16xf32>
    %c23 = arith.constant 23 : index
    %428 = memref.load %arg2[%c23] : memref<144xf32, #tpu.memory_space<smem>>
    %429 = vector.broadcast %428 : f32 to vector<16x16xf32>
    %430 = arith.mulf %429, %427 : vector<16x16xf32>
    %431 = arith.addf %414, %430 : vector<16x16xf32>
    %c59 = arith.constant 59 : index
    %432 = memref.load %arg2[%c59] : memref<144xf32, #tpu.memory_space<smem>>
    %433 = vector.broadcast %432 : f32 to vector<16x16xf32>
    %434 = arith.mulf %433, %427 : vector<16x16xf32>
    %435 = arith.addf %418, %434 : vector<16x16xf32>
    %c95 = arith.constant 95 : index
    %436 = memref.load %arg2[%c95] : memref<144xf32, #tpu.memory_space<smem>>
    %437 = vector.broadcast %436 : f32 to vector<16x16xf32>
    %438 = arith.mulf %437, %427 : vector<16x16xf32>
    %439 = arith.addf %422, %438 : vector<16x16xf32>
    %c131 = arith.constant 131 : index
    %440 = memref.load %arg2[%c131] : memref<144xf32, #tpu.memory_space<smem>>
    %441 = vector.broadcast %440 : f32 to vector<16x16xf32>
    %442 = arith.mulf %441, %427 : vector<16x16xf32>
    %443 = arith.addf %426, %442 : vector<16x16xf32>
    %444 = vector.extract_strided_slice %25 {offsets = [2, 0], sizes = [16, 16], strides = [1, 1]} : vector<18x18xf32> to vector<16x16xf32>
    %c24 = arith.constant 24 : index
    %445 = memref.load %arg2[%c24] : memref<144xf32, #tpu.memory_space<smem>>
    %446 = vector.broadcast %445 : f32 to vector<16x16xf32>
    %447 = arith.mulf %446, %444 : vector<16x16xf32>
    %448 = arith.addf %431, %447 : vector<16x16xf32>
    %c60 = arith.constant 60 : index
    %449 = memref.load %arg2[%c60] : memref<144xf32, #tpu.memory_space<smem>>
    %450 = vector.broadcast %449 : f32 to vector<16x16xf32>
    %451 = arith.mulf %450, %444 : vector<16x16xf32>
    %452 = arith.addf %435, %451 : vector<16x16xf32>
    %c96 = arith.constant 96 : index
    %453 = memref.load %arg2[%c96] : memref<144xf32, #tpu.memory_space<smem>>
    %454 = vector.broadcast %453 : f32 to vector<16x16xf32>
    %455 = arith.mulf %454, %444 : vector<16x16xf32>
    %456 = arith.addf %439, %455 : vector<16x16xf32>
    %c132 = arith.constant 132 : index
    %457 = memref.load %arg2[%c132] : memref<144xf32, #tpu.memory_space<smem>>
    %458 = vector.broadcast %457 : f32 to vector<16x16xf32>
    %459 = arith.mulf %458, %444 : vector<16x16xf32>
    %460 = arith.addf %443, %459 : vector<16x16xf32>
    %461 = vector.extract_strided_slice %25 {offsets = [2, 1], sizes = [16, 16], strides = [1, 1]} : vector<18x18xf32> to vector<16x16xf32>
    %c25 = arith.constant 25 : index
    %462 = memref.load %arg2[%c25] : memref<144xf32, #tpu.memory_space<smem>>
    %463 = vector.broadcast %462 : f32 to vector<16x16xf32>
    %464 = arith.mulf %463, %461 : vector<16x16xf32>
    %465 = arith.addf %448, %464 : vector<16x16xf32>
    %c61 = arith.constant 61 : index
    %466 = memref.load %arg2[%c61] : memref<144xf32, #tpu.memory_space<smem>>
    %467 = vector.broadcast %466 : f32 to vector<16x16xf32>
    %468 = arith.mulf %467, %461 : vector<16x16xf32>
    %469 = arith.addf %452, %468 : vector<16x16xf32>
    %c97 = arith.constant 97 : index
    %470 = memref.load %arg2[%c97] : memref<144xf32, #tpu.memory_space<smem>>
    %471 = vector.broadcast %470 : f32 to vector<16x16xf32>
    %472 = arith.mulf %471, %461 : vector<16x16xf32>
    %473 = arith.addf %456, %472 : vector<16x16xf32>
    %c133 = arith.constant 133 : index
    %474 = memref.load %arg2[%c133] : memref<144xf32, #tpu.memory_space<smem>>
    %475 = vector.broadcast %474 : f32 to vector<16x16xf32>
    %476 = arith.mulf %475, %461 : vector<16x16xf32>
    %477 = arith.addf %460, %476 : vector<16x16xf32>
    %478 = vector.extract_strided_slice %25 {offsets = [2, 2], sizes = [16, 16], strides = [1, 1]} : vector<18x18xf32> to vector<16x16xf32>
    %c26 = arith.constant 26 : index
    %479 = memref.load %arg2[%c26] : memref<144xf32, #tpu.memory_space<smem>>
    %480 = vector.broadcast %479 : f32 to vector<16x16xf32>
    %481 = arith.mulf %480, %478 : vector<16x16xf32>
    %482 = arith.addf %465, %481 : vector<16x16xf32>
    %c62 = arith.constant 62 : index
    %483 = memref.load %arg2[%c62] : memref<144xf32, #tpu.memory_space<smem>>
    %484 = vector.broadcast %483 : f32 to vector<16x16xf32>
    %485 = arith.mulf %484, %478 : vector<16x16xf32>
    %486 = arith.addf %469, %485 : vector<16x16xf32>
    %c98 = arith.constant 98 : index
    %487 = memref.load %arg2[%c98] : memref<144xf32, #tpu.memory_space<smem>>
    %488 = vector.broadcast %487 : f32 to vector<16x16xf32>
    %489 = arith.mulf %488, %478 : vector<16x16xf32>
    %490 = arith.addf %473, %489 : vector<16x16xf32>
    %c134 = arith.constant 134 : index
    %491 = memref.load %arg2[%c134] : memref<144xf32, #tpu.memory_space<smem>>
    %492 = vector.broadcast %491 : f32 to vector<16x16xf32>
    %493 = arith.mulf %492, %478 : vector<16x16xf32>
    %494 = arith.addf %477, %493 : vector<16x16xf32>
    %495 = vector.extract_strided_slice %31 {offsets = [0, 0], sizes = [16, 16], strides = [1, 1]} : vector<18x18xf32> to vector<16x16xf32>
    %c27 = arith.constant 27 : index
    %496 = memref.load %arg2[%c27] : memref<144xf32, #tpu.memory_space<smem>>
    %497 = vector.broadcast %496 : f32 to vector<16x16xf32>
    %498 = arith.mulf %497, %495 : vector<16x16xf32>
    %499 = arith.addf %482, %498 : vector<16x16xf32>
    %c63 = arith.constant 63 : index
    %500 = memref.load %arg2[%c63] : memref<144xf32, #tpu.memory_space<smem>>
    %501 = vector.broadcast %500 : f32 to vector<16x16xf32>
    %502 = arith.mulf %501, %495 : vector<16x16xf32>
    %503 = arith.addf %486, %502 : vector<16x16xf32>
    %c99 = arith.constant 99 : index
    %504 = memref.load %arg2[%c99] : memref<144xf32, #tpu.memory_space<smem>>
    %505 = vector.broadcast %504 : f32 to vector<16x16xf32>
    %506 = arith.mulf %505, %495 : vector<16x16xf32>
    %507 = arith.addf %490, %506 : vector<16x16xf32>
    %c135 = arith.constant 135 : index
    %508 = memref.load %arg2[%c135] : memref<144xf32, #tpu.memory_space<smem>>
    %509 = vector.broadcast %508 : f32 to vector<16x16xf32>
    %510 = arith.mulf %509, %495 : vector<16x16xf32>
    %511 = arith.addf %494, %510 : vector<16x16xf32>
    %512 = vector.extract_strided_slice %31 {offsets = [0, 1], sizes = [16, 16], strides = [1, 1]} : vector<18x18xf32> to vector<16x16xf32>
    %c28 = arith.constant 28 : index
    %513 = memref.load %arg2[%c28] : memref<144xf32, #tpu.memory_space<smem>>
    %514 = vector.broadcast %513 : f32 to vector<16x16xf32>
    %515 = arith.mulf %514, %512 : vector<16x16xf32>
    %516 = arith.addf %499, %515 : vector<16x16xf32>
    %c64 = arith.constant 64 : index
    %517 = memref.load %arg2[%c64] : memref<144xf32, #tpu.memory_space<smem>>
    %518 = vector.broadcast %517 : f32 to vector<16x16xf32>
    %519 = arith.mulf %518, %512 : vector<16x16xf32>
    %520 = arith.addf %503, %519 : vector<16x16xf32>
    %c100 = arith.constant 100 : index
    %521 = memref.load %arg2[%c100] : memref<144xf32, #tpu.memory_space<smem>>
    %522 = vector.broadcast %521 : f32 to vector<16x16xf32>
    %523 = arith.mulf %522, %512 : vector<16x16xf32>
    %524 = arith.addf %507, %523 : vector<16x16xf32>
    %c136 = arith.constant 136 : index
    %525 = memref.load %arg2[%c136] : memref<144xf32, #tpu.memory_space<smem>>
    %526 = vector.broadcast %525 : f32 to vector<16x16xf32>
    %527 = arith.mulf %526, %512 : vector<16x16xf32>
    %528 = arith.addf %511, %527 : vector<16x16xf32>
    %529 = vector.extract_strided_slice %31 {offsets = [0, 2], sizes = [16, 16], strides = [1, 1]} : vector<18x18xf32> to vector<16x16xf32>
    %c29 = arith.constant 29 : index
    %530 = memref.load %arg2[%c29] : memref<144xf32, #tpu.memory_space<smem>>
    %531 = vector.broadcast %530 : f32 to vector<16x16xf32>
    %532 = arith.mulf %531, %529 : vector<16x16xf32>
    %533 = arith.addf %516, %532 : vector<16x16xf32>
    %c65 = arith.constant 65 : index
    %534 = memref.load %arg2[%c65] : memref<144xf32, #tpu.memory_space<smem>>
    %535 = vector.broadcast %534 : f32 to vector<16x16xf32>
    %536 = arith.mulf %535, %529 : vector<16x16xf32>
    %537 = arith.addf %520, %536 : vector<16x16xf32>
    %c101 = arith.constant 101 : index
    %538 = memref.load %arg2[%c101] : memref<144xf32, #tpu.memory_space<smem>>
    %539 = vector.broadcast %538 : f32 to vector<16x16xf32>
    %540 = arith.mulf %539, %529 : vector<16x16xf32>
    %541 = arith.addf %524, %540 : vector<16x16xf32>
    %c137 = arith.constant 137 : index
    %542 = memref.load %arg2[%c137] : memref<144xf32, #tpu.memory_space<smem>>
    %543 = vector.broadcast %542 : f32 to vector<16x16xf32>
    %544 = arith.mulf %543, %529 : vector<16x16xf32>
    %545 = arith.addf %528, %544 : vector<16x16xf32>
    %546 = vector.extract_strided_slice %31 {offsets = [1, 0], sizes = [16, 16], strides = [1, 1]} : vector<18x18xf32> to vector<16x16xf32>
    %c30 = arith.constant 30 : index
    %547 = memref.load %arg2[%c30] : memref<144xf32, #tpu.memory_space<smem>>
    %548 = vector.broadcast %547 : f32 to vector<16x16xf32>
    %549 = arith.mulf %548, %546 : vector<16x16xf32>
    %550 = arith.addf %533, %549 : vector<16x16xf32>
    %c66 = arith.constant 66 : index
    %551 = memref.load %arg2[%c66] : memref<144xf32, #tpu.memory_space<smem>>
    %552 = vector.broadcast %551 : f32 to vector<16x16xf32>
    %553 = arith.mulf %552, %546 : vector<16x16xf32>
    %554 = arith.addf %537, %553 : vector<16x16xf32>
    %c102 = arith.constant 102 : index
    %555 = memref.load %arg2[%c102] : memref<144xf32, #tpu.memory_space<smem>>
    %556 = vector.broadcast %555 : f32 to vector<16x16xf32>
    %557 = arith.mulf %556, %546 : vector<16x16xf32>
    %558 = arith.addf %541, %557 : vector<16x16xf32>
    %c138 = arith.constant 138 : index
    %559 = memref.load %arg2[%c138] : memref<144xf32, #tpu.memory_space<smem>>
    %560 = vector.broadcast %559 : f32 to vector<16x16xf32>
    %561 = arith.mulf %560, %546 : vector<16x16xf32>
    %562 = arith.addf %545, %561 : vector<16x16xf32>
    %563 = vector.extract_strided_slice %31 {offsets = [1, 1], sizes = [16, 16], strides = [1, 1]} : vector<18x18xf32> to vector<16x16xf32>
    %c31 = arith.constant 31 : index
    %564 = memref.load %arg2[%c31] : memref<144xf32, #tpu.memory_space<smem>>
    %565 = vector.broadcast %564 : f32 to vector<16x16xf32>
    %566 = arith.mulf %565, %563 : vector<16x16xf32>
    %567 = arith.addf %550, %566 : vector<16x16xf32>
    %c67 = arith.constant 67 : index
    %568 = memref.load %arg2[%c67] : memref<144xf32, #tpu.memory_space<smem>>
    %569 = vector.broadcast %568 : f32 to vector<16x16xf32>
    %570 = arith.mulf %569, %563 : vector<16x16xf32>
    %571 = arith.addf %554, %570 : vector<16x16xf32>
    %c103 = arith.constant 103 : index
    %572 = memref.load %arg2[%c103] : memref<144xf32, #tpu.memory_space<smem>>
    %573 = vector.broadcast %572 : f32 to vector<16x16xf32>
    %574 = arith.mulf %573, %563 : vector<16x16xf32>
    %575 = arith.addf %558, %574 : vector<16x16xf32>
    %c139 = arith.constant 139 : index
    %576 = memref.load %arg2[%c139] : memref<144xf32, #tpu.memory_space<smem>>
    %577 = vector.broadcast %576 : f32 to vector<16x16xf32>
    %578 = arith.mulf %577, %563 : vector<16x16xf32>
    %579 = arith.addf %562, %578 : vector<16x16xf32>
    %580 = vector.extract_strided_slice %31 {offsets = [1, 2], sizes = [16, 16], strides = [1, 1]} : vector<18x18xf32> to vector<16x16xf32>
    %c32 = arith.constant 32 : index
    %581 = memref.load %arg2[%c32] : memref<144xf32, #tpu.memory_space<smem>>
    %582 = vector.broadcast %581 : f32 to vector<16x16xf32>
    %583 = arith.mulf %582, %580 : vector<16x16xf32>
    %584 = arith.addf %567, %583 : vector<16x16xf32>
    %c68 = arith.constant 68 : index
    %585 = memref.load %arg2[%c68] : memref<144xf32, #tpu.memory_space<smem>>
    %586 = vector.broadcast %585 : f32 to vector<16x16xf32>
    %587 = arith.mulf %586, %580 : vector<16x16xf32>
    %588 = arith.addf %571, %587 : vector<16x16xf32>
    %c104 = arith.constant 104 : index
    %589 = memref.load %arg2[%c104] : memref<144xf32, #tpu.memory_space<smem>>
    %590 = vector.broadcast %589 : f32 to vector<16x16xf32>
    %591 = arith.mulf %590, %580 : vector<16x16xf32>
    %592 = arith.addf %575, %591 : vector<16x16xf32>
    %c140 = arith.constant 140 : index
    %593 = memref.load %arg2[%c140] : memref<144xf32, #tpu.memory_space<smem>>
    %594 = vector.broadcast %593 : f32 to vector<16x16xf32>
    %595 = arith.mulf %594, %580 : vector<16x16xf32>
    %596 = arith.addf %579, %595 : vector<16x16xf32>
    %597 = vector.extract_strided_slice %31 {offsets = [2, 0], sizes = [16, 16], strides = [1, 1]} : vector<18x18xf32> to vector<16x16xf32>
    %c33 = arith.constant 33 : index
    %598 = memref.load %arg2[%c33] : memref<144xf32, #tpu.memory_space<smem>>
    %599 = vector.broadcast %598 : f32 to vector<16x16xf32>
    %600 = arith.mulf %599, %597 : vector<16x16xf32>
    %601 = arith.addf %584, %600 : vector<16x16xf32>
    %c69 = arith.constant 69 : index
    %602 = memref.load %arg2[%c69] : memref<144xf32, #tpu.memory_space<smem>>
    %603 = vector.broadcast %602 : f32 to vector<16x16xf32>
    %604 = arith.mulf %603, %597 : vector<16x16xf32>
    %605 = arith.addf %588, %604 : vector<16x16xf32>
    %c105 = arith.constant 105 : index
    %606 = memref.load %arg2[%c105] : memref<144xf32, #tpu.memory_space<smem>>
    %607 = vector.broadcast %606 : f32 to vector<16x16xf32>
    %608 = arith.mulf %607, %597 : vector<16x16xf32>
    %609 = arith.addf %592, %608 : vector<16x16xf32>
    %c141 = arith.constant 141 : index
    %610 = memref.load %arg2[%c141] : memref<144xf32, #tpu.memory_space<smem>>
    %611 = vector.broadcast %610 : f32 to vector<16x16xf32>
    %612 = arith.mulf %611, %597 : vector<16x16xf32>
    %613 = arith.addf %596, %612 : vector<16x16xf32>
    %614 = vector.extract_strided_slice %31 {offsets = [2, 1], sizes = [16, 16], strides = [1, 1]} : vector<18x18xf32> to vector<16x16xf32>
    %c34 = arith.constant 34 : index
    %615 = memref.load %arg2[%c34] : memref<144xf32, #tpu.memory_space<smem>>
    %616 = vector.broadcast %615 : f32 to vector<16x16xf32>
    %617 = arith.mulf %616, %614 : vector<16x16xf32>
    %618 = arith.addf %601, %617 : vector<16x16xf32>
    %c70 = arith.constant 70 : index
    %619 = memref.load %arg2[%c70] : memref<144xf32, #tpu.memory_space<smem>>
    %620 = vector.broadcast %619 : f32 to vector<16x16xf32>
    %621 = arith.mulf %620, %614 : vector<16x16xf32>
    %622 = arith.addf %605, %621 : vector<16x16xf32>
    %c106 = arith.constant 106 : index
    %623 = memref.load %arg2[%c106] : memref<144xf32, #tpu.memory_space<smem>>
    %624 = vector.broadcast %623 : f32 to vector<16x16xf32>
    %625 = arith.mulf %624, %614 : vector<16x16xf32>
    %626 = arith.addf %609, %625 : vector<16x16xf32>
    %c142 = arith.constant 142 : index
    %627 = memref.load %arg2[%c142] : memref<144xf32, #tpu.memory_space<smem>>
    %628 = vector.broadcast %627 : f32 to vector<16x16xf32>
    %629 = arith.mulf %628, %614 : vector<16x16xf32>
    %630 = arith.addf %613, %629 : vector<16x16xf32>
    %631 = vector.extract_strided_slice %31 {offsets = [2, 2], sizes = [16, 16], strides = [1, 1]} : vector<18x18xf32> to vector<16x16xf32>
    %c35 = arith.constant 35 : index
    %632 = memref.load %arg2[%c35] : memref<144xf32, #tpu.memory_space<smem>>
    %633 = vector.broadcast %632 : f32 to vector<16x16xf32>
    %634 = arith.mulf %633, %631 : vector<16x16xf32>
    %635 = arith.addf %618, %634 : vector<16x16xf32>
    %c71 = arith.constant 71 : index
    %636 = memref.load %arg2[%c71] : memref<144xf32, #tpu.memory_space<smem>>
    %637 = vector.broadcast %636 : f32 to vector<16x16xf32>
    %638 = arith.mulf %637, %631 : vector<16x16xf32>
    %639 = arith.addf %622, %638 : vector<16x16xf32>
    %c107 = arith.constant 107 : index
    %640 = memref.load %arg2[%c107] : memref<144xf32, #tpu.memory_space<smem>>
    %641 = vector.broadcast %640 : f32 to vector<16x16xf32>
    %642 = arith.mulf %641, %631 : vector<16x16xf32>
    %643 = arith.addf %626, %642 : vector<16x16xf32>
    %c143 = arith.constant 143 : index
    %644 = memref.load %arg2[%c143] : memref<144xf32, #tpu.memory_space<smem>>
    %645 = vector.broadcast %644 : f32 to vector<16x16xf32>
    %646 = arith.mulf %645, %631 : vector<16x16xf32>
    %647 = arith.addf %630, %646 : vector<16x16xf32>
    %cst_19 = arith.constant dense<0.000000e+00> : vector<16xf32>
    %648 = vector.multi_reduction <add>, %635, %cst_19 [1] : vector<16x16xf32> to vector<16xf32>
    %649 = vector.shape_cast %648 : vector<16xf32> to vector<16x1xf32>
    %cst_20 = arith.constant dense<0.000000e+00> : vector<1xf32>
    %650 = vector.multi_reduction <add>, %649, %cst_20 [0] : vector<16x1xf32> to vector<1xf32>
    %651 = vector.shape_cast %650 : vector<1xf32> to vector<1x1xf32>
    %652 = arith.mulf %635, %635 : vector<16x16xf32>
    %cst_21 = arith.constant dense<0.000000e+00> : vector<16xf32>
    %653 = vector.multi_reduction <add>, %652, %cst_21 [1] : vector<16x16xf32> to vector<16xf32>
    %654 = vector.shape_cast %653 : vector<16xf32> to vector<16x1xf32>
    %cst_22 = arith.constant dense<0.000000e+00> : vector<1xf32>
    %655 = vector.multi_reduction <add>, %654, %cst_22 [0] : vector<16x1xf32> to vector<1xf32>
    %656 = vector.shape_cast %655 : vector<1xf32> to vector<1x1xf32>
    %cst_23 = arith.constant 3.906250e-03 : f32
    %657 = vector.broadcast %cst_23 : f32 to vector<1x1xf32>
    %658 = arith.mulf %651, %657 : vector<1x1xf32>
    %cst_24 = arith.constant 3.906250e-03 : f32
    %659 = vector.broadcast %cst_24 : f32 to vector<1x1xf32>
    %660 = arith.mulf %656, %659 : vector<1x1xf32>
    %661 = arith.mulf %658, %658 : vector<1x1xf32>
    %662 = arith.subf %660, %661 : vector<1x1xf32>
    %663 = vector.broadcast %658 : vector<1x1xf32> to vector<16x16xf32>
    %664 = arith.subf %635, %663 : vector<16x16xf32>
    %cst_25 = arith.constant 9.99999974E-6 : f32
    %665 = vector.broadcast %cst_25 : f32 to vector<1x1xf32>
    %666 = arith.addf %662, %665 : vector<1x1xf32>
    %667 = math.rsqrt %666 : vector<1x1xf32>
    %668 = vector.broadcast %667 : vector<1x1xf32> to vector<16x16xf32>
    %669 = arith.mulf %664, %668 : vector<16x16xf32>
    %cst_26 = arith.constant 0.000000e+00 : f32
    %670 = vector.broadcast %cst_26 : f32 to vector<16x16xf32>
    %671 = arith.maximumf %669, %670 : vector<16x16xf32>
    %cst_27 = arith.constant dense<0.000000e+00> : vector<16xf32>
    %672 = vector.multi_reduction <add>, %639, %cst_27 [1] : vector<16x16xf32> to vector<16xf32>
    %673 = vector.shape_cast %672 : vector<16xf32> to vector<16x1xf32>
    %cst_28 = arith.constant dense<0.000000e+00> : vector<1xf32>
    %674 = vector.multi_reduction <add>, %673, %cst_28 [0] : vector<16x1xf32> to vector<1xf32>
    %675 = vector.shape_cast %674 : vector<1xf32> to vector<1x1xf32>
    %676 = arith.mulf %639, %639 : vector<16x16xf32>
    %cst_29 = arith.constant dense<0.000000e+00> : vector<16xf32>
    %677 = vector.multi_reduction <add>, %676, %cst_29 [1] : vector<16x16xf32> to vector<16xf32>
    %678 = vector.shape_cast %677 : vector<16xf32> to vector<16x1xf32>
    %cst_30 = arith.constant dense<0.000000e+00> : vector<1xf32>
    %679 = vector.multi_reduction <add>, %678, %cst_30 [0] : vector<16x1xf32> to vector<1xf32>
    %680 = vector.shape_cast %679 : vector<1xf32> to vector<1x1xf32>
    %cst_31 = arith.constant 3.906250e-03 : f32
    %681 = vector.broadcast %cst_31 : f32 to vector<1x1xf32>
    %682 = arith.mulf %675, %681 : vector<1x1xf32>
    %cst_32 = arith.constant 3.906250e-03 : f32
    %683 = vector.broadcast %cst_32 : f32 to vector<1x1xf32>
    %684 = arith.mulf %680, %683 : vector<1x1xf32>
    %685 = arith.mulf %682, %682 : vector<1x1xf32>
    %686 = arith.subf %684, %685 : vector<1x1xf32>
    %687 = vector.broadcast %682 : vector<1x1xf32> to vector<16x16xf32>
    %688 = arith.subf %639, %687 : vector<16x16xf32>
    %cst_33 = arith.constant 9.99999974E-6 : f32
    %689 = vector.broadcast %cst_33 : f32 to vector<1x1xf32>
    %690 = arith.addf %686, %689 : vector<1x1xf32>
    %691 = math.rsqrt %690 : vector<1x1xf32>
    %692 = vector.broadcast %691 : vector<1x1xf32> to vector<16x16xf32>
    %693 = arith.mulf %688, %692 : vector<16x16xf32>
    %cst_34 = arith.constant 0.000000e+00 : f32
    %694 = vector.broadcast %cst_34 : f32 to vector<16x16xf32>
    %695 = arith.maximumf %693, %694 : vector<16x16xf32>
    %cst_35 = arith.constant dense<0.000000e+00> : vector<16xf32>
    %696 = vector.multi_reduction <add>, %643, %cst_35 [1] : vector<16x16xf32> to vector<16xf32>
    %697 = vector.shape_cast %696 : vector<16xf32> to vector<16x1xf32>
    %cst_36 = arith.constant dense<0.000000e+00> : vector<1xf32>
    %698 = vector.multi_reduction <add>, %697, %cst_36 [0] : vector<16x1xf32> to vector<1xf32>
    %699 = vector.shape_cast %698 : vector<1xf32> to vector<1x1xf32>
    %700 = arith.mulf %643, %643 : vector<16x16xf32>
    %cst_37 = arith.constant dense<0.000000e+00> : vector<16xf32>
    %701 = vector.multi_reduction <add>, %700, %cst_37 [1] : vector<16x16xf32> to vector<16xf32>
    %702 = vector.shape_cast %701 : vector<16xf32> to vector<16x1xf32>
    %cst_38 = arith.constant dense<0.000000e+00> : vector<1xf32>
    %703 = vector.multi_reduction <add>, %702, %cst_38 [0] : vector<16x1xf32> to vector<1xf32>
    %704 = vector.shape_cast %703 : vector<1xf32> to vector<1x1xf32>
    %cst_39 = arith.constant 3.906250e-03 : f32
    %705 = vector.broadcast %cst_39 : f32 to vector<1x1xf32>
    %706 = arith.mulf %699, %705 : vector<1x1xf32>
    %cst_40 = arith.constant 3.906250e-03 : f32
    %707 = vector.broadcast %cst_40 : f32 to vector<1x1xf32>
    %708 = arith.mulf %704, %707 : vector<1x1xf32>
    %709 = arith.mulf %706, %706 : vector<1x1xf32>
    %710 = arith.subf %708, %709 : vector<1x1xf32>
    %711 = vector.broadcast %706 : vector<1x1xf32> to vector<16x16xf32>
    %712 = arith.subf %643, %711 : vector<16x16xf32>
    %cst_41 = arith.constant 9.99999974E-6 : f32
    %713 = vector.broadcast %cst_41 : f32 to vector<1x1xf32>
    %714 = arith.addf %710, %713 : vector<1x1xf32>
    %715 = math.rsqrt %714 : vector<1x1xf32>
    %716 = vector.broadcast %715 : vector<1x1xf32> to vector<16x16xf32>
    %717 = arith.mulf %712, %716 : vector<16x16xf32>
    %cst_42 = arith.constant 0.000000e+00 : f32
    %718 = vector.broadcast %cst_42 : f32 to vector<16x16xf32>
    %719 = arith.maximumf %717, %718 : vector<16x16xf32>
    %cst_43 = arith.constant dense<0.000000e+00> : vector<16xf32>
    %720 = vector.multi_reduction <add>, %647, %cst_43 [1] : vector<16x16xf32> to vector<16xf32>
    %721 = vector.shape_cast %720 : vector<16xf32> to vector<16x1xf32>
    %cst_44 = arith.constant dense<0.000000e+00> : vector<1xf32>
    %722 = vector.multi_reduction <add>, %721, %cst_44 [0] : vector<16x1xf32> to vector<1xf32>
    %723 = vector.shape_cast %722 : vector<1xf32> to vector<1x1xf32>
    %724 = arith.mulf %647, %647 : vector<16x16xf32>
    %cst_45 = arith.constant dense<0.000000e+00> : vector<16xf32>
    %725 = vector.multi_reduction <add>, %724, %cst_45 [1] : vector<16x16xf32> to vector<16xf32>
    %726 = vector.shape_cast %725 : vector<16xf32> to vector<16x1xf32>
    %cst_46 = arith.constant dense<0.000000e+00> : vector<1xf32>
    %727 = vector.multi_reduction <add>, %726, %cst_46 [0] : vector<16x1xf32> to vector<1xf32>
    %728 = vector.shape_cast %727 : vector<1xf32> to vector<1x1xf32>
    %cst_47 = arith.constant 3.906250e-03 : f32
    %729 = vector.broadcast %cst_47 : f32 to vector<1x1xf32>
    %730 = arith.mulf %723, %729 : vector<1x1xf32>
    %cst_48 = arith.constant 3.906250e-03 : f32
    %731 = vector.broadcast %cst_48 : f32 to vector<1x1xf32>
    %732 = arith.mulf %728, %731 : vector<1x1xf32>
    %733 = arith.mulf %730, %730 : vector<1x1xf32>
    %734 = arith.subf %732, %733 : vector<1x1xf32>
    %735 = vector.broadcast %730 : vector<1x1xf32> to vector<16x16xf32>
    %736 = arith.subf %647, %735 : vector<16x16xf32>
    %cst_49 = arith.constant 9.99999974E-6 : f32
    %737 = vector.broadcast %cst_49 : f32 to vector<1x1xf32>
    %738 = arith.addf %734, %737 : vector<1x1xf32>
    %739 = math.rsqrt %738 : vector<1x1xf32>
    %740 = vector.broadcast %739 : vector<1x1xf32> to vector<16x16xf32>
    %741 = arith.mulf %736, %740 : vector<16x16xf32>
    %cst_50 = arith.constant 0.000000e+00 : f32
    %742 = vector.broadcast %cst_50 : f32 to vector<16x16xf32>
    %743 = arith.maximumf %741, %742 : vector<16x16xf32>
    %744 = vector.extract_strided_slice %671 {offsets = [0, 1], sizes = [16, 1], strides = [1, 1]} : vector<16x16xf32> to vector<16x1xf32>
    %745 = vector.extract_strided_slice %671 {offsets = [0, 14], sizes = [16, 1], strides = [1, 1]} : vector<16x16xf32> to vector<16x1xf32>
    %746 = tpu.concatenate %744, %671, %745 in 1 : vector<16x1xf32>, vector<16x16xf32>, vector<16x1xf32> -> vector<16x18xf32>
    %747 = vector.extract_strided_slice %746 {offsets = [1, 0], sizes = [1, 18], strides = [1, 1]} : vector<16x18xf32> to vector<1x18xf32>
    %748 = vector.extract_strided_slice %746 {offsets = [14, 0], sizes = [1, 18], strides = [1, 1]} : vector<16x18xf32> to vector<1x18xf32>
    %749 = tpu.concatenate %747, %746, %748 in 0 : vector<1x18xf32>, vector<16x18xf32>, vector<1x18xf32> -> vector<18x18xf32>
    %750 = vector.extract_strided_slice %695 {offsets = [0, 1], sizes = [16, 1], strides = [1, 1]} : vector<16x16xf32> to vector<16x1xf32>
    %751 = vector.extract_strided_slice %695 {offsets = [0, 14], sizes = [16, 1], strides = [1, 1]} : vector<16x16xf32> to vector<16x1xf32>
    %752 = tpu.concatenate %750, %695, %751 in 1 : vector<16x1xf32>, vector<16x16xf32>, vector<16x1xf32> -> vector<16x18xf32>
    %753 = vector.extract_strided_slice %752 {offsets = [1, 0], sizes = [1, 18], strides = [1, 1]} : vector<16x18xf32> to vector<1x18xf32>
    %754 = vector.extract_strided_slice %752 {offsets = [14, 0], sizes = [1, 18], strides = [1, 1]} : vector<16x18xf32> to vector<1x18xf32>
    %755 = tpu.concatenate %753, %752, %754 in 0 : vector<1x18xf32>, vector<16x18xf32>, vector<1x18xf32> -> vector<18x18xf32>
    %756 = vector.extract_strided_slice %719 {offsets = [0, 1], sizes = [16, 1], strides = [1, 1]} : vector<16x16xf32> to vector<16x1xf32>
    %757 = vector.extract_strided_slice %719 {offsets = [0, 14], sizes = [16, 1], strides = [1, 1]} : vector<16x16xf32> to vector<16x1xf32>
    %758 = tpu.concatenate %756, %719, %757 in 1 : vector<16x1xf32>, vector<16x16xf32>, vector<16x1xf32> -> vector<16x18xf32>
    %759 = vector.extract_strided_slice %758 {offsets = [1, 0], sizes = [1, 18], strides = [1, 1]} : vector<16x18xf32> to vector<1x18xf32>
    %760 = vector.extract_strided_slice %758 {offsets = [14, 0], sizes = [1, 18], strides = [1, 1]} : vector<16x18xf32> to vector<1x18xf32>
    %761 = tpu.concatenate %759, %758, %760 in 0 : vector<1x18xf32>, vector<16x18xf32>, vector<1x18xf32> -> vector<18x18xf32>
    %762 = vector.extract_strided_slice %743 {offsets = [0, 1], sizes = [16, 1], strides = [1, 1]} : vector<16x16xf32> to vector<16x1xf32>
    %763 = vector.extract_strided_slice %743 {offsets = [0, 14], sizes = [16, 1], strides = [1, 1]} : vector<16x16xf32> to vector<16x1xf32>
    %764 = tpu.concatenate %762, %743, %763 in 1 : vector<16x1xf32>, vector<16x16xf32>, vector<16x1xf32> -> vector<16x18xf32>
    %765 = vector.extract_strided_slice %764 {offsets = [1, 0], sizes = [1, 18], strides = [1, 1]} : vector<16x18xf32> to vector<1x18xf32>
    %766 = vector.extract_strided_slice %764 {offsets = [14, 0], sizes = [1, 18], strides = [1, 1]} : vector<16x18xf32> to vector<1x18xf32>
    %767 = tpu.concatenate %765, %764, %766 in 0 : vector<1x18xf32>, vector<16x18xf32>, vector<1x18xf32> -> vector<18x18xf32>
    %cst_51 = arith.constant 0.000000e+00 : f32
    %768 = vector.broadcast %cst_51 : f32 to vector<16x16xf32>
    %cst_52 = arith.constant 0.000000e+00 : f32
    %769 = vector.broadcast %cst_52 : f32 to vector<16x16xf32>
    %cst_53 = arith.constant 0.000000e+00 : f32
    %770 = vector.broadcast %cst_53 : f32 to vector<16x16xf32>
    %cst_54 = arith.constant 0.000000e+00 : f32
    %771 = vector.broadcast %cst_54 : f32 to vector<16x16xf32>
    %772 = vector.extract_strided_slice %749 {offsets = [0, 0], sizes = [16, 16], strides = [1, 1]} : vector<18x18xf32> to vector<16x16xf32>
    %c0_55 = arith.constant 0 : index
    %773 = memref.load %arg3[%c0_55] : memref<144xf32, #tpu.memory_space<smem>>
    %774 = vector.broadcast %773 : f32 to vector<16x16xf32>
    %775 = arith.mulf %774, %772 : vector<16x16xf32>
    %776 = arith.addf %768, %775 : vector<16x16xf32>
    %c36_56 = arith.constant 36 : index
    %777 = memref.load %arg3[%c36_56] : memref<144xf32, #tpu.memory_space<smem>>
    %778 = vector.broadcast %777 : f32 to vector<16x16xf32>
    %779 = arith.mulf %778, %772 : vector<16x16xf32>
    %780 = arith.addf %769, %779 : vector<16x16xf32>
    %c72_57 = arith.constant 72 : index
    %781 = memref.load %arg3[%c72_57] : memref<144xf32, #tpu.memory_space<smem>>
    %782 = vector.broadcast %781 : f32 to vector<16x16xf32>
    %783 = arith.mulf %782, %772 : vector<16x16xf32>
    %784 = arith.addf %770, %783 : vector<16x16xf32>
    %c108_58 = arith.constant 108 : index
    %785 = memref.load %arg3[%c108_58] : memref<144xf32, #tpu.memory_space<smem>>
    %786 = vector.broadcast %785 : f32 to vector<16x16xf32>
    %787 = arith.mulf %786, %772 : vector<16x16xf32>
    %788 = arith.addf %771, %787 : vector<16x16xf32>
    %789 = vector.extract_strided_slice %749 {offsets = [0, 1], sizes = [16, 16], strides = [1, 1]} : vector<18x18xf32> to vector<16x16xf32>
    %c1_59 = arith.constant 1 : index
    %790 = memref.load %arg3[%c1_59] : memref<144xf32, #tpu.memory_space<smem>>
    %791 = vector.broadcast %790 : f32 to vector<16x16xf32>
    %792 = arith.mulf %791, %789 : vector<16x16xf32>
    %793 = arith.addf %776, %792 : vector<16x16xf32>
    %c37_60 = arith.constant 37 : index
    %794 = memref.load %arg3[%c37_60] : memref<144xf32, #tpu.memory_space<smem>>
    %795 = vector.broadcast %794 : f32 to vector<16x16xf32>
    %796 = arith.mulf %795, %789 : vector<16x16xf32>
    %797 = arith.addf %780, %796 : vector<16x16xf32>
    %c73_61 = arith.constant 73 : index
    %798 = memref.load %arg3[%c73_61] : memref<144xf32, #tpu.memory_space<smem>>
    %799 = vector.broadcast %798 : f32 to vector<16x16xf32>
    %800 = arith.mulf %799, %789 : vector<16x16xf32>
    %801 = arith.addf %784, %800 : vector<16x16xf32>
    %c109_62 = arith.constant 109 : index
    %802 = memref.load %arg3[%c109_62] : memref<144xf32, #tpu.memory_space<smem>>
    %803 = vector.broadcast %802 : f32 to vector<16x16xf32>
    %804 = arith.mulf %803, %789 : vector<16x16xf32>
    %805 = arith.addf %788, %804 : vector<16x16xf32>
    %806 = vector.extract_strided_slice %749 {offsets = [0, 2], sizes = [16, 16], strides = [1, 1]} : vector<18x18xf32> to vector<16x16xf32>
    %c2_63 = arith.constant 2 : index
    %807 = memref.load %arg3[%c2_63] : memref<144xf32, #tpu.memory_space<smem>>
    %808 = vector.broadcast %807 : f32 to vector<16x16xf32>
    %809 = arith.mulf %808, %806 : vector<16x16xf32>
    %810 = arith.addf %793, %809 : vector<16x16xf32>
    %c38_64 = arith.constant 38 : index
    %811 = memref.load %arg3[%c38_64] : memref<144xf32, #tpu.memory_space<smem>>
    %812 = vector.broadcast %811 : f32 to vector<16x16xf32>
    %813 = arith.mulf %812, %806 : vector<16x16xf32>
    %814 = arith.addf %797, %813 : vector<16x16xf32>
    %c74_65 = arith.constant 74 : index
    %815 = memref.load %arg3[%c74_65] : memref<144xf32, #tpu.memory_space<smem>>
    %816 = vector.broadcast %815 : f32 to vector<16x16xf32>
    %817 = arith.mulf %816, %806 : vector<16x16xf32>
    %818 = arith.addf %801, %817 : vector<16x16xf32>
    %c110_66 = arith.constant 110 : index
    %819 = memref.load %arg3[%c110_66] : memref<144xf32, #tpu.memory_space<smem>>
    %820 = vector.broadcast %819 : f32 to vector<16x16xf32>
    %821 = arith.mulf %820, %806 : vector<16x16xf32>
    %822 = arith.addf %805, %821 : vector<16x16xf32>
    %823 = vector.extract_strided_slice %749 {offsets = [1, 0], sizes = [16, 16], strides = [1, 1]} : vector<18x18xf32> to vector<16x16xf32>
    %c3_67 = arith.constant 3 : index
    %824 = memref.load %arg3[%c3_67] : memref<144xf32, #tpu.memory_space<smem>>
    %825 = vector.broadcast %824 : f32 to vector<16x16xf32>
    %826 = arith.mulf %825, %823 : vector<16x16xf32>
    %827 = arith.addf %810, %826 : vector<16x16xf32>
    %c39_68 = arith.constant 39 : index
    %828 = memref.load %arg3[%c39_68] : memref<144xf32, #tpu.memory_space<smem>>
    %829 = vector.broadcast %828 : f32 to vector<16x16xf32>
    %830 = arith.mulf %829, %823 : vector<16x16xf32>
    %831 = arith.addf %814, %830 : vector<16x16xf32>
    %c75_69 = arith.constant 75 : index
    %832 = memref.load %arg3[%c75_69] : memref<144xf32, #tpu.memory_space<smem>>
    %833 = vector.broadcast %832 : f32 to vector<16x16xf32>
    %834 = arith.mulf %833, %823 : vector<16x16xf32>
    %835 = arith.addf %818, %834 : vector<16x16xf32>
    %c111_70 = arith.constant 111 : index
    %836 = memref.load %arg3[%c111_70] : memref<144xf32, #tpu.memory_space<smem>>
    %837 = vector.broadcast %836 : f32 to vector<16x16xf32>
    %838 = arith.mulf %837, %823 : vector<16x16xf32>
    %839 = arith.addf %822, %838 : vector<16x16xf32>
    %840 = vector.extract_strided_slice %749 {offsets = [1, 1], sizes = [16, 16], strides = [1, 1]} : vector<18x18xf32> to vector<16x16xf32>
    %c4_71 = arith.constant 4 : index
    %841 = memref.load %arg3[%c4_71] : memref<144xf32, #tpu.memory_space<smem>>
    %842 = vector.broadcast %841 : f32 to vector<16x16xf32>
    %843 = arith.mulf %842, %840 : vector<16x16xf32>
    %844 = arith.addf %827, %843 : vector<16x16xf32>
    %c40_72 = arith.constant 40 : index
    %845 = memref.load %arg3[%c40_72] : memref<144xf32, #tpu.memory_space<smem>>
    %846 = vector.broadcast %845 : f32 to vector<16x16xf32>
    %847 = arith.mulf %846, %840 : vector<16x16xf32>
    %848 = arith.addf %831, %847 : vector<16x16xf32>
    %c76_73 = arith.constant 76 : index
    %849 = memref.load %arg3[%c76_73] : memref<144xf32, #tpu.memory_space<smem>>
    %850 = vector.broadcast %849 : f32 to vector<16x16xf32>
    %851 = arith.mulf %850, %840 : vector<16x16xf32>
    %852 = arith.addf %835, %851 : vector<16x16xf32>
    %c112_74 = arith.constant 112 : index
    %853 = memref.load %arg3[%c112_74] : memref<144xf32, #tpu.memory_space<smem>>
    %854 = vector.broadcast %853 : f32 to vector<16x16xf32>
    %855 = arith.mulf %854, %840 : vector<16x16xf32>
    %856 = arith.addf %839, %855 : vector<16x16xf32>
    %857 = vector.extract_strided_slice %749 {offsets = [1, 2], sizes = [16, 16], strides = [1, 1]} : vector<18x18xf32> to vector<16x16xf32>
    %c5_75 = arith.constant 5 : index
    %858 = memref.load %arg3[%c5_75] : memref<144xf32, #tpu.memory_space<smem>>
    %859 = vector.broadcast %858 : f32 to vector<16x16xf32>
    %860 = arith.mulf %859, %857 : vector<16x16xf32>
    %861 = arith.addf %844, %860 : vector<16x16xf32>
    %c41_76 = arith.constant 41 : index
    %862 = memref.load %arg3[%c41_76] : memref<144xf32, #tpu.memory_space<smem>>
    %863 = vector.broadcast %862 : f32 to vector<16x16xf32>
    %864 = arith.mulf %863, %857 : vector<16x16xf32>
    %865 = arith.addf %848, %864 : vector<16x16xf32>
    %c77_77 = arith.constant 77 : index
    %866 = memref.load %arg3[%c77_77] : memref<144xf32, #tpu.memory_space<smem>>
    %867 = vector.broadcast %866 : f32 to vector<16x16xf32>
    %868 = arith.mulf %867, %857 : vector<16x16xf32>
    %869 = arith.addf %852, %868 : vector<16x16xf32>
    %c113_78 = arith.constant 113 : index
    %870 = memref.load %arg3[%c113_78] : memref<144xf32, #tpu.memory_space<smem>>
    %871 = vector.broadcast %870 : f32 to vector<16x16xf32>
    %872 = arith.mulf %871, %857 : vector<16x16xf32>
    %873 = arith.addf %856, %872 : vector<16x16xf32>
    %874 = vector.extract_strided_slice %749 {offsets = [2, 0], sizes = [16, 16], strides = [1, 1]} : vector<18x18xf32> to vector<16x16xf32>
    %c6_79 = arith.constant 6 : index
    %875 = memref.load %arg3[%c6_79] : memref<144xf32, #tpu.memory_space<smem>>
    %876 = vector.broadcast %875 : f32 to vector<16x16xf32>
    %877 = arith.mulf %876, %874 : vector<16x16xf32>
    %878 = arith.addf %861, %877 : vector<16x16xf32>
    %c42_80 = arith.constant 42 : index
    %879 = memref.load %arg3[%c42_80] : memref<144xf32, #tpu.memory_space<smem>>
    %880 = vector.broadcast %879 : f32 to vector<16x16xf32>
    %881 = arith.mulf %880, %874 : vector<16x16xf32>
    %882 = arith.addf %865, %881 : vector<16x16xf32>
    %c78_81 = arith.constant 78 : index
    %883 = memref.load %arg3[%c78_81] : memref<144xf32, #tpu.memory_space<smem>>
    %884 = vector.broadcast %883 : f32 to vector<16x16xf32>
    %885 = arith.mulf %884, %874 : vector<16x16xf32>
    %886 = arith.addf %869, %885 : vector<16x16xf32>
    %c114_82 = arith.constant 114 : index
    %887 = memref.load %arg3[%c114_82] : memref<144xf32, #tpu.memory_space<smem>>
    %888 = vector.broadcast %887 : f32 to vector<16x16xf32>
    %889 = arith.mulf %888, %874 : vector<16x16xf32>
    %890 = arith.addf %873, %889 : vector<16x16xf32>
    %891 = vector.extract_strided_slice %749 {offsets = [2, 1], sizes = [16, 16], strides = [1, 1]} : vector<18x18xf32> to vector<16x16xf32>
    %c7_83 = arith.constant 7 : index
    %892 = memref.load %arg3[%c7_83] : memref<144xf32, #tpu.memory_space<smem>>
    %893 = vector.broadcast %892 : f32 to vector<16x16xf32>
    %894 = arith.mulf %893, %891 : vector<16x16xf32>
    %895 = arith.addf %878, %894 : vector<16x16xf32>
    %c43_84 = arith.constant 43 : index
    %896 = memref.load %arg3[%c43_84] : memref<144xf32, #tpu.memory_space<smem>>
    %897 = vector.broadcast %896 : f32 to vector<16x16xf32>
    %898 = arith.mulf %897, %891 : vector<16x16xf32>
    %899 = arith.addf %882, %898 : vector<16x16xf32>
    %c79_85 = arith.constant 79 : index
    %900 = memref.load %arg3[%c79_85] : memref<144xf32, #tpu.memory_space<smem>>
    %901 = vector.broadcast %900 : f32 to vector<16x16xf32>
    %902 = arith.mulf %901, %891 : vector<16x16xf32>
    %903 = arith.addf %886, %902 : vector<16x16xf32>
    %c115_86 = arith.constant 115 : index
    %904 = memref.load %arg3[%c115_86] : memref<144xf32, #tpu.memory_space<smem>>
    %905 = vector.broadcast %904 : f32 to vector<16x16xf32>
    %906 = arith.mulf %905, %891 : vector<16x16xf32>
    %907 = arith.addf %890, %906 : vector<16x16xf32>
    %908 = vector.extract_strided_slice %749 {offsets = [2, 2], sizes = [16, 16], strides = [1, 1]} : vector<18x18xf32> to vector<16x16xf32>
    %c8_87 = arith.constant 8 : index
    %909 = memref.load %arg3[%c8_87] : memref<144xf32, #tpu.memory_space<smem>>
    %910 = vector.broadcast %909 : f32 to vector<16x16xf32>
    %911 = arith.mulf %910, %908 : vector<16x16xf32>
    %912 = arith.addf %895, %911 : vector<16x16xf32>
    %c44_88 = arith.constant 44 : index
    %913 = memref.load %arg3[%c44_88] : memref<144xf32, #tpu.memory_space<smem>>
    %914 = vector.broadcast %913 : f32 to vector<16x16xf32>
    %915 = arith.mulf %914, %908 : vector<16x16xf32>
    %916 = arith.addf %899, %915 : vector<16x16xf32>
    %c80_89 = arith.constant 80 : index
    %917 = memref.load %arg3[%c80_89] : memref<144xf32, #tpu.memory_space<smem>>
    %918 = vector.broadcast %917 : f32 to vector<16x16xf32>
    %919 = arith.mulf %918, %908 : vector<16x16xf32>
    %920 = arith.addf %903, %919 : vector<16x16xf32>
    %c116_90 = arith.constant 116 : index
    %921 = memref.load %arg3[%c116_90] : memref<144xf32, #tpu.memory_space<smem>>
    %922 = vector.broadcast %921 : f32 to vector<16x16xf32>
    %923 = arith.mulf %922, %908 : vector<16x16xf32>
    %924 = arith.addf %907, %923 : vector<16x16xf32>
    %925 = vector.extract_strided_slice %755 {offsets = [0, 0], sizes = [16, 16], strides = [1, 1]} : vector<18x18xf32> to vector<16x16xf32>
    %c9_91 = arith.constant 9 : index
    %926 = memref.load %arg3[%c9_91] : memref<144xf32, #tpu.memory_space<smem>>
    %927 = vector.broadcast %926 : f32 to vector<16x16xf32>
    %928 = arith.mulf %927, %925 : vector<16x16xf32>
    %929 = arith.addf %912, %928 : vector<16x16xf32>
    %c45_92 = arith.constant 45 : index
    %930 = memref.load %arg3[%c45_92] : memref<144xf32, #tpu.memory_space<smem>>
    %931 = vector.broadcast %930 : f32 to vector<16x16xf32>
    %932 = arith.mulf %931, %925 : vector<16x16xf32>
    %933 = arith.addf %916, %932 : vector<16x16xf32>
    %c81_93 = arith.constant 81 : index
    %934 = memref.load %arg3[%c81_93] : memref<144xf32, #tpu.memory_space<smem>>
    %935 = vector.broadcast %934 : f32 to vector<16x16xf32>
    %936 = arith.mulf %935, %925 : vector<16x16xf32>
    %937 = arith.addf %920, %936 : vector<16x16xf32>
    %c117_94 = arith.constant 117 : index
    %938 = memref.load %arg3[%c117_94] : memref<144xf32, #tpu.memory_space<smem>>
    %939 = vector.broadcast %938 : f32 to vector<16x16xf32>
    %940 = arith.mulf %939, %925 : vector<16x16xf32>
    %941 = arith.addf %924, %940 : vector<16x16xf32>
    %942 = vector.extract_strided_slice %755 {offsets = [0, 1], sizes = [16, 16], strides = [1, 1]} : vector<18x18xf32> to vector<16x16xf32>
    %c10_95 = arith.constant 10 : index
    %943 = memref.load %arg3[%c10_95] : memref<144xf32, #tpu.memory_space<smem>>
    %944 = vector.broadcast %943 : f32 to vector<16x16xf32>
    %945 = arith.mulf %944, %942 : vector<16x16xf32>
    %946 = arith.addf %929, %945 : vector<16x16xf32>
    %c46_96 = arith.constant 46 : index
    %947 = memref.load %arg3[%c46_96] : memref<144xf32, #tpu.memory_space<smem>>
    %948 = vector.broadcast %947 : f32 to vector<16x16xf32>
    %949 = arith.mulf %948, %942 : vector<16x16xf32>
    %950 = arith.addf %933, %949 : vector<16x16xf32>
    %c82_97 = arith.constant 82 : index
    %951 = memref.load %arg3[%c82_97] : memref<144xf32, #tpu.memory_space<smem>>
    %952 = vector.broadcast %951 : f32 to vector<16x16xf32>
    %953 = arith.mulf %952, %942 : vector<16x16xf32>
    %954 = arith.addf %937, %953 : vector<16x16xf32>
    %c118_98 = arith.constant 118 : index
    %955 = memref.load %arg3[%c118_98] : memref<144xf32, #tpu.memory_space<smem>>
    %956 = vector.broadcast %955 : f32 to vector<16x16xf32>
    %957 = arith.mulf %956, %942 : vector<16x16xf32>
    %958 = arith.addf %941, %957 : vector<16x16xf32>
    %959 = vector.extract_strided_slice %755 {offsets = [0, 2], sizes = [16, 16], strides = [1, 1]} : vector<18x18xf32> to vector<16x16xf32>
    %c11_99 = arith.constant 11 : index
    %960 = memref.load %arg3[%c11_99] : memref<144xf32, #tpu.memory_space<smem>>
    %961 = vector.broadcast %960 : f32 to vector<16x16xf32>
    %962 = arith.mulf %961, %959 : vector<16x16xf32>
    %963 = arith.addf %946, %962 : vector<16x16xf32>
    %c47_100 = arith.constant 47 : index
    %964 = memref.load %arg3[%c47_100] : memref<144xf32, #tpu.memory_space<smem>>
    %965 = vector.broadcast %964 : f32 to vector<16x16xf32>
    %966 = arith.mulf %965, %959 : vector<16x16xf32>
    %967 = arith.addf %950, %966 : vector<16x16xf32>
    %c83_101 = arith.constant 83 : index
    %968 = memref.load %arg3[%c83_101] : memref<144xf32, #tpu.memory_space<smem>>
    %969 = vector.broadcast %968 : f32 to vector<16x16xf32>
    %970 = arith.mulf %969, %959 : vector<16x16xf32>
    %971 = arith.addf %954, %970 : vector<16x16xf32>
    %c119_102 = arith.constant 119 : index
    %972 = memref.load %arg3[%c119_102] : memref<144xf32, #tpu.memory_space<smem>>
    %973 = vector.broadcast %972 : f32 to vector<16x16xf32>
    %974 = arith.mulf %973, %959 : vector<16x16xf32>
    %975 = arith.addf %958, %974 : vector<16x16xf32>
    %976 = vector.extract_strided_slice %755 {offsets = [1, 0], sizes = [16, 16], strides = [1, 1]} : vector<18x18xf32> to vector<16x16xf32>
    %c12_103 = arith.constant 12 : index
    %977 = memref.load %arg3[%c12_103] : memref<144xf32, #tpu.memory_space<smem>>
    %978 = vector.broadcast %977 : f32 to vector<16x16xf32>
    %979 = arith.mulf %978, %976 : vector<16x16xf32>
    %980 = arith.addf %963, %979 : vector<16x16xf32>
    %c48_104 = arith.constant 48 : index
    %981 = memref.load %arg3[%c48_104] : memref<144xf32, #tpu.memory_space<smem>>
    %982 = vector.broadcast %981 : f32 to vector<16x16xf32>
    %983 = arith.mulf %982, %976 : vector<16x16xf32>
    %984 = arith.addf %967, %983 : vector<16x16xf32>
    %c84_105 = arith.constant 84 : index
    %985 = memref.load %arg3[%c84_105] : memref<144xf32, #tpu.memory_space<smem>>
    %986 = vector.broadcast %985 : f32 to vector<16x16xf32>
    %987 = arith.mulf %986, %976 : vector<16x16xf32>
    %988 = arith.addf %971, %987 : vector<16x16xf32>
    %c120_106 = arith.constant 120 : index
    %989 = memref.load %arg3[%c120_106] : memref<144xf32, #tpu.memory_space<smem>>
    %990 = vector.broadcast %989 : f32 to vector<16x16xf32>
    %991 = arith.mulf %990, %976 : vector<16x16xf32>
    %992 = arith.addf %975, %991 : vector<16x16xf32>
    %993 = vector.extract_strided_slice %755 {offsets = [1, 1], sizes = [16, 16], strides = [1, 1]} : vector<18x18xf32> to vector<16x16xf32>
    %c13_107 = arith.constant 13 : index
    %994 = memref.load %arg3[%c13_107] : memref<144xf32, #tpu.memory_space<smem>>
    %995 = vector.broadcast %994 : f32 to vector<16x16xf32>
    %996 = arith.mulf %995, %993 : vector<16x16xf32>
    %997 = arith.addf %980, %996 : vector<16x16xf32>
    %c49_108 = arith.constant 49 : index
    %998 = memref.load %arg3[%c49_108] : memref<144xf32, #tpu.memory_space<smem>>
    %999 = vector.broadcast %998 : f32 to vector<16x16xf32>
    %1000 = arith.mulf %999, %993 : vector<16x16xf32>
    %1001 = arith.addf %984, %1000 : vector<16x16xf32>
    %c85_109 = arith.constant 85 : index
    %1002 = memref.load %arg3[%c85_109] : memref<144xf32, #tpu.memory_space<smem>>
    %1003 = vector.broadcast %1002 : f32 to vector<16x16xf32>
    %1004 = arith.mulf %1003, %993 : vector<16x16xf32>
    %1005 = arith.addf %988, %1004 : vector<16x16xf32>
    %c121_110 = arith.constant 121 : index
    %1006 = memref.load %arg3[%c121_110] : memref<144xf32, #tpu.memory_space<smem>>
    %1007 = vector.broadcast %1006 : f32 to vector<16x16xf32>
    %1008 = arith.mulf %1007, %993 : vector<16x16xf32>
    %1009 = arith.addf %992, %1008 : vector<16x16xf32>
    %1010 = vector.extract_strided_slice %755 {offsets = [1, 2], sizes = [16, 16], strides = [1, 1]} : vector<18x18xf32> to vector<16x16xf32>
    %c14_111 = arith.constant 14 : index
    %1011 = memref.load %arg3[%c14_111] : memref<144xf32, #tpu.memory_space<smem>>
    %1012 = vector.broadcast %1011 : f32 to vector<16x16xf32>
    %1013 = arith.mulf %1012, %1010 : vector<16x16xf32>
    %1014 = arith.addf %997, %1013 : vector<16x16xf32>
    %c50_112 = arith.constant 50 : index
    %1015 = memref.load %arg3[%c50_112] : memref<144xf32, #tpu.memory_space<smem>>
    %1016 = vector.broadcast %1015 : f32 to vector<16x16xf32>
    %1017 = arith.mulf %1016, %1010 : vector<16x16xf32>
    %1018 = arith.addf %1001, %1017 : vector<16x16xf32>
    %c86_113 = arith.constant 86 : index
    %1019 = memref.load %arg3[%c86_113] : memref<144xf32, #tpu.memory_space<smem>>
    %1020 = vector.broadcast %1019 : f32 to vector<16x16xf32>
    %1021 = arith.mulf %1020, %1010 : vector<16x16xf32>
    %1022 = arith.addf %1005, %1021 : vector<16x16xf32>
    %c122_114 = arith.constant 122 : index
    %1023 = memref.load %arg3[%c122_114] : memref<144xf32, #tpu.memory_space<smem>>
    %1024 = vector.broadcast %1023 : f32 to vector<16x16xf32>
    %1025 = arith.mulf %1024, %1010 : vector<16x16xf32>
    %1026 = arith.addf %1009, %1025 : vector<16x16xf32>
    %1027 = vector.extract_strided_slice %755 {offsets = [2, 0], sizes = [16, 16], strides = [1, 1]} : vector<18x18xf32> to vector<16x16xf32>
    %c15_115 = arith.constant 15 : index
    %1028 = memref.load %arg3[%c15_115] : memref<144xf32, #tpu.memory_space<smem>>
    %1029 = vector.broadcast %1028 : f32 to vector<16x16xf32>
    %1030 = arith.mulf %1029, %1027 : vector<16x16xf32>
    %1031 = arith.addf %1014, %1030 : vector<16x16xf32>
    %c51_116 = arith.constant 51 : index
    %1032 = memref.load %arg3[%c51_116] : memref<144xf32, #tpu.memory_space<smem>>
    %1033 = vector.broadcast %1032 : f32 to vector<16x16xf32>
    %1034 = arith.mulf %1033, %1027 : vector<16x16xf32>
    %1035 = arith.addf %1018, %1034 : vector<16x16xf32>
    %c87_117 = arith.constant 87 : index
    %1036 = memref.load %arg3[%c87_117] : memref<144xf32, #tpu.memory_space<smem>>
    %1037 = vector.broadcast %1036 : f32 to vector<16x16xf32>
    %1038 = arith.mulf %1037, %1027 : vector<16x16xf32>
    %1039 = arith.addf %1022, %1038 : vector<16x16xf32>
    %c123_118 = arith.constant 123 : index
    %1040 = memref.load %arg3[%c123_118] : memref<144xf32, #tpu.memory_space<smem>>
    %1041 = vector.broadcast %1040 : f32 to vector<16x16xf32>
    %1042 = arith.mulf %1041, %1027 : vector<16x16xf32>
    %1043 = arith.addf %1026, %1042 : vector<16x16xf32>
    %1044 = vector.extract_strided_slice %755 {offsets = [2, 1], sizes = [16, 16], strides = [1, 1]} : vector<18x18xf32> to vector<16x16xf32>
    %c16_119 = arith.constant 16 : index
    %1045 = memref.load %arg3[%c16_119] : memref<144xf32, #tpu.memory_space<smem>>
    %1046 = vector.broadcast %1045 : f32 to vector<16x16xf32>
    %1047 = arith.mulf %1046, %1044 : vector<16x16xf32>
    %1048 = arith.addf %1031, %1047 : vector<16x16xf32>
    %c52_120 = arith.constant 52 : index
    %1049 = memref.load %arg3[%c52_120] : memref<144xf32, #tpu.memory_space<smem>>
    %1050 = vector.broadcast %1049 : f32 to vector<16x16xf32>
    %1051 = arith.mulf %1050, %1044 : vector<16x16xf32>
    %1052 = arith.addf %1035, %1051 : vector<16x16xf32>
    %c88_121 = arith.constant 88 : index
    %1053 = memref.load %arg3[%c88_121] : memref<144xf32, #tpu.memory_space<smem>>
    %1054 = vector.broadcast %1053 : f32 to vector<16x16xf32>
    %1055 = arith.mulf %1054, %1044 : vector<16x16xf32>
    %1056 = arith.addf %1039, %1055 : vector<16x16xf32>
    %c124_122 = arith.constant 124 : index
    %1057 = memref.load %arg3[%c124_122] : memref<144xf32, #tpu.memory_space<smem>>
    %1058 = vector.broadcast %1057 : f32 to vector<16x16xf32>
    %1059 = arith.mulf %1058, %1044 : vector<16x16xf32>
    %1060 = arith.addf %1043, %1059 : vector<16x16xf32>
    %1061 = vector.extract_strided_slice %755 {offsets = [2, 2], sizes = [16, 16], strides = [1, 1]} : vector<18x18xf32> to vector<16x16xf32>
    %c17_123 = arith.constant 17 : index
    %1062 = memref.load %arg3[%c17_123] : memref<144xf32, #tpu.memory_space<smem>>
    %1063 = vector.broadcast %1062 : f32 to vector<16x16xf32>
    %1064 = arith.mulf %1063, %1061 : vector<16x16xf32>
    %1065 = arith.addf %1048, %1064 : vector<16x16xf32>
    %c53_124 = arith.constant 53 : index
    %1066 = memref.load %arg3[%c53_124] : memref<144xf32, #tpu.memory_space<smem>>
    %1067 = vector.broadcast %1066 : f32 to vector<16x16xf32>
    %1068 = arith.mulf %1067, %1061 : vector<16x16xf32>
    %1069 = arith.addf %1052, %1068 : vector<16x16xf32>
    %c89_125 = arith.constant 89 : index
    %1070 = memref.load %arg3[%c89_125] : memref<144xf32, #tpu.memory_space<smem>>
    %1071 = vector.broadcast %1070 : f32 to vector<16x16xf32>
    %1072 = arith.mulf %1071, %1061 : vector<16x16xf32>
    %1073 = arith.addf %1056, %1072 : vector<16x16xf32>
    %c125_126 = arith.constant 125 : index
    %1074 = memref.load %arg3[%c125_126] : memref<144xf32, #tpu.memory_space<smem>>
    %1075 = vector.broadcast %1074 : f32 to vector<16x16xf32>
    %1076 = arith.mulf %1075, %1061 : vector<16x16xf32>
    %1077 = arith.addf %1060, %1076 : vector<16x16xf32>
    %1078 = vector.extract_strided_slice %761 {offsets = [0, 0], sizes = [16, 16], strides = [1, 1]} : vector<18x18xf32> to vector<16x16xf32>
    %c18_127 = arith.constant 18 : index
    %1079 = memref.load %arg3[%c18_127] : memref<144xf32, #tpu.memory_space<smem>>
    %1080 = vector.broadcast %1079 : f32 to vector<16x16xf32>
    %1081 = arith.mulf %1080, %1078 : vector<16x16xf32>
    %1082 = arith.addf %1065, %1081 : vector<16x16xf32>
    %c54_128 = arith.constant 54 : index
    %1083 = memref.load %arg3[%c54_128] : memref<144xf32, #tpu.memory_space<smem>>
    %1084 = vector.broadcast %1083 : f32 to vector<16x16xf32>
    %1085 = arith.mulf %1084, %1078 : vector<16x16xf32>
    %1086 = arith.addf %1069, %1085 : vector<16x16xf32>
    %c90_129 = arith.constant 90 : index
    %1087 = memref.load %arg3[%c90_129] : memref<144xf32, #tpu.memory_space<smem>>
    %1088 = vector.broadcast %1087 : f32 to vector<16x16xf32>
    %1089 = arith.mulf %1088, %1078 : vector<16x16xf32>
    %1090 = arith.addf %1073, %1089 : vector<16x16xf32>
    %c126_130 = arith.constant 126 : index
    %1091 = memref.load %arg3[%c126_130] : memref<144xf32, #tpu.memory_space<smem>>
    %1092 = vector.broadcast %1091 : f32 to vector<16x16xf32>
    %1093 = arith.mulf %1092, %1078 : vector<16x16xf32>
    %1094 = arith.addf %1077, %1093 : vector<16x16xf32>
    %1095 = vector.extract_strided_slice %761 {offsets = [0, 1], sizes = [16, 16], strides = [1, 1]} : vector<18x18xf32> to vector<16x16xf32>
    %c19_131 = arith.constant 19 : index
    %1096 = memref.load %arg3[%c19_131] : memref<144xf32, #tpu.memory_space<smem>>
    %1097 = vector.broadcast %1096 : f32 to vector<16x16xf32>
    %1098 = arith.mulf %1097, %1095 : vector<16x16xf32>
    %1099 = arith.addf %1082, %1098 : vector<16x16xf32>
    %c55_132 = arith.constant 55 : index
    %1100 = memref.load %arg3[%c55_132] : memref<144xf32, #tpu.memory_space<smem>>
    %1101 = vector.broadcast %1100 : f32 to vector<16x16xf32>
    %1102 = arith.mulf %1101, %1095 : vector<16x16xf32>
    %1103 = arith.addf %1086, %1102 : vector<16x16xf32>
    %c91_133 = arith.constant 91 : index
    %1104 = memref.load %arg3[%c91_133] : memref<144xf32, #tpu.memory_space<smem>>
    %1105 = vector.broadcast %1104 : f32 to vector<16x16xf32>
    %1106 = arith.mulf %1105, %1095 : vector<16x16xf32>
    %1107 = arith.addf %1090, %1106 : vector<16x16xf32>
    %c127_134 = arith.constant 127 : index
    %1108 = memref.load %arg3[%c127_134] : memref<144xf32, #tpu.memory_space<smem>>
    %1109 = vector.broadcast %1108 : f32 to vector<16x16xf32>
    %1110 = arith.mulf %1109, %1095 : vector<16x16xf32>
    %1111 = arith.addf %1094, %1110 : vector<16x16xf32>
    %1112 = vector.extract_strided_slice %761 {offsets = [0, 2], sizes = [16, 16], strides = [1, 1]} : vector<18x18xf32> to vector<16x16xf32>
    %c20_135 = arith.constant 20 : index
    %1113 = memref.load %arg3[%c20_135] : memref<144xf32, #tpu.memory_space<smem>>
    %1114 = vector.broadcast %1113 : f32 to vector<16x16xf32>
    %1115 = arith.mulf %1114, %1112 : vector<16x16xf32>
    %1116 = arith.addf %1099, %1115 : vector<16x16xf32>
    %c56_136 = arith.constant 56 : index
    %1117 = memref.load %arg3[%c56_136] : memref<144xf32, #tpu.memory_space<smem>>
    %1118 = vector.broadcast %1117 : f32 to vector<16x16xf32>
    %1119 = arith.mulf %1118, %1112 : vector<16x16xf32>
    %1120 = arith.addf %1103, %1119 : vector<16x16xf32>
    %c92_137 = arith.constant 92 : index
    %1121 = memref.load %arg3[%c92_137] : memref<144xf32, #tpu.memory_space<smem>>
    %1122 = vector.broadcast %1121 : f32 to vector<16x16xf32>
    %1123 = arith.mulf %1122, %1112 : vector<16x16xf32>
    %1124 = arith.addf %1107, %1123 : vector<16x16xf32>
    %c128_138 = arith.constant 128 : index
    %1125 = memref.load %arg3[%c128_138] : memref<144xf32, #tpu.memory_space<smem>>
    %1126 = vector.broadcast %1125 : f32 to vector<16x16xf32>
    %1127 = arith.mulf %1126, %1112 : vector<16x16xf32>
    %1128 = arith.addf %1111, %1127 : vector<16x16xf32>
    %1129 = vector.extract_strided_slice %761 {offsets = [1, 0], sizes = [16, 16], strides = [1, 1]} : vector<18x18xf32> to vector<16x16xf32>
    %c21_139 = arith.constant 21 : index
    %1130 = memref.load %arg3[%c21_139] : memref<144xf32, #tpu.memory_space<smem>>
    %1131 = vector.broadcast %1130 : f32 to vector<16x16xf32>
    %1132 = arith.mulf %1131, %1129 : vector<16x16xf32>
    %1133 = arith.addf %1116, %1132 : vector<16x16xf32>
    %c57_140 = arith.constant 57 : index
    %1134 = memref.load %arg3[%c57_140] : memref<144xf32, #tpu.memory_space<smem>>
    %1135 = vector.broadcast %1134 : f32 to vector<16x16xf32>
    %1136 = arith.mulf %1135, %1129 : vector<16x16xf32>
    %1137 = arith.addf %1120, %1136 : vector<16x16xf32>
    %c93_141 = arith.constant 93 : index
    %1138 = memref.load %arg3[%c93_141] : memref<144xf32, #tpu.memory_space<smem>>
    %1139 = vector.broadcast %1138 : f32 to vector<16x16xf32>
    %1140 = arith.mulf %1139, %1129 : vector<16x16xf32>
    %1141 = arith.addf %1124, %1140 : vector<16x16xf32>
    %c129_142 = arith.constant 129 : index
    %1142 = memref.load %arg3[%c129_142] : memref<144xf32, #tpu.memory_space<smem>>
    %1143 = vector.broadcast %1142 : f32 to vector<16x16xf32>
    %1144 = arith.mulf %1143, %1129 : vector<16x16xf32>
    %1145 = arith.addf %1128, %1144 : vector<16x16xf32>
    %1146 = vector.extract_strided_slice %761 {offsets = [1, 1], sizes = [16, 16], strides = [1, 1]} : vector<18x18xf32> to vector<16x16xf32>
    %c22_143 = arith.constant 22 : index
    %1147 = memref.load %arg3[%c22_143] : memref<144xf32, #tpu.memory_space<smem>>
    %1148 = vector.broadcast %1147 : f32 to vector<16x16xf32>
    %1149 = arith.mulf %1148, %1146 : vector<16x16xf32>
    %1150 = arith.addf %1133, %1149 : vector<16x16xf32>
    %c58_144 = arith.constant 58 : index
    %1151 = memref.load %arg3[%c58_144] : memref<144xf32, #tpu.memory_space<smem>>
    %1152 = vector.broadcast %1151 : f32 to vector<16x16xf32>
    %1153 = arith.mulf %1152, %1146 : vector<16x16xf32>
    %1154 = arith.addf %1137, %1153 : vector<16x16xf32>
    %c94_145 = arith.constant 94 : index
    %1155 = memref.load %arg3[%c94_145] : memref<144xf32, #tpu.memory_space<smem>>
    %1156 = vector.broadcast %1155 : f32 to vector<16x16xf32>
    %1157 = arith.mulf %1156, %1146 : vector<16x16xf32>
    %1158 = arith.addf %1141, %1157 : vector<16x16xf32>
    %c130_146 = arith.constant 130 : index
    %1159 = memref.load %arg3[%c130_146] : memref<144xf32, #tpu.memory_space<smem>>
    %1160 = vector.broadcast %1159 : f32 to vector<16x16xf32>
    %1161 = arith.mulf %1160, %1146 : vector<16x16xf32>
    %1162 = arith.addf %1145, %1161 : vector<16x16xf32>
    %1163 = vector.extract_strided_slice %761 {offsets = [1, 2], sizes = [16, 16], strides = [1, 1]} : vector<18x18xf32> to vector<16x16xf32>
    %c23_147 = arith.constant 23 : index
    %1164 = memref.load %arg3[%c23_147] : memref<144xf32, #tpu.memory_space<smem>>
    %1165 = vector.broadcast %1164 : f32 to vector<16x16xf32>
    %1166 = arith.mulf %1165, %1163 : vector<16x16xf32>
    %1167 = arith.addf %1150, %1166 : vector<16x16xf32>
    %c59_148 = arith.constant 59 : index
    %1168 = memref.load %arg3[%c59_148] : memref<144xf32, #tpu.memory_space<smem>>
    %1169 = vector.broadcast %1168 : f32 to vector<16x16xf32>
    %1170 = arith.mulf %1169, %1163 : vector<16x16xf32>
    %1171 = arith.addf %1154, %1170 : vector<16x16xf32>
    %c95_149 = arith.constant 95 : index
    %1172 = memref.load %arg3[%c95_149] : memref<144xf32, #tpu.memory_space<smem>>
    %1173 = vector.broadcast %1172 : f32 to vector<16x16xf32>
    %1174 = arith.mulf %1173, %1163 : vector<16x16xf32>
    %1175 = arith.addf %1158, %1174 : vector<16x16xf32>
    %c131_150 = arith.constant 131 : index
    %1176 = memref.load %arg3[%c131_150] : memref<144xf32, #tpu.memory_space<smem>>
    %1177 = vector.broadcast %1176 : f32 to vector<16x16xf32>
    %1178 = arith.mulf %1177, %1163 : vector<16x16xf32>
    %1179 = arith.addf %1162, %1178 : vector<16x16xf32>
    %1180 = vector.extract_strided_slice %761 {offsets = [2, 0], sizes = [16, 16], strides = [1, 1]} : vector<18x18xf32> to vector<16x16xf32>
    %c24_151 = arith.constant 24 : index
    %1181 = memref.load %arg3[%c24_151] : memref<144xf32, #tpu.memory_space<smem>>
    %1182 = vector.broadcast %1181 : f32 to vector<16x16xf32>
    %1183 = arith.mulf %1182, %1180 : vector<16x16xf32>
    %1184 = arith.addf %1167, %1183 : vector<16x16xf32>
    %c60_152 = arith.constant 60 : index
    %1185 = memref.load %arg3[%c60_152] : memref<144xf32, #tpu.memory_space<smem>>
    %1186 = vector.broadcast %1185 : f32 to vector<16x16xf32>
    %1187 = arith.mulf %1186, %1180 : vector<16x16xf32>
    %1188 = arith.addf %1171, %1187 : vector<16x16xf32>
    %c96_153 = arith.constant 96 : index
    %1189 = memref.load %arg3[%c96_153] : memref<144xf32, #tpu.memory_space<smem>>
    %1190 = vector.broadcast %1189 : f32 to vector<16x16xf32>
    %1191 = arith.mulf %1190, %1180 : vector<16x16xf32>
    %1192 = arith.addf %1175, %1191 : vector<16x16xf32>
    %c132_154 = arith.constant 132 : index
    %1193 = memref.load %arg3[%c132_154] : memref<144xf32, #tpu.memory_space<smem>>
    %1194 = vector.broadcast %1193 : f32 to vector<16x16xf32>
    %1195 = arith.mulf %1194, %1180 : vector<16x16xf32>
    %1196 = arith.addf %1179, %1195 : vector<16x16xf32>
    %1197 = vector.extract_strided_slice %761 {offsets = [2, 1], sizes = [16, 16], strides = [1, 1]} : vector<18x18xf32> to vector<16x16xf32>
    %c25_155 = arith.constant 25 : index
    %1198 = memref.load %arg3[%c25_155] : memref<144xf32, #tpu.memory_space<smem>>
    %1199 = vector.broadcast %1198 : f32 to vector<16x16xf32>
    %1200 = arith.mulf %1199, %1197 : vector<16x16xf32>
    %1201 = arith.addf %1184, %1200 : vector<16x16xf32>
    %c61_156 = arith.constant 61 : index
    %1202 = memref.load %arg3[%c61_156] : memref<144xf32, #tpu.memory_space<smem>>
    %1203 = vector.broadcast %1202 : f32 to vector<16x16xf32>
    %1204 = arith.mulf %1203, %1197 : vector<16x16xf32>
    %1205 = arith.addf %1188, %1204 : vector<16x16xf32>
    %c97_157 = arith.constant 97 : index
    %1206 = memref.load %arg3[%c97_157] : memref<144xf32, #tpu.memory_space<smem>>
    %1207 = vector.broadcast %1206 : f32 to vector<16x16xf32>
    %1208 = arith.mulf %1207, %1197 : vector<16x16xf32>
    %1209 = arith.addf %1192, %1208 : vector<16x16xf32>
    %c133_158 = arith.constant 133 : index
    %1210 = memref.load %arg3[%c133_158] : memref<144xf32, #tpu.memory_space<smem>>
    %1211 = vector.broadcast %1210 : f32 to vector<16x16xf32>
    %1212 = arith.mulf %1211, %1197 : vector<16x16xf32>
    %1213 = arith.addf %1196, %1212 : vector<16x16xf32>
    %1214 = vector.extract_strided_slice %761 {offsets = [2, 2], sizes = [16, 16], strides = [1, 1]} : vector<18x18xf32> to vector<16x16xf32>
    %c26_159 = arith.constant 26 : index
    %1215 = memref.load %arg3[%c26_159] : memref<144xf32, #tpu.memory_space<smem>>
    %1216 = vector.broadcast %1215 : f32 to vector<16x16xf32>
    %1217 = arith.mulf %1216, %1214 : vector<16x16xf32>
    %1218 = arith.addf %1201, %1217 : vector<16x16xf32>
    %c62_160 = arith.constant 62 : index
    %1219 = memref.load %arg3[%c62_160] : memref<144xf32, #tpu.memory_space<smem>>
    %1220 = vector.broadcast %1219 : f32 to vector<16x16xf32>
    %1221 = arith.mulf %1220, %1214 : vector<16x16xf32>
    %1222 = arith.addf %1205, %1221 : vector<16x16xf32>
    %c98_161 = arith.constant 98 : index
    %1223 = memref.load %arg3[%c98_161] : memref<144xf32, #tpu.memory_space<smem>>
    %1224 = vector.broadcast %1223 : f32 to vector<16x16xf32>
    %1225 = arith.mulf %1224, %1214 : vector<16x16xf32>
    %1226 = arith.addf %1209, %1225 : vector<16x16xf32>
    %c134_162 = arith.constant 134 : index
    %1227 = memref.load %arg3[%c134_162] : memref<144xf32, #tpu.memory_space<smem>>
    %1228 = vector.broadcast %1227 : f32 to vector<16x16xf32>
    %1229 = arith.mulf %1228, %1214 : vector<16x16xf32>
    %1230 = arith.addf %1213, %1229 : vector<16x16xf32>
    %1231 = vector.extract_strided_slice %767 {offsets = [0, 0], sizes = [16, 16], strides = [1, 1]} : vector<18x18xf32> to vector<16x16xf32>
    %c27_163 = arith.constant 27 : index
    %1232 = memref.load %arg3[%c27_163] : memref<144xf32, #tpu.memory_space<smem>>
    %1233 = vector.broadcast %1232 : f32 to vector<16x16xf32>
    %1234 = arith.mulf %1233, %1231 : vector<16x16xf32>
    %1235 = arith.addf %1218, %1234 : vector<16x16xf32>
    %c63_164 = arith.constant 63 : index
    %1236 = memref.load %arg3[%c63_164] : memref<144xf32, #tpu.memory_space<smem>>
    %1237 = vector.broadcast %1236 : f32 to vector<16x16xf32>
    %1238 = arith.mulf %1237, %1231 : vector<16x16xf32>
    %1239 = arith.addf %1222, %1238 : vector<16x16xf32>
    %c99_165 = arith.constant 99 : index
    %1240 = memref.load %arg3[%c99_165] : memref<144xf32, #tpu.memory_space<smem>>
    %1241 = vector.broadcast %1240 : f32 to vector<16x16xf32>
    %1242 = arith.mulf %1241, %1231 : vector<16x16xf32>
    %1243 = arith.addf %1226, %1242 : vector<16x16xf32>
    %c135_166 = arith.constant 135 : index
    %1244 = memref.load %arg3[%c135_166] : memref<144xf32, #tpu.memory_space<smem>>
    %1245 = vector.broadcast %1244 : f32 to vector<16x16xf32>
    %1246 = arith.mulf %1245, %1231 : vector<16x16xf32>
    %1247 = arith.addf %1230, %1246 : vector<16x16xf32>
    %1248 = vector.extract_strided_slice %767 {offsets = [0, 1], sizes = [16, 16], strides = [1, 1]} : vector<18x18xf32> to vector<16x16xf32>
    %c28_167 = arith.constant 28 : index
    %1249 = memref.load %arg3[%c28_167] : memref<144xf32, #tpu.memory_space<smem>>
    %1250 = vector.broadcast %1249 : f32 to vector<16x16xf32>
    %1251 = arith.mulf %1250, %1248 : vector<16x16xf32>
    %1252 = arith.addf %1235, %1251 : vector<16x16xf32>
    %c64_168 = arith.constant 64 : index
    %1253 = memref.load %arg3[%c64_168] : memref<144xf32, #tpu.memory_space<smem>>
    %1254 = vector.broadcast %1253 : f32 to vector<16x16xf32>
    %1255 = arith.mulf %1254, %1248 : vector<16x16xf32>
    %1256 = arith.addf %1239, %1255 : vector<16x16xf32>
    %c100_169 = arith.constant 100 : index
    %1257 = memref.load %arg3[%c100_169] : memref<144xf32, #tpu.memory_space<smem>>
    %1258 = vector.broadcast %1257 : f32 to vector<16x16xf32>
    %1259 = arith.mulf %1258, %1248 : vector<16x16xf32>
    %1260 = arith.addf %1243, %1259 : vector<16x16xf32>
    %c136_170 = arith.constant 136 : index
    %1261 = memref.load %arg3[%c136_170] : memref<144xf32, #tpu.memory_space<smem>>
    %1262 = vector.broadcast %1261 : f32 to vector<16x16xf32>
    %1263 = arith.mulf %1262, %1248 : vector<16x16xf32>
    %1264 = arith.addf %1247, %1263 : vector<16x16xf32>
    %1265 = vector.extract_strided_slice %767 {offsets = [0, 2], sizes = [16, 16], strides = [1, 1]} : vector<18x18xf32> to vector<16x16xf32>
    %c29_171 = arith.constant 29 : index
    %1266 = memref.load %arg3[%c29_171] : memref<144xf32, #tpu.memory_space<smem>>
    %1267 = vector.broadcast %1266 : f32 to vector<16x16xf32>
    %1268 = arith.mulf %1267, %1265 : vector<16x16xf32>
    %1269 = arith.addf %1252, %1268 : vector<16x16xf32>
    %c65_172 = arith.constant 65 : index
    %1270 = memref.load %arg3[%c65_172] : memref<144xf32, #tpu.memory_space<smem>>
    %1271 = vector.broadcast %1270 : f32 to vector<16x16xf32>
    %1272 = arith.mulf %1271, %1265 : vector<16x16xf32>
    %1273 = arith.addf %1256, %1272 : vector<16x16xf32>
    %c101_173 = arith.constant 101 : index
    %1274 = memref.load %arg3[%c101_173] : memref<144xf32, #tpu.memory_space<smem>>
    %1275 = vector.broadcast %1274 : f32 to vector<16x16xf32>
    %1276 = arith.mulf %1275, %1265 : vector<16x16xf32>
    %1277 = arith.addf %1260, %1276 : vector<16x16xf32>
    %c137_174 = arith.constant 137 : index
    %1278 = memref.load %arg3[%c137_174] : memref<144xf32, #tpu.memory_space<smem>>
    %1279 = vector.broadcast %1278 : f32 to vector<16x16xf32>
    %1280 = arith.mulf %1279, %1265 : vector<16x16xf32>
    %1281 = arith.addf %1264, %1280 : vector<16x16xf32>
    %1282 = vector.extract_strided_slice %767 {offsets = [1, 0], sizes = [16, 16], strides = [1, 1]} : vector<18x18xf32> to vector<16x16xf32>
    %c30_175 = arith.constant 30 : index
    %1283 = memref.load %arg3[%c30_175] : memref<144xf32, #tpu.memory_space<smem>>
    %1284 = vector.broadcast %1283 : f32 to vector<16x16xf32>
    %1285 = arith.mulf %1284, %1282 : vector<16x16xf32>
    %1286 = arith.addf %1269, %1285 : vector<16x16xf32>
    %c66_176 = arith.constant 66 : index
    %1287 = memref.load %arg3[%c66_176] : memref<144xf32, #tpu.memory_space<smem>>
    %1288 = vector.broadcast %1287 : f32 to vector<16x16xf32>
    %1289 = arith.mulf %1288, %1282 : vector<16x16xf32>
    %1290 = arith.addf %1273, %1289 : vector<16x16xf32>
    %c102_177 = arith.constant 102 : index
    %1291 = memref.load %arg3[%c102_177] : memref<144xf32, #tpu.memory_space<smem>>
    %1292 = vector.broadcast %1291 : f32 to vector<16x16xf32>
    %1293 = arith.mulf %1292, %1282 : vector<16x16xf32>
    %1294 = arith.addf %1277, %1293 : vector<16x16xf32>
    %c138_178 = arith.constant 138 : index
    %1295 = memref.load %arg3[%c138_178] : memref<144xf32, #tpu.memory_space<smem>>
    %1296 = vector.broadcast %1295 : f32 to vector<16x16xf32>
    %1297 = arith.mulf %1296, %1282 : vector<16x16xf32>
    %1298 = arith.addf %1281, %1297 : vector<16x16xf32>
    %1299 = vector.extract_strided_slice %767 {offsets = [1, 1], sizes = [16, 16], strides = [1, 1]} : vector<18x18xf32> to vector<16x16xf32>
    %c31_179 = arith.constant 31 : index
    %1300 = memref.load %arg3[%c31_179] : memref<144xf32, #tpu.memory_space<smem>>
    %1301 = vector.broadcast %1300 : f32 to vector<16x16xf32>
    %1302 = arith.mulf %1301, %1299 : vector<16x16xf32>
    %1303 = arith.addf %1286, %1302 : vector<16x16xf32>
    %c67_180 = arith.constant 67 : index
    %1304 = memref.load %arg3[%c67_180] : memref<144xf32, #tpu.memory_space<smem>>
    %1305 = vector.broadcast %1304 : f32 to vector<16x16xf32>
    %1306 = arith.mulf %1305, %1299 : vector<16x16xf32>
    %1307 = arith.addf %1290, %1306 : vector<16x16xf32>
    %c103_181 = arith.constant 103 : index
    %1308 = memref.load %arg3[%c103_181] : memref<144xf32, #tpu.memory_space<smem>>
    %1309 = vector.broadcast %1308 : f32 to vector<16x16xf32>
    %1310 = arith.mulf %1309, %1299 : vector<16x16xf32>
    %1311 = arith.addf %1294, %1310 : vector<16x16xf32>
    %c139_182 = arith.constant 139 : index
    %1312 = memref.load %arg3[%c139_182] : memref<144xf32, #tpu.memory_space<smem>>
    %1313 = vector.broadcast %1312 : f32 to vector<16x16xf32>
    %1314 = arith.mulf %1313, %1299 : vector<16x16xf32>
    %1315 = arith.addf %1298, %1314 : vector<16x16xf32>
    %1316 = vector.extract_strided_slice %767 {offsets = [1, 2], sizes = [16, 16], strides = [1, 1]} : vector<18x18xf32> to vector<16x16xf32>
    %c32_183 = arith.constant 32 : index
    %1317 = memref.load %arg3[%c32_183] : memref<144xf32, #tpu.memory_space<smem>>
    %1318 = vector.broadcast %1317 : f32 to vector<16x16xf32>
    %1319 = arith.mulf %1318, %1316 : vector<16x16xf32>
    %1320 = arith.addf %1303, %1319 : vector<16x16xf32>
    %c68_184 = arith.constant 68 : index
    %1321 = memref.load %arg3[%c68_184] : memref<144xf32, #tpu.memory_space<smem>>
    %1322 = vector.broadcast %1321 : f32 to vector<16x16xf32>
    %1323 = arith.mulf %1322, %1316 : vector<16x16xf32>
    %1324 = arith.addf %1307, %1323 : vector<16x16xf32>
    %c104_185 = arith.constant 104 : index
    %1325 = memref.load %arg3[%c104_185] : memref<144xf32, #tpu.memory_space<smem>>
    %1326 = vector.broadcast %1325 : f32 to vector<16x16xf32>
    %1327 = arith.mulf %1326, %1316 : vector<16x16xf32>
    %1328 = arith.addf %1311, %1327 : vector<16x16xf32>
    %c140_186 = arith.constant 140 : index
    %1329 = memref.load %arg3[%c140_186] : memref<144xf32, #tpu.memory_space<smem>>
    %1330 = vector.broadcast %1329 : f32 to vector<16x16xf32>
    %1331 = arith.mulf %1330, %1316 : vector<16x16xf32>
    %1332 = arith.addf %1315, %1331 : vector<16x16xf32>
    %1333 = vector.extract_strided_slice %767 {offsets = [2, 0], sizes = [16, 16], strides = [1, 1]} : vector<18x18xf32> to vector<16x16xf32>
    %c33_187 = arith.constant 33 : index
    %1334 = memref.load %arg3[%c33_187] : memref<144xf32, #tpu.memory_space<smem>>
    %1335 = vector.broadcast %1334 : f32 to vector<16x16xf32>
    %1336 = arith.mulf %1335, %1333 : vector<16x16xf32>
    %1337 = arith.addf %1320, %1336 : vector<16x16xf32>
    %c69_188 = arith.constant 69 : index
    %1338 = memref.load %arg3[%c69_188] : memref<144xf32, #tpu.memory_space<smem>>
    %1339 = vector.broadcast %1338 : f32 to vector<16x16xf32>
    %1340 = arith.mulf %1339, %1333 : vector<16x16xf32>
    %1341 = arith.addf %1324, %1340 : vector<16x16xf32>
    %c105_189 = arith.constant 105 : index
    %1342 = memref.load %arg3[%c105_189] : memref<144xf32, #tpu.memory_space<smem>>
    %1343 = vector.broadcast %1342 : f32 to vector<16x16xf32>
    %1344 = arith.mulf %1343, %1333 : vector<16x16xf32>
    %1345 = arith.addf %1328, %1344 : vector<16x16xf32>
    %c141_190 = arith.constant 141 : index
    %1346 = memref.load %arg3[%c141_190] : memref<144xf32, #tpu.memory_space<smem>>
    %1347 = vector.broadcast %1346 : f32 to vector<16x16xf32>
    %1348 = arith.mulf %1347, %1333 : vector<16x16xf32>
    %1349 = arith.addf %1332, %1348 : vector<16x16xf32>
    %1350 = vector.extract_strided_slice %767 {offsets = [2, 1], sizes = [16, 16], strides = [1, 1]} : vector<18x18xf32> to vector<16x16xf32>
    %c34_191 = arith.constant 34 : index
    %1351 = memref.load %arg3[%c34_191] : memref<144xf32, #tpu.memory_space<smem>>
    %1352 = vector.broadcast %1351 : f32 to vector<16x16xf32>
    %1353 = arith.mulf %1352, %1350 : vector<16x16xf32>
    %1354 = arith.addf %1337, %1353 : vector<16x16xf32>
    %c70_192 = arith.constant 70 : index
    %1355 = memref.load %arg3[%c70_192] : memref<144xf32, #tpu.memory_space<smem>>
    %1356 = vector.broadcast %1355 : f32 to vector<16x16xf32>
    %1357 = arith.mulf %1356, %1350 : vector<16x16xf32>
    %1358 = arith.addf %1341, %1357 : vector<16x16xf32>
    %c106_193 = arith.constant 106 : index
    %1359 = memref.load %arg3[%c106_193] : memref<144xf32, #tpu.memory_space<smem>>
    %1360 = vector.broadcast %1359 : f32 to vector<16x16xf32>
    %1361 = arith.mulf %1360, %1350 : vector<16x16xf32>
    %1362 = arith.addf %1345, %1361 : vector<16x16xf32>
    %c142_194 = arith.constant 142 : index
    %1363 = memref.load %arg3[%c142_194] : memref<144xf32, #tpu.memory_space<smem>>
    %1364 = vector.broadcast %1363 : f32 to vector<16x16xf32>
    %1365 = arith.mulf %1364, %1350 : vector<16x16xf32>
    %1366 = arith.addf %1349, %1365 : vector<16x16xf32>
    %1367 = vector.extract_strided_slice %767 {offsets = [2, 2], sizes = [16, 16], strides = [1, 1]} : vector<18x18xf32> to vector<16x16xf32>
    %c35_195 = arith.constant 35 : index
    %1368 = memref.load %arg3[%c35_195] : memref<144xf32, #tpu.memory_space<smem>>
    %1369 = vector.broadcast %1368 : f32 to vector<16x16xf32>
    %1370 = arith.mulf %1369, %1367 : vector<16x16xf32>
    %1371 = arith.addf %1354, %1370 : vector<16x16xf32>
    %c71_196 = arith.constant 71 : index
    %1372 = memref.load %arg3[%c71_196] : memref<144xf32, #tpu.memory_space<smem>>
    %1373 = vector.broadcast %1372 : f32 to vector<16x16xf32>
    %1374 = arith.mulf %1373, %1367 : vector<16x16xf32>
    %1375 = arith.addf %1358, %1374 : vector<16x16xf32>
    %c107_197 = arith.constant 107 : index
    %1376 = memref.load %arg3[%c107_197] : memref<144xf32, #tpu.memory_space<smem>>
    %1377 = vector.broadcast %1376 : f32 to vector<16x16xf32>
    %1378 = arith.mulf %1377, %1367 : vector<16x16xf32>
    %1379 = arith.addf %1362, %1378 : vector<16x16xf32>
    %c143_198 = arith.constant 143 : index
    %1380 = memref.load %arg3[%c143_198] : memref<144xf32, #tpu.memory_space<smem>>
    %1381 = vector.broadcast %1380 : f32 to vector<16x16xf32>
    %1382 = arith.mulf %1381, %1367 : vector<16x16xf32>
    %1383 = arith.addf %1366, %1382 : vector<16x16xf32>
    %cst_199 = arith.constant dense<0.000000e+00> : vector<16xf32>
    %1384 = vector.multi_reduction <add>, %1371, %cst_199 [1] : vector<16x16xf32> to vector<16xf32>
    %1385 = vector.shape_cast %1384 : vector<16xf32> to vector<16x1xf32>
    %cst_200 = arith.constant dense<0.000000e+00> : vector<1xf32>
    %1386 = vector.multi_reduction <add>, %1385, %cst_200 [0] : vector<16x1xf32> to vector<1xf32>
    %1387 = vector.shape_cast %1386 : vector<1xf32> to vector<1x1xf32>
    %1388 = arith.mulf %1371, %1371 : vector<16x16xf32>
    %cst_201 = arith.constant dense<0.000000e+00> : vector<16xf32>
    %1389 = vector.multi_reduction <add>, %1388, %cst_201 [1] : vector<16x16xf32> to vector<16xf32>
    %1390 = vector.shape_cast %1389 : vector<16xf32> to vector<16x1xf32>
    %cst_202 = arith.constant dense<0.000000e+00> : vector<1xf32>
    %1391 = vector.multi_reduction <add>, %1390, %cst_202 [0] : vector<16x1xf32> to vector<1xf32>
    %1392 = vector.shape_cast %1391 : vector<1xf32> to vector<1x1xf32>
    %cst_203 = arith.constant 3.906250e-03 : f32
    %1393 = vector.broadcast %cst_203 : f32 to vector<1x1xf32>
    %1394 = arith.mulf %1387, %1393 : vector<1x1xf32>
    %cst_204 = arith.constant 3.906250e-03 : f32
    %1395 = vector.broadcast %cst_204 : f32 to vector<1x1xf32>
    %1396 = arith.mulf %1392, %1395 : vector<1x1xf32>
    %1397 = arith.mulf %1394, %1394 : vector<1x1xf32>
    %1398 = arith.subf %1396, %1397 : vector<1x1xf32>
    %1399 = vector.broadcast %1394 : vector<1x1xf32> to vector<16x16xf32>
    %1400 = arith.subf %1371, %1399 : vector<16x16xf32>
    %cst_205 = arith.constant 9.99999974E-6 : f32
    %1401 = vector.broadcast %cst_205 : f32 to vector<1x1xf32>
    %1402 = arith.addf %1398, %1401 : vector<1x1xf32>
    %1403 = math.rsqrt %1402 : vector<1x1xf32>
    %1404 = vector.broadcast %1403 : vector<1x1xf32> to vector<16x16xf32>
    %1405 = arith.mulf %1400, %1404 : vector<16x16xf32>
    %1406 = arith.addf %1, %1405 : vector<16x16xf32>
    %c0_206 = arith.constant 0 : index
    %c0_207 = arith.constant 0 : index
    %c0_208 = arith.constant 0 : index
    %c0_209 = arith.constant 0 : index
    %1407 = vector.load %arg4[%c0_206, %c0_207, %c0_208, %c0_209] : memref<1x4x16x16xf32, #tpu.memory_space<vmem>>, vector<1x1x16x16xf32>
    %1408 = vector.shape_cast %1407 : vector<1x1x16x16xf32> to vector<16x16xf32>
    %1409 = vector.shape_cast %1406 : vector<16x16xf32> to vector<1x1x16x16xf32>
    tpu.vector_store %arg4[%c0_206, %c0_207, %c0_208, %c0_209], %1409 {strides = array<i32>} : memref<1x4x16x16xf32, #tpu.memory_space<vmem>>, vector<1x1x16x16xf32>,
    %cst_210 = arith.constant dense<0.000000e+00> : vector<16xf32>
    %1410 = vector.multi_reduction <add>, %1375, %cst_210 [1] : vector<16x16xf32> to vector<16xf32>
    %1411 = vector.shape_cast %1410 : vector<16xf32> to vector<16x1xf32>
    %cst_211 = arith.constant dense<0.000000e+00> : vector<1xf32>
    %1412 = vector.multi_reduction <add>, %1411, %cst_211 [0] : vector<16x1xf32> to vector<1xf32>
    %1413 = vector.shape_cast %1412 : vector<1xf32> to vector<1x1xf32>
    %1414 = arith.mulf %1375, %1375 : vector<16x16xf32>
    %cst_212 = arith.constant dense<0.000000e+00> : vector<16xf32>
    %1415 = vector.multi_reduction <add>, %1414, %cst_212 [1] : vector<16x16xf32> to vector<16xf32>
    %1416 = vector.shape_cast %1415 : vector<16xf32> to vector<16x1xf32>
    %cst_213 = arith.constant dense<0.000000e+00> : vector<1xf32>
    %1417 = vector.multi_reduction <add>, %1416, %cst_213 [0] : vector<16x1xf32> to vector<1xf32>
    %1418 = vector.shape_cast %1417 : vector<1xf32> to vector<1x1xf32>
    %cst_214 = arith.constant 3.906250e-03 : f32
    %1419 = vector.broadcast %cst_214 : f32 to vector<1x1xf32>
    %1420 = arith.mulf %1413, %1419 : vector<1x1xf32>
    %cst_215 = arith.constant 3.906250e-03 : f32
    %1421 = vector.broadcast %cst_215 : f32 to vector<1x1xf32>
    %1422 = arith.mulf %1418, %1421 : vector<1x1xf32>
    %1423 = arith.mulf %1420, %1420 : vector<1x1xf32>
    %1424 = arith.subf %1422, %1423 : vector<1x1xf32>
    %1425 = vector.broadcast %1420 : vector<1x1xf32> to vector<16x16xf32>
    %1426 = arith.subf %1375, %1425 : vector<16x16xf32>
    %cst_216 = arith.constant 9.99999974E-6 : f32
    %1427 = vector.broadcast %cst_216 : f32 to vector<1x1xf32>
    %1428 = arith.addf %1424, %1427 : vector<1x1xf32>
    %1429 = math.rsqrt %1428 : vector<1x1xf32>
    %1430 = vector.broadcast %1429 : vector<1x1xf32> to vector<16x16xf32>
    %1431 = arith.mulf %1426, %1430 : vector<16x16xf32>
    %1432 = arith.addf %3, %1431 : vector<16x16xf32>
    %c0_217 = arith.constant 0 : index
    %c1_218 = arith.constant 1 : index
    %c0_219 = arith.constant 0 : index
    %c0_220 = arith.constant 0 : index
    %1433 = vector.load %arg4[%c0_217, %c1_218, %c0_219, %c0_220] : memref<1x4x16x16xf32, #tpu.memory_space<vmem>>, vector<1x1x16x16xf32>
    %1434 = vector.shape_cast %1433 : vector<1x1x16x16xf32> to vector<16x16xf32>
    %1435 = vector.shape_cast %1432 : vector<16x16xf32> to vector<1x1x16x16xf32>
    tpu.vector_store %arg4[%c0_217, %c1_218, %c0_219, %c0_220], %1435 {strides = array<i32>} : memref<1x4x16x16xf32, #tpu.memory_space<vmem>>, vector<1x1x16x16xf32>,
    %cst_221 = arith.constant dense<0.000000e+00> : vector<16xf32>
    %1436 = vector.multi_reduction <add>, %1379, %cst_221 [1] : vector<16x16xf32> to vector<16xf32>
    %1437 = vector.shape_cast %1436 : vector<16xf32> to vector<16x1xf32>
    %cst_222 = arith.constant dense<0.000000e+00> : vector<1xf32>
    %1438 = vector.multi_reduction <add>, %1437, %cst_222 [0] : vector<16x1xf32> to vector<1xf32>
    %1439 = vector.shape_cast %1438 : vector<1xf32> to vector<1x1xf32>
    %1440 = arith.mulf %1379, %1379 : vector<16x16xf32>
    %cst_223 = arith.constant dense<0.000000e+00> : vector<16xf32>
    %1441 = vector.multi_reduction <add>, %1440, %cst_223 [1] : vector<16x16xf32> to vector<16xf32>
    %1442 = vector.shape_cast %1441 : vector<16xf32> to vector<16x1xf32>
    %cst_224 = arith.constant dense<0.000000e+00> : vector<1xf32>
    %1443 = vector.multi_reduction <add>, %1442, %cst_224 [0] : vector<16x1xf32> to vector<1xf32>
    %1444 = vector.shape_cast %1443 : vector<1xf32> to vector<1x1xf32>
    %cst_225 = arith.constant 3.906250e-03 : f32
    %1445 = vector.broadcast %cst_225 : f32 to vector<1x1xf32>
    %1446 = arith.mulf %1439, %1445 : vector<1x1xf32>
    %cst_226 = arith.constant 3.906250e-03 : f32
    %1447 = vector.broadcast %cst_226 : f32 to vector<1x1xf32>
    %1448 = arith.mulf %1444, %1447 : vector<1x1xf32>
    %1449 = arith.mulf %1446, %1446 : vector<1x1xf32>
    %1450 = arith.subf %1448, %1449 : vector<1x1xf32>
    %1451 = vector.broadcast %1446 : vector<1x1xf32> to vector<16x16xf32>
    %1452 = arith.subf %1379, %1451 : vector<16x16xf32>
    %cst_227 = arith.constant 9.99999974E-6 : f32
    %1453 = vector.broadcast %cst_227 : f32 to vector<1x1xf32>
    %1454 = arith.addf %1450, %1453 : vector<1x1xf32>
    %1455 = math.rsqrt %1454 : vector<1x1xf32>
    %1456 = vector.broadcast %1455 : vector<1x1xf32> to vector<16x16xf32>
    %1457 = arith.mulf %1452, %1456 : vector<16x16xf32>
    %1458 = arith.addf %5, %1457 : vector<16x16xf32>
    %c0_228 = arith.constant 0 : index
    %c2_229 = arith.constant 2 : index
    %c0_230 = arith.constant 0 : index
    %c0_231 = arith.constant 0 : index
    %1459 = vector.load %arg4[%c0_228, %c2_229, %c0_230, %c0_231] : memref<1x4x16x16xf32, #tpu.memory_space<vmem>>, vector<1x1x16x16xf32>
    %1460 = vector.shape_cast %1459 : vector<1x1x16x16xf32> to vector<16x16xf32>
    %1461 = vector.shape_cast %1458 : vector<16x16xf32> to vector<1x1x16x16xf32>
    tpu.vector_store %arg4[%c0_228, %c2_229, %c0_230, %c0_231], %1461 {strides = array<i32>} : memref<1x4x16x16xf32, #tpu.memory_space<vmem>>, vector<1x1x16x16xf32>,
    %cst_232 = arith.constant dense<0.000000e+00> : vector<16xf32>
    %1462 = vector.multi_reduction <add>, %1383, %cst_232 [1] : vector<16x16xf32> to vector<16xf32>
    %1463 = vector.shape_cast %1462 : vector<16xf32> to vector<16x1xf32>
    %cst_233 = arith.constant dense<0.000000e+00> : vector<1xf32>
    %1464 = vector.multi_reduction <add>, %1463, %cst_233 [0] : vector<16x1xf32> to vector<1xf32>
    %1465 = vector.shape_cast %1464 : vector<1xf32> to vector<1x1xf32>
    %1466 = arith.mulf %1383, %1383 : vector<16x16xf32>
    %cst_234 = arith.constant dense<0.000000e+00> : vector<16xf32>
    %1467 = vector.multi_reduction <add>, %1466, %cst_234 [1] : vector<16x16xf32> to vector<16xf32>
    %1468 = vector.shape_cast %1467 : vector<16xf32> to vector<16x1xf32>
    %cst_235 = arith.constant dense<0.000000e+00> : vector<1xf32>
    %1469 = vector.multi_reduction <add>, %1468, %cst_235 [0] : vector<16x1xf32> to vector<1xf32>
    %1470 = vector.shape_cast %1469 : vector<1xf32> to vector<1x1xf32>
    %cst_236 = arith.constant 3.906250e-03 : f32
    %1471 = vector.broadcast %cst_236 : f32 to vector<1x1xf32>
    %1472 = arith.mulf %1465, %1471 : vector<1x1xf32>
    %cst_237 = arith.constant 3.906250e-03 : f32
    %1473 = vector.broadcast %cst_237 : f32 to vector<1x1xf32>
    %1474 = arith.mulf %1470, %1473 : vector<1x1xf32>
    %1475 = arith.mulf %1472, %1472 : vector<1x1xf32>
    %1476 = arith.subf %1474, %1475 : vector<1x1xf32>
    %1477 = vector.broadcast %1472 : vector<1x1xf32> to vector<16x16xf32>
    %1478 = arith.subf %1383, %1477 : vector<16x16xf32>
    %cst_238 = arith.constant 9.99999974E-6 : f32
    %1479 = vector.broadcast %cst_238 : f32 to vector<1x1xf32>
    %1480 = arith.addf %1476, %1479 : vector<1x1xf32>
    %1481 = math.rsqrt %1480 : vector<1x1xf32>
    %1482 = vector.broadcast %1481 : vector<1x1xf32> to vector<16x16xf32>
    %1483 = arith.mulf %1478, %1482 : vector<16x16xf32>
    %1484 = arith.addf %7, %1483 : vector<16x16xf32>
    %c0_239 = arith.constant 0 : index
    %c3_240 = arith.constant 3 : index
    %c0_241 = arith.constant 0 : index
    %c0_242 = arith.constant 0 : index
    %1485 = vector.load %arg4[%c0_239, %c3_240, %c0_241, %c0_242] : memref<1x4x16x16xf32, #tpu.memory_space<vmem>>, vector<1x1x16x16xf32>
    %1486 = vector.shape_cast %1485 : vector<1x1x16x16xf32> to vector<16x16xf32>
    %1487 = vector.shape_cast %1484 : vector<16x16xf32> to vector<1x1x16x16xf32>
    tpu.vector_store %arg4[%c0_239, %c3_240, %c0_241, %c0_242], %1487 {strides = array<i32>} : memref<1x4x16x16xf32, #tpu.memory_space<vmem>>, vector<1x1x16x16xf32>,
    return
  }
  func.func @transform_0(%arg0: i32) -> (i32, i32, i32, i32) {
    %c0_i32 = arith.constant 0 : i32
    %c0_i32_0 = arith.constant 0 : i32
    %c0_i32_1 = arith.constant 0 : i32
    %c0_i32_2 = arith.constant 0 : i32
    return %arg0, %c0_i32, %c0_i32_0, %c0_i32_1 : i32, i32, i32, i32
  }
  func.func @transform_1(%arg0: i32) -> i32 {
    %c0_i32 = arith.constant 0 : i32
    %c0_i32_0 = arith.constant 0 : i32
    return %c0_i32 : i32
  }
  func.func @transform_2(%arg0: i32) -> i32 {
    %c0_i32 = arith.constant 0 : i32
    %c0_i32_0 = arith.constant 0 : i32
    return %c0_i32 : i32
  }
  func.func @transform_3(%arg0: i32) -> (i32, i32, i32, i32) {
    %c0_i32 = arith.constant 0 : i32
    %c0_i32_0 = arith.constant 0 : i32
    %c0_i32_1 = arith.constant 0 : i32
    %c0_i32_2 = arith.constant 0 : i32
    return %arg0, %c0_i32, %c0_i32_0, %c0_i32_1 : i32, i32, i32, i32
  }
}

</mosaic_0001>

<bundles_post_ra>
// kernel: tpu_custom_call.1
= control target key start
LH: loop header
LB: loop body
LE: loop exit
PB: predicated region body
PF: predicated region fallthrough
CT: control target
= control target key end

     0   :  { %s10950_s0 = inlined_call_operand.hbm [shape: f32[2,4,16,16], index: 0, kind: input, shape index: {}]   ;;  %s10951_s1 = inlined_call_operand.hbm [shape: f32[144], index: 1, kind: input, shape index: {}]   ;;  %s10952_s2 = inlined_call_operand.hbm [shape: f32[144], index: 2, kind: input, shape index: {}]   ;;  %s10953_s3 = inlined_call_operand.hbm [shape: f32[2,4,16,16], index: 3, kind: output, shape index: {}]  }
   0x1   :  { %10980 = sst [smem:[#allocation132_spill]] %s10950_s0 }
   0x2   :  { %10981 = sst [smem:[#allocation133_spill]] %s10951_s1 }
   0x3   :  { %10982 = sst [smem:[#allocation134_spill]] %s10952_s2 }
   0x4   :  { %8 = vsyncpa [#allocation3], 0 }
   0x5   :  { %10 = vsyncpa [#allocation3 + $0x1], 0 }
   0x6   :  { %11 = vsyncpa [#allocation5], 0 }
   0x7   :  { %12 = vsyncpa [#allocation8], 0 }
   0x8   :  { %13 = vsyncpa [#allocation4], 0 }
   0x9   :  { %15 = vsyncpa [#allocation4 + $0x1], 0  ;;  %s6500_s12 = smov 0   ;;  %s6502_s13 = smov 0  }
   0xa   :  { %s6504_s14 = smov 0   ;;  %s6506_s15 = smov 0  }
   0xb LB: > { %10983 = sst [smem:[#allocation14_spill]] %s6464_s14  ;;  %s6521_s16 = sadd.s32 4294967295, %s6468_s15   ;;  %s6468_s15 = sphi %s6506_s15, %s11338_s15   ;;  %s6464_s14 = sphi %s6504_s14, %s11335_s14   ;;  %s6460_s13 = sphi %s6502_s13, %s11337_s13   ;;  %s6456_s12 = sphi %s6500_s12, %s11336_s12  }
   0xc   : > { %s5917_s17 = sadd.s32 4294967294, %s6468_s15   ;;  %s6525_s18 = sadd.s32 1, %s6468_s15  }
   0xd   : > { %s28_s19 = sadd.s32 1, %s6464_s14  ;;  %s25_s20 = ssub.s32 %s6468_s15, %s6525_s18 }
   0xe   : > { %p35_p0 = scmp.ne.s32.totalorder %s6464_s14, %s6460_s13  ;;  %p26_p1 = scmp.eq.s32.totalorder %s25_s20, 0 }
   0xf   : > { %p36_p2 = scmp.eq.s32.totalorder %s6468_s15, 0  ;;  %p41_p3 = scmp.ne.s32.totalorder %s6460_s13, %s6456_s12 }
  0x10   : > { %p42_p4 = scmp.eq.s32.totalorder %s6521_s16, 0  ;;  %p107_p7 = scmp.eq.s32.totalorder %s6521_s16, 1 }
  0x11   : > { %s6537_s21 = scalar_select %p26_p1, %s6464_s14, %s28_s19  }
  0x12   : > { %p6539_p5 = por %p36_p2, %p35_p0  ;;  %p6545_p6 = por %p42_p4, %p41_p3 }
  0x13   : > { %10984 = sst [smem:[#allocation15_spill]] %s6537_s21  ;;  %p113_p8 = scmp.eq.s32.totalorder %s5917_s17, 1 }
  0x14   : > { %p5918_p9 = scmp.ge.s32.totalorder %s6468_s15, 1  ;;  %p120_p10 = scmp.lt.s32.totalorder %s6468_s15, 3 }
  0x15   : > { %p6552_p11 = por %p107_p7, %p35_p0  ;;  %p6556_p12 = por %p113_p8, %p41_p3 }
  0x16   : > { %p6560_p13 = pnand %p5918_p9, %p120_p10  ;;  %s10990_s1 = sld [smem:[#allocation133_spill]] }
  0x17   : > { %p6264_p2 = scmp.lt.s32.totalorder %s6468_s15, 2  ;;  %s10991_s2 = sld [smem:[#allocation134_spill]] }
  0x18   : > { %p6247_p1 = pneg %p6560_p13  ;;  %s6470_s7 = smov [#allocation6]  }
  0x19   : > { %p6578_p7 = pnand %p6264_p2, %p6539_p5  ;;  %s153_s8 = sand.u32 1, %s6464_s14  }
  0x1a   : > { %p6248_p3 = pnand %p6247_p1, %p42_p4  ;;  %s6471_s9 = smov [#allocation7]  }
  0x1b   : > { %s5922_s10 = sshll.u32 %s153_s8, 6  ;;  %s6233_s11 = sshll.u32 %s6468_s15, 6 }
  0x1c   : > { %s132_s29 = sshll.u32 %s10990_s1, 4  ;;  %s10993_s0 = sld [smem:[#allocation132_spill]]  ;;  %s133_s29 = int_to_ptr.hbm [resolvable:$true] %s132_s29 }
  0x1d   : > { %s142_s5 = sshll.u32 %s10991_s2, 4  ;;  %s157_s27 = scalar_lea.vmem [#allocation2], %s5922_s10  ;;  %s143_s5 = int_to_ptr.hbm [resolvable:$true] %s142_s5 }
  0x1e   : > { %6250 = dma.hbm_to_smem (!%p6248_p3), %s133_s29, 32, %s6470_s7, [#allocation5]  }
  0x1f   : > { %6253 = dma.hbm_to_smem (!%p6248_p3), %s143_s5, 32, %s6471_s9, [#allocation8]  }
  0x20   : > { %s165_s28 = sshll.u32 %s157_s27, 4  ;;  %s154_s30 = scalar_lea.sflag [#allocation3], %s153_s8  ;;  %s166_s28 = int_to_ptr.vmem [resolvable:$true] %s165_s28 }
  0x21   : > { %p6368_p8 = pneg %p6578_p7 }
  0x22   : > { %s162_s20 = scalar_lea.hbm %s10993_s0, %s6233_s11  ;;  %s6371_s7 = scalar_lea.hbm %s10993_s0, 128 }
  0x23   : > { %s163_s22 = sshll.u32 %s162_s20, 4  ;;  %s164_s22 = int_to_ptr.hbm [resolvable:$true] %s163_s22 }
  0x24   : > { %s6364_s4 = sshra.s32 %s164_s22, 4  ;;  %s6365_s4 = int_to_ptr.hbm [resolvable:$true] %s6364_s4 }
  0x25   : > { %s6366_s1 = scalar_lea.hbm %s6365_s4, 64  ;;  %p6372_p1 = scmp.lt.s32.totalorder %s6365_s4, %s10993_s0 }
  0x26   : > { %p6367_p5 = scmp.ne.s32.totalorder %s6365_s4, %s6366_s1  ;;  %p6373_p2 = scmp.lt.s32.totalorder %s6371_s7, %s6366_s1 }
  0x28   : > { %p6369_p9 = pnand %p6368_p8, %p6367_p5  ;;  %p6374_p3 = por %p6373_p2, %p6372_p1 }
  0x2a   : > { %p6370_p10 = pneg %p6369_p9 }
  0x2c   : > { %p6375_p0 = pnand %p6374_p3, %p6370_p10 }
  0x2e   : > { %6378 = shalt.err (!%p6375_p0)
}
  0x2f   : > { %s6472_s8 = smov 128   ;;  %s6473_s10 = smov 8  }
  0x30   : > { %6257 = dma.hbm_to_vmem [thread:$0]  (!%p6578_p7), %s164_s22, 1024, %s166_s28, %s154_s30, %s6472_s8, %s6472_s8, %s6473_s10  }
  0x31   : > { %177 = sbr.rel (%p6560_p13) target bundleno = 1919 (0x77f), region = 32 }
  0x36   : > { %s6600_s17 = sand.u32 1, %s6460_s13  }
  0x37   : > { %s10954_s19 = sshll.u32 %s6600_s17, 6  ;;  %s180_s1 = scalar_lea.sflag [#allocation3], %s6600_s17 }
  0x38   : > { %s6606_s20 = scalar_lea.vmem [#allocation2], %s10954_s19 }
  0x39   : > { %6439 = dma.done.wait (%p6545_p6), %s180_s1, 1024  }
  0x3a   : > { %6441 = vsyncadd (%p6545_p6), %s180_s1, 4294966272 }
  0x3b   : > { %6443 = dma.done.wait (%p42_p4), [#allocation5], 32  }
  0x3c   : > { %6445 = vsyncadd (%p42_p4), [#allocation5], 4294967264 }
  0x3d   : > { %6447 = dma.done.wait (%p42_p4), [#allocation8], 32  }
  0x3e   : > { %6449 = vsyncadd (%p42_p4), [#allocation8], 4294967264 }
  0x3f   : > { %199 = sfence }
  0x40   : > { %v218_v0 = vld [vmem:[%s6606_s20] sm:$0xff]  ;;  %s10957_s23 = smov 1   ;;  %s10959_s26 = smov 127   ;;  %v219_v1 = vld [vmem:[%s6606_s20 + $0x8] sm:$0xff]  ;;  %v5930_v2 = vld [vmem:[%s6606_s20 + $0x10] sm:$0xff]  ;;  %vm249_vm0 = vcmask 7168  }
  0x41   : > { %237 = vrot.lane.b32.xlu1 %v218_v0, %s10957_s23  ;;  %231 = vrot.lane.b32.xlu0 %v218_v0, %s10959_s26  ;;  %s10955_s6 = smov 3   ;;  %v5931_v3 = vld [vmem:[%s6606_s20 + $0x18] sm:$0xff]  ;;  %v5932_v4 = vld [vmem:[%s6606_s20 + $0x20] sm:$0xff]  ;;  %s6652_s27 = sld [smem:[#allocation6 + $0x25]]  ;;  %vm252_vm1 = vcmask 138240   ;;  %vm259_vm2 = vcmask 1040384  }
  0x42   : > { %243 = vrot.lane.b32.xlu2 %v218_v0, %s10955_s6  ;;  %v5933_v5 = vld [vmem:[%s6606_s20 + $0x28] sm:$0xff]  ;;  %v5934_v6 = vld [vmem:[%s6606_s20 + $0x30] sm:$0xff]  ;;  %v5935_v7 = vld [vmem:[%s6606_s20 + $0x38] sm:$0xff]  ;;  %s6654_s28 = sld [smem:[#allocation6 + $0x1]]  ;;  %s10994_s21 = smov 127   ;;  %vm528_vm3 = vcmask 1046528  }
  0x43   : > { %s6656_s22 = sld [smem:[#allocation6 + $0x49]]  ;;  %vm765_vm4 = vcmask 1045504   ;;  %vm2818_vm5 = vcmask 130048  }
  0x44   : > { %s6658_s30 = sld [smem:[#allocation6 + $0x2]] }
  0x45   : > { %s6660_s4 = sld [smem:[#allocation6 + $0x6d]] }
  0x46   : > { %s6662_s29 = sld [smem:[#allocation6 + $0x26]] }
  0x47   : > { %s6664_s5 = sld [smem:[#allocation6 + $0x6e]]  ;;  %v423_v15 = vstv %s6652_s27 }
  0x48   : > { %s6666_s7 = sld [smem:[#allocation6 + $0x4a]]  ;;  %v409_v16 = vstv %s6654_s28 }
  0x49   : > { %239 = vrot.lane.b32.xlu1 %v219_v1, %s10957_s23  ;;  %233 = vrot.lane.b32.xlu0 %v219_v1, %s10959_s26  ;;  %s6669_s9 = sld [smem:[#allocation6 + $0x4]]  ;;  %v437_v27 = vstv %s6656_s22 }
  0x4a   : > { %245 = vrot.lane.b32.xlu2 %v219_v1, %s10955_s6  ;;  %s6672_s11 = sld [smem:[#allocation6 + $0x4c]]  ;;  %v465_v31 = vstv %s6658_s30 }
  0x4b   : > { %s6676_s8 = sld [smem:[#allocation6 + $0x28]]  ;;  %v451_v32 = vstv %s6660_s4 }
  0x4c   : > { %s6678_s10 = sld [smem:[#allocation6 + $0x70]]  ;;  %v479_v33 = vstv %s6662_s29 }
  0x4d   : > { %s6683_s1 = sld [smem:[#allocation6 + $0x29]]  ;;  %v507_v34 = vstv %s6664_s5 }
  0x4e   : > { %s6687_s19 = sld [smem:[#allocation6 + $0x5]]  ;;  %v493_v35 = vstv %s6666_s7 }
  0x4f   : > { %s6693_s27 = sld [smem:[#allocation6 + $0x71]]  ;;  %v590_v36 = vstv %s6669_s9 }
  0x50   : > { %s6696_s28 = sld [smem:[#allocation6 + $0x2b]]  ;;  %v6726_v37 = vstv %s6672_s11 }
  0x51   : > { %272 = vrot.lane.b32.xlu0 %v5930_v2, %s10959_s26  ;;  %274 = vrot.lane.b32.xlu1 %v5931_v3, %s10959_s26  ;;  %s6701_s0 = sld [smem:[#allocation6 + $0x4f]]  ;;  %v6729_v38 = vstv %s6676_s8 }
  0x52   : > { %278 = vrot.lane.b32.xlu2 %v5930_v2, %s10957_s23  ;;  %s5969_s2 = sld [smem:[#allocation6 + $0x50]]  ;;  %v6732_v39 = vstv %s6678_s10 }
  0x53   : > { %s6716_s22 = sld [smem:[#allocation6 + $0x2c]]  ;;  %v6735_v40 = vstv %s6683_s1 }
  0x54   : > { %s6722_s14 = sld [smem:[#allocation6 + $0x74]]  ;;  %v6738_v41 = vstv %s6687_s19 }
  0x55   : > { %v6744_v43 = vstv %s6693_s27  ;;  %s6913_s19 = sld [smem:[#allocation6 + $0x6f]] }
  0x56   : > { %v6747_v44 = vstv %s6696_s28  ;;  %s7019_s30 = sld [smem:[#allocation6 + $0x72]] }
  0x57   : > { %v6753_v47 = vstv %s6701_s0  ;;  %s6477_s0 = smov 126   ;;  %s7041_s4 = sld [smem:[#allocation6 + $0x4e]] }
  0x58   : > { %v6758_v49 = vstv %s5969_s2  ;;  %s6892_s2 = sld [smem:[#allocation6 + $0x3]] }
  0x59   : > { %280 = vrot.lane.b32.xlu0 %v5931_v3, %s10957_s23  ;;  %284 = vrot.lane.b32.xlu1 %v5930_v2, %s10955_s6  ;;  %v6792_v61 = vstv %s6716_s22  ;;  %s7076_s29 = sld [smem:[#allocation6 + $0x4d]] }
  0x5a   : > { %286 = vrot.lane.b32.xlu2 %v5931_v3, %s10955_s6  ;;  %v6805_v1 = vstv %s6722_s14  ;;  %s6904_s14 = sld [smem:[#allocation6 + $0x4b]] }
  0x5b   : > { %s7208_s5 = sld [smem:[#allocation6]] }
  0x5c   : > { %s7221_s7 = sld [smem:[#allocation6 + $0x2e]] }
  0x5d   : > { %s7224_s9 = sld [smem:[#allocation6 + $0xa]] }
  0x5e   : > { %s7227_s11 = sld [smem:[#allocation6 + $0x24]] }
  0x5f   : > { %s7239_s8 = sld [smem:[#allocation6 + $0x52]] }
  0x60   : > { %s7252_s10 = sld [smem:[#allocation6 + $0x6c]] }
  0x61   : > { %310 = vrot.lane.b32.xlu0 %v5932_v4, %s10959_s26  ;;  %312 = vrot.lane.b32.xlu1 %v5933_v5, %s10959_s26  ;;  %s7271_s1 = sld [smem:[#allocation6 + $0x48]] }
  0x62   : > { %316 = vrot.lane.b32.xlu2 %v5932_v4, %s10957_s23  ;;  %s7274_s27 = sld [smem:[#allocation6 + $0xb]] }
  0x63   : > { %s7276_s28 = sld [smem:[#allocation6 + $0x76]] }
  0x64   : > { %s7289_s22 = sld [smem:[#allocation6 + $0x2f]] }
  0x69   : > { %318 = vrot.lane.b32.xlu0 %v5933_v5, %s10957_s23  ;;  %322 = vrot.lane.b32.xlu1 %v5932_v4, %s10955_s6 }
  0x6a   : > { %324 = vrot.lane.b32.xlu2 %v5933_v5, %s10955_s6 }
  0x71   : > { %348 = vrot.lane.b32.xlu0 %v5934_v6, %s10959_s26  ;;  %350 = vrot.lane.b32.xlu1 %v5935_v7, %s10959_s26 }
  0x72   : > { %354 = vrot.lane.b32.xlu2 %v5934_v6, %s10957_s23 }
  0x79   : > { %356 = vrot.lane.b32.xlu0 %v5935_v7, %s10957_s23  ;;  %360 = vrot.lane.b32.xlu1 %v5934_v6, %s10955_s6  ;;  %s6699_s23 = sld [smem:[#allocation6 + $0x73]] }
  0x7a   : > { %362 = vrot.lane.b32.xlu2 %v5935_v7, %s10955_s6  ;;  %s6689_s6 = sld [smem:[#allocation6 + $0x7]] }
  0x7f   : > { %v6750_v45 = vstv %s6699_s23  ;;  %s6941_s23 = sld [smem:[#allocation6 + $0x27]] }
  0x80   : > { %v6741_v42 = vstv %s6689_s6  ;;  %s6986_s6 = sld [smem:[#allocation6 + $0x2a]] }
  0x9c   : > { %v244_v8 = vpop.permute.xlu2 %243 }
  0xa4   : > { %v246_v20 = vpop.permute.xlu2 %245 }
  0xb3   : > { %v238_v9 = vpop.permute.xlu1 %237  ;;  %v232_v10 = vpop.permute.xlu0 %231 }
  0xb4   : > { %v250_v11 = vsel %vm249_vm0, %v232_v10, %v238_v9 }
  0xb5   : > { %v253_v12 = vsel %vm252_vm1, %v250_v11, %v244_v8 }
  0xb6   : > { %v256_v13 = vrot.slane %v253_v12, 1  ;;  %v260_v14 = vrot.slane %v253_v12, 7 }
  0xb8   : > { %v6681_v17 = vsel %vm259_vm2, %v256_v13, %v260_v14 }
  0xb9   : > { %v424_v18 = vmul.f32 %v423_v15, %v6681_v17  ;;  %v410_v19 = vmul.f32 %v409_v16, %v6681_v17  ;;  %v466_v50 = vmul.f32 %v465_v31, %v6681_v17  ;;  %v452_v51 = vmul.f32 %v451_v32, %v6681_v17 }
  0xba   : > { %v828_v52 = vmul.f32 %v6741_v42, %v6681_v17  ;;  %v738_v53 = vmul.f32 %v6744_v43, %v6681_v17  ;;  %v438_v54 = vmul.f32 %v437_v27, %v6681_v17  ;;  %v6768_v55 = vmul.f32 %v507_v34, %v6681_v17 }
  0xbb   : > { %v240_v21 = vpop.permute.xlu1 %239  ;;  %428 = vrot.lane.b32.xlu2 %v424_v18, %s10959_s26  ;;  %414 = vrot.lane.b32.xlu0 %v410_v19, %s10959_s26  ;;  %v234_v22 = vpop.permute.xlu0 %233  ;;  %s6703_s26 = sld [smem:[#allocation6 + $0x8]]  ;;  %v6772_v56 = vmul.f32 %v6726_v37, %v6681_v17  ;;  %v6776_v57 = vmul.f32 %v6729_v38, %v6681_v17  ;;  %v6781_v58 = vmul.f32 %v493_v35, %v6681_v17 }
  0xbc   : > { %v251_v23 = vsel %vm249_vm0, %v234_v22, %v240_v21  ;;  %v6799_v63 = vmul.f32 %v479_v33, %v6681_v17  ;;  %v6802_v0 = vmul.f32 %v590_v36, %v6681_v17  ;;  %v834_v2 = vrot.slane %v828_v52, 2 }
  0xbd   : > { %v254_v24 = vsel %vm252_vm1, %v251_v23, %v246_v20  ;;  %v744_v4 = vrot.slane %v738_v53, 1  ;;  %v639_v6 = vrot.slane %v6772_v56, 1  ;;  %v618_v7 = vrot.slane %v6776_v57, 1 }
  0xbe   : > { %v261_v25 = vrot.slane %v254_v24, 7  ;;  %v266_v46 = vrot.slane %v254_v24, 5  ;;  %v891_v9 = vmul.f32 %v6750_v45, %v6681_v17  ;;  %v597_v18 = vrot.slane %v6802_v0, 1 }
  0xbf   : > { %v870_v22 = vmul.f32 %v6753_v47, %v6681_v17 }
  0xc0   : > { %v6706_v26 = vsel %vm259_vm2, %v260_v14, %v261_v25  ;;  %v6795_v62 = vsel %vm259_vm2, %v261_v25, %v266_v46 }
  0xc1   : > { %v439_v28 = vmul.f32 %v437_v27, %v6706_v26  ;;  %v425_v29 = vmul.f32 %v423_v15, %v6706_v26  ;;  %v411_v30 = vmul.f32 %v409_v16, %v6706_v26  ;;  %v6756_v48 = vstv %s6703_s26  ;;  %s6977_s26 = sld [smem:[#allocation6 + $0x6]] }
  0xc2   : > { %v6785_v59 = vmul.f32 %v6741_v42, %v6706_v26  ;;  %v6789_v60 = vmul.f32 %v6744_v43, %v6706_v26  ;;  %v6813_v8 = vmul.f32 %v6747_v44, %v6706_v26  ;;  %v6818_v10 = vmul.f32 %v590_v36, %v6706_v26 }
  0xc3   : > { %444 = vrot.lane.b32.xlu2 %v439_v28, %s10994_s21  ;;  %430 = vrot.lane.b32.xlu0 %v425_v29, %s10994_s21  ;;  %v6821_v11 = vmul.f32 %v590_v36, %v6795_v62  ;;  %v481_v14 = vmul.f32 %v479_v33, %v6706_v26  ;;  %v467_v15 = vmul.f32 %v465_v31, %v6706_v26  ;;  %v876_v33 = vrot.slane %v870_v22, 2 }
  0xc4   : > { %416 = vrot.lane.b32.xlu1 %v411_v30, %s10994_s21  ;;  %v10963_v3 = vrot.slane %v6785_v59, 2  ;;  %v10962_v5 = vrot.slane %v6789_v60, 1  ;;  %v453_v16 = vmul.f32 %v451_v32, %v6706_v26  ;;  %v6838_v19 = vmul.f32 %v507_v34, %v6706_v26 }
  0xc5   : > { %v6841_v20 = vmul.f32 %v493_v35, %v6706_v26  ;;  %v892_v21 = vmul.f32 %v6750_v45, %v6706_v26  ;;  %v6849_v23 = vmul.f32 %v6726_v37, %v6706_v26  ;;  %v10964_v24 = vrot.slane %v6813_v8, 2 }
  0xc6   : > { %v6826_v12 = vsel %vm765_vm4, %v834_v2, %v10963_v3  ;;  %v6831_v13 = vsel %vm528_vm3, %v744_v4, %v10962_v5  ;;  %v871_v25 = vmul.f32 %v6753_v47, %v6706_v26  ;;  %v849_v27 = vmul.f32 %v6747_v44, %v6681_v17 }
  0xc7   : > { %v598_v28 = vrot.slane %v6818_v10, 1  ;;  %v600_v29 = vrot.slane %v6821_v11, 1  ;;  %v897_v30 = vrot.slane %v891_v9, 2  ;;  %v898_v31 = vrot.slane %v892_v21, 2 }
  0xc8   : > { %v6863_v32 = vmul.f32 %v6729_v38, %v6706_v26  ;;  %v877_v34 = vrot.slane %v871_v25, 2  ;;  %v855_v35 = vrot.slane %v849_v27, 2  ;;  %v913_v46 = vmul.f32 %v6756_v48, %v6706_v26 }
  0xc9   : > { %v6866_v36 = vsel %vm765_vm4, %v897_v30, %v898_v31  ;;  %v954_v2 = vmul.f32 %v6758_v49, %v6681_v17  ;;  %v934_v21 = vmul.f32 %v6792_v61, %v6706_v26  ;;  %v912_v30 = vmul.f32 %v6756_v48, %v6681_v17 }
  0xca   : > { %v6875_v52 = vsel %vm765_vm4, %v876_v33, %v877_v34  ;;  %v6880_v53 = vsel %vm765_vm4, %v855_v35, %v10964_v24  ;;  %v919_v4 = vrot.slane %v913_v46, 2  ;;  %v6908_v33 = vmul.f32 %v6732_v39, %v6706_v26 }
  0xcb   : > { %470 = vrot.lane.b32.xlu2 %v466_v50, %s6477_s0  ;;  %456 = vrot.lane.b32.xlu0 %v452_v51, %s10994_s21  ;;  %v914_v50 = vmul.f32 %v6756_v48, %v6795_v62  ;;  %v893_v51 = vmul.f32 %v6750_v45, %v6795_v62  ;;  %v955_v45 = vmul.f32 %v6758_v49, %v6706_v26 }
  0xcc   : > { %442 = vrot.lane.b32.xlu1 %v438_v54, %s10994_s21  ;;  %v872_v54 = vmul.f32 %v6753_v47, %v6795_v62  ;;  %v6894_v47 = vpop.permute.xlu2 %278 }
  0xcd   : > { %v921_v9 = vrot.slane %v914_v50, 2  ;;  %v900_v11 = vrot.slane %v893_v51, 2  ;;  %v961_v27 = vrot.slane %v955_v45, 2  ;;  %v940_v50 = vrot.slane %v934_v21, 2 }
  0xce   : > { %v976_v51 = vmul.f32 %v6805_v1, %v6706_v26  ;;  %v6955_v21 = vmul.f32 %v6729_v38, %v6795_v62 }
  0xcf   : > { %v6897_v22 = vsel %vm765_vm4, %v919_v4, %v921_v9  ;;  %v6900_v25 = vsel %vm765_vm4, %v898_v31, %v900_v11  ;;  %v918_v31 = vrot.slane %v912_v30, 2  ;;  %v656_v9 = vmul.f32 %v6732_v39, %v6795_v62 }
  0xd0   : > { %v982_v45 = vrot.slane %v976_v51, 2  ;;  %v599_v51 = vsel %vm528_vm3, %v597_v18, %v598_v28  ;;  %v621_v18 = vrot.slane %v6955_v21, 1 }
  0xd1   : > { %v6939_v11 = vsel %vm765_vm4, %v918_v31, %v919_v4  ;;  %v601_v4 = vsel %vm528_vm3, %v598_v28, %v600_v29  ;;  %v521_v31 = vstv %s6892_s2  ;;  %v7034_v28 = vmul.f32 %v6735_v40, %v6706_v26  ;;  %s7312_s2 = sld [smem:[#allocation6 + $0x77]] }
  0xd2   : > { %v523_v29 = vmul.f32 %v521_v31, %v6706_v26  ;;  %v522_v3 = vmul.f32 %v521_v31, %v6681_v17 }
  0xd3   : > { %486 = vrot.lane.b32.xlu2 %v481_v14, %s6477_s0  ;;  %472 = vrot.lane.b32.xlu0 %v467_v15, %s6477_s0  ;;  %v879_v14 = vrot.slane %v872_v54, 2  ;;  %v960_v15 = vrot.slane %v954_v2, 2  ;;  %v640_v54 = vrot.slane %v6849_v23, 1  ;;  %v935_v2 = vmul.f32 %v6792_v61, %v6795_v62 }
  0xd4   : > { %458 = vrot.lane.b32.xlu1 %v453_v16, %s10994_s21  ;;  %v933_v16 = vmul.f32 %v6792_v61, %v6681_v17  ;;  %v975_v61 = vmul.f32 %v6805_v1, %v6681_v17 }
  0xd5   : > { %v6911_v35 = vsel %vm765_vm4, %v877_v34, %v879_v14  ;;  %v6920_v48 = vsel %vm765_vm4, %v960_v15, %v961_v27  ;;  %v977_v34 = vmul.f32 %v6805_v1, %v6795_v62  ;;  %v6945_v14 = vmul.f32 %v6726_v37, %v6795_v62 }
  0xd6   : > { %v939_v46 = vrot.slane %v933_v16, 2  ;;  %v942_v15 = vrot.slane %v935_v2, 2  ;;  %v619_v16 = vrot.slane %v6863_v32, 1  ;;  %v981_v1 = vrot.slane %v975_v61, 2 }
  0xd7   : > { %v642_v10 = vrot.slane %v6945_v14, 1  ;;  %v7038_v14 = vmul.f32 %v6738_v41, %v6706_v26 }
  0xd8   : > { %v6972_v38 = vsel %vm765_vm4, %v981_v1, %v982_v45  ;;  %v663_v1 = vrot.slane %v656_v9, 1  ;;  %v620_v0 = vsel %vm528_vm3, %v618_v7, %v619_v16 }
  0xdb   : > { %512 = vrot.lane.b32.xlu2 %v6768_v55, %s6477_s0  ;;  %498 = vrot.lane.b32.xlu0 %v6781_v58, %s6477_s0  ;;  %v6930_v55 = vsel %vm765_vm4, %v939_v46, %v940_v50  ;;  %v956_v58 = vmul.f32 %v6758_v49, %v6795_v62  ;;  %v6964_v46 = vsel %vm765_vm4, %v940_v50, %v942_v15  ;;  %v6982_v50 = vpop.permute.xlu2 %286 }
  0xdc   : > { %484 = vrot.lane.b32.xlu1 %v6799_v63, %s6477_s0  ;;  %v984_v63 = vrot.slane %v977_v34, 2  ;;  %v524_v34 = vmul.f32 %v521_v31, %v6795_v62  ;;  %v529_v31 = vrot.slane %v522_v3, 1 }
  0xdd   : > { %v963_v49 = vrot.slane %v956_v58, 2  ;;  %v556_v58 = vstv %s6904_s14  ;;  %s5987_s14 = sld [smem:[#allocation6 + $0xd]] }
  0xde   : > { %v6958_v30 = vsel %vm765_vm4, %v982_v45, %v984_v63  ;;  %v557_v2 = vmul.f32 %v556_v58, %v6681_v17  ;;  %v573_v63 = vstv %s6913_s19  ;;  %v532_v15 = vrot.slane %v524_v34, 1  ;;  %s7320_s19 = sld [smem:[#allocation6 + $0x53]] }
  0xdf   : > { %v6961_v37 = vsel %vm765_vm4, %v961_v27, %v963_v49  ;;  %v558_v27 = vmul.f32 %v556_v58, %v6706_v26  ;;  %v530_v49 = vrot.slane %v523_v29, 1  ;;  %v575_v45 = vmul.f32 %v573_v63, %v6706_v26 }
  0xe0   : > { %v576_v61 = vmul.f32 %v573_v63, %v6795_v62  ;;  %v563_v5 = vrot.slane %v557_v2, 1  ;;  %v539_v34 = vstv %s6941_s23  ;;  %v641_v2 = vsel %vm528_vm3, %v639_v6, %v640_v54  ;;  %s5989_s23 = sld [smem:[#allocation6 + $0x55]] }
  0xe1   : > { %v581_v24 = vrot.slane %v575_v45, 1  ;;  %v540_v56 = vmul.f32 %v539_v34, %v6681_v17  ;;  %v541_v57 = vmul.f32 %v539_v34, %v6706_v26  ;;  %v10995_v6 = vrot.slane %v6908_v33, 1 }
  0xe2   : > { %v583_v29 = vrot.slane %v576_v61, 1  ;;  %v542_v21 = vmul.f32 %v539_v34, %v6795_v62  ;;  %v574_v45 = vmul.f32 %v573_v63, %v6681_v17  ;;  %v643_v61 = vsel %vm528_vm3, %v640_v54, %v642_v10 }
  0xe3   : > { %604 = vrot.lane.b32.xlu2 %v601_v4, %s10994_s21  ;;  %514 = vrot.lane.b32.xlu0 %v6838_v19, %s6477_s0  ;;  %v564_v4 = vrot.slane %v558_v27, 1  ;;  %v6992_v19 = vsel %vm528_vm3, %v530_v49, %v532_v15  ;;  %v664_v7 = vsel %vm528_vm3, %v10995_v6, %v663_v1  ;;  %v546_v27 = vrot.slane %v540_v56, 1  ;;  %v7060_v23 = vpop.permute.xlu2 %316 }
  0xe4   : > { %500 = vrot.lane.b32.xlu1 %v6841_v20, %s6477_s0  ;;  %v7002_v20 = vmul.f32 %v6735_v40, %v6681_v17  ;;  %v7022_v3 = vsel %vm528_vm3, %v581_v24, %v583_v29  ;;  %v559_v15 = vmul.f32 %v556_v58, %v6795_v62  ;;  %v549_v1 = vrot.slane %v542_v21, 1  ;;  %10996 = vst [vmem:[#allocation16_spill] sm:$0xff] %v7060_v23 }
  0xe5   : > { %v7005_v9 = vsel %vm528_vm3, %v563_v5, %v564_v4  ;;  %v7025_v5 = vsel %vm528_vm3, %v529_v31, %v530_v49  ;;  %v547_v49 = vrot.slane %v541_v57, 1  ;;  %v758_v29 = vstv %s6977_s26  ;;  %s5988_s26 = sld [smem:[#allocation6 + $0x31]] }
  0xe6   : > { %v776_v31 = vstv %s6986_s6  ;;  %v566_v58 = vrot.slane %v559_v15, 1  ;;  %v580_v56 = vrot.slane %v574_v45, 1  ;;  %v759_v63 = vmul.f32 %v758_v29, %v6681_v17  ;;  %s5990_s6 = sld [smem:[#allocation6 + $0x79]] }
  0xe7   : > { %v7054_v34 = vsel %vm528_vm3, %v546_v27, %v547_v49  ;;  %v7063_v54 = vsel %vm528_vm3, %v547_v49, %v549_v1  ;;  %v779_v32 = vmul.f32 %v776_v31, %v6795_v62  ;;  %v810_v21 = vstv %s7019_s30  ;;  %v7081_v1 = vpop.permute.xlu0 %272  ;;  %s5992_s30 = sld [smem:[#allocation6 + $0x32]] }
  0xe8   : > { %v7068_v10 = vsel %vm528_vm3, %v564_v4, %v566_v58  ;;  %v7071_v57 = vsel %vm528_vm3, %v580_v56, %v581_v24  ;;  %v766_v6 = vrot.slane %v759_v63, 2  ;;  %v761_v27 = vmul.f32 %v758_v29, %v6795_v62 }
  0xe9   : > { %v786_v49 = vrot.slane %v779_v32, 2  ;;  %v811_v15 = vmul.f32 %v810_v21, %v6681_v17  ;;  %v812_v4 = vmul.f32 %v810_v21, %v6706_v26  ;;  %v777_v45 = vmul.f32 %v776_v31, %v6681_v17 }
  0xea   : > { %v769_v58 = vrot.slane %v761_v27, 2  ;;  %v793_v56 = vstv %s7041_s4  ;;  %v813_v63 = vmul.f32 %v810_v21, %v6795_v62  ;;  %v675_v21 = vmul.f32 %v6738_v41, %v6681_v17  ;;  %s5991_s4 = sld [smem:[#allocation6 + $0xe]] }
  0xeb   : > { %644 = vrot.lane.b32.xlu2 %v641_v2, %s10994_s21  ;;  %623 = vrot.lane.b32.xlu0 %v620_v0, %s10994_s21  ;;  %v622_v2 = vsel %vm528_vm3, %v619_v16, %v621_v18  ;;  %v760_v0 = vmul.f32 %v758_v29, %v6706_v26  ;;  %v783_v32 = vrot.slane %v777_v45, 2  ;;  %v795_v27 = vmul.f32 %v793_v56, %v6706_v26 }
  0xec   : > { %602 = vrot.lane.b32.xlu1 %v599_v51, %s10994_s21  ;;  %v778_v51 = vmul.f32 %v776_v31, %v6706_v26  ;;  %v820_v23 = vrot.slane %v813_v63, 2 }
  0xed   : > { %v767_v16 = vrot.slane %v760_v0, 2  ;;  %v817_v0 = vrot.slane %v811_v15, 2 }
  0xee   : > { %v784_v18 = vrot.slane %v778_v51, 2  ;;  %v818_v51 = vrot.slane %v812_v4, 2  ;;  %v801_v4 = vrot.slane %v795_v27, 2  ;;  %v698_v27 = vmul.f32 %v6735_v40, %v6795_v62 }
  0xef   : > { %v7084_v24 = vsel %vm765_vm4, %v766_v6, %v767_v16  ;;  %v7094_v31 = vsel %vm765_vm4, %v767_v16, %v769_v58  ;;  %v794_v6 = vmul.f32 %v793_v56, %v6681_v17  ;;  %v654_v16 = vmul.f32 %v6732_v39, %v6681_v17 }
  0xf0   : > { %v7089_v29 = vsel %vm765_vm4, %v784_v18, %v786_v49  ;;  %v7102_v49 = vsel %vm765_vm4, %v817_v0, %v818_v51  ;;  %v7111_v45 = vsel %vm765_vm4, %v818_v51, %v820_v23  ;;  %v682_v58 = vrot.slane %v7038_v14, 1  ;;  %v7115_v0 = vpop.permute.xlu2 %324 }
  0xf1   : > { %10997 = vst [vmem:[#allocation17_spill] sm:$0xff] %v7102_v49  ;;  %v800_v15 = vrot.slane %v794_v6, 2  ;;  %v716_v49 = vstv %s7076_s29  ;;  %v660_v6 = vrot.slane %v654_v16, 1  ;;  %v7138_v16 = vpop.permute.xlu0 %280  ;;  %v705_v40 = vrot.slane %v698_v27, 1  ;;  %s5993_s29 = sld [smem:[#allocation6 + $0x56]] }
  0xf2   : > { %v718_v23 = vmul.f32 %v716_v49, %v6706_v26  ;;  %v719_v51 = vmul.f32 %v716_v49, %v6795_v62  ;;  %v851_v27 = vmul.f32 %v6747_v44, %v6795_v62 }
  0xf3   : > { %667 = vrot.lane.b32.xlu2 %v664_v7, %s10994_s21  ;;  %646 = vrot.lane.b32.xlu0 %v643_v61, %s10994_s21  ;;  %v7105_v7 = vsel %vm765_vm4, %v783_v32, %v784_v18  ;;  %v796_v61 = vmul.f32 %v793_v56, %v6795_v62  ;;  %v7118_v18 = vsel %vm765_vm4, %v800_v15, %v801_v4  ;;  %v702_v56 = vrot.slane %v7002_v20, 1  ;;  %v7141_v15 = vpop.permute.xlu1 %274 }
  0xf4   : > { %625 = vrot.lane.b32.xlu1 %v622_v2, %s10994_s21  ;;  %v703_v2 = vrot.slane %v7034_v28, 1  ;;  %v681_v32 = vrot.slane %v675_v21, 1  ;;  %v10998_v20 = vrot.slane %v6908_v33, 1 }
  0xf5   : > { %v803_v63 = vrot.slane %v796_v61, 2  ;;  %v677_v61 = vmul.f32 %v6738_v41, %v6795_v62 }
  0xf6   : > { %v704_v28 = vsel %vm528_vm3, %v702_v56, %v703_v2  ;;  %v683_v14 = vsel %vm528_vm3, %v681_v32, %v682_v58  ;;  %v662_v21 = vsel %vm528_vm3, %v660_v6, %v10998_v20  ;;  %v706_v33 = vsel %vm528_vm3, %v703_v2, %v705_v40 }
  0xf7   : > { %v7123_v39 = vsel %vm765_vm4, %v801_v4, %v803_v63  ;;  %v724_v4 = vrot.slane %v718_v23, 1  ;;  %v726_v63 = vrot.slane %v719_v51, 1  ;;  %v684_v56 = vrot.slane %v677_v61, 1 }
  0xf8   : > { %v7143_v32 = vpop.permute.xlu2 %354  ;;  %v717_v6 = vmul.f32 %v716_v49, %v6681_v17  ;;  %v830_v2 = vmul.f32 %v6741_v42, %v6795_v62  ;;  %v740_v49 = vmul.f32 %v6744_v43, %v6795_v62  ;;  %v11001_v43 = vrot.slane %v6789_v60, 1 }
  0xf9   : > { %v685_v41 = vsel %vm528_vm3, %v682_v58, %v684_v56  ;;  %v7152_v23 = vpop.permute.xlu0 %310 }
  0xfa   : > { %v723_v51 = vrot.slane %v717_v6, 1  ;;  %v837_v44 = vrot.slane %v830_v2, 2  ;;  %v747_v61 = vrot.slane %v740_v49, 1  ;;  %v391_v49 = vstv %s7227_s11  ;;  %s6002_s11 = sld [smem:[#allocation6 + $0x7c]] }
  0xfb   : > { %707 = vrot.lane.b32.xlu2 %v704_v28, %s6477_s0  ;;  %686 = vrot.lane.b32.xlu0 %v683_v14, %s6477_s0  ;;  %v727_v28 = vsel %vm528_vm3, %v724_v4, %v726_v63  ;;  %v285_v14 = vpop.permute.xlu1 %284 }
  0xfc   : > { %665 = vrot.lane.b32.xlu1 %v662_v21, %s10994_s21  ;;  %v725_v58 = vsel %vm528_vm3, %v723_v51, %v724_v4  ;;  %v858_v21 = vrot.slane %v851_v27, 2  ;;  %v11000_v4 = vrot.slane %v6785_v59, 2  ;;  %v748_v62 = vsel %vm528_vm3, %v11001_v43, %v747_v61 }
  0xfe   : > { %v838_v40 = vsel %vm765_vm4, %v11000_v4, %v837_v44 }
 0x100   : > { %v7163_v20 = vpop.permute.xlu2 %362 }
 0x101   : > { %v7168_v63 = vpop.permute.xlu0 %318 }
 0x103   : > { %730 = vrot.lane.b32.xlu2 %v727_v28, %s6477_s0  ;;  %709 = vrot.lane.b32.xlu0 %v706_v33, %s6477_s0  ;;  %v7170_v42 = vpop.permute.xlu1 %312 }
 0x104   : > { %688 = vrot.lane.b32.xlu1 %v685_v41, %s6477_s0 }
 0x109   : > { %v7186_v28 = vpop.permute.xlu0 %348 }
 0x10b   : > { %839 = vrot.lane.b32.xlu2 %v6826_v12, %s10994_s21  ;;  %749 = vrot.lane.b32.xlu0 %v6831_v13, %s6477_s0  ;;  %v10999_v12 = vrot.slane %v6813_v8, 2  ;;  %v7188_v8 = vpop.permute.xlu1 %322 }
 0x10c   : > { %728 = vrot.lane.b32.xlu1 %v725_v58, %s6477_s0 }
 0x10d   : > { %v859_v13 = vsel %vm765_vm4, %v10999_v12, %v858_v21 }
 0x111   : > { %v7202_v60 = vpop.permute.xlu0 %356 }
 0x113   : > { %862 = vrot.lane.b32.xlu2 %v859_v13, %s10994_s21  ;;  %841 = vrot.lane.b32.xlu0 %v838_v40, %s10994_s21  ;;  %v7204_v33 = vpop.permute.xlu1 %350  ;;  %v1047_v40 = vstv %s7239_s8  ;;  %s6001_s8 = sld [smem:[#allocation6 + $0x58]] }
 0x114   : > { %751 = vrot.lane.b32.xlu1 %v748_v62, %s6477_s0 }
 0x115   : > { %v7184_v56 = vpop.permute.xlu2 %428 }
 0x11b   : > { %902 = vrot.lane.b32.xlu2 %v6866_v36, %s10994_s21  ;;  %881 = vrot.lane.b32.xlu0 %v6875_v52, %s10994_s21 }
 0x11c   : > { %860 = vrot.lane.b32.xlu1 %v6880_v53, %s10994_s21 }
 0x11d   : > { %v7196_v59 = vpop.permute.xlu2 %444 }
 0x123   : > { %925 = vrot.lane.b32.xlu2 %v6897_v22, %s6477_s0  ;;  %904 = vrot.lane.b32.xlu0 %v6900_v25, %s10994_s21  ;;  %v290_v22 = vsel %vm249_vm0, %v7081_v1, %v6894_v47  ;;  %v7219_v25 = vpop.permute.xlu1 %360  ;;  %v291_v47 = vsel %vm249_vm0, %v7141_v15, %v7138_v16  ;;  %v1033_v16 = vstv %s7221_s7  ;;  %v1019_v15 = vstv %s7224_s9  ;;  %s5994_s7 = sld [smem:[#allocation6 + $0x7a]] }
 0x124   : > { %883 = vrot.lane.b32.xlu1 %v6911_v35, %s10994_s21  ;;  %v385_v35 = vstv %s7208_s5  ;;  %s5999_s5 = sld [smem:[#allocation6 + $0x10]] }
 0x125   : > { %v471_v36 = vpop.permute.xlu2 %470  ;;  %v387_v62 = vmul.f32 %v385_v35, %v6706_v26  ;;  %s6000_s9 = sld [smem:[#allocation6 + $0x34]] }
 0x12b   : > { %965 = vrot.lane.b32.xlu2 %v6920_v48, %s6477_s0  ;;  %944 = vrot.lane.b32.xlu0 %v6930_v55, %s6477_s0  ;;  %v292_v48 = vsel %vm252_vm1, %v290_v22, %v285_v14  ;;  %v386_v55 = vmul.f32 %v385_v35, %v6681_v17 }
 0x12c   : > { %923 = vrot.lane.b32.xlu1 %v6939_v11, %s6477_s0  ;;  %v295_v11 = vrot.slane %v292_v48, 1  ;;  %v298_v1 = vrot.slane %v292_v48, 7 }
 0x12d   : > { %v487_v52 = vpop.permute.xlu2 %486  ;;  %v415_v53 = vpop.permute.xlu0 %414 }
 0x12e   : > { %v420_v41 = vadd.f32 %v415_v53, %v386_v55 }
 0x130   : > { %v476_v27 = vadd.f32 %v471_v36, %v420_v41  ;;  %v397_v41 = vstv %s7271_s1  ;;  %s6005_s1 = sld [smem:[#allocation6 + $0x59]] }
 0x132   : > { %v7264_v61 = vadd.f32 %v7025_v5, %v476_v27 }
 0x133   : > { %988 = vrot.lane.b32.xlu2 %v6958_v30, %s6477_s0  ;;  %967 = vrot.lane.b32.xlu0 %v6961_v37, %s6477_s0  ;;  %v7243_v30 = vsel %vm252_vm1, %v291_v47, %v6982_v50  ;;  %v7246_v37 = vsel %vm259_vm2, %v295_v11, %v298_v1  ;;  %v393_v50 = vmul.f32 %v391_v49, %v6706_v26 }
 0x134   : > { %946 = vrot.lane.b32.xlu1 %v6964_v46, %s6477_s0  ;;  %v1034_v2 = vmul.f32 %v1033_v16, %v7246_v37  ;;  %v1020_v46 = vmul.f32 %v1019_v15, %v7246_v37  ;;  %v299_v58 = vrot.slane %v7243_v30, 7 }
 0x135   : > { %v513_v6 = vpop.permute.xlu2 %512  ;;  %v431_v14 = vpop.permute.xlu0 %430 }
 0x136   : > { %v417_v51 = vpop.permute.xlu1 %416  ;;  %v7269_v12 = vsel %vm259_vm2, %v298_v1, %v299_v58  ;;  %v435_v13 = vadd.f32 %v431_v14, %v393_v50  ;;  %v1048_v50 = vmul.f32 %v1047_v40, %v7246_v37 }
 0x137   : > { %v1049_v43 = vmul.f32 %v1047_v40, %v7269_v12  ;;  %v1035_v5 = vmul.f32 %v1033_v16, %v7269_v12  ;;  %v1021_v53 = vmul.f32 %v1019_v15, %v7269_v12  ;;  %v421_v22 = vadd.f32 %v417_v51, %v387_v62 }
 0x138   : > { %v491_v36 = vadd.f32 %v487_v52, %v435_v13  ;;  %v1075_v51 = vstv %s7274_s27  ;;  %v1061_v16 = vstv %s7276_s28  ;;  %s6004_s27 = sld [smem:[#allocation6 + $0x35]] }
 0x139   : > { %v1076_v15 = vmul.f32 %v1075_v51, %v7246_v37  ;;  %v1062_v27 = vmul.f32 %v1061_v16, %v7246_v37  ;;  %s6006_s28 = sld [smem:[#allocation6 + $0x7d]] }
 0x13a   : > { %v7292_v52 = vadd.f32 %v7063_v54, %v491_v36  ;;  %v1089_v36 = vstv %s7289_s22  ;;  %s7538_s22 = sld [smem:[#allocation6 + $0x37]] }
 0x13b   : > { %1038 = vrot.lane.b32.xlu2 %v1034_v2, %s10994_s21  ;;  %1024 = vrot.lane.b32.xlu0 %v1020_v46, %s10994_s21  ;;  %v398_v2 = vmul.f32 %v397_v41, %v6681_v17 }
 0x13c   : > { %986 = vrot.lane.b32.xlu1 %v6972_v38, %s6477_s0  ;;  %v403_v38 = vstv %s7252_s10  ;;  %s6003_s10 = sld [smem:[#allocation6 + $0x11]] }
 0x13d   : > { %v7261_v21 = vpop.permute.xlu2 %604  ;;  %v457_v44 = vpop.permute.xlu0 %456  ;;  %v404_v48 = vmul.f32 %v403_v38, %v6681_v17 }
 0x13e   : > { %v443_v4 = vpop.permute.xlu1 %442 }
 0x13f   : > { %v462_v11 = vadd.f32 %v457_v44, %v404_v48  ;;  %v392_v44 = vmul.f32 %v391_v49, %v6681_v17  ;;  %v399_v48 = vmul.f32 %v397_v41, %v6706_v26 }
 0x141   : > { %v518_v46 = vadd.f32 %v513_v6, %v462_v11  ;;  %v434_v54 = vadd.f32 %v7184_v56, %v392_v44  ;;  %v1091_v56 = vmul.f32 %v1089_v36, %v7269_v12 }
 0x143   : > { %1054 = vrot.lane.b32.xlu2 %v1049_v43, %s10994_s21  ;;  %1040 = vrot.lane.b32.xlu0 %v1035_v5, %s10994_s21  ;;  %v7315_v6 = vadd.f32 %v7071_v57, %v518_v46  ;;  %v304_v57 = vrot.slane %v7243_v30, 5  ;;  %v1090_v46 = vmul.f32 %v1089_v36, %v7246_v37 }
 0x144   : > { %1026 = vrot.lane.b32.xlu1 %v1021_v53, %s10994_s21  ;;  %v405_v53 = vmul.f32 %v403_v38, %v6706_v26 }
 0x145   : > { %v7287_v55 = vpop.permute.xlu2 %644  ;;  %v473_v47 = vpop.permute.xlu0 %472  ;;  %v7336_v26 = vsel %vm259_vm2, %v299_v58, %v304_v57 }
 0x146   : > { %v459_v1 = vpop.permute.xlu1 %458  ;;  %v477_v35 = vadd.f32 %v473_v47, %v421_v22  ;;  %v1063_v22 = vmul.f32 %v1061_v16, %v7269_v12  ;;  %v449_v47 = vadd.f32 %v7196_v59, %v399_v48 }
 0x148   : > { %v7296_v14 = vadd.f32 %v6992_v19, %v477_v35  ;;  %v448_v19 = vadd.f32 %v443_v4, %v398_v2  ;;  %v1077_v4 = vmul.f32 %v1075_v51, %v7269_v12  ;;  %v1199_v51 = vstv %s5987_s14  ;;  %s7560_s14 = sld [smem:[#allocation6 + $0x5b]] }
 0x149   : > { %v1201_v30 = vmul.f32 %v1199_v51, %v7269_v12  ;;  %v1202_v58 = vmul.f32 %v1199_v51, %v7336_v26 }
 0x14b   : > { %1080 = vrot.lane.b32.xlu2 %v1076_v15, %s6477_s0  ;;  %1066 = vrot.lane.b32.xlu0 %v1062_v27, %s10994_s21  ;;  %v1103_v15 = vstv %s7320_s19  ;;  %s6015_s19 = sld [smem:[#allocation6 + $0x14]] }
 0x14c   : > { %1052 = vrot.lane.b32.xlu1 %v1048_v50, %s10994_s21  ;;  %v1104_v27 = vmul.f32 %v1103_v15, %v7246_v37 }
 0x14d   : > { %v7309_v13 = vpop.permute.xlu2 %667  ;;  %v499_v43 = vpop.permute.xlu0 %498 }
 0x14e   : > { %v485_v5 = vpop.permute.xlu1 %484  ;;  %v504_v62 = vadd.f32 %v499_v43, %v448_v19  ;;  %v1207_v19 = vrot.slane %v1201_v30, 1  ;;  %v1241_v43 = vstv %s5989_s23  ;;  %s6014_s23 = sld [smem:[#allocation6 + $0x7f]] }
 0x14f   : > { %v490_v17 = vadd.f32 %v485_v5, %v434_v54  ;;  %v1209_v54 = vrot.slane %v1202_v58, 1  ;;  %v1242_v36 = vmul.f32 %v1241_v43, %v7246_v37  ;;  %v1244_v58 = vmul.f32 %v1241_v43, %v7336_v26 }
 0x150   : > { %v7318_v49 = vadd.f32 %v7005_v9, %v504_v62  ;;  %v463_v9 = vadd.f32 %v459_v1, %v405_v53  ;;  %v1117_v1 = vstv %s7312_s2  ;;  %v1105_v62 = vmul.f32 %v1103_v15, %v7269_v12  ;;  %s7540_s2 = sld [smem:[#allocation6 + $0x13]] }
 0x151   : > { %v553_v40 = vadd.f32 %v7054_v34, %v490_v17  ;;  %v1118_v59 = vmul.f32 %v1117_v1, %v7246_v37  ;;  %v1119_v5 = vmul.f32 %v1117_v1, %v7269_v12  ;;  %v1210_v17 = vsel %vm528_vm3, %v1207_v19, %v1209_v54 }
 0x153   : > { %1096 = vrot.lane.b32.xlu2 %v1091_v56, %s6477_s0  ;;  %1082 = vrot.lane.b32.xlu0 %v1077_v4, %s6477_s0  ;;  %v1243_v56 = vmul.f32 %v1241_v43, %v7269_v12 }
 0x154   : > { %1068 = vrot.lane.b32.xlu1 %v1063_v22, %s10994_s21  ;;  %v1200_v22 = vmul.f32 %v1199_v51, %v7246_v37 }
 0x155   : > { %v708_v34 = vpop.permute.xlu2 %707  ;;  %v515_v11 = vpop.permute.xlu0 %514 }
 0x156   : > { %v501_v38 = vpop.permute.xlu1 %500  ;;  %v519_v35 = vadd.f32 %v515_v11, %v463_v9  ;;  %v1248_v9 = vrot.slane %v1242_v36, 1  ;;  %v1206_v15 = vrot.slane %v1200_v22, 1 }
 0x157   : > { %v505_v41 = vadd.f32 %v501_v38, %v449_v47  ;;  %v1262_v47 = vstv %s5990_s6  ;;  %s7612_s6 = sld [smem:[#allocation6 + $0x80]] }
 0x158   : > { %v7339_v16 = vadd.f32 %v7022_v3, %v519_v35  ;;  %v1249_v35 = vrot.slane %v1243_v56, 1  ;;  %v1265_v51 = vmul.f32 %v1262_v47, %v7336_v26 }
 0x159   : > { %v571_v2 = vadd.f32 %v7068_v10, %v505_v41  ;;  %v1220_v10 = vstv %s5988_s26  ;;  %s7597_s26 = sld [smem:[#allocation6 + $0x38]] }
 0x15a   : > { %v1221_v4 = vmul.f32 %v1220_v10, %v7246_v37  ;;  %v1222_v53 = vmul.f32 %v1220_v10, %v7269_v12  ;;  %v1272_v36 = vrot.slane %v1265_v51, 1 }
 0x15b   : > { %1122 = vrot.lane.b32.xlu2 %v1118_v59, %s6477_s0  ;;  %1108 = vrot.lane.b32.xlu0 %v1104_v27, %s6477_s0  ;;  %v7366_v59 = vmul.f32 %v1262_v47, %v7269_v12 }
 0x15c   : > { %1094 = vrot.lane.b32.xlu1 %v1090_v46, %s6477_s0  ;;  %v1227_v41 = vrot.slane %v1221_v4, 1  ;;  %v1228_v1 = vrot.slane %v1222_v53, 1  ;;  %v1250_v46 = vsel %vm528_vm3, %v1248_v9, %v1249_v35  ;;  %v1251_v53 = vrot.slane %v1244_v58, 1 }
 0x15d   : > { %v731_v3 = vpop.permute.xlu2 %730  ;;  %v624_v50 = vpop.permute.xlu0 %623 }
 0x15e   : > { %v603_v44 = vpop.permute.xlu1 %602  ;;  %v629_v11 = vadd.f32 %v624_v50, %v553_v40  ;;  %v1229_v30 = vsel %vm528_vm3, %v1227_v41, %v1228_v1  ;;  %v1208_v40 = vsel %vm528_vm3, %v1206_v15, %v1207_v19  ;;  %v1223_v50 = vmul.f32 %v1220_v10, %v7336_v26 }
 0x15f   : > { %v608_v54 = vadd.f32 %v603_v44, %v7264_v61  ;;  %v1283_v10 = vstv %s5991_s4  ;;  %v1263_v15 = vmul.f32 %v1262_v47, %v7246_v37  ;;  %s7614_s4 = sld [smem:[#allocation6 + $0x5c]] }
 0x160   : > { %v713_v27 = vadd.f32 %v708_v34, %v629_v11  ;;  %v1230_v19 = vrot.slane %v1223_v50, 1 }
 0x162   : > { %v7382_v22 = vadd.f32 %v7105_v7, %v713_v27  ;;  %v1285_v7 = vmul.f32 %v1283_v10, %v7269_v12 }
 0x163   : > { %1213 = vrot.lane.b32.xlu2 %v1210_v17, %s10994_s21  ;;  %1124 = vrot.lane.b32.xlu0 %v1119_v5, %s6477_s0  ;;  %v1304_v17 = vstv %s5992_s30  ;;  %s6023_s30 = sld [smem:[#allocation6 + $0x16]] }
 0x164   : > { %1110 = vrot.lane.b32.xlu1 %v1105_v62, %s6477_s0  ;;  %v1270_v62 = vrot.slane %v7366_v59, 1  ;;  %v1305_v9 = vmul.f32 %v1304_v17, %v7246_v37  ;;  %v1306_v11 = vmul.f32 %v1304_v17, %v7269_v12  ;;  %v1291_v50 = vrot.slane %v1285_v7, 1 }
 0x165   : > { %v7363_v57 = vpop.permute.xlu2 %839  ;;  %v647_v48 = vpop.permute.xlu0 %646 }
 0x166   : > { %v626_v38 = vpop.permute.xlu1 %625  ;;  %v651_v43 = vadd.f32 %v647_v48, %v571_v2  ;;  %v1273_v44 = vsel %vm528_vm3, %v1270_v62, %v1272_v36  ;;  %v1252_v2 = vsel %vm528_vm3, %v1249_v35, %v1251_v53  ;;  %v1284_v48 = vmul.f32 %v1283_v10, %v7246_v37 }
 0x167   : > { %v630_v59 = vadd.f32 %v626_v38, %v7292_v52  ;;  %v1311_v27 = vrot.slane %v1305_v9, 1  ;;  %v1269_v52 = vrot.slane %v1263_v15, 1  ;;  %v1325_v38 = vstv %s5993_s29  ;;  %s6025_s29 = sld [smem:[#allocation6 + $0x5e]] }
 0x168   : > { %v735_v41 = vadd.f32 %v731_v3, %v651_v43  ;;  %v609_v3 = vadd.f32 %v7261_v21, %v7296_v14  ;;  %v1307_v21 = vmul.f32 %v1304_v17, %v7336_v26  ;;  %v1327_v43 = vmul.f32 %v1325_v38, %v7269_v12 }
 0x169   : > { %v650_v53 = vadd.f32 %v7287_v55, %v7318_v49 }
 0x16b   : > { %1253 = vrot.lane.b32.xlu2 %v1250_v46, %s10994_s21  ;;  %1232 = vrot.lane.b32.xlu0 %v1229_v30, %s10994_s21  ;;  %v1312_v46 = vrot.slane %v1306_v11, 1 }
 0x16c   : > { %1211 = vrot.lane.b32.xlu1 %v1208_v40, %s10994_s21  ;;  %v1290_v40 = vrot.slane %v1284_v48, 1  ;;  %v1435_v48 = vstv %s5999_s5  ;;  %s6024_s5 = sld [smem:[#allocation6 + $0x3a]] }
 0x16d   : > { %v7378_v5 = vpop.permute.xlu2 %862  ;;  %v687_v34 = vpop.permute.xlu0 %686  ;;  %v1436_v15 = vmul.f32 %v1435_v48, %v7246_v37 }
 0x16e   : > { %v666_v56 = vpop.permute.xlu1 %665  ;;  %v692_v4 = vadd.f32 %v687_v34, %v608_v54  ;;  %v1313_v34 = vsel %vm528_vm3, %v1311_v27, %v1312_v46  ;;  %v1292_v36 = vsel %vm528_vm3, %v1290_v40, %v1291_v50 }
 0x16f   : > { %v671_v17 = vadd.f32 %v666_v56, %v7315_v6  ;;  %v1442_v40 = vrot.slane %v1436_v15, 2 }
 0x170   : > { %v7385_v61 = vadd.f32 %v7084_v24, %v692_v4  ;;  %v1231_v24 = vsel %vm528_vm3, %v1228_v1, %v1230_v19  ;;  %v7404_v1 = vadd.f32 %v7123_v39, %v735_v41  ;;  %v1328_v39 = vmul.f32 %v1325_v38, %v7336_v26 }
 0x171   : > { %v1286_v4 = vmul.f32 %v1283_v10, %v7336_v26  ;;  %v1333_v41 = vrot.slane %v1327_v43, 1  ;;  %v1346_v10 = vstv %s5994_s7  ;;  %s6026_s7 = sld [smem:[#allocation6 + $0x82]] }
 0x173   : > { %1276 = vrot.lane.b32.xlu2 %v1273_v44, %s10994_s21  ;;  %1255 = vrot.lane.b32.xlu0 %v1252_v2, %s10994_s21  ;;  %v1314_v44 = vrot.slane %v1307_v21, 1  ;;  %v1335_v2 = vrot.slane %v1328_v39, 1  ;;  %v1293_v7 = vrot.slane %v1286_v4, 1  ;;  %v1438_v4 = vmul.f32 %v1435_v48, %v7336_v26 }
 0x174   : > { %1234 = vrot.lane.b32.xlu1 %v1231_v24, %s10994_s21  ;;  %v11002_v24 = vld [vmem:[#allocation17_spill] sm:$0xff] }
 0x175   : > { %v7399_v51 = vpop.permute.xlu2 %902  ;;  %v710_v35 = vpop.permute.xlu0 %709  ;;  %v1315_v56 = vsel %vm528_vm3, %v1312_v46, %v1314_v44  ;;  %v1336_v49 = vsel %vm528_vm3, %v1333_v41, %v1335_v2  ;;  %v1294_v27 = vsel %vm528_vm3, %v1291_v50, %v1293_v7  ;;  %v1326_v46 = vmul.f32 %v1325_v38, %v7246_v37 }
 0x176   : > { %v689_v30 = vpop.permute.xlu1 %688  ;;  %v714_v58 = vadd.f32 %v710_v35, %v630_v59  ;;  %v1437_v59 = vmul.f32 %v1435_v48, %v7269_v12  ;;  %v1348_v35 = vmul.f32 %v1346_v10, %v7269_v12  ;;  %v1445_v2 = vrot.slane %v1438_v4, 2 }
 0x177   : > { %v693_v47 = vadd.f32 %v689_v30, %v609_v3  ;;  %v1347_v3 = vmul.f32 %v1346_v10, %v7246_v37  ;;  %v672_v30 = vadd.f32 %v7309_v13, %v7339_v16  ;;  %v1332_v50 = vrot.slane %v1326_v46, 1 }
 0x178   : > { %v7407_v54 = vadd.f32 %v7089_v29, %v714_v58  ;;  %v1271_v29 = vsel %vm528_vm3, %v1269_v52, %v1270_v62  ;;  %v1443_v52 = vrot.slane %v1437_v59, 2  ;;  %v1498_v48 = vstv %s6002_s11  ;;  %s6027_s11 = sld [smem:[#allocation6 + $0x17]] }
 0x179   : > { %v7411_v14 = vadd.f32 %v7094_v31, %v693_v47  ;;  %v1353_v21 = vrot.slane %v1347_v3, 1  ;;  %v1477_v7 = vstv %s6001_s8  ;;  %s6029_s8 = sld [smem:[#allocation6 + $0x5f]] }
 0x17a   : > { %v1478_v15 = vmul.f32 %v1477_v7, %v7246_v37 }
 0x17b   : > { %1316 = vrot.lane.b32.xlu2 %v1313_v34, %s6477_s0  ;;  %1295 = vrot.lane.b32.xlu0 %v1292_v36, %s6477_s0  ;;  %v1354_v34 = vrot.slane %v1348_v35, 1  ;;  %v1456_v36 = vstv %s6000_s9  ;;  %s6028_s9 = sld [smem:[#allocation6 + $0x3b]] }
 0x17c   : > { %1274 = vrot.lane.b32.xlu1 %v1271_v29, %s10994_s21  ;;  %v1458_v38 = vmul.f32 %v1456_v36, %v7269_v12  ;;  %v1444_v29 = vsel %vm765_vm4, %v1442_v40, %v1443_v52  ;;  %v1459_v16 = vmul.f32 %v1456_v36, %v7336_v26  ;;  %v1457_v3 = vmul.f32 %v1456_v36, %v7246_v37 }
 0x17d   : > { %v7423_v31 = vpop.permute.xlu2 %925  ;;  %v750_v19 = vpop.permute.xlu0 %749  ;;  %v1355_v13 = vsel %vm528_vm3, %v1353_v21, %v1354_v34 }
 0x17e   : > { %v729_v9 = vpop.permute.xlu1 %728  ;;  %v755_v11 = vadd.f32 %v750_v19, %v671_v17  ;;  %v1334_v17 = vsel %vm528_vm3, %v1332_v50, %v1333_v41  ;;  %v1500_v41 = vmul.f32 %v1498_v48, %v7269_v12  ;;  %v1463_v21 = vrot.slane %v1457_v3, 2 }
 0x17f   : > { %v734_v62 = vadd.f32 %v729_v9, %v650_v53  ;;  %v1349_v53 = vmul.f32 %v1346_v10, %v7336_v26  ;;  %v1464_v9 = vrot.slane %v1458_v38, 2 }
 0x180   : > { %v7428_v6 = vadd.f32 %v11002_v24, %v755_v11  ;;  %v1466_v11 = vrot.slane %v1459_v16, 2  ;;  %v1499_v24 = vmul.f32 %v1498_v48, %v7246_v37  ;;  %v1480_v16 = vmul.f32 %v1477_v7, %v7336_v26 }
 0x181   : > { %v7433_v55 = vadd.f32 %v7118_v18, %v734_v62  ;;  %v1356_v62 = vrot.slane %v1349_v53, 1 }
 0x182   : > { %v1467_v10 = vsel %vm765_vm4, %v1464_v9, %v1466_v11  ;;  %v1505_v46 = vrot.slane %v1499_v24, 2  ;;  %v1487_v24 = vrot.slane %v1480_v16, 2 }
 0x183   : > { %1339 = vrot.lane.b32.xlu2 %v1336_v49, %s6477_s0  ;;  %1318 = vrot.lane.b32.xlu0 %v1315_v56, %s6477_s0  ;;  %v1446_v56 = vsel %vm765_vm4, %v1443_v52, %v1445_v2  ;;  %v1479_v49 = vmul.f32 %v1477_v7, %v7269_v12  ;;  %v1357_v59 = vsel %vm528_vm3, %v1354_v34, %v1356_v62 }
 0x184   : > { %1297 = vrot.lane.b32.xlu1 %v1294_v27, %s6477_s0 }
 0x185   : > { %v7444_v18 = vpop.permute.xlu2 %965  ;;  %v7448_v58 = vpop.permute.xlu0 %841  ;;  %v1485_v52 = vrot.slane %v1479_v49, 2 }
 0x186   : > { %v752_v47 = vpop.permute.xlu1 %751 }
 0x187   : > { %v756_v43 = vadd.f32 %v752_v47, %v672_v30  ;;  %v1506_v30 = vrot.slane %v1500_v41, 2  ;;  %v1484_v47 = vrot.slane %v1478_v15, 2  ;;  %v1540_v41 = vstv %s6004_s27  ;;  %s6036_s27 = sld [smem:[#allocation6 + $0x3d]] }
 0x188   : > { %v1541_v15 = vmul.f32 %v1540_v41, %v7246_v37  ;;  %v1542_v49 = vmul.f32 %v1540_v41, %v7269_v12 }
 0x189   : > { %v7452_v39 = vadd.f32 %v7111_v45, %v756_v43  ;;  %v1519_v43 = vstv %s6003_s10  ;;  %v1507_v34 = vsel %vm765_vm4, %v1505_v46, %v1506_v30  ;;  %v1486_v36 = vsel %vm765_vm4, %v1484_v47, %v1485_v52  ;;  %s6035_s10 = sld [smem:[#allocation6 + $0x19]] }
 0x18a   : > { %v1521_v50 = vmul.f32 %v1519_v43, %v7269_v12  ;;  %v1522_v38 = vmul.f32 %v1519_v43, %v7336_v26  ;;  %v1520_v3 = vmul.f32 %v1519_v43, %v7246_v37 }
 0x18b   : > { %1447 = vrot.lane.b32.xlu2 %v1444_v29, %s10994_s21  ;;  %1358 = vrot.lane.b32.xlu0 %v1355_v13, %s6477_s0  ;;  %v1501_v29 = vmul.f32 %v1498_v48, %v7336_v26  ;;  %v1465_v13 = vsel %vm765_vm4, %v1463_v21, %v1464_v9  ;;  %v1561_v48 = vstv %s6005_s1  ;;  %s6030_s1 = sld [smem:[#allocation6 + $0x83]] }
 0x18c   : > { %1337 = vrot.lane.b32.xlu1 %v1334_v17, %s6477_s0  ;;  %v1527_v11 = vrot.slane %v1521_v50, 2  ;;  %v1529_v2 = vrot.slane %v1522_v38, 2  ;;  %v1563_v9 = vmul.f32 %v1561_v48, %v7269_v12  ;;  %v1548_v50 = vrot.slane %v1542_v49, 2 }
 0x18d   : > { %v7463_v45 = vpop.permute.xlu2 %988  ;;  %v7465_v19 = vpop.permute.xlu0 %881  ;;  %v1508_v62 = vrot.slane %v1501_v29, 2  ;;  %v1526_v38 = vrot.slane %v1520_v3, 2  ;;  %v1582_v29 = vstv %s6006_s28  ;;  %s6038_s28 = sld [smem:[#allocation6 + $0x85]] }
 0x18e   : > { %11003 = vst [vmem:[#allocation17_spill] sm:$0xff] %v7463_v45  ;;  %v7467_v44 = vpop.permute.xlu1 %860  ;;  %v1530_v7 = vsel %vm765_vm4, %v1527_v11, %v1529_v2  ;;  %v1584_v43 = vmul.f32 %v1582_v29, %v7269_v12  ;;  %v1585_v16 = vmul.f32 %v1582_v29, %v7336_v26  ;;  %v1564_v2 = vmul.f32 %v1561_v48, %v7336_v26 }
 0x18f   : > { %v2064_v45 = vstv %s6036_s27  ;;  %s6064_s27 = sld [smem:[#allocation6 + $0x44]] }
 0x190   : > { %v1592_v49 = vrot.slane %v1585_v16, 2 }
 0x193   : > { %1470 = vrot.lane.b32.xlu2 %v1467_v10, %s10994_s21  ;;  %1449 = vrot.lane.b32.xlu0 %v1446_v56, %s10994_s21  ;;  %v1562_v10 = vmul.f32 %v1561_v48, %v7246_v37  ;;  %v1509_v56 = vsel %vm765_vm4, %v1506_v30, %v1508_v62  ;;  %v1569_v30 = vrot.slane %v1563_v9, 2  ;;  %v1528_v62 = vsel %vm765_vm4, %v1526_v38, %v1527_v11 }
 0x194   : > { %1360 = vrot.lane.b32.xlu1 %v1357_v59, %s6477_s0  ;;  %v1488_v59 = vsel %vm765_vm4, %v1485_v52, %v1487_v24  ;;  %v1543_v24 = vmul.f32 %v1540_v41, %v7336_v26  ;;  %v1590_v48 = vrot.slane %v1584_v43, 2  ;;  %v329_v38 = vsel %vm249_vm0, %v7170_v42, %v7168_v63 }
 0x195   : > { %v7480_v35 = vpop.permute.xlu2 %1038  ;;  %v7482_v27 = vpop.permute.xlu0 %904  ;;  %v1568_v21 = vrot.slane %v1562_v10, 2  ;;  %v1641_v63 = vstv %s7538_s22  ;;  %v1627_v42 = vstv %s7540_s2  ;;  %s6037_s22 = sld [smem:[#allocation6 + $0x61]] }
 0x196   : > { %11004 = vst [vmem:[#allocation18_spill] sm:$0xff] %v7480_v35  ;;  %v7484_v40 = vpop.permute.xlu1 %883  ;;  %v1550_v3 = vrot.slane %v1543_v24, 2  ;;  %v1593_v41 = vsel %vm765_vm4, %v1590_v48, %v1592_v49  ;;  %s6039_s2 = sld [smem:[#allocation6 + $0x1a]] }
 0x19b   : > { %1510 = vrot.lane.b32.xlu2 %v1507_v34, %s10994_s21  ;;  %1489 = vrot.lane.b32.xlu0 %v1486_v36, %s10994_s21  ;;  %v1547_v36 = vrot.slane %v1541_v15, 2 }
 0x19c   : > { %1468 = vrot.lane.b32.xlu1 %v1465_v13, %s10994_s21  ;;  %v1570_v13 = vsel %vm765_vm4, %v1568_v21, %v1569_v30  ;;  %v2127_v35 = vstv %s6039_s2  ;;  %s6071_s2 = sld [smem:[#allocation6 + $0x22]] }
 0x19d   : > { %v7496_v4 = vpop.permute.xlu2 %1054  ;;  %v7498_v17 = vpop.permute.xlu0 %944  ;;  %v1549_v52 = vsel %vm765_vm4, %v1547_v36, %v1548_v50  ;;  %v1583_v36 = vmul.f32 %v1582_v29, %v7246_v37 }
 0x19e   : > { %11005 = vst [vmem:[#allocation19_spill] sm:$0xff] %v7496_v4  ;;  %v7500_v53 = vpop.permute.xlu1 %923 }
 0x19f   : > { %v1589_v29 = vrot.slane %v1583_v36, 2 }
 0x1a3   : > { %1533 = vrot.lane.b32.xlu2 %v1530_v7, %s6477_s0  ;;  %1512 = vrot.lane.b32.xlu0 %v1509_v56, %s10994_s21  ;;  %v11008_v7 = vld [vmem:[#allocation16_spill] sm:$0xff] }
 0x1a4   : > { %1491 = vrot.lane.b32.xlu1 %v1488_v59, %s10994_s21  ;;  %v328_v56 = vsel %vm249_vm0, %v7152_v23, %v11008_v7  ;;  %v1571_v59 = vrot.slane %v1564_v2, 2  ;;  %v1551_v23 = vsel %vm765_vm4, %v1548_v50, %v1550_v3  ;;  %v331_v50 = vsel %vm252_vm1, %v329_v38, %v7115_v0 }
 0x1a5   : > { %v7513_v46 = vpop.permute.xlu2 %1080  ;;  %v7515_v47 = vpop.permute.xlu0 %967  ;;  %v330_v11 = vsel %vm252_vm1, %v328_v56, %v7188_v8  ;;  %v337_v24 = vrot.slane %v331_v50, 7  ;;  %v1591_v7 = vsel %vm765_vm4, %v1589_v29, %v1590_v48  ;;  %v1655_v3 = vstv %s7560_s14  ;;  %s6041_s14 = sld [smem:[#allocation6 + $0x62]] }
 0x1a6   : > { %11006 = vst [vmem:[#allocation20_spill] sm:$0xff] %v7515_v47  ;;  %v7517_v34 = vpop.permute.xlu1 %946  ;;  %v1572_v21 = vsel %vm765_vm4, %v1569_v30, %v1571_v59  ;;  %v336_v8 = vrot.slane %v330_v11, 7  ;;  %v1683_v38 = vstv %s6015_s19  ;;  %s6040_s19 = sld [smem:[#allocation6 + $0x3e]] }
 0x1a8   : > { %v7580_v49 = vsel %vm259_vm2, %v336_v8, %v337_v24 }
 0x1a9   : > { %v1657_v48 = vmul.f32 %v1655_v3, %v7580_v49 }
 0x1ab   : > { %1573 = vrot.lane.b32.xlu2 %v1570_v13, %s6477_s0  ;;  %1552 = vrot.lane.b32.xlu0 %v1549_v52, %s6477_s0  ;;  %v333_v13 = vrot.slane %v330_v11, 1  ;;  %v1643_v11 = vmul.f32 %v1641_v63, %v7580_v49 }
 0x1ac   : > { %1531 = vrot.lane.b32.xlu1 %v1528_v62, %s6477_s0 }
 0x1ad   : > { %v7529_v10 = vpop.permute.xlu2 %1096  ;;  %v7531_v9 = vpop.permute.xlu0 %1024  ;;  %v7565_v16 = vsel %vm259_vm2, %v333_v13, %v336_v8  ;;  %v1669_v13 = vstv %s6014_s23  ;;  %s6042_s23 = sld [smem:[#allocation6 + $0x86]] }
 0x1ae   : > { %11007 = vst [vmem:[#allocation21_spill] sm:$0xff] %v7529_v10  ;;  %v7536_v15 = vpop.permute.xlu1 %986  ;;  %v1642_v2 = vmul.f32 %v1641_v63, %v7565_v16  ;;  %v1628_v62 = vmul.f32 %v1627_v42, %v7565_v16  ;;  %v1684_v8 = vmul.f32 %v1683_v38, %v7565_v16  ;;  %v1670_v29 = vmul.f32 %v1669_v13, %v7565_v16 }
 0x1af   : > { %11009 = vst [vmem:[#allocation16_spill] sm:$0xff] %v7536_v15  ;;  %v1656_v63 = vmul.f32 %v1655_v3, %v7565_v16  ;;  %v1870_v10 = vstv %s6026_s7  ;;  %s7889_s7 = sld [smem:[#allocation6 + $0x89]] }
 0x1b3   : > { %1596 = vrot.lane.b32.xlu2 %v1593_v41, %s6477_s0  ;;  %1575 = vrot.lane.b32.xlu0 %v1572_v21, %s6477_s0  ;;  %v1629_v41 = vmul.f32 %v1627_v42, %v7580_v49 }
 0x1b4   : > { %1554 = vrot.lane.b32.xlu1 %v1551_v23, %s6477_s0 }
 0x1b5   : > { %v7554_v52 = vpop.permute.xlu2 %1122  ;;  %v7556_v30 = vpop.permute.xlu0 %1040 }
 0x1b6   : > { %11010 = vst [vmem:[#allocation22_spill] sm:$0xff] %v7554_v52  ;;  %v7558_v43 = vpop.permute.xlu1 %1026 }
 0x1b7   : > { %11011 = vst [vmem:[#allocation23_spill] sm:$0xff] %v7556_v30 }
 0x1bb   : > { %1646 = vrot.lane.b32.xlu2 %v1642_v2, %s10994_s21  ;;  %1632 = vrot.lane.b32.xlu0 %v1628_v62, %s10994_s21 }
 0x1bc   : > { %1594 = vrot.lane.b32.xlu1 %v1591_v7, %s6477_s0  ;;  %v1697_v7 = vstv %s7597_s26  ;;  %s7815_s26 = sld [smem:[#allocation6 + $0x40]] }
 0x1bd   : > { %v7575_v0 = vpop.permute.xlu2 %1213  ;;  %v7577_v56 = vpop.permute.xlu0 %1066  ;;  %v1699_v3 = vmul.f32 %v1697_v7, %v7580_v49 }
 0x1be   : > { %11012 = vst [vmem:[#allocation24_spill] sm:$0xff] %v7577_v56  ;;  %v7582_v59 = vpop.permute.xlu1 %1052 }
 0x1bf   : > { %11013 = vst [vmem:[#allocation25_spill] sm:$0xff] %v7582_v59 }
 0x1c3   : > { %1662 = vrot.lane.b32.xlu2 %v1657_v48, %s10994_s21  ;;  %1648 = vrot.lane.b32.xlu0 %v1643_v11, %s10994_s21  ;;  %v1685_v48 = vmul.f32 %v1683_v38, %v7580_v49  ;;  %v1671_v11 = vmul.f32 %v1669_v13, %v7580_v49  ;;  %v1807_v38 = vstv %s6023_s30  ;;  %v1725_v13 = vstv %s7612_s6  ;;  %s7817_s6 = sld [smem:[#allocation6 + $0x1c]] }
 0x1c4   : > { %1634 = vrot.lane.b32.xlu1 %v1629_v41, %s10994_s21  ;;  %v342_v41 = vrot.slane %v331_v50, 5  ;;  %v1711_v50 = vstv %s7614_s4  ;;  %v1809_v52 = vmul.f32 %v1807_v38, %v7580_v49  ;;  %s7837_s30 = sld [smem:[#allocation6 + $0x64]] }
 0x1c5   : > { %v7591_v21 = vpop.permute.xlu2 %1253  ;;  %v7593_v23 = vpop.permute.xlu0 %1082  ;;  %v1713_v4 = vmul.f32 %v1711_v50, %v7580_v49  ;;  %s6051_s4 = sld [smem:[#allocation6 + $0x1d]] }
 0x1c6   : > { %11014 = vst [vmem:[#allocation26_spill] sm:$0xff] %v7591_v21  ;;  %v7595_v36 = vpop.permute.xlu1 %1068  ;;  %v1815_v56 = vrot.slane %v1809_v52, 1  ;;  %v1808_v52 = vmul.f32 %v1807_v38, %v7565_v16 }
 0x1c7   : > { %11015 = vst [vmem:[#allocation27_spill] sm:$0xff] %v7595_v36 }
 0x1c8   : > { %v1814_v47 = vrot.slane %v1808_v52, 1 }
 0x1cb   : > { %1688 = vrot.lane.b32.xlu2 %v1684_v8, %s6477_s0  ;;  %1674 = vrot.lane.b32.xlu0 %v1670_v29, %s10994_s21 }
 0x1cc   : > { %1660 = vrot.lane.b32.xlu1 %v1656_v63, %s10994_s21 }
 0x1cd   : > { %v7605_v42 = vpop.permute.xlu2 %1276  ;;  %v7607_v2 = vpop.permute.xlu0 %1108 }
 0x1ce   : > { %11016 = vst [vmem:[#allocation28_spill] sm:$0xff] %v7605_v42  ;;  %v7609_v62 = vpop.permute.xlu1 %1094  ;;  %v7629_v42 = vsel %vm259_vm2, %v337_v24, %v342_v41 }
 0x1cf   : > { %11017 = vst [vmem:[#allocation29_spill] sm:$0xff] %v7607_v2 }
 0x1d0   : > { %11018 = vst [vmem:[#allocation30_spill] sm:$0xff] %v7609_v62 }
 0x1d3   : > { %1704 = vrot.lane.b32.xlu2 %v1699_v3, %s6477_s0  ;;  %1690 = vrot.lane.b32.xlu0 %v1685_v48, %s6477_s0  ;;  %v1726_v3 = vmul.f32 %v1725_v13, %v7565_v16  ;;  %v1712_v48 = vmul.f32 %v1711_v50, %v7565_v16 }
 0x1d4   : > { %1676 = vrot.lane.b32.xlu1 %v1671_v11, %s10994_s21  ;;  %v1698_v11 = vmul.f32 %v1697_v7, %v7565_v16  ;;  %v1828_v7 = vstv %s6024_s5  ;;  %s7874_s5 = sld [smem:[#allocation6 + $0x41]] }
 0x1d5   : > { %v7622_v8 = vpop.permute.xlu2 %1316  ;;  %v7624_v29 = vpop.permute.xlu0 %1124  ;;  %v1830_v15 = vmul.f32 %v1828_v7, %v7580_v49 }
 0x1d6   : > { %11019 = vst [vmem:[#allocation31_spill] sm:$0xff] %v7622_v8  ;;  %v7626_v63 = vpop.permute.xlu1 %1110  ;;  %v1727_v8 = vmul.f32 %v1725_v13, %v7580_v49 }
 0x1d7   : > { %11020 = vst [vmem:[#allocation32_spill] sm:$0xff] %v7624_v29  ;;  %v1810_v29 = vmul.f32 %v1807_v38, %v7629_v42  ;;  %v1836_v59 = vrot.slane %v1830_v15, 1  ;;  %v1873_v38 = vmul.f32 %v1870_v10, %v7629_v42  ;;  %v1816_v15 = vsel %vm528_vm3, %v1814_v47, %v1815_v56 }
 0x1d8   : > { %11021 = vst [vmem:[#allocation33_spill] sm:$0xff] %v7626_v63  ;;  %v1849_v63 = vstv %s6025_s29  ;;  %s6050_s29 = sld [smem:[#allocation6 + $0x88]] }
 0x1d9   : > { %v1817_v21 = vrot.slane %v1810_v29, 1 }
 0x1db   : > { %1730 = vrot.lane.b32.xlu2 %v1726_v3, %s6477_s0  ;;  %1716 = vrot.lane.b32.xlu0 %v1712_v48, %s6477_s0  ;;  %v1850_v3 = vmul.f32 %v1849_v63, %v7565_v16  ;;  %v1818_v48 = vsel %vm528_vm3, %v1815_v56, %v1817_v21 }
 0x1dc   : > { %1702 = vrot.lane.b32.xlu1 %v1698_v11, %s6477_s0  ;;  %v1851_v11 = vmul.f32 %v1849_v63, %v7580_v49 }
 0x1dd   : > { %v7641_v24 = vpop.permute.xlu2 %1339  ;;  %v7643_v41 = vpop.permute.xlu0 %1232  ;;  %v1856_v50 = vrot.slane %v1850_v3, 1 }
 0x1de   : > { %11022 = vst [vmem:[#allocation34_spill] sm:$0xff] %v7641_v24  ;;  %v7645_v36 = vpop.permute.xlu1 %1211  ;;  %v1829_v24 = vmul.f32 %v1828_v7, %v7565_v16 }
 0x1df   : > { %11023 = vst [vmem:[#allocation35_spill] sm:$0xff] %v7643_v41  ;;  %v1857_v41 = vrot.slane %v1851_v11, 1 }
 0x1e0   : > { %11024 = vst [vmem:[#allocation36_spill] sm:$0xff] %v7645_v36  ;;  %v1835_v2 = vrot.slane %v1829_v24, 1  ;;  %v1831_v24 = vmul.f32 %v1828_v7, %v7629_v42  ;;  %v1933_v36 = vstv %s6029_s8  ;;  %s6061_s8 = sld [smem:[#allocation6 + $0x67]] }
 0x1e3   : > { %1821 = vrot.lane.b32.xlu2 %v1818_v48, %s10994_s21  ;;  %1732 = vrot.lane.b32.xlu0 %v1727_v8, %s6477_s0  ;;  %v1872_v8 = vmul.f32 %v1870_v10, %v7580_v49  ;;  %v1837_v48 = vsel %vm528_vm3, %v1835_v2, %v1836_v59 }
 0x1e4   : > { %1718 = vrot.lane.b32.xlu1 %v1713_v4, %s6477_s0  ;;  %v1858_v4 = vsel %vm528_vm3, %v1856_v50, %v1857_v41  ;;  %v1880_v50 = vrot.slane %v1873_v38, 1  ;;  %v1871_v38 = vmul.f32 %v1870_v10, %v7565_v16  ;;  %v1936_v10 = vmul.f32 %v1933_v36, %v7629_v42 }
 0x1e5   : > { %v7658_v29 = vpop.permute.xlu2 %1447  ;;  %v7660_v13 = vpop.permute.xlu0 %1255  ;;  %v1878_v52 = vrot.slane %v1872_v8, 1 }
 0x1e6   : > { %11025 = vst [vmem:[#allocation37_spill] sm:$0xff] %v7658_v29  ;;  %v7662_v21 = vpop.permute.xlu1 %1234 }
 0x1e7   : > { %11026 = vst [vmem:[#allocation38_spill] sm:$0xff] %v7660_v13  ;;  %v1852_v13 = vmul.f32 %v1849_v63, %v7629_v42  ;;  %v1912_v63 = vstv %s6028_s9  ;;  %s6059_s9 = sld [smem:[#allocation6 + $0x1f]] }
 0x1e8   : > { %11027 = vst [vmem:[#allocation39_spill] sm:$0xff] %v7662_v21  ;;  %v1891_v21 = vstv %s6027_s11  ;;  %v1913_v47 = vmul.f32 %v1912_v63, %v7565_v16  ;;  %v1914_v7 = vmul.f32 %v1912_v63, %v7580_v49  ;;  %s7891_s11 = sld [smem:[#allocation6 + $0x65]] }
 0x1e9   : > { %v1859_v2 = vrot.slane %v1852_v13, 1  ;;  %v1893_v8 = vmul.f32 %v1891_v21, %v7580_v49 }
 0x1eb   : > { %1861 = vrot.lane.b32.xlu2 %v1858_v4, %s10994_s21  ;;  %1840 = vrot.lane.b32.xlu0 %v1837_v48, %s10994_s21  ;;  %v1838_v4 = vrot.slane %v1831_v24, 1  ;;  %v1881_v48 = vsel %vm528_vm3, %v1878_v52, %v1880_v50  ;;  %v1860_v56 = vsel %vm528_vm3, %v1857_v41, %v1859_v2  ;;  %v1919_v41 = vrot.slane %v1913_v47, 1 }
 0x1ec   : > { %1819 = vrot.lane.b32.xlu1 %v1816_v15, %s10994_s21  ;;  %v1892_v15 = vmul.f32 %v1891_v21, %v7565_v16 }
 0x1ed   : > { %v7674_v3 = vpop.permute.xlu2 %1470  ;;  %v7676_v11 = vpop.permute.xlu0 %1295  ;;  %v1839_v13 = vsel %vm528_vm3, %v1836_v59, %v1838_v4  ;;  %v1935_v59 = vmul.f32 %v1933_v36, %v7580_v49 }
 0x1ee   : > { %11028 = vst [vmem:[#allocation40_spill] sm:$0xff] %v7674_v3  ;;  %v7678_v29 = vpop.permute.xlu1 %1274  ;;  %v1898_v3 = vrot.slane %v1892_v15, 1 }
 0x1ef   : > { %11029 = vst [vmem:[#allocation41_spill] sm:$0xff] %v7676_v11  ;;  %v1899_v11 = vrot.slane %v1893_v8, 1 }
 0x1f0   : > { %11030 = vst [vmem:[#allocation42_spill] sm:$0xff] %v7678_v29  ;;  %v1920_v29 = vrot.slane %v1914_v7, 1  ;;  %v1894_v7 = vmul.f32 %v1891_v21, %v7629_v42 }
 0x1f2   : > { %v1921_v4 = vsel %vm528_vm3, %v1919_v41, %v1920_v29  ;;  %v1943_v41 = vrot.slane %v1936_v10, 1 }
 0x1f3   : > { %1884 = vrot.lane.b32.xlu2 %v1881_v48, %s10994_s21  ;;  %1863 = vrot.lane.b32.xlu0 %v1860_v56, %s10994_s21  ;;  %v1877_v48 = vrot.slane %v1871_v38, 1  ;;  %v1900_v56 = vsel %vm528_vm3, %v1898_v3, %v1899_v11  ;;  %v1941_v38 = vrot.slane %v1935_v59, 1 }
 0x1f4   : > { %1842 = vrot.lane.b32.xlu1 %v1839_v13, %s10994_s21  ;;  %v1915_v13 = vmul.f32 %v1912_v63, %v7629_v42  ;;  %v2043_v63 = vstv %s6035_s10  ;;  %s6060_s10 = sld [smem:[#allocation6 + $0x43]] }
 0x1f5   : > { %v7691_v24 = vpop.permute.xlu2 %1510  ;;  %v7693_v50 = vpop.permute.xlu0 %1318  ;;  %v1879_v47 = vsel %vm528_vm3, %v1877_v48, %v1878_v52  ;;  %v2044_v52 = vmul.f32 %v2043_v63, %v7565_v16  ;;  %v2045_v48 = vmul.f32 %v2043_v63, %v7580_v49 }
 0x1f6   : > { %11031 = vst [vmem:[#allocation43_spill] sm:$0xff] %v7691_v24  ;;  %v7695_v2 = vpop.permute.xlu1 %1297  ;;  %v1922_v3 = vrot.slane %v1915_v13, 1  ;;  %v1934_v13 = vmul.f32 %v1933_v36, %v7565_v16  ;;  %v2067_v36 = vmul.f32 %v2064_v45, %v7629_v42 }
 0x1f7   : > { %11032 = vst [vmem:[#allocation44_spill] sm:$0xff] %v7693_v50  ;;  %v1954_v50 = vstv %s6030_s1  ;;  %s6062_s1 = sld [smem:[#allocation6 + $0x8b]] }
 0x1f8   : > { %v1923_v21 = vsel %vm528_vm3, %v1920_v29, %v1922_v3  ;;  %v1956_v59 = vmul.f32 %v1954_v50, %v7580_v49  ;;  %v2050_v29 = vrot.slane %v2044_v52, 2 }
 0x1fa   : > { %v1962_v62 = vrot.slane %v1956_v59, 1 }
 0x1fb   : > { %1924 = vrot.lane.b32.xlu2 %v1921_v4, %s6477_s0  ;;  %1903 = vrot.lane.b32.xlu0 %v1900_v56, %s6477_s0  ;;  %v1901_v4 = vrot.slane %v1894_v7, 1  ;;  %v1944_v56 = vsel %vm528_vm3, %v1941_v38, %v1943_v41 }
 0x1fc   : > { %1882 = vrot.lane.b32.xlu1 %v1879_v47, %s10994_s21  ;;  %v1955_v47 = vmul.f32 %v1954_v50, %v7565_v16 }
 0x1fd   : > { %v7707_v15 = vpop.permute.xlu2 %1533  ;;  %v7709_v8 = vpop.permute.xlu0 %1358  ;;  %v1902_v10 = vsel %vm528_vm3, %v1899_v11, %v1901_v4  ;;  %v2066_v11 = vmul.f32 %v2064_v45, %v7580_v49 }
 0x1fe   : > { %11033 = vst [vmem:[#allocation45_spill] sm:$0xff] %v7709_v8  ;;  %v7711_v24 = vpop.permute.xlu1 %1337  ;;  %v2051_v8 = vrot.slane %v2045_v48, 2  ;;  %v1957_v48 = vmul.f32 %v1954_v50, %v7629_v42 }
 0x1ff   : > { %11034 = vst [vmem:[#allocation46_spill] sm:$0xff] %v7711_v24  ;;  %v1961_v24 = vrot.slane %v1955_v47, 1 }
 0x200   : > { %v2052_v4 = vsel %vm765_vm4, %v2050_v29, %v2051_v8  ;;  %v2074_v29 = vrot.slane %v2067_v36, 2 }
 0x203   : > { %1947 = vrot.lane.b32.xlu2 %v1944_v56, %s6477_s0  ;;  %1926 = vrot.lane.b32.xlu0 %v1923_v21, %s6477_s0  ;;  %v1940_v56 = vrot.slane %v1934_v13, 1  ;;  %v1963_v21 = vsel %vm528_vm3, %v1961_v24, %v1962_v62  ;;  %v2072_v13 = vrot.slane %v2066_v11, 2 }
 0x204   : > { %1905 = vrot.lane.b32.xlu1 %v1902_v10, %s6477_s0  ;;  %v2046_v10 = vmul.f32 %v2043_v63, %v7629_v42  ;;  %v2106_v63 = vstv %s6038_s28  ;;  %s6063_s28 = sld [smem:[#allocation6 + $0x20]] }
 0x205   : > { %v7724_v7 = vpop.permute.xlu2 %1573  ;;  %v7726_v41 = vpop.permute.xlu0 %1449  ;;  %v1942_v52 = vsel %vm528_vm3, %v1940_v56, %v1941_v38  ;;  %v2107_v38 = vmul.f32 %v2106_v63, %v7565_v16  ;;  %v2108_v56 = vmul.f32 %v2106_v63, %v7580_v49 }
 0x206   : > { %11035 = vst [vmem:[#allocation47_spill] sm:$0xff] %v7724_v7  ;;  %v7728_v3 = vpop.permute.xlu1 %1360  ;;  %v2053_v24 = vrot.slane %v2046_v10, 2  ;;  %v2085_v7 = vstv %s6037_s22  ;;  %v2065_v10 = vmul.f32 %v2064_v45, %v7565_v16  ;;  %v2130_v45 = vmul.f32 %v2127_v35, %v7629_v42  ;;  %s6065_s22 = sld [smem:[#allocation6 + $0x68]] }
 0x207   : > { %11036 = vst [vmem:[#allocation48_spill] sm:$0xff] %v7728_v3  ;;  %v2087_v11 = vmul.f32 %v2085_v7, %v7580_v49 }
 0x208   : > { %v2054_v50 = vsel %vm765_vm4, %v2051_v8, %v2053_v24  ;;  %v2113_v8 = vrot.slane %v2107_v38, 2 }
 0x20b   : > { %2055 = vrot.lane.b32.xlu2 %v2052_v4, %s10994_s21  ;;  %1966 = vrot.lane.b32.xlu0 %v1963_v21, %s6477_s0  ;;  %v1964_v4 = vrot.slane %v1957_v48, 1  ;;  %v2075_v21 = vsel %vm765_vm4, %v2072_v13, %v2074_v29 }
 0x20c   : > { %1945 = vrot.lane.b32.xlu1 %v1942_v52, %s6477_s0  ;;  %v2086_v52 = vmul.f32 %v2085_v7, %v7565_v16 }
 0x20d   : > { %v7740_v47 = vpop.permute.xlu2 %1596  ;;  %v7742_v59 = vpop.permute.xlu0 %1489  ;;  %v1965_v36 = vsel %vm528_vm3, %v1962_v62, %v1964_v4  ;;  %v2129_v62 = vmul.f32 %v2127_v35, %v7580_v49 }
 0x20e   : > { %11037 = vst [vmem:[#allocation49_spill] sm:$0xff] %v7740_v47  ;;  %v7744_v3 = vpop.permute.xlu1 %1468  ;;  %v2114_v47 = vrot.slane %v2108_v56, 2  ;;  %v2088_v56 = vmul.f32 %v2085_v7, %v7629_v42 }
 0x20f   : > { %11038 = vst [vmem:[#allocation50_spill] sm:$0xff] %v7742_v59  ;;  %v2092_v59 = vrot.slane %v2086_v52, 2 }
 0x210   : > { %11039 = vst [vmem:[#allocation51_spill] sm:$0xff] %v7744_v3  ;;  %v2093_v3 = vrot.slane %v2087_v11, 2  ;;  %v2115_v4 = vsel %vm765_vm4, %v2113_v8, %v2114_v47  ;;  %v2137_v8 = vrot.slane %v2130_v45, 2 }
 0x213   : > { %2078 = vrot.lane.b32.xlu2 %v2075_v21, %s10994_s21  ;;  %2057 = vrot.lane.b32.xlu0 %v2054_v50, %s10994_s21  ;;  %v2071_v21 = vrot.slane %v2065_v10, 2  ;;  %v2094_v50 = vsel %vm765_vm4, %v2092_v59, %v2093_v3  ;;  %v2135_v10 = vrot.slane %v2129_v62, 2 }
 0x214   : > { %1968 = vrot.lane.b32.xlu1 %v1965_v36, %s6477_s0  ;;  %v2109_v36 = vmul.f32 %v2106_v63, %v7629_v42  ;;  %v2169_v63 = vstv %s6041_s14  ;;  %s6066_s14 = sld [smem:[#allocation6 + $0x8c]] }
 0x215   : > { %v7757_v48 = vpop.permute.xlu2 %1646  ;;  %v7759_v29 = vpop.permute.xlu0 %1512  ;;  %v2073_v38 = vsel %vm765_vm4, %v2071_v21, %v2072_v13  ;;  %v2170_v13 = vmul.f32 %v2169_v63, %v7565_v16  ;;  %v2171_v21 = vmul.f32 %v2169_v63, %v7580_v49 }
 0x216   : > { %11040 = vst [vmem:[#allocation52_spill] sm:$0xff] %v7757_v48  ;;  %v7761_v24 = vpop.permute.xlu1 %1491  ;;  %v2116_v59 = vrot.slane %v2109_v36, 2  ;;  %v2128_v36 = vmul.f32 %v2127_v35, %v7565_v16 }
 0x217   : > { %11041 = vst [vmem:[#allocation53_spill] sm:$0xff] %v7759_v29 }
 0x218   : > { %11042 = vst [vmem:[#allocation54_spill] sm:$0xff] %v7761_v24  ;;  %v2148_v24 = vstv %s6040_s19  ;;  %v2117_v7 = vsel %vm765_vm4, %v2114_v47, %v2116_v59  ;;  %v2176_v47 = vrot.slane %v2170_v13, 2  ;;  %s6072_s19 = sld [smem:[#allocation6 + $0x46]] }
 0x219   : > { %v2150_v62 = vmul.f32 %v2148_v24, %v7580_v49 }
 0x21b   : > { %2118 = vrot.lane.b32.xlu2 %v2115_v4, %s10994_s21  ;;  %2097 = vrot.lane.b32.xlu0 %v2094_v50, %s10994_s21  ;;  %v2095_v4 = vrot.slane %v2088_v56, 2  ;;  %v2138_v50 = vsel %vm765_vm4, %v2135_v10, %v2137_v8 }
 0x21c   : > { %2076 = vrot.lane.b32.xlu1 %v2073_v38, %s10994_s21  ;;  %v2149_v38 = vmul.f32 %v2148_v24, %v7565_v16 }
 0x21d   : > { %v7773_v52 = vpop.permute.xlu2 %1662  ;;  %v7775_v11 = vpop.permute.xlu0 %1552  ;;  %v2096_v45 = vsel %vm765_vm4, %v2093_v3, %v2095_v4 }
 0x21e   : > { %11043 = vst [vmem:[#allocation55_spill] sm:$0xff] %v7773_v52  ;;  %v7777_v29 = vpop.permute.xlu1 %1531  ;;  %v2177_v52 = vrot.slane %v2171_v21, 2  ;;  %v2155_v48 = vrot.slane %v2149_v38, 2  ;;  %v2151_v21 = vmul.f32 %v2148_v24, %v7629_v42 }
 0x21f   : > { %11044 = vst [vmem:[#allocation56_spill] sm:$0xff] %v7775_v11  ;;  %v2156_v11 = vrot.slane %v2150_v62, 2 }
 0x220   : > { %11045 = vst [vmem:[#allocation57_spill] sm:$0xff] %v7777_v29  ;;  %v2190_v29 = vstv %s6042_s23  ;;  %v2178_v3 = vsel %vm765_vm4, %v2176_v47, %v2177_v52  ;;  %s6074_s23 = sld [smem:[#allocation6 + $0x8e]] }
 0x221   : > { %v2157_v35 = vsel %vm765_vm4, %v2155_v48, %v2156_v11  ;;  %v2193_v4 = vmul.f32 %v2190_v29, %v7629_v42  ;;  %v366_v48 = vsel %vm249_vm0, %v7186_v28, %v7143_v32  ;;  %v2191_v28 = vmul.f32 %v2190_v29, %v7565_v16 }
 0x222   : > { %v368_v24 = vsel %vm252_vm1, %v366_v48, %v7219_v25 }
 0x223   : > { %2141 = vrot.lane.b32.xlu2 %v2138_v50, %s6477_s0  ;;  %2120 = vrot.lane.b32.xlu0 %v2117_v7, %s10994_s21  ;;  %v2134_v50 = vrot.slane %v2128_v36, 2  ;;  %v2192_v7 = vmul.f32 %v2190_v29, %v7580_v49  ;;  %v2200_v47 = vrot.slane %v2193_v4, 2  ;;  %v371_v4 = vrot.slane %v368_v24, 1 }
 0x224   : > { %2099 = vrot.lane.b32.xlu1 %v2096_v45, %s10994_s21  ;;  %v2172_v45 = vmul.f32 %v2169_v63, %v7629_v42  ;;  %v374_v25 = vrot.slane %v368_v24, 7  ;;  %v2197_v29 = vrot.slane %v2191_v28, 2 }
 0x225   : > { %v7790_v56 = vpop.permute.xlu2 %1688  ;;  %v7792_v8 = vpop.permute.xlu0 %1575  ;;  %v2136_v13 = vsel %vm765_vm4, %v2134_v50, %v2135_v10  ;;  %v2198_v63 = vrot.slane %v2192_v7, 2  ;;  %v367_v7 = vsel %vm249_vm0, %v7204_v33, %v7202_v60  ;;  %v2249_v60 = vstv %s7815_s26  ;;  %s6073_s26 = sld [smem:[#allocation6 + $0x6a]] }
 0x226   : > { %11046 = vst [vmem:[#allocation58_spill] sm:$0xff] %v7790_v56  ;;  %v7794_v59 = vpop.permute.xlu1 %1554  ;;  %v2235_v33 = vstv %s7817_s6  ;;  %s6075_s6 = sld [smem:[#allocation6 + $0x23]] }
 0x227   : > { %11047 = vst [vmem:[#allocation59_spill] sm:$0xff] %v7792_v8  ;;  %v2201_v10 = vsel %vm765_vm4, %v2198_v63, %v2200_v47 }
 0x228   : > { %11048 = vst [vmem:[#allocation60_spill] sm:$0xff] %v7794_v59  ;;  %v2478_v59 = vstv %s6062_s1  ;;  %s8098_s1 = sld [smem:[#allocation6 + $0x75]] }
 0x22b   : > { %2181 = vrot.lane.b32.xlu2 %v2178_v3, %s6477_s0  ;;  %2160 = vrot.lane.b32.xlu0 %v2157_v35, %s6477_s0  ;;  %v2179_v3 = vrot.slane %v2172_v45, 2  ;;  %v2158_v35 = vrot.slane %v2151_v21, 2  ;;  %v7842_v21 = vsel %vm259_vm2, %v371_v4, %v374_v25 }
 0x22c   : > { %2139 = vrot.lane.b32.xlu1 %v2136_v13, %s6477_s0  ;;  %11055 = vst [vmem:[#allocation67_spill] sm:$0xff] %v7842_v21  ;;  %v2250_v48 = vmul.f32 %v2249_v60, %v7842_v21  ;;  %v2236_v47 = vmul.f32 %v2235_v33, %v7842_v21 }
 0x22d   : > { %v7806_v38 = vpop.permute.xlu2 %1704  ;;  %v7808_v62 = vpop.permute.xlu0 %1632  ;;  %v2180_v50 = vsel %vm765_vm4, %v2177_v52, %v2179_v3  ;;  %v2159_v32 = vsel %vm765_vm4, %v2156_v11, %v2158_v35  ;;  %v369_v11 = vsel %vm252_vm1, %v367_v7, %v7163_v20  ;;  %v2199_v35 = vsel %vm765_vm4, %v2197_v29, %v2198_v63 }
 0x22e   : > { %11049 = vst [vmem:[#allocation61_spill] sm:$0xff] %v7806_v38  ;;  %v7813_v36 = vpop.permute.xlu1 %1594  ;;  %v375_v3 = vrot.slane %v369_v11, 7 }
 0x22f   : > { %11050 = vst [vmem:[#allocation62_spill] sm:$0xff] %v7808_v62  ;;  %v2541_v62 = vstv %s6065_s22  ;;  %s8128_s22 = sld [smem:[#allocation6 + $0x33]] }
 0x230   : > { %11051 = vst [vmem:[#allocation63_spill] sm:$0xff] %v7813_v36 }
 0x233   : > { %2204 = vrot.lane.b32.xlu2 %v2201_v10, %s6477_s0  ;;  %2183 = vrot.lane.b32.xlu0 %v2180_v50, %s6477_s0  ;;  %v7857_v10 = vsel %vm259_vm2, %v374_v25, %v375_v3 }
 0x234   : > { %2162 = vrot.lane.b32.xlu1 %v2159_v32, %s6477_s0  ;;  %11058 = vst [vmem:[#allocation70_spill] sm:$0xff] %v7857_v10  ;;  %v2263_v32 = vstv %s7837_s30  ;;  %v2251_v28 = vmul.f32 %v2249_v60, %v7857_v10  ;;  %v2237_v7 = vmul.f32 %v2235_v33, %v7857_v10  ;;  %s6077_s30 = sld [smem:[#allocation6 + $0x6b]] }
 0x235   : > { %v7831_v45 = vpop.permute.xlu2 %1730  ;;  %v7833_v52 = vpop.permute.xlu0 %1648  ;;  %v2265_v63 = vmul.f32 %v2263_v32, %v7857_v10 }
 0x236   : > { %11052 = vst [vmem:[#allocation64_spill] sm:$0xff] %v7831_v45  ;;  %v7835_v13 = vpop.permute.xlu1 %1634 }
 0x237   : > { %11053 = vst [vmem:[#allocation65_spill] sm:$0xff] %v7833_v52 }
 0x238   : > { %11054 = vst [vmem:[#allocation66_spill] sm:$0xff] %v7835_v13 }
 0x23b   : > { %2254 = vrot.lane.b32.xlu2 %v2250_v48, %s10994_s21  ;;  %2240 = vrot.lane.b32.xlu0 %v2236_v47, %s10994_s21  ;;  %v2291_v48 = vstv %s6051_s4  ;;  %v2277_v47 = vstv %s6050_s29  ;;  %s6076_s4 = sld [smem:[#allocation6 + $0x47]] }
 0x23c   : > { %2202 = vrot.lane.b32.xlu1 %v2199_v35, %s6477_s0  ;;  %v2292_v60 = vmul.f32 %v2291_v48, %v7842_v21  ;;  %v2278_v33 = vmul.f32 %v2277_v47, %v7842_v21  ;;  %v2264_v35 = vmul.f32 %v2263_v32, %v7842_v21  ;;  %s6078_s29 = sld [smem:[#allocation6 + $0x8f]] }
 0x23d   : > { %v7852_v20 = vpop.permute.xlu2 %1821  ;;  %v7854_v24 = vpop.permute.xlu0 %1674 }
 0x23e   : > { %11056 = vst [vmem:[#allocation68_spill] sm:$0xff] %v7852_v20  ;;  %v7859_v50 = vpop.permute.xlu1 %1660 }
 0x23f   : > { %11057 = vst [vmem:[#allocation69_spill] sm:$0xff] %v7854_v24 }
 0x240   : > { %11059 = vst [vmem:[#allocation71_spill] sm:$0xff] %v7859_v50  ;;  %v2457_v50 = vstv %s6061_s8  ;;  %s8087_s8 = sld [smem:[#allocation6 + $0x9]] }
 0x241   : > { %v2458_v8 = vmul.f32 %v2457_v50, %v7842_v21 }
 0x243   : > { %2270 = vrot.lane.b32.xlu2 %v2265_v63, %s10994_s21  ;;  %2256 = vrot.lane.b32.xlu0 %v2251_v28, %s10994_s21 }
 0x244   : > { %2242 = vrot.lane.b32.xlu1 %v2237_v7, %s10994_s21 }
 0x245   : > { %v7868_v4 = vpop.permute.xlu2 %1861  ;;  %v7870_v25 = vpop.permute.xlu0 %1690 }
 0x246   : > { %11060 = vst [vmem:[#allocation72_spill] sm:$0xff] %v7868_v4  ;;  %v7872_v29 = vpop.permute.xlu1 %1676 }
 0x247   : > { %11061 = vst [vmem:[#allocation73_spill] sm:$0xff] %v7870_v25 }
 0x248   : > { %11062 = vst [vmem:[#allocation74_spill] sm:$0xff] %v7872_v29  ;;  %v2305_v29 = vstv %s7874_s5  ;;  %s8073_s5 = sld [smem:[#allocation6 + $0x51]] }
 0x249   : > { %v2307_v32 = vmul.f32 %v2305_v29, %v7857_v10 }
 0x24b   : > { %2296 = vrot.lane.b32.xlu2 %v2292_v60, %s6477_s0  ;;  %2282 = vrot.lane.b32.xlu0 %v2278_v33, %s10994_s21  ;;  %v2293_v60 = vmul.f32 %v2291_v48, %v7857_v10  ;;  %v2279_v33 = vmul.f32 %v2277_v47, %v7857_v10  ;;  %v2415_v48 = vstv %s6059_s9  ;;  %v2333_v47 = vstv %s7889_s7  ;;  %s5983_s7 = sld [smem:[#allocation6 + $0xc]] }
 0x24c   : > { %2268 = vrot.lane.b32.xlu1 %v2264_v35, %s10994_s21  ;;  %v380_v35 = vrot.slane %v369_v11, 5  ;;  %v2319_v11 = vstv %s7891_s11  ;;  %v2335_v38 = vmul.f32 %v2333_v47, %v7857_v10  ;;  %s5985_s9 = sld [smem:[#allocation6 + $0x54]] }
 0x24d   : > { %v7882_v63 = vpop.permute.xlu2 %1884  ;;  %v7884_v28 = vpop.permute.xlu0 %1716  ;;  %s5986_s11 = sld [smem:[#allocation6 + $0x78]] }
 0x24e   : > { %11063 = vst [vmem:[#allocation75_spill] sm:$0xff] %v7882_v63  ;;  %v7886_v7 = vpop.permute.xlu1 %1702  ;;  %v7906_v4 = vsel %vm259_vm2, %v375_v3, %v380_v35 }
 0x24f   : > { %11064 = vst [vmem:[#allocation76_spill] sm:$0xff] %v7884_v28 }
 0x250   : > { %11065 = vst [vmem:[#allocation77_spill] sm:$0xff] %v7886_v7 }
 0x251   : > { %11069 = vst [vmem:[#allocation81_spill] sm:$0xff] %v7906_v4 }
 0x253   : > { %2312 = vrot.lane.b32.xlu2 %v2307_v32, %s6477_s0  ;;  %2298 = vrot.lane.b32.xlu0 %v2293_v60, %s6477_s0  ;;  %v2334_v32 = vmul.f32 %v2333_v47, %v7842_v21  ;;  %v2320_v60 = vmul.f32 %v2319_v11, %v7842_v21 }
 0x254   : > { %2284 = vrot.lane.b32.xlu1 %v2279_v33, %s10994_s21  ;;  %v2306_v33 = vmul.f32 %v2305_v29, %v7842_v21  ;;  %v2436_v29 = vstv %s6060_s10  ;;  %s8096_s10 = sld [smem:[#allocation6 + $0x2d]] }
 0x255   : > { %v7899_v63 = vpop.permute.xlu2 %1924  ;;  %v7901_v45 = vpop.permute.xlu0 %1732 }
 0x256   : > { %11066 = vst [vmem:[#allocation78_spill] sm:$0xff] %v7899_v63  ;;  %v7903_v24 = vpop.permute.xlu1 %1718  ;;  %v2417_v63 = vmul.f32 %v2415_v48, %v7857_v10 }
 0x257   : > { %11067 = vst [vmem:[#allocation79_spill] sm:$0xff] %v7901_v45  ;;  %v2418_v45 = vmul.f32 %v2415_v48, %v7906_v4 }
 0x258   : > { %11068 = vst [vmem:[#allocation80_spill] sm:$0xff] %v7903_v24  ;;  %v2423_v36 = vrot.slane %v2417_v63, 1 }
 0x259   : > { %v2425_v28 = vrot.slane %v2418_v45, 1  ;;  %v2416_v45 = vmul.f32 %v2415_v48, %v7842_v21 }
 0x25b   : > { %2338 = vrot.lane.b32.xlu2 %v2334_v32, %s6477_s0  ;;  %2324 = vrot.lane.b32.xlu0 %v2320_v60, %s6477_s0  ;;  %v2459_v32 = vmul.f32 %v2457_v50, %v7857_v10  ;;  %v2426_v60 = vsel %vm528_vm3, %v2423_v36, %v2425_v28  ;;  %v2422_v56 = vrot.slane %v2416_v45, 1 }
 0x25c   : > { %2310 = vrot.lane.b32.xlu1 %v2306_v33, %s6477_s0  ;;  %v2321_v33 = vmul.f32 %v2319_v11, %v7857_v10 }
 0x25d   : > { %v7918_v3 = vpop.permute.xlu2 %1947  ;;  %v7920_v35 = vpop.permute.xlu0 %1840  ;;  %v2465_v28 = vrot.slane %v2459_v32, 1 }
 0x25e   : > { %11070 = vst [vmem:[#allocation82_spill] sm:$0xff] %v7918_v3  ;;  %v7922_v24 = vpop.permute.xlu1 %1819  ;;  %v2437_v3 = vmul.f32 %v2436_v29, %v7842_v21 }
 0x25f   : > { %11071 = vst [vmem:[#allocation83_spill] sm:$0xff] %v7920_v35  ;;  %v2438_v35 = vmul.f32 %v2436_v29, %v7857_v10 }
 0x260   : > { %11072 = vst [vmem:[#allocation84_spill] sm:$0xff] %v7922_v24  ;;  %v2464_v24 = vrot.slane %v2458_v8, 1  ;;  %v2443_v11 = vrot.slane %v2437_v3, 1  ;;  %v2424_v8 = vsel %vm528_vm3, %v2422_v56, %v2423_v36  ;;  %v2439_v3 = vmul.f32 %v2436_v29, %v7906_v4 }
 0x261   : > { %v2444_v52 = vrot.slane %v2438_v35, 1 }
 0x263   : > { %2429 = vrot.lane.b32.xlu2 %v2426_v60, %s10994_s21  ;;  %2340 = vrot.lane.b32.xlu0 %v2335_v38, %s6477_s0  ;;  %v2466_v38 = vsel %vm528_vm3, %v2464_v24, %v2465_v28  ;;  %v2445_v48 = vsel %vm528_vm3, %v2443_v11, %v2444_v52  ;;  %v2480_v60 = vmul.f32 %v2478_v59, %v7857_v10 }
 0x264   : > { %2326 = vrot.lane.b32.xlu1 %v2321_v33, %s6477_s0  ;;  %v2481_v33 = vmul.f32 %v2478_v59, %v7906_v4 }
 0x265   : > { %v7935_v63 = vpop.permute.xlu2 %2055  ;;  %v7937_v47 = vpop.permute.xlu0 %1863  ;;  %v2486_v45 = vrot.slane %v2480_v60, 1  ;;  %v2479_v60 = vmul.f32 %v2478_v59, %v7842_v21 }
 0x266   : > { %11073 = vst [vmem:[#allocation85_spill] sm:$0xff] %v7935_v63  ;;  %v7939_v7 = vpop.permute.xlu1 %1842  ;;  %v2488_v11 = vrot.slane %v2481_v33, 1 }
 0x267   : > { %11074 = vst [vmem:[#allocation86_spill] sm:$0xff] %v7937_v47  ;;  %v2460_v47 = vmul.f32 %v2457_v50, %v7906_v4  ;;  %v2520_v50 = vstv %s6064_s27  ;;  %s8100_s27 = sld [smem:[#allocation6 + $0x30]] }
 0x268   : > { %11075 = vst [vmem:[#allocation87_spill] sm:$0xff] %v7939_v7  ;;  %v2446_v7 = vrot.slane %v2439_v3, 1  ;;  %v2521_v56 = vmul.f32 %v2520_v50, %v7842_v21  ;;  %v2522_v36 = vmul.f32 %v2520_v50, %v7857_v10  ;;  %v2489_v29 = vsel %vm528_vm3, %v2486_v45, %v2488_v11 }
 0x269   : > { %v2467_v63 = vrot.slane %v2460_v47, 1 }
 0x26a   : > { %v2447_v47 = vsel %vm528_vm3, %v2444_v52, %v2446_v7  ;;  %v2527_v11 = vrot.slane %v2521_v56, 1  ;;  %v2543_v7 = vmul.f32 %v2541_v62, %v7857_v10 }
 0x26b   : > { %2469 = vrot.lane.b32.xlu2 %v2466_v38, %s10994_s21  ;;  %2448 = vrot.lane.b32.xlu0 %v2445_v48, %s10994_s21  ;;  %v2499_v38 = vstv %s6063_s28  ;;  %v2468_v48 = vsel %vm528_vm3, %v2465_v28, %v2467_v63  ;;  %v2528_v63 = vrot.slane %v2522_v36, 1  ;;  %s8116_s28 = sld [smem:[#allocation6 + $0xf]] }
 0x26c   : > { %2427 = vrot.lane.b32.xlu1 %v2424_v8, %s10994_s21  ;;  %v2500_v8 = vmul.f32 %v2499_v38, %v7842_v21 }
 0x26d   : > { %v7951_v35 = vpop.permute.xlu2 %2078  ;;  %v7953_v24 = vpop.permute.xlu0 %1903  ;;  %v2529_v52 = vsel %vm528_vm3, %v2527_v11, %v2528_v63 }
 0x26e   : > { %11076 = vst [vmem:[#allocation88_spill] sm:$0xff] %v7951_v35  ;;  %v7955_v32 = vpop.permute.xlu1 %1882  ;;  %v2501_v35 = vmul.f32 %v2499_v38, %v7857_v10 }
 0x26f   : > { %11077 = vst [vmem:[#allocation89_spill] sm:$0xff] %v7953_v24 }
 0x270   : > { %11078 = vst [vmem:[#allocation90_spill] sm:$0xff] %v7955_v32  ;;  %v2506_v32 = vrot.slane %v2500_v8, 1  ;;  %v2507_v24 = vrot.slane %v2501_v35, 1  ;;  %v2502_v35 = vmul.f32 %v2499_v38, %v7906_v4 }
 0x272   : > { %v2508_v59 = vsel %vm528_vm3, %v2506_v32, %v2507_v24 }
 0x273   : > { %2492 = vrot.lane.b32.xlu2 %v2489_v29, %s10994_s21  ;;  %2471 = vrot.lane.b32.xlu0 %v2468_v48, %s10994_s21  ;;  %v2485_v29 = vrot.slane %v2479_v60, 1  ;;  %v2544_v48 = vmul.f32 %v2541_v62, %v7906_v4  ;;  %v2549_v60 = vrot.slane %v2543_v7, 1 }
 0x274   : > { %2450 = vrot.lane.b32.xlu1 %v2447_v47, %s10994_s21  ;;  %v2523_v47 = vmul.f32 %v2520_v50, %v7906_v4  ;;  %v2651_v50 = vstv %s6071_s2  ;;  %s8137_s2 = sld [smem:[#allocation6 + $0x7b]] }
 0x275   : > { %v7968_v33 = vpop.permute.xlu2 %2118  ;;  %v7970_v3 = vpop.permute.xlu0 %1926  ;;  %v2487_v56 = vsel %vm528_vm3, %v2485_v29, %v2486_v45  ;;  %v2551_v11 = vrot.slane %v2544_v48, 1  ;;  %v2652_v45 = vmul.f32 %v2651_v50, %v7842_v21  ;;  %v2653_v29 = vmul.f32 %v2651_v50, %v7857_v10 }
 0x276   : > { %11079 = vst [vmem:[#allocation91_spill] sm:$0xff] %v7968_v33  ;;  %v7972_v28 = vpop.permute.xlu1 %1905  ;;  %v2530_v33 = vrot.slane %v2523_v47, 1  ;;  %v2542_v48 = vmul.f32 %v2541_v62, %v7842_v21 }
 0x277   : > { %11080 = vst [vmem:[#allocation92_spill] sm:$0xff] %v7970_v3  ;;  %v2509_v3 = vrot.slane %v2502_v35, 1  ;;  %v2552_v38 = vsel %vm528_vm3, %v2549_v60, %v2551_v11  ;;  %v2658_v11 = vrot.slane %v2652_v45, 2 }
 0x278   : > { %11081 = vst [vmem:[#allocation93_spill] sm:$0xff] %v7972_v28  ;;  %v2672_v28 = vstv %s6072_s19  ;;  %s8207_s19 = sld [smem:[#allocation6 + $0x36]] }
 0x279   : > { %v2510_v7 = vsel %vm528_vm3, %v2507_v24, %v2509_v3  ;;  %v2674_v3 = vmul.f32 %v2672_v28, %v7857_v10 }
 0x27b   : > { %2532 = vrot.lane.b32.xlu2 %v2529_v52, %s6477_s0  ;;  %2511 = vrot.lane.b32.xlu0 %v2508_v59, %s6477_s0  ;;  %v2562_v52 = vstv %s6066_s14  ;;  %v2531_v59 = vsel %vm528_vm3, %v2528_v63, %v2530_v33  ;;  %v2659_v33 = vrot.slane %v2653_v29, 2  ;;  %s8152_s14 = sld [smem:[#allocation6 + $0x57]] }
 0x27c   : > { %2490 = vrot.lane.b32.xlu1 %v2487_v56, %s10994_s21  ;;  %v2563_v56 = vmul.f32 %v2562_v52, %v7842_v21 }
 0x27d   : > { %v7984_v36 = vpop.permute.xlu2 %2141  ;;  %v7986_v8 = vpop.permute.xlu0 %1966  ;;  %v2660_v24 = vsel %vm765_vm4, %v2658_v11, %v2659_v33 }
 0x27e   : > { %11082 = vst [vmem:[#allocation94_spill] sm:$0xff] %v7984_v36  ;;  %v7988_v32 = vpop.permute.xlu1 %1945 }
 0x27f   : > { %11083 = vst [vmem:[#allocation95_spill] sm:$0xff] %v7986_v8  ;;  %v2564_v8 = vmul.f32 %v2562_v52, %v7857_v10 }
 0x280   : > { %11084 = vst [vmem:[#allocation96_spill] sm:$0xff] %v7988_v32  ;;  %v2569_v32 = vrot.slane %v2563_v56, 1 }
 0x281   : > { %v2570_v36 = vrot.slane %v2564_v8, 1  ;;  %v2565_v8 = vmul.f32 %v2562_v52, %v7906_v4 }
 0x283   : > { %2555 = vrot.lane.b32.xlu2 %v2552_v38, %s6477_s0  ;;  %2534 = vrot.lane.b32.xlu0 %v2531_v59, %s6477_s0  ;;  %v2548_v38 = vrot.slane %v2542_v48, 1  ;;  %v2571_v62 = vsel %vm528_vm3, %v2569_v32, %v2570_v36  ;;  %v2675_v59 = vmul.f32 %v2672_v28, %v7906_v4  ;;  %v2680_v48 = vrot.slane %v2674_v3, 2 }
 0x284   : > { %2513 = vrot.lane.b32.xlu1 %v2510_v7, %s6477_s0  ;;  %v2654_v7 = vmul.f32 %v2651_v50, %v7906_v4  ;;  %v2714_v50 = vstv %s6074_s23  ;;  %s8211_s23 = sld [smem:[#allocation6 + $0x5a]] }
 0x285   : > { %v8001_v47 = vpop.permute.xlu2 %2181  ;;  %v8003_v35 = vpop.permute.xlu0 %2057  ;;  %v2550_v45 = vsel %vm528_vm3, %v2548_v38, %v2549_v60  ;;  %v2682_v11 = vrot.slane %v2675_v59, 2  ;;  %v2715_v60 = vmul.f32 %v2714_v50, %v7842_v21  ;;  %v2716_v38 = vmul.f32 %v2714_v50, %v7857_v10 }
 0x286   : > { %11085 = vst [vmem:[#allocation97_spill] sm:$0xff] %v8001_v47  ;;  %v8005_v63 = vpop.permute.xlu1 %1968  ;;  %v2572_v47 = vrot.slane %v2565_v8, 1  ;;  %v2673_v59 = vmul.f32 %v2672_v28, %v7842_v21 }
 0x287   : > { %11086 = vst [vmem:[#allocation98_spill] sm:$0xff] %v8003_v35  ;;  %v2683_v52 = vsel %vm765_vm4, %v2680_v48, %v2682_v11  ;;  %v2721_v11 = vrot.slane %v2715_v60, 2  ;;  %v2735_v35 = vstv %s6075_s6  ;;  %s8219_s6 = sld [smem:[#allocation6 + $0x12]] }
 0x288   : > { %11087 = vst [vmem:[#allocation99_spill] sm:$0xff] %v8005_v63  ;;  %v2661_v63 = vrot.slane %v2654_v7, 2  ;;  %v2573_v3 = vsel %vm528_vm3, %v2570_v36, %v2572_v47  ;;  %v2737_v47 = vmul.f32 %v2735_v35, %v7857_v10 }
 0x28b   : > { %2663 = vrot.lane.b32.xlu2 %v2660_v24, %s10994_s21  ;;  %2574 = vrot.lane.b32.xlu0 %v2571_v62, %s6477_s0  ;;  %v2693_v24 = vstv %s6073_s26  ;;  %v2662_v62 = vsel %vm765_vm4, %v2659_v33, %v2661_v63  ;;  %v2722_v33 = vrot.slane %v2716_v38, 2  ;;  %s8215_s26 = sld [smem:[#allocation6 + $0x15]] }
 0x28c   : > { %2553 = vrot.lane.b32.xlu1 %v2550_v45, %s6477_s0  ;;  %v2694_v45 = vmul.f32 %v2693_v24, %v7842_v21 }
 0x28d   : > { %v8017_v29 = vpop.permute.xlu2 %2204  ;;  %v8019_v56 = vpop.permute.xlu0 %2097  ;;  %v2723_v36 = vsel %vm765_vm4, %v2721_v11, %v2722_v33 }
 0x28e   : > { %11088 = vst [vmem:[#allocation100_spill] sm:$0xff] %v8017_v29  ;;  %v8021_v32 = vpop.permute.xlu1 %2076  ;;  %v2695_v29 = vmul.f32 %v2693_v24, %v7857_v10 }
 0x28f   : > { %11089 = vst [vmem:[#allocation101_spill] sm:$0xff] %v8019_v56  ;;  %v2700_v56 = vrot.slane %v2694_v45, 2 }
 0x290   : > { %11090 = vst [vmem:[#allocation102_spill] sm:$0xff] %v8021_v32  ;;  %v2701_v32 = vrot.slane %v2695_v29, 2  ;;  %v2696_v29 = vmul.f32 %v2693_v24, %v7906_v4 }
 0x292   : > { %v2702_v28 = vsel %vm765_vm4, %v2700_v56, %v2701_v32 }
 0x293   : > { %2686 = vrot.lane.b32.xlu2 %v2683_v52, %s10994_s21  ;;  %2665 = vrot.lane.b32.xlu0 %v2662_v62, %s10994_s21  ;;  %v2679_v52 = vrot.slane %v2673_v59, 2  ;;  %v2738_v62 = vmul.f32 %v2735_v35, %v7906_v4  ;;  %v2743_v59 = vrot.slane %v2737_v47, 2 }
 0x294   : > { %2576 = vrot.lane.b32.xlu1 %v2573_v3, %s6477_s0  ;;  %v2717_v3 = vmul.f32 %v2714_v50, %v7906_v4  ;;  %v2777_v50 = vstv %s6077_s30  ;;  %s8236_s30 = sld [smem:[#allocation6 + $0x5d]] }
 0x295   : > { %v8034_v7 = vpop.permute.xlu2 %2254  ;;  %v8036_v8 = vpop.permute.xlu0 %2120  ;;  %v2681_v60 = vsel %vm765_vm4, %v2679_v52, %v2680_v48  ;;  %v2745_v11 = vrot.slane %v2738_v62, 2  ;;  %v2778_v48 = vmul.f32 %v2777_v50, %v7842_v21  ;;  %v2779_v52 = vmul.f32 %v2777_v50, %v7857_v10 }
 0x296   : > { %11091 = vst [vmem:[#allocation103_spill] sm:$0xff] %v8034_v7  ;;  %v8038_v63 = vpop.permute.xlu1 %2099  ;;  %v2736_v62 = vmul.f32 %v2735_v35, %v7842_v21 }
 0x297   : > { %11092 = vst [vmem:[#allocation104_spill] sm:$0xff] %v8036_v8  ;;  %v2724_v8 = vrot.slane %v2717_v3, 2  ;;  %v2746_v24 = vsel %vm765_vm4, %v2743_v59, %v2745_v11  ;;  %v2784_v11 = vrot.slane %v2778_v48, 2  ;;  %v2780_v48 = vmul.f32 %v2777_v50, %v7906_v4 }
 0x298   : > { %11093 = vst [vmem:[#allocation105_spill] sm:$0xff] %v8038_v63  ;;  %v2703_v63 = vrot.slane %v2696_v29, 2 }
 0x29a   : > { %v2704_v47 = vsel %vm765_vm4, %v2701_v32, %v2703_v63 }
 0x29b   : > { %2726 = vrot.lane.b32.xlu2 %v2723_v36, %s10994_s21  ;;  %2705 = vrot.lane.b32.xlu0 %v2702_v28, %s10994_s21  ;;  %v2756_v36 = vstv %s6076_s4  ;;  %v2725_v28 = vsel %vm765_vm4, %v2722_v33, %v2724_v8  ;;  %v2785_v8 = vrot.slane %v2779_v52, 2  ;;  %s8249_s4 = sld [smem:[#allocation6 + $0x81]] }
 0x29c   : > { %2684 = vrot.lane.b32.xlu1 %v2681_v60, %s10994_s21  ;;  %v2757_v60 = vmul.f32 %v2756_v36, %v7842_v21  ;;  %v2759_v52 = vmul.f32 %v2756_v36, %v7906_v4 }
 0x29d   : > { %v8050_v38 = vpop.permute.xlu2 %2270  ;;  %v8052_v45 = vpop.permute.xlu0 %2160  ;;  %v2786_v32 = vsel %vm765_vm4, %v2784_v11, %v2785_v8  ;;  %v2787_v11 = vrot.slane %v2780_v48, 2 }
 0x29e   : > { %11094 = vst [vmem:[#allocation106_spill] sm:$0xff] %v8050_v38  ;;  %v8054_v56 = vpop.permute.xlu1 %2139  ;;  %v2758_v38 = vmul.f32 %v2756_v36, %v7857_v10  ;;  %v2763_v7 = vrot.slane %v2757_v60, 2  ;;  %v1131_v36 = vstv %s5983_s7  ;;  %s8345_s7 = sld [smem:[#allocation6 + $0x18]] }
 0x29f   : > { %11095 = vst [vmem:[#allocation107_spill] sm:$0xff] %v8052_v45 }
 0x2a0   : > { %11096 = vst [vmem:[#allocation108_spill] sm:$0xff] %v8054_v56  ;;  %v2764_v45 = vrot.slane %v2758_v38, 2  ;;  %v2742_v56 = vrot.slane %v2736_v62, 2 }
 0x2a2   : > { %v2765_v35 = vsel %vm765_vm4, %v2763_v7, %v2764_v45  ;;  %v2744_v38 = vsel %vm765_vm4, %v2742_v56, %v2743_v59  ;;  %v2766_v56 = vrot.slane %v2759_v52, 2  ;;  %v846_v59 = vadd.f32 %v7448_v58, %v7411_v14 }
 0x2a3   : > { %2749 = vrot.lane.b32.xlu2 %v2746_v24, %s6477_s0  ;;  %2728 = vrot.lane.b32.xlu0 %v2725_v28, %s10994_s21  ;;  %v2798_v24 = vstv %s6078_s29  ;;  %v1007_v52 = vstv %s8073_s5  ;;  %v8114_v58 = vmul.f32 %v1131_v36, %v7269_v12  ;;  %s8265_s29 = sld [smem:[#allocation6 + $0x7e]] }
 0x2a4   : > { %2707 = vrot.lane.b32.xlu1 %v2704_v47, %s10994_s21  ;;  %v8078_v63 = vmul.f32 %v2798_v24, %v7857_v10  ;;  %v2801_v28 = vmul.f32 %v2798_v24, %v7906_v4  ;;  %v2799_v48 = vmul.f32 %v2798_v24, %v7842_v21  ;;  %v995_v14 = vstv %s8087_s8  ;;  %s8278_s5 = sld [smem:[#allocation6 + $0x39]] }
 0x2a5   : > { %v8067_v3 = vpop.permute.xlu2 %2296  ;;  %v8069_v29 = vpop.permute.xlu0 %2183  ;;  %s8439_s8 = sld [smem:[#allocation6 + $0x1b]] }
 0x2a6   : > { %11097 = vst [vmem:[#allocation109_spill] sm:$0xff] %v8067_v3  ;;  %v8071_v33 = vpop.permute.xlu1 %2162  ;;  %v2806_v50 = vrot.slane %v8078_v63, 2  ;;  %v2808_v62 = vrot.slane %v2801_v28, 2  ;;  %v1165_v63 = vstv %s5985_s9  ;;  %v2767_v28 = vsel %vm765_vm4, %v2764_v45, %v2766_v56  ;;  %s8371_s9 = sld [smem:[#allocation6 + $0x3c]] }
 0x2a7   : > { %11098 = vst [vmem:[#allocation110_spill] sm:$0xff] %v8069_v29  ;;  %v930_v45 = vadd.f32 %v7423_v31, %v846_v59  ;;  %v1166_v24 = vmul.f32 %v1165_v63, %v7246_v37  ;;  %v8126_v56 = vmul.f32 %v1165_v63, %v7269_v12  ;;  %v2805_v31 = vrot.slane %v2799_v48, 2 }
 0x2a8   : > { %11099 = vst [vmem:[#allocation111_spill] sm:$0xff] %v8071_v33  ;;  %v8147_v29 = vmul.f32 %v995_v14, %v7246_v37  ;;  %v1148_v33 = vstv %s8100_s27  ;;  %s8529_s27 = sld [smem:[#allocation6 + $0x21]] }
 0x2a9   : > { %v1172_v21 = vrot.slane %v1166_v24, 1  ;;  %v1367_v24 = vstv %s8116_s28  ;;  %s8565_s28 = sld [smem:[#allocation6 + $0x3f]] }
 0x2ab   : > { %2789 = vrot.lane.b32.xlu2 %v2786_v32, %s6477_s0  ;;  %2768 = vrot.lane.b32.xlu0 %v2765_v35, %s6477_s0  ;;  %v2809_v32 = vsel %vm765_vm4, %v2806_v50, %v2808_v62  ;;  %v2788_v35 = vsel %vm765_vm4, %v2785_v8, %v2787_v11  ;;  %v1134_v11 = vmul.f32 %v1131_v36, %v7336_v26 }
 0x2ac   : > { %2747 = vrot.lane.b32.xlu1 %v2744_v38, %s6477_s0  ;;  %v1182_v38 = vstv %s5986_s11  ;;  %s8389_s11 = sld [smem:[#allocation6 + $0x84]] }
 0x2ad   : > { %v8089_v7 = vpop.permute.xlu2 %2312  ;;  %v8091_v60 = vpop.permute.xlu0 %2240  ;;  %v1141_v48 = vrot.slane %v1134_v11, 1 }
 0x2ae   : > { %11100 = vst [vmem:[#allocation112_spill] sm:$0xff] %v8089_v7  ;;  %v8093_v47 = vpop.permute.xlu1 %2202  ;;  %v997_v7 = vmul.f32 %v995_v14, %v7269_v12  ;;  %v2807_v14 = vsel %vm765_vm4, %v2805_v31, %v2806_v50  ;;  %v1150_v50 = vmul.f32 %v1148_v33, %v7269_v12 }
 0x2af   : > { %11101 = vst [vmem:[#allocation113_spill] sm:$0xff] %v8091_v60 }
 0x2b0   : > { %11102 = vst [vmem:[#allocation114_spill] sm:$0xff] %v8093_v47  ;;  %v8143_v47 = vmul.f32 %v1007_v52, %v7269_v12  ;;  %v999_v60 = vadd.f32 %v997_v7, %v930_v45  ;;  %v1132_v7 = vmul.f32 %v1131_v36, %v7246_v37  ;;  %v1149_v45 = vmul.f32 %v1148_v33, %v7246_v37 }
 0x2b1   : > { %v11112_v36 = vrot.slane %v8114_v58, 1 }
 0x2b2   : > { %11106 = vst [vmem:[#allocation118_spill] sm:$0xff] %v8143_v47  ;;  %v1031_v3 = vadd.f32 %v7558_v43, %v999_v60  ;;  %v8162_v47 = vmul.f32 %v1007_v52, %v7246_v37 }
 0x2b3   : > { %2812 = vrot.lane.b32.xlu2 %v2809_v32, %s6477_s0  ;;  %2791 = vrot.lane.b32.xlu0 %v2788_v35, %s6477_s0  ;;  %v1001_v35 = vstv %s8096_s10  ;;  %v1142_v52 = vsel %vm528_vm3, %v11112_v36, %v1141_v48  ;;  %v1168_v48 = vmul.f32 %v1165_v63, %v7336_v26  ;;  %v1418_v36 = vstv %s8137_s2  ;;  %s8448_s10 = sld [smem:[#allocation6 + $0x1e]] }
 0x2b4   : > { %2770 = vrot.lane.b32.xlu1 %v2767_v28, %s6477_s0  ;;  %v8134_v28 = vmul.f32 %v1182_v38, %v7269_v12  ;;  %v8140_v59 = vmul.f32 %v1001_v35, %v7246_v37  ;;  %v8156_v4 = vmul.f32 %v1001_v35, %v7269_v12  ;;  %11107 = vst [vmem:[#allocation119_spill] sm:$0xff] %v8162_v47  ;;  %s8616_s2 = sld [smem:[#allocation6 + $0x87]] }
 0x2b5   : > { %v8118_v8 = vpop.permute.xlu2 %2338  ;;  %v8120_v62 = vpop.permute.xlu0 %2256  ;;  %v1087_v35 = vadd.f32 %v7593_v23, %v1031_v3  ;;  %v1155_v23 = vrot.slane %v1149_v45, 1  ;;  %v1183_v3 = vmul.f32 %v1182_v38, %v7246_v37  ;;  %v1420_v63 = vmul.f32 %v1418_v36, %v7269_v12 }
 0x2b6   : > { %11103 = vst [vmem:[#allocation115_spill] sm:$0xff] %v8118_v8  ;;  %v8130_v32 = vpop.permute.xlu1 %2242  ;;  %v1185_v8 = vmul.f32 %v1182_v38, %v7336_v26  ;;  %v10972_v10 = vrot.slane %v8134_v28, 1  ;;  %v1175_v45 = vrot.slane %v1168_v48, 1  ;;  %v1370_v38 = vmul.f32 %v1367_v24, %v7336_v26 }
 0x2b7   : > { %11104 = vst [vmem:[#allocation116_spill] sm:$0xff] %v8120_v62  ;;  %v1013_v62 = vstv %s8098_s1  ;;  %v1146_v47 = vadd.f32 %v1142_v52, %v1087_v35  ;;  %s8476_s1 = sld [smem:[#allocation6 + $0x60]] }
 0x2b8   : > { %11105 = vst [vmem:[#allocation117_spill] sm:$0xff] %v8130_v32  ;;  %v10971_v32 = vrot.slane %v8126_v56, 1  ;;  %v1192_v20 = vrot.slane %v1185_v8, 1  ;;  %v8168_v11 = vmul.f32 %v1013_v62, %v7246_v37  ;;  %v8171_v8 = vmul.f32 %v1013_v62, %v7269_v12 }
 0x2b9   : > { %v1384_v62 = vstv %s8128_s22  ;;  %v1218_v48 = vadd.f32 %v7575_v0, %v1146_v47  ;;  %s8572_s22 = sld [smem:[#allocation6 + $0x63]] }
 0x2ba   : > { %11108 = vst [vmem:[#allocation120_spill] sm:$0xff] %v8168_v11  ;;  %v8186_v31 = vsel %vm528_vm3, %v1172_v21, %v10971_v32  ;;  %v1138_v11 = vrot.slane %v1132_v7, 1  ;;  %v1368_v21 = vmul.f32 %v1367_v24, %v7246_v37  ;;  %v1156_v32 = vrot.slane %v1150_v50, 1 }
 0x2bb   : > { %11109 = vst [vmem:[#allocation121_spill] sm:$0xff] %v8171_v8  ;;  %v1369_v8 = vmul.f32 %v1367_v24, %v7269_v12  ;;  %v1385_v50 = vmul.f32 %v1384_v62, %v7246_v37  ;;  %v1302_v0 = vadd.f32 %v7695_v2, %v1218_v48  ;;  %v866_v48 = vadd.f32 %v7467_v44, %v7382_v22 }
 0x2bc   : > { %2810 = vrot.lane.b32.xlu1 %v2807_v14, %s6477_s0  ;;  %11113 = vst [vmem:[#allocation124_spill] sm:$0xff] %v8186_v31  ;;  %v1401_v31 = vstv %s8152_s14  ;;  %v1773_v22 = vstv %s8236_s30  ;;  %v887_v44 = vadd.f32 %v7465_v19, %v7433_v55  ;;  %v1621_v55 = vstv %s8265_s29  ;;  %s8622_s14 = sld [smem:[#allocation6 + $0x66]]  ;;  %s11257_s29 = smov 3  }
 0x2bd   : > { %v8175_v43 = vpop.permute.xlu2 %2429  ;;  %v8177_v60 = vpop.permute.xlu0 %2282  ;;  %v1402_v52 = vmul.f32 %v1401_v31, %v7246_v37  ;;  %v1403_v35 = vmul.f32 %v1401_v31, %v7269_v12  ;;  %v1375_v25 = vrot.slane %v1369_v8, 2  ;;  %v1404_v13 = vmul.f32 %v1401_v31, %v7336_v26  ;;  %s8773_s30 = sld [smem:[#allocation6 + $0x8d]] }
 0x2be   : > { %11110 = vst [vmem:[#allocation122_spill] sm:$0xff] %v8175_v43  ;;  %v8189_v14 = vpop.permute.xlu1 %2268  ;;  %v8194_v43 = vsel %vm528_vm3, %v10972_v10, %v1192_v20  ;;  %v1387_v20 = vmul.f32 %v1384_v62, %v7336_v26  ;;  %v1189_v10 = vrot.slane %v1183_v3, 1  ;;  %v11118_v8 = vrot.slane %v8114_v58, 1 }
 0x2bf   : > { %11111 = vst [vmem:[#allocation123_spill] sm:$0xff] %v8177_v60  ;;  %v1151_v60 = vmul.f32 %v1148_v33, %v7336_v26  ;;  %v1419_v33 = vmul.f32 %v1418_v36, %v7246_v37  ;;  %v1377_v31 = vrot.slane %v1370_v38, 2  ;;  %v1408_v47 = vrot.slane %v1402_v52, 2 }
 0x2c0   : > { %11114 = vst [vmem:[#allocation125_spill] sm:$0xff] %v8189_v14  ;;  %v1386_v14 = vmul.f32 %v1384_v62, %v7269_v12  ;;  %v1394_v3 = vrot.slane %v1387_v20, 2  ;;  %v1409_v20 = vrot.slane %v1403_v35, 2  ;;  %v845_v58 = vadd.f32 %v7363_v57, %v7385_v61 }
 0x2c1   : > { %11115 = vst [vmem:[#allocation126_spill] sm:$0xff] %v8194_v43  ;;  %v1158_v7 = vrot.slane %v1151_v60, 1  ;;  %v1374_v43 = vrot.slane %v1368_v21, 2  ;;  %v1421_v60 = vmul.f32 %v1418_v36, %v7336_v26  ;;  %v1425_v37 = vrot.slane %v1419_v33, 2 }
 0x2c2   : > { %v1392_v30 = vrot.slane %v1386_v14, 2  ;;  %v1426_v21 = vrot.slane %v1420_v63, 2  ;;  %v8231_v14 = vsel %vm528_vm3, %v1138_v11, %v11118_v8  ;;  %v8234_v26 = vsel %vm528_vm3, %v1155_v23, %v1156_v32 }
 0x2c3   : > { %v1391_v36 = vrot.slane %v1385_v50, 2  ;;  %v11119_v11 = vrot.slane %v8126_v56, 1  ;;  %v1411_v33 = vrot.slane %v1404_v13, 2  ;;  %v1428_v63 = vrot.slane %v1421_v60, 2 }
 0x2c4   : > { %v8260_v57 = vsel %vm765_vm4, %v1392_v30, %v1394_v3  ;;  %v8263_v61 = vsel %vm765_vm4, %v1425_v37, %v1426_v21  ;;  %v929_v13 = vadd.f32 %v7500_v53, %v845_v58  ;;  %v1378_v56 = vsel %vm765_vm4, %v1375_v25, %v1377_v31 }
 0x2c5   : > { %v8221_v24 = vpop.permute.xlu2 %2469  ;;  %v8223_v62 = vpop.permute.xlu0 %2298  ;;  %v8247_v23 = vsel %vm528_vm3, %v11119_v11, %v1175_v45  ;;  %v1382_v45 = vadd.f32 %v1378_v56, %v1302_v0  ;;  %v1609_v38 = vstv %s8207_s19  ;;  %v1739_v50 = vstv %s8215_s26  ;;  %s8643_s19 = sld [smem:[#allocation6 + $0x42]] }
 0x2c6   : > { %11116 = vst [vmem:[#allocation127_spill] sm:$0xff] %v8221_v24  ;;  %v8226_v12 = vpop.permute.xlu1 %2284  ;;  %v8239_v24 = vsel %vm528_vm3, %v1156_v32, %v1158_v7  ;;  %v11120_v32 = vrot.slane %v8134_v28, 1  ;;  %v8257_v7 = vsel %vm765_vm4, %v1374_v43, %v1375_v25  ;;  %v8270_v28 = vsel %vm765_vm4, %v1391_v36, %v1392_v30  ;;  %s8692_s26 = sld [smem:[#allocation6 + $0x45]] }
 0x2c7   : > { %11117 = vst [vmem:[#allocation128_spill] sm:$0xff] %v8226_v12  ;;  %v8274_v43 = vsel %vm765_vm4, %v1408_v47, %v1409_v20  ;;  %v8281_v52 = vsel %vm765_vm4, %v1409_v20, %v1411_v33  ;;  %v8284_v53 = vsel %vm765_vm4, %v1426_v21, %v1428_v63  ;;  %v8287_v25 = vmul.f32 %v1609_v38, %v7565_v16  ;;  %v11152_v12 = vld [vmem:[#allocation121_spill] sm:$0xff] }
 0x2c8   : > { %v8254_v2 = vsel %vm528_vm3, %v1189_v10, %v11120_v32  ;;  %v1615_v10 = vstv %s8211_s23  ;;  %v1603_v30 = vstv %s8219_s6  ;;  %v1454_v3 = vadd.f32 %v7726_v41, %v1382_v45  ;;  %s8664_s23 = sld [smem:[#allocation6 + $0x8a]] }
 0x2c9   : > { %v8298_v37 = vmul.f32 %v1615_v10, %v7580_v49  ;;  %v8301_v21 = vmul.f32 %v1603_v30, %v7565_v16  ;;  %v998_v31 = vadd.f32 %v8147_v29, %v929_v13  ;;  %v8307_v36 = vmul.f32 %v1739_v50, %v7580_v49  ;;  %s8728_s6 = sld [smem:[#allocation6 + $0x69]] }
 0x2ca   : > { %v1742_v0 = vmul.f32 %v1739_v50, %v7629_v42  ;;  %v867_v41 = vadd.f32 %v7378_v5, %v7407_v54  ;;  %v1605_v47 = vmul.f32 %v1603_v30, %v7580_v49  ;;  %v8317_v20 = vmul.f32 %v1609_v38, %v7580_v49 }
 0x2cb   : > { %v950_v29 = vadd.f32 %v7498_v17, %v866_v48  ;;  %v1030_v58 = vadd.f32 %v7531_v9, %v998_v31  ;;  %v8322_v11 = vmul.f32 %v1615_v10, %v7565_v16  ;;  %v1790_v33 = vstv %s8249_s4  ;;  %v11128_v31 = vld [vmem:[#allocation73_spill] sm:$0xff]  ;;  %s11256_s4 = smov 1  }
 0x2cc   : > { %v1538_v63 = vadd.f32 %v7707_v15, %v1454_v3  ;;  %v1774_v19 = vmul.f32 %v1773_v22, %v7565_v16  ;;  %v8329_v5 = vmul.f32 %v1773_v22, %v7580_v49  ;;  %v951_v54 = vadd.f32 %v7517_v34, %v867_v41 }
 0x2cd   : > { %v8290_v35 = vpop.permute.xlu2 %2492  ;;  %v8292_v60 = vpop.permute.xlu0 %2324  ;;  %v8334_v32 = vadd.f32 %v7399_v51, %v7428_v6  ;;  %v1747_v17 = vrot.slane %v8307_v36, 1  ;;  %v1749_v9 = vrot.slane %v1742_v0, 1  ;;  %v971_v13 = vadd.f32 %v7444_v18, %v887_v44 }
 0x2ce   : > { %11121 = vst [vmem:[#allocation129_spill] sm:$0xff] %v8290_v35  ;;  %v8303_v8 = vpop.permute.xlu1 %2310  ;;  %v8339_v56 = vmul.f32 %v1621_v55, %v7565_v16  ;;  %v8342_v15 = vmul.f32 %v1790_v33, %v7580_v49  ;;  %v1756_v10 = vstv %s8278_s5  ;;  %v1004_v34 = vadd.f32 %v8140_v59, %v950_v29  ;;  %v11124_v29 = vld [vmem:[#allocation66_spill] sm:$0xff]  ;;  %s6083_s5 = sld [smem:[#allocation7 + $0x25]] }
 0x2cf   : > { %v1086_v45 = vadd.f32 %v7513_v46, %v1030_v58  ;;  %v8350_v51 = vmul.f32 %v1621_v55, %v7580_v49  ;;  %v1793_v6 = vmul.f32 %v1790_v33, %v7629_v42  ;;  %v909_v30 = vadd.f32 %v7482_v27, %v7452_v39  ;;  %v11130_v39 = vld [vmem:[#allocation30_spill] sm:$0xff] }
 0x2d0   : > { %v1607_v48 = vadd.f32 %v1605_v47, %v1538_v63  ;;  %v1780_v3 = vrot.slane %v1774_v19, 1  ;;  %v1005_v46 = vadd.f32 %v8156_v4, %v951_v54  ;;  %v1750_v59 = vsel %vm528_vm3, %v1747_v17, %v1749_v9  ;;  %v11125_v47 = vld [vmem:[#allocation23_spill] sm:$0xff]  ;;  %v11126_v63 = vld [vmem:[#allocation18_spill] sm:$0xff]  ;;  %v11127_v54 = vld [vmem:[#allocation17_spill] sm:$0xff] }
 0x2d1   : > { %v1740_v0 = vmul.f32 %v1739_v50, %v7565_v16  ;;  %v1757_v44 = vmul.f32 %v1756_v10, %v7565_v16  ;;  %v888_v41 = vadd.f32 %v7484_v40, %v7404_v1  ;;  %v1758_v27 = vmul.f32 %v1756_v10, %v7580_v49 }
 0x2d2   : > { %v1639_v58 = vadd.f32 %v11124_v29, %v1607_v48  ;;  %v1045_v4 = vadd.f32 %v11125_v47, %v1005_v46  ;;  %v1044_v55 = vadd.f32 %v11126_v63, %v1004_v34  ;;  %v1145_v50 = vadd.f32 %v8231_v14, %v1086_v45  ;;  %v11132_v63 = vld [vmem:[#allocation119_spill] sm:$0xff] }
 0x2d3   : > { %v1800_v19 = vrot.slane %v1793_v6, 1  ;;  %v993_v9 = vadd.f32 %v11127_v54, %v909_v30  ;;  %v11129_v40 = vrot.slane %v8329_v5, 1  ;;  %v1759_v29 = vmul.f32 %v1756_v10, %v7629_v42 }
 0x2d4   : > { %v1695_v1 = vadd.f32 %v11128_v31, %v1639_v58  ;;  %v1100_v35 = vadd.f32 %v11130_v39, %v1044_v55  ;;  %v1746_v47 = vrot.slane %v1740_v0, 1  ;;  %v1763_v34 = vrot.slane %v1757_v44, 1  ;;  %v11133_v31 = vld [vmem:[#allocation20_spill] sm:$0xff] }
 0x2d5   : > { %v8353_v38 = vpop.permute.xlu2 %2532  ;;  %v8355_v18 = vpop.permute.xlu0 %2340  ;;  %v8381_v48 = vsel %vm528_vm3, %v1780_v3, %v11129_v40  ;;  %v1010_v14 = vadd.f32 %v11132_v63, %v971_v13  ;;  %v1764_v45 = vrot.slane %v1758_v27, 1  ;;  %v1776_v6 = vmul.f32 %v1773_v22, %v7629_v42  ;;  %v11134_v3 = vld [vmem:[#allocation21_spill] sm:$0xff] }
 0x2d6   : > { %11122 = vst [vmem:[#allocation130_spill] sm:$0xff] %v8355_v18  ;;  %v8360_v36 = vpop.permute.xlu1 %2326  ;;  %v11131_v18 = vld [vmem:[#allocation36_spill] sm:$0xff]  ;;  %v1975_v30 = vstv %s8345_s7  ;;  %v972_v58 = vadd.f32 %v11133_v31, %v888_v41  ;;  %v1101_v54 = vadd.f32 %v11134_v3, %v1045_v4  ;;  %v11135_v40 = vld [vmem:[#allocation41_spill] sm:$0xff]  ;;  %v11136_v39 = vrot.slane %v8342_v15, 1  ;;  %s6082_s7 = sld [smem:[#allocation7 + $0x1]] }
 0x2d7   : > { %11123 = vst [vmem:[#allocation131_spill] sm:$0xff] %v8360_v36  ;;  %v1217_v46 = vadd.f32 %v11131_v18, %v1145_v50  ;;  %v11137_v13 = vld [vmem:[#allocation25_spill] sm:$0xff]  ;;  %v1754_v22 = vadd.f32 %v1750_v59, %v1695_v1  ;;  %v1766_v27 = vrot.slane %v1759_v29, 1  ;;  %v1791_v55 = vmul.f32 %v1790_v33, %v7565_v16  ;;  %v11140_v29 = vld [vmem:[#allocation118_spill] sm:$0xff] }
 0x2d8   : > { %v8397_v18 = vsel %vm528_vm3, %v11136_v39, %v1800_v19  ;;  %v1058_v44 = vadd.f32 %v11137_v13, %v1010_v14  ;;  %v1162_v41 = vadd.f32 %v8234_v26, %v1100_v35  ;;  %v8407_v4 = vsel %vm528_vm3, %v1746_v47, %v1747_v17  ;;  %v11139_v31 = vld [vmem:[#allocation29_spill] sm:$0xff]  ;;  %v11141_v35 = vld [vmem:[#allocation35_spill] sm:$0xff] }
 0x2d9   : > { %v1301_v10 = vadd.f32 %v11135_v40, %v1217_v46  ;;  %v8410_v46 = vmul.f32 %v1975_v30, %v7580_v49  ;;  %v1978_v19 = vmul.f32 %v1975_v30, %v7629_v42  ;;  %v8417_v59 = vsel %vm528_vm3, %v1763_v34, %v1764_v45  ;;  %v11142_v34 = vld [vmem:[#allocation68_spill] sm:$0xff] }
 0x2da   : > { %v1114_v14 = vadd.f32 %v11139_v31, %v1058_v44  ;;  %v1783_v33 = vrot.slane %v1776_v6, 1  ;;  %v8420_v1 = vstv %s8371_s9  ;;  %v1011_v26 = vadd.f32 %v11140_v29, %v972_v58  ;;  %v11143_v44 = vld [vmem:[#allocation39_spill] sm:$0xff]  ;;  %s6084_s9 = sld [smem:[#allocation7 + $0x49]] }
 0x2db   : > { %v1238_v17 = vadd.f32 %v11141_v35, %v1162_v41  ;;  %v1163_v47 = vadd.f32 %v8239_v24, %v1101_v54  ;;  %v1381_v3 = vadd.f32 %v8257_v7, %v1301_v10  ;;  %v8427_v40 = vsel %vm528_vm3, %v1764_v45, %v1766_v27  ;;  %v11144_v7 = vld [vmem:[#allocation16_spill] sm:$0xff]  ;;  %v11148_v29 = vld [vmem:[#allocation31_spill] sm:$0xff] }
 0x2dc   : > { %v1797_v39 = vrot.slane %v1791_v55, 1  ;;  %v8430_v13 = vmul.f32 %v1975_v30, %v7565_v16  ;;  %v1826_v6 = vadd.f32 %v11142_v34, %v1754_v22  ;;  %v1983_v58 = vrot.slane %v8410_v46, 2  ;;  %v11145_v54 = vld [vmem:[#allocation124_spill] sm:$0xff]  ;;  %v11146_v30 = vld [vmem:[#allocation93_spill] sm:$0xff]  ;;  %v11147_v22 = vld [vmem:[#allocation19_spill] sm:$0xff] }
 0x2dd   : > { %v8399_v0 = vpop.permute.xlu0 %2448  ;;  %v8413_v63 = vpop.permute.xlu2 %2555  ;;  %v1239_v31 = vadd.f32 %v11143_v44, %v1163_v47  ;;  %v8437_v41 = vmul.f32 %v8420_v1, %v7580_v49  ;;  %v1985_v24 = vrot.slane %v1978_v19, 2  ;;  %v992_v45 = vadd.f32 %v11144_v7, %v8334_v32  ;;  %v11149_v47 = vld [vmem:[#allocation44_spill] sm:$0xff]  ;;  %v11150_v19 = vld [vmem:[#allocation37_spill] sm:$0xff] }
 0x2de   : > { %v8403_v50 = vpop.permute.xlu1 %2427  ;;  %11138 = vst [vmem:[#allocation66_spill] sm:$0xff] %v8413_v63  ;;  %v1179_v10 = vadd.f32 %v11145_v54, %v1114_v14  ;;  %v1910_v27 = vadd.f32 %v11146_v30, %v1826_v6  ;;  %v8446_v55 = vstv %s8389_s11  ;;  %v1059_v46 = vadd.f32 %v11147_v22, %v1011_v26  ;;  %v11156_v30 = vld [vmem:[#allocation57_spill] sm:$0xff]  ;;  %s6086_s11 = sld [smem:[#allocation7 + $0x2]] }
 0x2df   : > { %v1322_v35 = vadd.f32 %v11148_v29, %v1238_v17  ;;  %v1323_v34 = vadd.f32 %v11149_v47, %v1239_v31  ;;  %v1453_v44 = vadd.f32 %v11150_v19, %v1381_v3  ;;  %v1017_v32 = vadd.f32 %v11152_v12, %v993_v9  ;;  %v11155_v3 = vld [vmem:[#allocation33_spill] sm:$0xff] }
 0x2e0   : > { %v11153_v14 = vrot.slane %v8329_v5, 1  ;;  %v11154_v7 = vrot.slane %v8342_v15, 1  ;;  %v1995_v26 = vmul.f32 %v8420_v1, %v7629_v42  ;;  %v1115_v31 = vadd.f32 %v11155_v3, %v1059_v46  ;;  %v11157_v15 = vld [vmem:[#allocation120_spill] sm:$0xff] }
 0x2e1   : > { %v1537_v22 = vadd.f32 %v11156_v30, %v1453_v44  ;;  %v2027_v12 = vmul.f32 %v8446_v55, %v7565_v16  ;;  %v1986_v5 = vsel %vm765_vm4, %v1983_v58, %v1985_v24  ;;  %v1016_v9 = vadd.f32 %v11157_v15, %v992_v45  ;;  %v11160_v45 = vld [vmem:[#allocation24_spill] sm:$0xff]  ;;  %v11162_v15 = vld [vmem:[#allocation98_spill] sm:$0xff] }
 0x2e2   : > { %v8460_v6 = vsel %vm528_vm3, %v11153_v14, %v1783_v33  ;;  %v8465_v54 = vsel %vm528_vm3, %v1797_v39, %v11154_v7  ;;  %v11158_v33 = vld [vmem:[#allocation26_spill] sm:$0xff]  ;;  %v8482_v29 = vmul.f32 %v8446_v55, %v7580_v49  ;;  %v1990_v47 = vadd.f32 %v1986_v5, %v1910_v27  ;;  %v11163_v5 = vld [vmem:[#allocation51_spill] sm:$0xff] }
 0x2e3   : > { %v1259_v39 = vadd.f32 %v11158_v33, %v1179_v10  ;;  %v1399_v46 = vadd.f32 %v8260_v57, %v1323_v34  ;;  %v1398_v19 = vadd.f32 %v8270_v28, %v1322_v35  ;;  %v1982_v44 = vrot.slane %v8430_v13, 2  ;;  %v11161_v10 = vld [vmem:[#allocation46_spill] sm:$0xff]  ;;  %v11164_v35 = vld [vmem:[#allocation27_spill] sm:$0xff] }
 0x2e4   : > { %v1072_v7 = vadd.f32 %v11160_v45, %v1016_v9  ;;  %v2002_v30 = vrot.slane %v1995_v26, 2  ;;  %v2062_v33 = vadd.f32 %v11162_v15, %v1990_v47  ;;  %v1180_v27 = vadd.f32 %v8247_v23, %v1115_v31  ;;  %v11165_v9 = vld [vmem:[#allocation38_spill] sm:$0xff]  ;;  %v11166_v26 = vld [vmem:[#allocation56_spill] sm:$0xff] }
 0x2e5   : > { %v8454_v63 = vpop.permute.xlu0 %2471  ;;  %v8488_v14 = vpop.permute.xlu2 %2663  ;;  %v1343_v3 = vadd.f32 %v11161_v10, %v1259_v39  ;;  %v1474_v57 = vadd.f32 %v11163_v5, %v1398_v19  ;;  %v1606_v34 = vadd.f32 %v8301_v21, %v1537_v22  ;;  %v2033_v28 = vrot.slane %v2027_v12, 2  ;;  %v11167_v45 = vld [vmem:[#allocation40_spill] sm:$0xff]  ;;  %v11168_v31 = vld [vmem:[#allocation62_spill] sm:$0xff] }
 0x2e6   : > { %11151 = vst [vmem:[#allocation23_spill] sm:$0xff] %v8454_v63  ;;  %v8469_v17 = vpop.permute.xlu1 %2450  ;;  %v1073_v13 = vadd.f32 %v11164_v35, %v1017_v32  ;;  %v10974_v24 = vrot.slane %v8482_v29, 2  ;;  %v10973_v63 = vstv %s8439_s8  ;;  %v8500_v36 = vstv %s8448_s10  ;;  %v11169_v21 = vld [vmem:[#allocation22_spill] sm:$0xff]  ;;  %s6087_s10 = sld [smem:[#allocation7 + $0x26]] }
 0x2e7   : > { %11159 = vst [vmem:[#allocation18_spill] sm:$0xff] %v8488_v14  ;;  %v1260_v39 = vadd.f32 %v11165_v9, %v1180_v27  ;;  %v1558_v47 = vadd.f32 %v11166_v26, %v1474_v57  ;;  %v1475_v23 = vadd.f32 %v11167_v45, %v1399_v46  ;;  %v1638_v19 = vadd.f32 %v11168_v31, %v1606_v34  ;;  %v11170_v12 = vld [vmem:[#allocation94_spill] sm:$0xff]  ;;  %v11172_v27 = vld [vmem:[#allocation32_spill] sm:$0xff]  ;;  %v11184_v14 = vld [vmem:[#allocation65_spill] sm:$0xff] }
 0x2e8   : > { %v1128_v22 = vadd.f32 %v11169_v21, %v1072_v7  ;;  %v1415_v32 = vadd.f32 %v8274_v43, %v1343_v3  ;;  %v2146_v15 = vadd.f32 %v11170_v12, %v2062_v33  ;;  %v1993_v5 = vmul.f32 %v8420_v1, %v7565_v16  ;;  %v11173_v57 = vld [vmem:[#allocation60_spill] sm:$0xff]  ;;  %v11174_v45 = vld [vmem:[#allocation70_spill] sm:$0xff]  ;;  %v11176_v33 = vld [vmem:[#allocation81_spill] sm:$0xff] }
 0x2e9   : > { %v1129_v9 = vadd.f32 %v11172_v27, %v1073_v13  ;;  %v1559_v26 = vadd.f32 %v11173_v57, %v1475_v23  ;;  %v2009_v46 = vstv %s8476_s1  ;;  %v8520_v34 = vmul.f32 %v8500_v36, %v11174_v45  ;;  %v11175_v31 = vld [vmem:[#allocation50_spill] sm:$0xff]  ;;  %s6089_s1 = sld [smem:[#allocation7 + $0x6e]] }
 0x2ea   : > { %v1495_v7 = vadd.f32 %v11175_v31, %v1415_v32  ;;  %v1984_v43 = vsel %vm765_vm4, %v1982_v44, %v1983_v58  ;;  %v2213_v3 = vmul.f32 %v10973_v63, %v11174_v45  ;;  %v2350_v1 = vmul.f32 %v8500_v36, %v11176_v33  ;;  %v11177_v13 = vld [vmem:[#allocation34_spill] sm:$0xff] }
 0x2eb   : > { %v1344_v21 = vadd.f32 %v11177_v13, %v1260_v39  ;;  %v1612_v23 = vadd.f32 %v8287_v25, %v1558_v47  ;;  %v11178_v12 = vld [vmem:[#allocation58_spill] sm:$0xff]  ;;  %v11179_v57 = vrot.slane %v8437_v41, 2  ;;  %v1196_v58 = vadd.f32 %v8254_v2, %v1128_v22  ;;  %v11182_v22 = vld [vmem:[#allocation47_spill] sm:$0xff] }
 0x2ec   : > { %v1694_v27 = vadd.f32 %v11178_v12, %v1638_v19  ;;  %v8543_v44 = vsel %vm765_vm4, %v2033_v28, %v10974_v24  ;;  %v8546_v31 = vmul.f32 %v2009_v46, %v7565_v16  ;;  %v2215_v39 = vadd.f32 %v2213_v3, %v2146_v15  ;;  %v11180_v13 = vld [vmem:[#allocation126_spill] sm:$0xff]  ;;  %v11185_v3 = vld [vmem:[#allocation52_spill] sm:$0xff] }
 0x2ed   : > { %v8506_v10 = vpop.permute.xlu0 %2511  ;;  %v8537_v32 = vsel %vm765_vm4, %v11179_v57, %v2002_v30  ;;  %v1197_v25 = vadd.f32 %v11180_v13, %v1129_v9  ;;  %v1613_v47 = vadd.f32 %v8317_v20, %v1559_v26  ;;  %v1999_v19 = vrot.slane %v1993_v5, 2  ;;  %v8551_v30 = vpop.permute.xlu2 %2686  ;;  %v11181_v57 = vld [vmem:[#allocation42_spill] sm:$0xff]  ;;  %v11186_v26 = vld [vmem:[#allocation45_spill] sm:$0xff] }
 0x2ee   : > { %v8513_v35 = vpop.permute.xlu1 %2490  ;;  %v2355_v12 = vrot.slane %v8520_v34, 1  ;;  %v1280_v2 = vadd.f32 %v11181_v57, %v1196_v58  ;;  %v1579_v63 = vadd.f32 %v11182_v22, %v1495_v7  ;;  %v2357_v24 = vrot.slane %v2350_v1, 1  ;;  %v11187_v1 = vld [vmem:[#allocation54_spill] sm:$0xff] }
 0x2ef   : > { %11171 = vst [vmem:[#allocation17_spill] sm:$0xff] %v8513_v35  ;;  %v11183_v35 = vld [vmem:[#allocation117_spill] sm:$0xff]  ;;  %v1416_v16 = vadd.f32 %v8281_v52, %v1344_v21  ;;  %v1653_v15 = vadd.f32 %v11184_v14, %v1613_v47  ;;  %v1652_v9 = vadd.f32 %v11185_v3, %v1612_v23  ;;  %v1753_v20 = vadd.f32 %v8407_v4, %v1694_v27  ;;  %v11190_v47 = vld [vmem:[#allocation28_spill] sm:$0xff] }
 0x2f0   : > { %v2247_v28 = vadd.f32 %v11183_v35, %v2215_v39  ;;  %v1364_v13 = vadd.f32 %v11186_v26, %v1280_v2  ;;  %v2011_v58 = vmul.f32 %v2009_v46, %v7580_v49  ;;  %v2016_v7 = vrot.slane %v8546_v31, 2  ;;  %v11188_v21 = vld [vmem:[#allocation77_spill] sm:$0xff]  ;;  %v11189_v39 = vld [vmem:[#allocation84_spill] sm:$0xff] }
 0x2f1   : > { %v1496_v14 = vadd.f32 %v11187_v1, %v1416_v16  ;;  %v1708_v23 = vadd.f32 %v11188_v21, %v1652_v9  ;;  %v1825_v4 = vadd.f32 %v11189_v39, %v1753_v20  ;;  %v2012_v27 = vmul.f32 %v2009_v46, %v7629_v42  ;;  %v11193_v3 = vld [vmem:[#allocation89_spill] sm:$0xff] }
 0x2f2   : > { %v2303_v35 = vadd.f32 %v8223_v62, %v2247_v28  ;;  %v1281_v57 = vadd.f32 %v11190_v47, %v1197_v25  ;;  %v1618_v49 = vadd.f32 %v8322_v11, %v1579_v63  ;;  %v2029_v31 = vmul.f32 %v8446_v55, %v7629_v42  ;;  %v11191_v62 = vld [vmem:[#allocation59_spill] sm:$0xff]  ;;  %v11192_v28 = vld [vmem:[#allocation61_spill] sm:$0xff]  ;;  %v11194_v25 = vld [vmem:[#allocation48_spill] sm:$0xff] }
 0x2f3   : > { %v8579_v2 = vstv %s8529_s27  ;;  %v1580_v22 = vadd.f32 %v11191_v62, %v1496_v14  ;;  %v1709_v16 = vadd.f32 %v11192_v28, %v1653_v15  ;;  %v1909_v9 = vadd.f32 %v11193_v3, %v1825_v4  ;;  %v11195_v11 = vld [vmem:[#allocation71_spill] sm:$0xff]  ;;  %s8950_s27 = sld [smem:[#allocation7 + $0x4a]] }
 0x2f4   : > { %v2358_v46 = vsel %vm528_vm3, %v2355_v12, %v2357_v24  ;;  %v1432_v20 = vadd.f32 %v8263_v61, %v1364_v13  ;;  %v1365_v26 = vadd.f32 %v11194_v25, %v1281_v57  ;;  %v1666_v63 = vadd.f32 %v11195_v11, %v1618_v49  ;;  %v11197_v61 = vld [vmem:[#allocation76_spill] sm:$0xff]  ;;  %v11199_v62 = vld [vmem:[#allocation43_spill] sm:$0xff] }
 0x2f5   : > { %v8560_v5 = vpop.permute.xlu0 %2534  ;;  %v2362_v1 = vadd.f32 %v2358_v46, %v2303_v35  ;;  %v1770_v42 = vadd.f32 %v8417_v59, %v1708_v23  ;;  %v11196_v55 = vrot.slane %v8437_v41, 2  ;;  %v8596_v14 = vmul.f32 %v8579_v2, %v11174_v45  ;;  %v11198_v23 = vld [vmem:[#allocation83_spill] sm:$0xff]  ;;  %v8604_v47 = vpop.permute.xlu2 %2726  ;;  %v11200_v46 = vld [vmem:[#allocation122_spill] sm:$0xff] }
 0x2f6   : > { %v2514_v52 = vpop.permute.xlu1 %2513  ;;  %v2586_v24 = vmul.f32 %v8579_v2, %v11176_v33  ;;  %v1722_v13 = vadd.f32 %v11197_v61, %v1666_v63  ;;  %v2017_v21 = vrot.slane %v2011_v58, 2  ;;  %v2019_v39 = vrot.slane %v2012_v27, 2  ;;  %v11203_v25 = vld [vmem:[#allocation63_spill] sm:$0xff] }
 0x2f7   : > { %v2001_v15 = vsel %vm765_vm4, %v1999_v19, %v11196_v55  ;;  %v2036_v35 = vrot.slane %v2029_v31, 2  ;;  %v1619_v59 = vadd.f32 %v8298_v37, %v1580_v22  ;;  %v1846_v41 = vadd.f32 %v11198_v23, %v1770_v42  ;;  %v11201_v31 = vld [vmem:[#allocation87_spill] sm:$0xff]  ;;  %v11206_v55 = vld [vmem:[#allocation92_spill] sm:$0xff]  ;;  %v11207_v23 = vld [vmem:[#allocation85_spill] sm:$0xff] }
 0x2f8   : > { %v1771_v4 = vadd.f32 %v8427_v40, %v1709_v16  ;;  %v1989_v19 = vadd.f32 %v1984_v43, %v1909_v9  ;;  %v1433_v49 = vadd.f32 %v8284_v53, %v1365_v26  ;;  %v1516_v28 = vadd.f32 %v11199_v62, %v1432_v20  ;;  %v11202_v16 = vld [vmem:[#allocation53_spill] sm:$0xff]  ;;  %v11204_v26 = vld [vmem:[#allocation55_spill] sm:$0xff] }
 0x2f9   : > { %v2217_v3 = vstv %s8565_s28  ;;  %v2434_v58 = vadd.f32 %v11200_v46, %v2362_v1  ;;  %v2223_v22 = vstv %s8572_s22  ;;  %v2591_v40 = vrot.slane %v8596_v14, 2  ;;  %v11205_v1 = vld [vmem:[#allocation78_spill] sm:$0xff]  ;;  %s6094_s28 = sld [smem:[#allocation7 + $0x4]] }
 0x2fa   : > { %v1847_v37 = vadd.f32 %v11201_v31, %v1771_v4  ;;  %v2593_v43 = vrot.slane %v2586_v24, 2  ;;  %v1517_v9 = vadd.f32 %v11202_v16, %v1433_v49  ;;  %v1600_v11 = vadd.f32 %v11203_v25, %v1516_v28  ;;  %s6096_s22 = sld [smem:[#allocation7 + $0x4c]] }
 0x2fb   : > { %v1787_v53 = vadd.f32 %v8381_v48, %v1722_v13  ;;  %v2518_v20 = vadd.f32 %v2514_v52, %v2434_v58  ;;  %v1667_v63 = vadd.f32 %v11204_v26, %v1619_v59  ;;  %v1930_v42 = vadd.f32 %v11205_v1, %v1846_v41  ;;  %v11209_v52 = vld [vmem:[#allocation67_spill] sm:$0xff]  ;;  %v11210_v59 = vld [vmem:[#allocation80_spill] sm:$0xff] }
 0x2fc   : > { %v1931_v61 = vadd.f32 %v11206_v55, %v1847_v37  ;;  %v2061_v4 = vadd.f32 %v11207_v23, %v1989_v19  ;;  %v2018_v24 = vsel %vm765_vm4, %v2016_v7, %v2017_v21  ;;  %v8630_v49 = vsel %vm765_vm4, %v2017_v21, %v2019_v39  ;;  %v11211_v41 = vld [vmem:[#allocation108_spill] sm:$0xff]  ;;  %v11212_v21 = vld [vmem:[#allocation49_spill] sm:$0xff] }
 0x2fd   : > { %v8606_v57 = vpop.permute.xlu0 %2574  ;;  %v11208_v62 = vrot.slane %v8482_v29, 2  ;;  %v2218_v13 = vmul.f32 %v2217_v3, %v11209_v52  ;;  %v1723_v28 = vadd.f32 %v11210_v59, %v1667_v63  ;;  %v8641_v58 = vmul.f32 %v2223_v22, %v11174_v45  ;;  %v11215_v55 = vld [vmem:[#allocation69_spill] sm:$0xff]  ;;  %v11216_v23 = vld [vmem:[#allocation96_spill] sm:$0xff] }
 0x2fe   : > { %v8612_v27 = vpop.permute.xlu1 %2553  ;;  %v2145_v46 = vadd.f32 %v11211_v41, %v2061_v4  ;;  %v2594_v7 = vsel %vm765_vm4, %v2591_v40, %v2593_v43  ;;  %v1601_v29 = vadd.f32 %v11212_v21, %v1517_v9  ;;  %v1624_v39 = vadd.f32 %v8339_v56, %v1600_v11 }
 0x2ff   : > { %v8635_v48 = vsel %vm765_vm4, %v11208_v62, %v2036_v35  ;;  %v11213_v35 = vld [vmem:[#allocation72_spill] sm:$0xff]  ;;  %v2598_v31 = vadd.f32 %v2594_v7, %v2518_v20  ;;  %v2007_v37 = vadd.f32 %v8537_v32, %v1931_v61  ;;  %v2006_v16 = vadd.f32 %v2001_v15, %v1930_v42  ;;  %v11217_v15 = vld [vmem:[#allocation102_spill] sm:$0xff]  ;;  %v2750_v61 = vpop.permute.xlu2 %2749  ;;  %v11219_v7 = vld [vmem:[#allocation107_spill] sm:$0xff] }
 0x300   : > { %v1867_v19 = vadd.f32 %v11213_v35, %v1787_v53  ;;  %v11214_v25 = vstv %s8439_s8  ;;  %v2219_v63 = vmul.f32 %v2217_v3, %v11174_v45  ;;  %v1680_v43 = vadd.f32 %v11215_v55, %v1624_v39  ;;  %v11221_v39 = vld [vmem:[#allocation113_spill] sm:$0xff]  ;;  %v11222_v35 = vld [vmem:[#allocation64_spill] sm:$0xff]  ;;  %s6085_s8 = sld [smem:[#allocation7 + $0x6d]] }
 0x301   : > { %v2212_v26 = vmul.f32 %v11214_v25, %v11209_v52  ;;  %v2348_v56 = vmul.f32 %v8500_v36, %v11209_v52  ;;  %v1788_v32 = vadd.f32 %v8460_v6, %v1723_v28  ;;  %v2082_v20 = vadd.f32 %v11217_v15, %v2006_v16  ;;  %v11218_v36 = vld [vmem:[#allocation86_spill] sm:$0xff]  ;;  %v11220_v6 = vld [vmem:[#allocation88_spill] sm:$0xff] }
 0x302   : > { %v1951_v9 = vadd.f32 %v11216_v23, %v1867_v19  ;;  %v1625_v3 = vadd.f32 %v8350_v51, %v1601_v29  ;;  %v2229_v4 = vstv %s8616_s2  ;;  %v8669_v62 = vstv %s8622_s14  ;;  %v11224_v29 = vld [vmem:[#allocation111_spill] sm:$0xff]  ;;  %s6095_s2 = sld [smem:[#allocation7 + $0x28]] }
 0x303   : > { %v2214_v42 = vadd.f32 %v2212_v26, %v2145_v46  ;;  %v1868_v41 = vadd.f32 %v11218_v36, %v1788_v32  ;;  %v2166_v21 = vadd.f32 %v11219_v7, %v2082_v20  ;;  %v2083_v28 = vadd.f32 %v11220_v6, %v2007_v37  ;;  %v11226_v37 = vld [vmem:[#allocation101_spill] sm:$0xff]  ;;  %s6097_s14 = sld [smem:[#allocation7 + $0x70]] }
 0x304   : > { %v1736_v19 = vadd.f32 %v11222_v35, %v1680_v43  ;;  %v2023_v25 = vadd.f32 %v2018_v24, %v1951_v9  ;;  %v2354_v55 = vrot.slane %v2348_v56, 1  ;;  %v2364_v23 = vstv %s8643_s19  ;;  %v11227_v9 = vld [vmem:[#allocation82_spill] sm:$0xff]  ;;  %s6099_s19 = sld [smem:[#allocation7 + $0x29]] }
 0x305   : > { %v2666_v1 = vpop.permute.xlu0 %2665  ;;  %v2246_v46 = vadd.f32 %v11221_v39, %v2214_v42  ;;  %v2167_v26 = vadd.f32 %v11224_v29, %v2083_v28  ;;  %v8687_v43 = vmul.f32 %v2229_v4, %v11209_v52  ;;  %v8690_v24 = vmul.f32 %v2229_v4, %v11174_v45  ;;  %v11232_v29 = vld [vmem:[#allocation103_spill] sm:$0xff] }
 0x306   : > { %v8660_v11 = vpop.permute.xlu1 %2576  ;;  %v2670_v53 = vadd.f32 %v2666_v1, %v2598_v31  ;;  %v11223_v31 = vld [vmem:[#allocation74_spill] sm:$0xff]  ;;  %v2224_v1 = vmul.f32 %v2223_v22, %v11209_v52  ;;  %v2103_v15 = vadd.f32 %v11226_v37, %v2023_v25  ;;  %v1952_v20 = vadd.f32 %v11227_v9, %v1868_v41  ;;  %v11228_v22 = vld [vmem:[#allocation109_spill] sm:$0xff] }
 0x307   : > { %v1681_v16 = vadd.f32 %v11223_v31, %v1625_v3  ;;  %v2220_v42 = vadd.f32 %v2218_v13, %v2166_v21  ;;  %v2302_v56 = vadd.f32 %v11228_v22, %v2246_v46  ;;  %v1804_v3 = vadd.f32 %v8465_v54, %v1736_v19  ;;  %v11229_v46 = vld [vmem:[#allocation90_spill] sm:$0xff]  ;;  %v11230_v19 = vld [vmem:[#allocation97_spill] sm:$0xff] }
 0x308   : > { %v8671_v59 = vadd.f32 %v2750_v61, %v2670_v53  ;;  %v11225_v53 = vld [vmem:[#allocation79_spill] sm:$0xff]  ;;  %v2382_v61 = vmul.f32 %v8669_v62, %v11209_v52  ;;  %v8701_v36 = vmul.f32 %v8669_v62, %v11174_v45  ;;  %v2365_v7 = vmul.f32 %v2364_v23, %v11209_v52 }
 0x309   : > { %v1737_v32 = vadd.f32 %v11225_v53, %v1681_v16  ;;  %v2366_v4 = vmul.f32 %v2364_v23, %v11174_v45  ;;  %v2221_v13 = vadd.f32 %v2219_v63, %v2167_v26  ;;  %v8710_v41 = vstv %s8664_s23  ;;  %v11231_v63 = vld [vmem:[#allocation116_spill] sm:$0xff]  ;;  %s6098_s23 = sld [smem:[#allocation7 + $0x5]] }
 0x30a   : > { %v2822_v51 = vsel %vm2818_vm5, %v8671_v59, 0.0  ;;  %v2356_v21 = vsel %vm528_vm3, %v2354_v55, %v2355_v12  ;;  %v2367_v54 = vmul.f32 %v2364_v23, %v11176_v33  ;;  %v1888_v35 = vadd.f32 %v11229_v46, %v1804_v3  ;;  %v11233_v12 = vld [vmem:[#allocation95_spill] sm:$0xff] }
 0x30b   : > { %2823 = vadd.xlane.f32.xlu1 %v2822_v51  ;;  %v1805_v39 = vadd.f32 %v8397_v18, %v1737_v32  ;;  %v2187_v31 = vadd.f32 %v11230_v19, %v2103_v15  ;;  %v2584_v16 = vmul.f32 %v8579_v2, %v11209_v52  ;;  %v2024_v25 = vadd.f32 %v8630_v49, %v1952_v20  ;;  %v11234_v32 = vld [vmem:[#allocation105_spill] sm:$0xff]  ;;  %v11235_v49 = vld [vmem:[#allocation75_spill] sm:$0xff] }
 0x30c   : > { %v2261_v51 = vadd.f32 %v11231_v63, %v2221_v13  ;;  %v2260_v34 = vadd.f32 %v11232_v29, %v2220_v42  ;;  %v2361_v26 = vadd.f32 %v2356_v21, %v2302_v56  ;;  %v1972_v55 = vadd.f32 %v11233_v12, %v1888_v35  ;;  %v11236_v56 = vld [vmem:[#allocation110_spill] sm:$0xff]  ;;  %v11237_v21 = vld [vmem:[#allocation112_spill] sm:$0xff]  ;;  %v11238_v46 = vld [vmem:[#allocation99_spill] sm:$0xff] }
 0x30d   : > { %v8707_v28 = vpop.permute.xlu0 %2705  ;;  %v2388_v23 = vrot.slane %v2382_v61, 1  ;;  %v2371_v53 = vrot.slane %v2365_v7, 1  ;;  %v2372_v18 = vrot.slane %v2366_v4, 1  ;;  %v2104_v37 = vadd.f32 %v11234_v32, %v2024_v25 }
 0x30e   : > { %v8705_v6 = vpop.permute.xlu1 %2684  ;;  %v2316_v15 = vadd.f32 %v8303_v8, %v2260_v34  ;;  %v2433_v9 = vadd.f32 %v8403_v50, %v2361_v26  ;;  %v2374_v2 = vrot.slane %v2367_v54, 1  ;;  %v1889_v20 = vadd.f32 %v11235_v49, %v1805_v39  ;;  %v11239_v54 = vld [vmem:[#allocation125_spill] sm:$0xff] }
 0x30f   : > { %v2226_v22 = vadd.f32 %v2224_v1, %v2187_v31  ;;  %v2590_v3 = vrot.slane %v2584_v16, 2  ;;  %v2600_v42 = vstv %s8692_s26  ;;  %v2188_v13 = vadd.f32 %v11236_v56, %v2104_v37  ;;  %s6100_s26 = sld [smem:[#allocation7 + $0x4d]] }
 0x310   : > { %v2317_v61 = vadd.f32 %v11237_v21, %v2261_v51  ;;  %v2389_v7 = vrot.slane %v8701_v36, 1  ;;  %v2517_v4 = vadd.f32 %v8506_v10, %v2433_v9  ;;  %v2040_v8 = vadd.f32 %v8543_v44, %v1972_v55  ;;  %v11241_v9 = vld [vmem:[#allocation104_spill] sm:$0xff] }
 0x311   : > { %v1973_v50 = vadd.f32 %v11238_v46, %v1889_v20  ;;  %v2274_v35 = vadd.f32 %v11239_v54, %v2226_v22  ;;  %v2373_v19 = vsel %vm528_vm3, %v2371_v53, %v2372_v18  ;;  %v8744_v1 = vmul.f32 %v8710_v41, %v11174_v45  ;;  %v11243_v22 = vld [vmem:[#allocation106_spill] sm:$0xff] }
 0x312   : > { %v2378_v31 = vadd.f32 %v2373_v19, %v2316_v15  ;;  %v2602_v16 = vmul.f32 %v2600_v42, %v11174_v45  ;;  %v2603_v36 = vmul.f32 %v2600_v42, %v11176_v33  ;;  %v2375_v44 = vsel %vm528_vm3, %v2372_v18, %v2374_v2  ;;  %v11242_v2 = vld [vmem:[#allocation114_spill] sm:$0xff]  ;;  %v11247_v19 = vld [vmem:[#allocation127_spill] sm:$0xff] }
 0x313   : > { %v2330_v10 = vadd.f32 %v8292_v60, %v2274_v35  ;;  %v2592_v25 = vsel %vm765_vm4, %v2590_v3, %v2591_v40  ;;  %v2601_v63 = vmul.f32 %v2600_v42, %v11209_v52  ;;  %v2227_v29 = vadd.f32 %v8641_v58, %v2188_v13  ;;  %v11240_v60 = vld [vmem:[#allocation91_spill] sm:$0xff]  ;;  %v11244_v42 = vld [vmem:[#allocation18_spill] sm:$0xff] }
 0x314   : > { %v2454_v34 = vadd.f32 %v8399_v0, %v2378_v31  ;;  %v2379_v26 = vadd.f32 %v2375_v44, %v2317_v61  ;;  %v2597_v12 = vadd.f32 %v2592_v25, %v2517_v4  ;;  %v2041_v55 = vadd.f32 %v8635_v48, %v1973_v50  ;;  %v11245_v4 = vld [vmem:[#allocation131_spill] sm:$0xff]  ;;  %v11246_v50 = vld [vmem:[#allocation100_spill] sm:$0xff] }
 0x315   : > { %v8754_v51 = vpop.permute.xlu0 %2728  ;;  %v2124_v53 = vadd.f32 %v11240_v60, %v2040_v8  ;;  %v2390_v18 = vsel %vm528_vm3, %v2388_v23, %v2389_v7  ;;  %v2384_v14 = vmul.f32 %v8669_v62, %v11176_v33  ;;  %v2608_v32 = vrot.slane %v2602_v16, 2  ;;  %v11248_v25 = vld [vmem:[#allocation123_spill] sm:$0xff] }
 0x316   : > { %v8740_v39 = vpop.permute.xlu1 %2707  ;;  %v2455_v40 = vadd.f32 %v8469_v17, %v2379_v26  ;;  %v2610_v37 = vrot.slane %v2603_v36, 2  ;;  %v2617_v15 = vstv %s8728_s6  ;;  %v2125_v58 = vadd.f32 %v11241_v9, %v2041_v55  ;;  %s6106_s6 = sld [smem:[#allocation7 + $0x7]] }
 0x317   : > { %v2208_v0 = vadd.f32 %v11242_v2, %v2124_v53  ;;  %v2395_v49 = vadd.f32 %v2390_v18, %v2330_v10  ;;  %v2607_v20 = vrot.slane %v2601_v63, 2  ;;  %v2275_v48 = vadd.f32 %v11243_v22, %v2227_v29  ;;  %v11250_v2 = vld [vmem:[#allocation128_spill] sm:$0xff] }
 0x318   : > { %v2538_v3 = vadd.f32 %v8353_v38, %v2454_v34  ;;  %v2539_v23 = vadd.f32 %v8560_v5, %v2455_v40  ;;  %v2669_v56 = vadd.f32 %v11244_v42, %v2597_v12  ;;  %v2401_v17 = vmul.f32 %v8710_v41, %v11176_v33 }
 0x319   : > { %v2391_v62 = vrot.slane %v2384_v14, 1  ;;  %v2618_v13 = vmul.f32 %v2617_v15, %v11209_v52  ;;  %v2619_v21 = vmul.f32 %v2617_v15, %v11174_v45  ;;  %v2331_v8 = vadd.f32 %v11245_v4, %v2275_v48 }
 0x31a   : > { %v2399_v38 = vmul.f32 %v8710_v41, %v11209_v52  ;;  %v2611_v5 = vsel %vm765_vm4, %v2608_v32, %v2610_v37  ;;  %v2209_v54 = vadd.f32 %v11246_v50, %v2125_v58  ;;  %v2232_v35 = vadd.f32 %v8687_v43, %v2208_v0  ;;  %v2790_v50 = vpop.permute.xlu2 %2789 }
 0x31b   : > { %v2475_v31 = vadd.f32 %v11247_v19, %v2395_v49  ;;  %v2609_v16 = vsel %vm765_vm4, %v2607_v20, %v2608_v32  ;;  %v2615_v36 = vadd.f32 %v2611_v5, %v2539_v23  ;;  %v2392_v29 = vsel %vm528_vm3, %v2389_v7, %v2391_v62  ;;  %v11249_v32 = vld [vmem:[#allocation23_spill] sm:$0xff] }
 0x31c   : > { %v2614_v10 = vadd.f32 %v2609_v16, %v2538_v3  ;;  %v2288_v63 = vadd.f32 %v11248_v25, %v2232_v35  ;;  %v2624_v34 = vrot.slane %v2618_v13, 2  ;;  %v2625_v26 = vrot.slane %v2619_v21, 2  ;;  %v11252_v3 = vld [vmem:[#allocation130_spill] sm:$0xff]  ;;  %v11254_v35 = vld [vmem:[#allocation17_spill] sm:$0xff] }
 0x31d   : > { %v2769_v12 = vpop.permute.xlu0 %2768  ;;  %v2396_v43 = vadd.f32 %v2392_v29, %v2331_v8  ;;  %v2559_v55 = vadd.f32 %v8612_v27, %v2475_v31  ;;  %v2233_v18 = vadd.f32 %v8690_v24, %v2209_v54  ;;  %v2406_v14 = vrot.slane %v8744_v1, 1  ;;  %v11251_v24 = vld [vmem:[#allocation115_spill] sm:$0xff]  ;;  %v11255_v29 = vld [vmem:[#allocation129_spill] sm:$0xff] }
 0x31e   : > { %v2748_v61 = vpop.permute.xlu1 %2747  ;;  %v2690_v60 = vadd.f32 %v8705_v6, %v2614_v10  ;;  %v2620_v40 = vmul.f32 %v2617_v15, %v11176_v33  ;;  %v2408_v7 = vrot.slane %v2401_v17, 1  ;;  %v2691_v58 = vadd.f32 %v8551_v30, %v2615_v36 }
 0x31f   : > { %v8781_v46 = vadd.f32 %v2748_v61, %v2669_v56  ;;  %v2476_v37 = vadd.f32 %v11249_v32, %v2396_v43  ;;  %v2289_v27 = vadd.f32 %v11250_v2, %v2233_v18  ;;  %v2405_v0 = vrot.slane %v2399_v38, 1  ;;  %v11253_v56 = vld [vmem:[#allocation66_spill] sm:$0xff] }
 0x320   : > { %v8800_v9 = vadd.f32 %v2769_v12, %v2690_v60  ;;  %v2634_v6 = vstv %s8773_s30  ;;  %v2626_v49 = vsel %vm765_vm4, %v2624_v34, %v2625_v26  ;;  %v2344_v22 = vadd.f32 %v11251_v24, %v2288_v63  ;;  %s6101_s30 = sld [smem:[#allocation7 + $0x71]] }
 0x321   : > { %v2819_v44 = vsel %vm2818_vm5, %v8781_v46, 0.0  ;;  %v2832_v41 = vmul.f32 %v8781_v46, %v8781_v46  ;;  %v2631_v1 = vadd.f32 %v2626_v49, %v2559_v55  ;;  %v2833_v15 = vmul.f32 %v8671_v59, %v8671_v59 }
 0x322   : > { %2820 = vadd.xlane.f32.xlu0 %v2819_v44  ;;  %v2345_v23 = vadd.f32 %v11252_v3, %v2289_v27  ;;  %v2627_v42 = vrot.slane %v2620_v40, 2  ;;  %v2560_v30 = vadd.f32 %v11253_v56, %v2476_v37  ;;  %v2868_v13 = vsel %vm2818_vm5, %v8800_v9, 0.0 }
 0x323   : > { %v2834_v53 = vsel %vm2818_vm5, %v2832_v41, 0.0  ;;  %v2711_v17 = vadd.f32 %v8707_v28, %v2631_v1  ;;  %v2407_v21 = vsel %vm528_vm3, %v2405_v0, %v2406_v14  ;;  %v2635_v61 = vmul.f32 %v2634_v6, %v11209_v52  ;;  %v2813_v0 = vpop.permute.xlu2 %2812 }
 0x324   : > { %2835 = vadd.xlane.f32.xlu2 %v2834_v53  ;;  %v2636_v4 = vmul.f32 %v2634_v6, %v11174_v45  ;;  %v2409_v8 = vsel %vm528_vm3, %v2406_v14, %v2408_v7  ;;  %v2412_v38 = vadd.f32 %v2407_v21, %v2344_v22  ;;  %v2837_v5 = vsel %vm2818_vm5, %v2833_v15, 0.0 }
 0x325   : > { %v2413_v28 = vadd.f32 %v2409_v8, %v2345_v23  ;;  %v2628_v54 = vsel %vm765_vm4, %v2625_v26, %v2627_v42  ;;  %v8825_v31 = vadd.f32 %v2790_v50, %v2711_v17  ;;  %v2641_v52 = vrot.slane %v2635_v61, 2  ;;  %v2792_v44 = vpop.permute.xlu0 %2791 }
 0x326   : > { %v2771_v20 = vpop.permute.xlu1 %2770  ;;  %v2496_v19 = vadd.f32 %v11254_v35, %v2412_v38  ;;  %v2632_v16 = vadd.f32 %v2628_v54, %v2560_v30  ;;  %v2642_v36 = vrot.slane %v2636_v4, 2  ;;  %v2637_v10 = vmul.f32 %v2634_v6, %v11176_v33 }
 0x327   : > { %v8807_v48 = vadd.f32 %v2771_v20, %v2691_v58  ;;  %v2881_v63 = vmul.f32 %v8800_v9, %v8800_v9  ;;  %v2497_v34 = vadd.f32 %v11255_v29, %v2413_v28  ;;  %v2917_v12 = vsel %vm2818_vm5, %v8825_v31, 0.0 }
 0x328   : > { %v2580_v41 = vadd.f32 %v8606_v57, %v2496_v19  ;;  %v2712_v25 = vadd.f32 %v8740_v39, %v2632_v16  ;;  %v2643_v55 = vsel %vm765_vm4, %v2641_v52, %v2642_v36  ;;  %v2644_v33 = vrot.slane %v2637_v10, 2 }
 0x329   : > { %v2871_v62 = vsel %vm2818_vm5, %v8807_v48, 0.0  ;;  %v2882_v45 = vmul.f32 %v8807_v48, %v8807_v48  ;;  %v2581_v39 = vadd.f32 %v8660_v11, %v2497_v34  ;;  %v2883_v60 = vsel %vm2818_vm5, %v2881_v63, 0.0 }
 0x32a   : > { %2872 = vadd.xlane.f32.xlu1 %v2871_v62  ;;  %2869 = vadd.xlane.f32.xlu0 %v2868_v13  ;;  %v8835_v26 = vadd.f32 %v2792_v44, %v2712_v25  ;;  %v2648_v57 = vadd.f32 %v2643_v55, %v2580_v41  ;;  %v2930_v53 = vmul.f32 %v8825_v31, %v8825_v31 }
 0x32b   : > { %v2886_v43 = vsel %vm2818_vm5, %v2882_v45, 0.0  ;;  %v2645_v14 = vsel %vm765_vm4, %v2642_v36, %v2644_v33 }
 0x32c   : > { %2838 = vadd.xlane.f32.xlu2 %v2837_v5  ;;  %v2931_v18 = vmul.f32 %v8835_v26, %v8835_v26  ;;  %v2649_v7 = vadd.f32 %v2645_v14, %v2581_v39  ;;  %v2732_v32 = vadd.f32 %v8604_v47, %v2648_v57  ;;  %v2932_v11 = vsel %vm2818_vm5, %v2930_v53, 0.0 }
 0x32d   : > { %v2920_v27 = vsel %vm2818_vm5, %v8835_v26, 0.0 }
 0x32e   : > { %v2811_v40 = vpop.permute.xlu1 %2810  ;;  %v2733_v37 = vadd.f32 %v8754_v51, %v2649_v7  ;;  %v2935_v2 = vsel %vm2818_vm5, %v2931_v18, 0.0 }
 0x32f   : > { %v8850_v58 = vadd.f32 %v2811_v40, %v2732_v32 }
 0x330   : > { %v8856_v6 = vadd.f32 %v2813_v0, %v2733_v37 }
 0x331   : > { %v2979_v47 = vmul.f32 %v8850_v58, %v8850_v58  ;;  %v2966_v20 = vsel %vm2818_vm5, %v8850_v58, 0.0 }
 0x332   : > { %2918 = vadd.xlane.f32.xlu1 %v2917_v12  ;;  %2887 = vadd.xlane.f32.xlu0 %v2886_v43  ;;  %v2969_v51 = vsel %vm2818_vm5, %v8856_v6, 0.0  ;;  %v2980_v24 = vmul.f32 %v8856_v6, %v8856_v6 }
 0x333   : > { %v2981_v49 = vsel %vm2818_vm5, %v2979_v47, 0.0 }
 0x334   : > { %2884 = vadd.xlane.f32.xlu2 %v2883_v60  ;;  %v2984_v22 = vsel %vm2818_vm5, %v2980_v24, 0.0 }
 0x33a   : > { %2933 = vadd.xlane.f32.xlu0 %v2932_v11  ;;  %2936 = vadd.xlane.f32.xlu1 %v2935_v2 }
 0x33c   : > { %2921 = vadd.xlane.f32.xlu2 %v2920_v27 }
 0x342   : > { %2970 = vadd.xlane.f32.xlu0 %v2969_v51  ;;  %2982 = vadd.xlane.f32.xlu1 %v2981_v49 }
 0x344   : > { %2967 = vadd.xlane.f32.xlu2 %v2966_v20 }
 0x34c   : > { %2985 = vadd.xlane.f32.xlu2 %v2984_v22 }
 0x37e   : > { %v2824_v1 = vpop.xlane.xlu1 %2823 }
 0x395   : > { %v2821_v15 = vpop.xlane.xlu0 %2820 }
 0x396   : > { %v2825_v3 = vadd.f32 %v2824_v1, %v2821_v15 }
 0x397   : > { %v2836_v23 = vpop.xlane.xlu2 %2835 }
 0x398   : > { %v2826_v42 = vrot.slane %v2825_v3, 4 }
 0x39a   : > { %v2827_v56 = vadd.f32 %v2826_v42, %v2825_v3 }
 0x39c   : > { %v2828_v30 = vrot.slane %v2827_v56, 2 }
 0x39d   : > { %v2873_v17 = vpop.xlane.xlu1 %2872  ;;  %v2870_v62 = vpop.xlane.xlu0 %2869 }
 0x39e   : > { %v2829_v13 = vadd.f32 %v2828_v30, %v2827_v56  ;;  %v2874_v21 = vadd.f32 %v2873_v17, %v2870_v62 }
 0x39f   : > { %v2839_v61 = vpop.xlane.xlu2 %2838 }
 0x3a0   : > { %v2875_v4 = vrot.slane %v2874_v21, 4  ;;  %v2840_v8 = vadd.f32 %v2839_v61, %v2836_v23  ;;  %v2830_v38 = vrot.slane %v2829_v13, 1 }
 0x3a2   : > { %v2876_v5 = vadd.f32 %v2875_v4, %v2874_v21  ;;  %v2841_v28 = vrot.slane %v2840_v8, 4  ;;  %v2831_v16 = vadd.f32 %v2830_v38, %v2829_v13 }
 0x3a4   : > { %v2877_v50 = vrot.slane %v2876_v5, 2  ;;  %v2842_v54 = vadd.f32 %v2841_v28, %v2840_v8  ;;  %v8868_v25 = vmul.f32 0.00390625, %v2831_v16 }
 0x3a5   : > { %v2919_v35 = vpop.xlane.xlu1 %2918  ;;  %v2888_v19 = vpop.xlane.xlu0 %2887 }
 0x3a6   : > { %v2878_v45 = vadd.f32 %v2877_v50, %v2876_v5  ;;  %v2843_v52 = vrot.slane %v2842_v54, 2  ;;  %v2849_v39 = vmul.f32 %v8868_v25, %v8868_v25 }
 0x3a7   : > { %v2885_v36 = vpop.xlane.xlu2 %2884 }
 0x3a8   : > { %v2844_v10 = vadd.f32 %v2843_v52, %v2842_v54  ;;  %v2889_v44 = vadd.f32 %v2888_v19, %v2885_v36  ;;  %v2879_v41 = vrot.slane %v2878_v45, 1 }
 0x3aa   : > { %v2845_v63 = vrot.slane %v2844_v10, 1  ;;  %v2890_v29 = vrot.slane %v2889_v44, 4  ;;  %v2880_v43 = vadd.f32 %v2879_v41, %v2878_v45 }
 0x3ac   : > { %v2846_v34 = vadd.f32 %v2845_v63, %v2844_v10  ;;  %v2891_v12 = vadd.f32 %v2890_v29, %v2889_v44  ;;  %v8872_v37 = vmul.f32 0.00390625, %v2880_v43 }
 0x3ad   : > { %v2937_v55 = vpop.xlane.xlu1 %2936  ;;  %v2934_v33 = vpop.xlane.xlu0 %2933 }
 0x3ae   : > { %v2848_v57 = vmul.f32 0.00390625, %v2846_v34  ;;  %v2892_v60 = vrot.slane %v2891_v12, 2  ;;  %v2938_v53 = vadd.f32 %v2937_v55, %v2934_v33  ;;  %v2898_v24 = vmul.f32 %v8872_v37, %v8872_v37 }
 0x3af   : > { %v2922_v18 = vpop.xlane.xlu2 %2921  ;;  %v2852_v33 = vsub.f32 %v8671_v59, %v8868_v25 }
 0x3b0   : > { %v2850_v14 = vsub.f32 %v2848_v57, %v2849_v39  ;;  %v2893_v40 = vadd.f32 %v2892_v60, %v2891_v12  ;;  %v2939_v7 = vrot.slane %v2938_v53, 4  ;;  %v2923_v32 = vadd.f32 %v2922_v18, %v2919_v35 }
 0x3b1   : > { %v2851_v39 = vsub.f32 %v8781_v46, %v8868_v25 }
 0x3b2   : > { %v2853_v11 = vadd.f32 1e-05, %v2850_v14  ;;  %v2894_v2 = vrot.slane %v2893_v40, 1  ;;  %v2940_v27 = vadd.f32 %v2939_v7, %v2938_v53  ;;  %v2924_v0 = vrot.slane %v2923_v32, 4 }
 0x3b4   : > { %6310 = vrsqrt.f32 %v2853_v11  ;;  %v2895_v47 = vadd.f32 %v2894_v2, %v2893_v40  ;;  %v2941_v51 = vrot.slane %v2940_v27, 2  ;;  %v2925_v49 = vadd.f32 %v2924_v0, %v2923_v32 }
 0x3b5   : > { %v2971_v15 = vpop.xlane.xlu0 %2970  ;;  %v2983_v54 = vpop.xlane.xlu1 %2982  ;;  %vm2860_vm7 = vweird.f32 %v2853_v11 }
 0x3b6   : > { %v2897_v20 = vmul.f32 0.00390625, %v2895_v47  ;;  %v2942_v22 = vadd.f32 %v2941_v51, %v2940_v27  ;;  %v2926_v1 = vrot.slane %v2925_v49, 2  ;;  %v2900_v51 = vsub.f32 %v8800_v9, %v8872_v37 }
 0x3b7   : > { %v2968_v3 = vpop.xlane.xlu2 %2967 }
 0x3b8   : > { %v2899_v23 = vsub.f32 %v2897_v20, %v2898_v24  ;;  %v2943_v42 = vrot.slane %v2942_v22, 1  ;;  %v2927_v56 = vadd.f32 %v2926_v1, %v2925_v49  ;;  %v2972_v30 = vadd.f32 %v2971_v15, %v2968_v3 }
 0x3ba   : > { %v6311_v17 = vpop.eup %6310  ;;  %v2902_v62 = vadd.f32 1e-05, %v2899_v23  ;;  %v2928_v13 = vrot.slane %v2927_v56, 1  ;;  %v2973_v21 = vrot.slane %v2972_v30, 4  ;;  %v2944_v4 = vadd.f32 %v2943_v42, %v2942_v22 }
 0x3bb   : > { %v2855_v61 = vmul.f32 %v6311_v17, %v2853_v11  ;;  %vm2861_vm6 = vweird.f32 %v6311_v17 }
 0x3bc   : > { %6312 = vrsqrt.f32 %v2902_v62  ;;  %v2929_v8 = vadd.f32 %v2928_v13, %v2927_v56  ;;  %v2974_v38 = vadd.f32 %v2973_v21, %v2972_v30  ;;  %v2946_v16 = vmul.f32 0.00390625, %v2944_v4  ;;  %vm2862_vm8 = vmor %vm2860_vm7, %vm2861_vm6 }
 0x3bd   : > { %v2856_v5 = vmul.f32 %v6311_v17, %v2855_v61  ;;  %vm2909_vm10 = vweird.f32 %v2902_v62  ;;  %v2901_v30 = vsub.f32 %v8807_v48, %v8872_v37 }
 0x3be   : > { %v8876_v28 = vmul.f32 0.00390625, %v2929_v8  ;;  %v2975_v50 = vrot.slane %v2974_v38, 2 }
 0x3bf   : > { %v2986_v35 = vpop.xlane.xlu2 %2985  ;;  %v2857_v19 = vmul.f32 0.5, %v2856_v5 }
 0x3c0   : > { %v2947_v45 = vmul.f32 %v8876_v28, %v8876_v28  ;;  %v2976_v52 = vadd.f32 %v2975_v50, %v2974_v38  ;;  %v2987_v36 = vadd.f32 %v2986_v35, %v2983_v54  ;;  %v2949_v48 = vsub.f32 %v8825_v31, %v8876_v28 }
 0x3c1   : > { %v2858_v10 = vsub.f32 1.5, %v2857_v19  ;;  %v2950_v50 = vsub.f32 %v8835_v26, %v8876_v28 }
 0x3c2   : > { %v6313_v44 = vpop.eup %6312  ;;  %v2948_v41 = vsub.f32 %v2946_v16, %v2947_v45  ;;  %v2977_v63 = vrot.slane %v2976_v52, 1  ;;  %v2988_v29 = vrot.slane %v2987_v36, 4 }
 0x3c3   : > { %v2904_v34 = vmul.f32 %v6313_v44, %v2902_v62  ;;  %v2859_v12 = vmul.f32 %v6311_v17, %v2858_v10  ;;  %vm2910_vm9 = vweird.f32 %v6313_v44 }
 0x3c4   : > { %v2951_v43 = vadd.f32 1e-05, %v2948_v41  ;;  %v2989_v55 = vadd.f32 %v2988_v29, %v2987_v36  ;;  %v2978_v53 = vadd.f32 %v2977_v63, %v2976_v52  ;;  %vm2911_vm11 = vmor %vm2909_vm10, %vm2910_vm9 }
 0x3c5   : > { %v2863_v57 = vsel %vm2862_vm8, %v6311_v17, %v2859_v12  ;;  %v2905_v60 = vmul.f32 %v6313_v44, %v2904_v34 }
 0x3c6   : > { %6314 = vrsqrt.f32 %v2951_v43  ;;  %v2990_v18 = vrot.slane %v2989_v55, 2  ;;  %v2865_v14 = vmul.f32 %v2863_v57, %v2852_v33  ;;  %v2864_v40 = vmul.f32 %v2863_v57, %v2851_v39 }
 0x3c7   : > { %v2906_v7 = vmul.f32 0.5, %v2905_v60  ;;  %v8884_v0 = vmul.f32 0.00390625, %v2978_v53  ;;  %vm2958_vm13 = vweird.f32 %v2951_v43  ;;  %v3192_v33 = vstv %s6082_s7  ;;  %s6110_s7 = sld [smem:[#allocation7 + $0x8]] }
 0x3c8   : > { %v2991_v32 = vadd.f32 %v2990_v18, %v2989_v55  ;;  %v2867_v2 = vmax.f32 %v2865_v14, 0.0  ;;  %v2866_v11 = vmax.f32 %v2864_v40, 0.0  ;;  %v3206_v55 = vstv %s6083_s5  ;;  %s6108_s5 = sld [smem:[#allocation7 + $0x4f]] }
 0x3c9   : > { %v2907_v27 = vsub.f32 1.5, %v2906_v7  ;;  %v2996_v22 = vmul.f32 %v8884_v0, %v8884_v0  ;;  %v2998_v26 = vsub.f32 %v8850_v58, %v8884_v0  ;;  %v2999_v52 = vsub.f32 %v8856_v6, %v8884_v0 }
 0x3ca   : > { %v2992_v59 = vrot.slane %v2991_v32, 1  ;;  %3019 = vrot.lane.b32.xlu1 %v2867_v2, %s10994_s21  ;;  %3023 = vrot.lane.b32.xlu2 %v2866_v11, %s11256_s4  ;;  %v3248_v0 = vstv %s6086_s11  ;;  %s6111_s11 = sld [smem:[#allocation7 + $0x2c]] }
 0x3cb   : > { %3017 = vrot.lane.b32.xlu0 %v2866_v11, %s10994_s21  ;;  %v2908_v46 = vmul.f32 %v6313_v44, %v2907_v27 }
 0x3cc   : > { %v6315_v25 = vpop.eup %6314  ;;  %v2993_v47 = vadd.f32 %v2992_v59, %v2991_v32  ;;  %v3220_v32 = vstv %s6084_s9  ;;  %v3234_v59 = vstv %s6085_s8  ;;  %s6112_s9 = sld [smem:[#allocation7 + $0x50]] }
 0x3cd   : > { %v2912_v49 = vsel %vm2911_vm11, %v6313_v44, %v2908_v46  ;;  %v2953_v20 = vmul.f32 %v6315_v25, %v2951_v43  ;;  %vm2959_vm12 = vweird.f32 %v6315_v25  ;;  %s6113_s8 = sld [smem:[#allocation7 + $0x74]] }
 0x3ce   : > { %v2995_v24 = vmul.f32 0.00390625, %v2993_v47  ;;  %v2913_v1 = vmul.f32 %v2912_v49, %v2900_v51  ;;  %v2914_v17 = vmul.f32 %v2912_v49, %v2901_v30  ;;  %vm2960_vm14 = vmor %vm2958_vm13, %vm2959_vm12  ;;  %v3262_v51 = vstv %s6087_s10  ;;  %s9122_s10 = sld [smem:[#allocation7 + $0x2e]] }
 0x3cf   : > { %v2954_v15 = vmul.f32 %v6315_v25, %v2953_v20 }
 0x3d0   : > { %v2997_v3 = vsub.f32 %v2995_v24, %v2996_v22  ;;  %v2915_v23 = vmax.f32 %v2913_v1, 0.0  ;;  %v2916_v13 = vmax.f32 %v2914_v17, 0.0  ;;  %v3290_v1 = vstv %s6089_s1  ;;  %s9126_s1 = sld [smem:[#allocation7 + $0xa]] }
 0x3d1   : > { %v2955_v42 = vmul.f32 0.5, %v2954_v15  ;;  %v3276_v15 = vstv %s8950_s27  ;;  %s6120_s27 = sld [smem:[#allocation7 + $0x52]] }
 0x3d2   : > { %v3000_v56 = vadd.f32 1e-05, %v2997_v3  ;;  %3029 = vrot.lane.b32.xlu1 %v2866_v11, %s11257_s29  ;;  %3055 = vrot.lane.b32.xlu2 %v2915_v23, %s10994_s21 }
 0x3d3   : > { %3025 = vrot.lane.b32.xlu0 %v2867_v2, %s11256_s4  ;;  %v2956_v9 = vsub.f32 1.5, %v2955_v42 }
 0x3d4   : > { %6316 = vrsqrt.f32 %v3000_v56  ;;  %vm3007_vm6 = vweird.f32 %v3000_v56 }
 0x3d5   : > { %v2957_v62 = vmul.f32 %v6315_v25, %v2956_v9 }
 0x3d7   : > { %v2961_v61 = vsel %vm2960_vm14, %v6315_v25, %v2957_v62 }
 0x3d8   : > { %v2962_v37 = vmul.f32 %v2961_v61, %v2949_v48  ;;  %v2963_v35 = vmul.f32 %v2961_v61, %v2950_v50  ;;  %v3414_v61 = vstv %s6096_s22  ;;  %s6121_s22 = sld [smem:[#allocation7 + $0x76]] }
 0x3da   : > { %v6317_v21 = vpop.eup %6316  ;;  %3057 = vrot.lane.b32.xlu1 %v2916_v13, %s10994_s21  ;;  %3063 = vrot.lane.b32.xlu2 %v2916_v13, %s11256_s4  ;;  %v2964_v5 = vmax.f32 %v2962_v37, 0.0  ;;  %v2965_v16 = vmax.f32 %v2963_v35, 0.0  ;;  %v3393_v37 = vstv %s6095_s2  ;;  %s9180_s2 = sld [smem:[#allocation7 + $0x2f]] }
 0x3db   : > { %v3002_v4 = vmul.f32 %v6317_v21, %v3000_v56  ;;  %3031 = vrot.lane.b32.xlu0 %v2867_v2, %s11257_s29  ;;  %vm3008_vm15 = vweird.f32 %v6317_v21  ;;  %v3372_v56 = vstv %s6094_s28  ;;  %s6122_s28 = sld [smem:[#allocation7 + $0xb]] }
 0x3dc   : > { %vm3009_vm7 = vmor %vm3007_vm6, %vm3008_vm15 }
 0x3dd   : > { %v3003_v8 = vmul.f32 %v6317_v21, %v3002_v4 }
 0x3df   : > { %v3004_v38 = vmul.f32 0.5, %v3003_v8 }
 0x3e1   : > { %v3005_v54 = vsub.f32 1.5, %v3004_v38 }
 0x3e2   : > { %3067 = vrot.lane.b32.xlu1 %v2915_v23, %s11257_s29  ;;  %3093 = vrot.lane.b32.xlu2 %v2964_v5, %s10994_s21 }
 0x3e3   : > { %3061 = vrot.lane.b32.xlu0 %v2915_v23, %s11256_s4  ;;  %v3006_v19 = vmul.f32 %v6317_v21, %v3005_v54 }
 0x3e5   : > { %v3010_v31 = vsel %vm3009_vm7, %v6317_v21, %v3006_v19 }
 0x3e6   : > { %v3011_v28 = vmul.f32 %v3010_v31, %v2998_v26  ;;  %v3012_v36 = vmul.f32 %v3010_v31, %v2999_v52 }
 0x3e8   : > { %v3013_v45 = vmax.f32 %v3011_v28, 0.0  ;;  %v3014_v10 = vmax.f32 %v3012_v36, 0.0  ;;  %v3435_v36 = vstv %s6097_s14  ;;  %s9192_s14 = sld [smem:[#allocation7 + $0x77]] }
 0x3ea   : > { %3095 = vrot.lane.b32.xlu1 %v2965_v16, %s10994_s21  ;;  %3101 = vrot.lane.b32.xlu2 %v2965_v16, %s11256_s4 }
 0x3eb   : > { %3069 = vrot.lane.b32.xlu0 %v2916_v13, %s11257_s29 }
 0x3f2   : > { %3105 = vrot.lane.b32.xlu1 %v2964_v5, %s11257_s29  ;;  %3131 = vrot.lane.b32.xlu2 %v3013_v45, %s10994_s21 }
 0x3f3   : > { %3099 = vrot.lane.b32.xlu0 %v2964_v5, %s11256_s4 }
 0x3fa   : > { %3133 = vrot.lane.b32.xlu1 %v3014_v10, %s10994_s21  ;;  %3139 = vrot.lane.b32.xlu2 %v3014_v10, %s11256_s4 }
 0x3fb   : > { %3107 = vrot.lane.b32.xlu0 %v2965_v16, %s11257_s29 }
 0x402   : > { %3143 = vrot.lane.b32.xlu1 %v3013_v45, %s11257_s29 }
 0x403   : > { %3137 = vrot.lane.b32.xlu0 %v3013_v45, %s11256_s4  ;;  %s6107_s4 = sld [smem:[#allocation7 + $0x2b]] }
 0x40b   : > { %3145 = vrot.lane.b32.xlu0 %v3014_v10, %s11257_s29  ;;  %s6109_s29 = sld [smem:[#allocation7 + $0x73]] }
 0x424   : > { %v3024_v44 = vpop.permute.xlu2 %3023 }
 0x42c   : > { %v8964_v30 = vpop.permute.xlu2 %3055 }
 0x434   : > { %v8980_v54 = vpop.permute.xlu2 %3063 }
 0x43c   : > { %v3020_v58 = vpop.permute.xlu1 %3019 }
 0x43d   : > { %v3018_v6 = vpop.permute.xlu0 %3017 }
 0x43e   : > { %v3035_v41 = vsel %vm249_vm0, %v3018_v6, %v3024_v44 }
 0x444   : > { %v3030_v63 = vpop.permute.xlu1 %3029 }
 0x445   : > { %v3037_v29 = vsel %vm252_vm1, %v3035_v41, %v3030_v63  ;;  %v3026_v34 = vpop.permute.xlu0 %3025 }
 0x446   : > { %v3040_v12 = vrot.slane %v3037_v29, 1  ;;  %v3043_v43 = vrot.slane %v3037_v29, 7  ;;  %v3036_v53 = vsel %vm249_vm0, %v3020_v58, %v3026_v34  ;;  %v8995_v29 = vpop.permute.xlu2 %3093 }
 0x448   : > { %v8927_v57 = vsel %vm259_vm2, %v3040_v12, %v3043_v43 }
 0x449   : > { %v3207_v39 = vmul.f32 %v3206_v55, %v8927_v57  ;;  %v3193_v60 = vmul.f32 %v3192_v33, %v8927_v57  ;;  %v3249_v46 = vmul.f32 %v3248_v0, %v8927_v57  ;;  %v3235_v25 = vmul.f32 %v3234_v59, %v8927_v57 }
 0x44a   : > { %v3221_v47 = vmul.f32 %v3220_v32, %v8927_v57  ;;  %v3291_v23 = vmul.f32 %v3290_v1, %v8927_v57  ;;  %v3277_v42 = vmul.f32 %v3276_v15, %v8927_v57  ;;  %v3263_v9 = vmul.f32 %v3262_v51, %v8927_v57 }
 0x44b   : > { %3211 = vrot.lane.b32.xlu0 %v3207_v39, %s10994_s21  ;;  %3197 = vrot.lane.b32.xlu2 %v3193_v60, %s10994_s21  ;;  %v3415_v50 = vmul.f32 %v3414_v61, %v8927_v57  ;;  %v3394_v35 = vmul.f32 %v3393_v37, %v8927_v57  ;;  %v3373_v16 = vmul.f32 %v3372_v56, %v8927_v57  ;;  %v3456_v60 = vstv %s6098_s23  ;;  %s6130_s23 = sld [smem:[#allocation7 + $0xd]] }
 0x44d   : > { %v3032_v18 = vpop.permute.xlu0 %3031  ;;  %v3421_v26 = vrot.slane %v3415_v50, 1  ;;  %v3400_v28 = vrot.slane %v3394_v35, 1  ;;  %v3379_v52 = vrot.slane %v3373_v16, 1 }
 0x44e   : > { %v3038_v14 = vsel %vm252_vm1, %v3036_v53, %v3032_v18 }
 0x44f   : > { %v3044_v40 = vrot.slane %v3038_v14, 7  ;;  %v3049_v22 = vrot.slane %v3038_v14, 5 }
 0x451   : > { %v8936_v7 = vsel %vm259_vm2, %v3043_v43, %v3044_v40  ;;  %v8960_v3 = vsel %vm259_vm2, %v3044_v40, %v3049_v22 }
 0x452   : > { %v3222_v2 = vmul.f32 %v3220_v32, %v8936_v7  ;;  %v3208_v11 = vmul.f32 %v3206_v55, %v8936_v7  ;;  %v3194_v27 = vmul.f32 %v3192_v33, %v8936_v7  ;;  %v3264_v49 = vmul.f32 %v3262_v51, %v8936_v7 }
 0x453   : > { %v3250_v20 = vmul.f32 %v3248_v0, %v8936_v7  ;;  %v3236_v24 = vmul.f32 %v3234_v59, %v8936_v7  ;;  %v3374_v17 = vmul.f32 %v3372_v56, %v8936_v7  ;;  %v3375_v62 = vmul.f32 %v3372_v56, %v8960_v3  ;;  %v9021_v56 = vpop.permute.xlu1 %3057 }
 0x454   : > { %3227 = vrot.lane.b32.xlu0 %v3222_v2, %s10994_s21  ;;  %3213 = vrot.lane.b32.xlu2 %v3208_v11, %s10994_s21  ;;  %v3292_v4 = vmul.f32 %v3290_v1, %v8936_v7  ;;  %v3416_v48 = vmul.f32 %v3414_v61, %v8936_v7  ;;  %v3278_v38 = vmul.f32 %v3276_v15, %v8936_v7  ;;  %v3477_v33 = vstv %s6099_s19  ;;  %s9196_s19 = sld [smem:[#allocation7 + $0x53]] }
 0x455   : > { %3199 = vrot.lane.b32.xlu1 %v3194_v27, %s10994_s21  ;;  %v3380_v13 = vrot.slane %v3374_v17, 1  ;;  %v3382_v21 = vrot.slane %v3375_v62, 1  ;;  %v3395_v5 = vmul.f32 %v3393_v37, %v8936_v7  ;;  %v3437_v58 = vmul.f32 %v3435_v36, %v8936_v7  ;;  %v8998_v53 = vpop.permute.xlu0 %3061 }
 0x456   : > { %v3422_v19 = vrot.slane %v3416_v48, 1  ;;  %v3438_v6 = vmul.f32 %v3435_v36, %v8960_v3  ;;  %v3417_v44 = vmul.f32 %v3414_v61, %v8960_v3  ;;  %v3396_v63 = vmul.f32 %v3393_v37, %v8960_v3 }
 0x457   : > { %v3383_v8 = vsel %vm528_vm3, %v3380_v13, %v3382_v21  ;;  %v3401_v31 = vrot.slane %v3395_v5, 1  ;;  %v3381_v41 = vsel %vm528_vm3, %v3379_v52, %v3380_v13  ;;  %v3443_v34 = vrot.slane %v3437_v58, 1 }
 0x458   : > { %v3423_v45 = vsel %vm528_vm3, %v3421_v26, %v3422_v19  ;;  %v3445_v12 = vrot.slane %v3438_v6, 1  ;;  %v3424_v43 = vrot.slane %v3417_v44, 1  ;;  %v3403_v55 = vrot.slane %v3396_v63, 1 }
 0x459   : > { %v3402_v10 = vsel %vm528_vm3, %v3400_v28, %v3401_v31  ;;  %v3479_v39 = vmul.f32 %v3477_v33, %v8936_v7  ;;  %v3458_v40 = vmul.f32 %v3456_v60, %v8936_v7  ;;  %v3478_v2 = vmul.f32 %v3477_v33, %v8927_v57 }
 0x45a   : > { %v3446_v18 = vsel %vm528_vm3, %v3443_v34, %v3445_v12  ;;  %v3425_v14 = vsel %vm528_vm3, %v3422_v19, %v3424_v43  ;;  %v3404_v32 = vsel %vm528_vm3, %v3401_v31, %v3403_v55  ;;  %v3457_v11 = vmul.f32 %v3456_v60, %v8927_v57 }
 0x45b   : > { %v3485_v27 = vrot.slane %v3479_v39, 1  ;;  %v3436_v0 = vmul.f32 %v3435_v36, %v8927_v57  ;;  %v3464_v59 = vrot.slane %v3458_v40, 1  ;;  %v3480_v15 = vmul.f32 %v3477_v33, %v8960_v3  ;;  %v9039_v26 = vpop.permute.xlu1 %3067 }
 0x45c   : > { %3253 = vrot.lane.b32.xlu0 %v3249_v46, %s6477_s0  ;;  %3239 = vrot.lane.b32.xlu2 %v3235_v25, %s10994_s21  ;;  %v3484_v46 = vrot.slane %v3478_v2, 1  ;;  %v9010_v25 = vpop.permute.xlu2 %3101  ;;  %v3608_v61 = vstv %s6106_s6  ;;  %v3519_v48 = vstv %s6101_s30  ;;  %s6131_s6 = sld [smem:[#allocation7 + $0x31]] }
 0x45d   : > { %3225 = vrot.lane.b32.xlu1 %v3221_v47, %s10994_s21  ;;  %v3463_v47 = vrot.slane %v3457_v11, 1  ;;  %v3487_v13 = vrot.slane %v3480_v15, 1  ;;  %v3521_v5 = vmul.f32 %v3519_v48, %v8936_v7  ;;  %v3609_v35 = vmul.f32 %v3608_v61, %v8927_v57  ;;  %s6133_s30 = sld [smem:[#allocation7 + $0x79]] }
 0x45e   : > { %v3486_v51 = vsel %vm528_vm3, %v3484_v46, %v3485_v27  ;;  %v3520_v19 = vmul.f32 %v3519_v48, %v8927_v57  ;;  %v3629_v6 = vstv %s6107_s4  ;;  %v3522_v43 = vmul.f32 %v3519_v48, %v8960_v3  ;;  %s6135_s4 = sld [smem:[#allocation7 + $0x32]] }
 0x45f   : > { %v3615_v52 = vrot.slane %v3609_v35, 2  ;;  %v3632_v63 = vmul.f32 %v3629_v6, %v8960_v3  ;;  %v3650_v11 = vstv %s6108_s5  ;;  %s6136_s5 = sld [smem:[#allocation7 + $0x56]] }
 0x460   : > { %v3526_v36 = vrot.slane %v3520_v19, 1 }
 0x461   : > { %v3639_v39 = vrot.slane %v3632_v63, 2 }
 0x464   : > { %3269 = vrot.lane.b32.xlu0 %v3264_v49, %s6477_s0  ;;  %3255 = vrot.lane.b32.xlu2 %v3250_v20, %s6477_s0  ;;  %v3442_v49 = vrot.slane %v3436_v0, 1  ;;  %v3498_v20 = vstv %s6100_s26  ;;  %v9027_v37 = vpop.permute.xlu2 %3131  ;;  %s6132_s26 = sld [smem:[#allocation7 + $0x55]] }
 0x465   : > { %3241 = vrot.lane.b32.xlu1 %v3236_v24, %s10994_s21  ;;  %v3465_v24 = vsel %vm528_vm3, %v3463_v47, %v3464_v59  ;;  %v3500_v22 = vmul.f32 %v3498_v20, %v8936_v7  ;;  %v3501_v1 = vmul.f32 %v3498_v20, %v8960_v3  ;;  %11258 = vst [vmem:[#allocation73_spill] sm:$0xff] %v9027_v37 }
 0x466   : > { %v3499_v31 = vmul.f32 %v3498_v20, %v8927_v57 }
 0x467   : > { %v3506_v17 = vrot.slane %v3500_v22, 1  ;;  %v3508_v62 = vrot.slane %v3501_v1, 1 }
 0x468   : > { %v3505_v58 = vrot.slane %v3499_v31, 1  ;;  %v3734_v31 = vstv %s6112_s9  ;;  %s6137_s9 = sld [smem:[#allocation7 + $0x7a]] }
 0x46a   : > { %v3507_v12 = vsel %vm528_vm3, %v3505_v58, %v3506_v17 }
 0x46c   : > { %3295 = vrot.lane.b32.xlu0 %v3291_v23, %s6477_s0  ;;  %3281 = vrot.lane.b32.xlu2 %v3277_v42, %s6477_s0  ;;  %v3444_v23 = vsel %vm528_vm3, %v3442_v49, %v3443_v34  ;;  %v3459_v42 = vmul.f32 %v3456_v60, %v8960_v3  ;;  %v3611_v34 = vmul.f32 %v3608_v61, %v8960_v3  ;;  %v9052_v55 = vpop.permute.xlu2 %3139 }
 0x46d   : > { %3267 = vrot.lane.b32.xlu1 %v3263_v9, %s6477_s0  ;;  %v9023_v9 = vpop.permute.xlu0 %3069  ;;  %11259 = vst [vmem:[#allocation30_spill] sm:$0xff] %v9052_v55  ;;  %v3651_v49 = vmul.f32 %v3650_v11, %v8927_v57  ;;  %v4106_v55 = vstv %s6136_s5  ;;  %s9516_s5 = sld [smem:[#allocation7 + $0x37]] }
 0x46e   : > { %v3466_v21 = vrot.slane %v3459_v42, 1  ;;  %v3618_v60 = vrot.slane %v3611_v34, 2 }
 0x46f   : > { %v3657_v15 = vrot.slane %v3651_v49, 2 }
 0x470   : > { %v3467_v50 = vsel %vm528_vm3, %v3464_v59, %v3466_v21  ;;  %v3652_v59 = vmul.f32 %v3650_v11, %v8936_v7 }
 0x472   : > { %v3658_v22 = vrot.slane %v3652_v59, 2 }
 0x474   : > { %3386 = vrot.lane.b32.xlu0 %v3383_v8, %s10994_s21  ;;  %3297 = vrot.lane.b32.xlu2 %v3292_v4, %s6477_s0  ;;  %v3610_v4 = vmul.f32 %v3608_v61, %v8936_v7  ;;  %v3509_v8 = vsel %vm528_vm3, %v3506_v17, %v3508_v62  ;;  %v3692_v17 = vstv %s6110_s7  ;;  %v3659_v21 = vsel %vm765_vm4, %v3657_v15, %v3658_v22  ;;  %s6142_s7 = sld [smem:[#allocation7 + $0x10]] }
 0x475   : > { %3283 = vrot.lane.b32.xlu1 %v3278_v38, %s6477_s0  ;;  %v3488_v38 = vsel %vm528_vm3, %v3485_v27, %v3487_v13  ;;  %v9041_v28 = vpop.permute.xlu0 %3099  ;;  %v3694_v61 = vmul.f32 %v3692_v17, %v8936_v7 }
 0x476   : > { %v3616_v16 = vrot.slane %v3610_v4, 2  ;;  %v3695_v4 = vmul.f32 %v3692_v17, %v8960_v3 }
 0x478   : > { %v3619_v0 = vsel %vm765_vm4, %v3616_v16, %v3618_v60  ;;  %v3702_v35 = vrot.slane %v3695_v4, 2 }
 0x47c   : > { %3426 = vrot.lane.b32.xlu0 %v3423_v45, %s10994_s21  ;;  %3405 = vrot.lane.b32.xlu2 %v3402_v10, %s10994_s21  ;;  %v3527_v45 = vrot.slane %v3521_v5, 1  ;;  %v3617_v10 = vsel %vm765_vm4, %v3615_v52, %v3616_v16  ;;  %v3713_v52 = vstv %s6111_s11  ;;  %s6143_s11 = sld [smem:[#allocation7 + $0x34]] }
 0x47d   : > { %3384 = vrot.lane.b32.xlu1 %v3381_v41, %s10994_s21  ;;  %v3631_v41 = vmul.f32 %v3629_v6, %v8936_v7  ;;  %v9057_v40 = vpop.permute.xlu0 %3107  ;;  %v3715_v58 = vmul.f32 %v3713_v52, %v8936_v7  ;;  %v3714_v34 = vmul.f32 %v3713_v52, %v8927_v57  ;;  %v3716_v49 = vmul.f32 %v3713_v52, %v8960_v3 }
 0x47e   : > { %v3528_v44 = vsel %vm528_vm3, %v3526_v36, %v3527_v45 }
 0x47f   : > { %v3637_v33 = vrot.slane %v3631_v41, 2 }
 0x481   : > { %v3640_v27 = vsel %vm765_vm4, %v3637_v33, %v3639_v39  ;;  %v3721_v39 = vrot.slane %v3715_v58, 2 }
 0x484   : > { %3449 = vrot.lane.b32.xlu0 %v3446_v18, %s10994_s21  ;;  %3428 = vrot.lane.b32.xlu2 %v3425_v14, %s10994_s21  ;;  %v3529_v18 = vrot.slane %v3522_v43, 1  ;;  %v9055_v14 = vpop.permute.xlu1 %3095 }
 0x485   : > { %3407 = vrot.lane.b32.xlu1 %v3404_v32, %s10994_s21  ;;  %v3671_v32 = vstv %s6109_s29  ;;  %v9075_v13 = vpop.permute.xlu0 %3137  ;;  %s6134_s29 = sld [smem:[#allocation7 + $0xe]] }
 0x486   : > { %v3673_v2 = vmul.f32 %v3671_v32, %v8936_v7  ;;  %v3530_v46 = vsel %vm528_vm3, %v3527_v45, %v3529_v18  ;;  %v3672_v47 = vmul.f32 %v3671_v32, %v8927_v57  ;;  %11260 = vst [vmem:[#allocation36_spill] sm:$0xff] %v9075_v13  ;;  %v3674_v48 = vmul.f32 %v3671_v32, %v8960_v3 }
 0x487   : > { %v3736_v45 = vmul.f32 %v3734_v31, %v8936_v7  ;;  %v3720_v18 = vrot.slane %v3714_v34, 2  ;;  %v3828_v34 = vstv %s6120_s27  ;;  %s9343_s27 = sld [smem:[#allocation7]] }
 0x488   : > { %v3679_v20 = vrot.slane %v3673_v2, 2  ;;  %v3678_v1 = vrot.slane %v3672_v47, 2  ;;  %v3681_v19 = vrot.slane %v3674_v48, 2 }
 0x489   : > { %v3742_v43 = vrot.slane %v3736_v45, 2 }
 0x48c   : > { %3489 = vrot.lane.b32.xlu0 %v3486_v51, %s6477_s0  ;;  %3468 = vrot.lane.b32.xlu2 %v3465_v24, %s6477_s0  ;;  %v3630_v24 = vmul.f32 %v3629_v6, %v8927_v57  ;;  %v9073_v62 = vpop.permute.xlu1 %3105 }
 0x48d   : > { %3447 = vrot.lane.b32.xlu1 %v3444_v23, %s10994_s21  ;;  %v3680_v23 = vsel %vm765_vm4, %v3678_v1, %v3679_v20  ;;  %v9098_v63 = vpop.permute.xlu0 %3145 }
 0x48e   : > { %v3636_v42 = vrot.slane %v3630_v24, 2  ;;  %11262 = vst [vmem:[#allocation20_spill] sm:$0xff] %v9098_v63  ;;  %v4085_v63 = vstv %s6135_s4  ;;  %s9475_s4 = sld [smem:[#allocation7 + $0x6f]] }
 0x494   : > { %3512 = vrot.lane.b32.xlu0 %v3509_v8, %s6477_s0  ;;  %3491 = vrot.lane.b32.xlu2 %v3488_v38, %s6477_s0  ;;  %v3638_v8 = vsel %vm765_vm4, %v3636_v42, %v3637_v33  ;;  %v3653_v38 = vmul.f32 %v3650_v11, %v8960_v3  ;;  %v9096_v41 = vpop.permute.xlu1 %3133  ;;  %v3693_v33 = vmul.f32 %v3692_v17, %v8927_v57  ;;  %v3755_v11 = vstv %s6113_s8  ;;  %s6145_s8 = sld [smem:[#allocation7 + $0x7c]] }
 0x495   : > { %3470 = vrot.lane.b32.xlu1 %v3467_v50, %s6477_s0  ;;  %v3700_v50 = vrot.slane %v3694_v61, 2  ;;  %11261 = vst [vmem:[#allocation119_spill] sm:$0xff] %v9096_v41  ;;  %v3758_v59 = vmul.f32 %v3755_v11, %v8960_v3 }
 0x496   : > { %v3660_v16 = vrot.slane %v3653_v38, 2  ;;  %v3699_v2 = vrot.slane %v3693_v33, 2  ;;  %v3756_v38 = vmul.f32 %v3755_v11, %v8927_v57 }
 0x497   : > { %v3703_v36 = vsel %vm765_vm4, %v3700_v50, %v3702_v35 }
 0x498   : > { %v3661_v6 = vsel %vm765_vm4, %v3658_v22, %v3660_v16  ;;  %v3701_v47 = vsel %vm765_vm4, %v3699_v2, %v3700_v50  ;;  %v3074_v50 = vsel %vm249_vm0, %v9021_v56, %v8980_v54  ;;  %v3814_v16 = vstv %s9122_s10  ;;  %s6144_s10 = sld [smem:[#allocation7 + $0x58]] }
 0x499   : > { %v3076_v45 = vsel %vm252_vm1, %v3074_v50, %v9023_v9  ;;  %v3762_v52 = vrot.slane %v3756_v38, 2  ;;  %v3856_v2 = vstv %s6122_s28  ;;  %s9350_s28 = sld [smem:[#allocation7 + $0x6c]] }
 0x49a   : > { %v3082_v58 = vrot.slane %v3076_v45, 7 }
 0x49c   : > { %3620 = vrot.lane.b32.xlu0 %v3617_v10, %s10994_s21  ;;  %3531 = vrot.lane.b32.xlu2 %v3528_v44, %s6477_s0  ;;  %v3682_v10 = vsel %vm765_vm4, %v3679_v20, %v3681_v19  ;;  %v3735_v44 = vmul.f32 %v3734_v31, %v8927_v57  ;;  %v3073_v20 = vsel %vm249_vm0, %v8964_v30, %v8998_v53  ;;  %v9124_v1 = vpop.permute.xlu1 %3143  ;;  %v3723_v30 = vrot.slane %v3716_v49, 2 }
 0x49d   : > { %3510 = vrot.lane.b32.xlu1 %v3507_v12, %s6477_s0  ;;  %11263 = vst [vmem:[#allocation21_spill] sm:$0xff] %v9124_v1  ;;  %v3075_v17 = vsel %vm252_vm1, %v3073_v20, %v9039_v26  ;;  %v3870_v20 = vstv %s9180_s2  ;;  %s9366_s2 = sld [smem:[#allocation7 + $0x48]] }
 0x49e   : > { %v3741_v60 = vrot.slane %v3735_v44, 2  ;;  %v3078_v53 = vrot.slane %v3075_v17, 1  ;;  %v3724_v48 = vsel %vm765_vm4, %v3721_v39, %v3723_v30 }
 0x4a0   : > { %v3743_v32 = vsel %vm765_vm4, %v3741_v60, %v3742_v43 }
 0x4a4   : > { %3643 = vrot.lane.b32.xlu0 %v3640_v27, %s10994_s21  ;;  %3622 = vrot.lane.b32.xlu2 %v3619_v0, %s10994_s21  ;;  %v3722_v27 = vsel %vm765_vm4, %v3720_v18, %v3721_v39  ;;  %v3757_v0 = vmul.f32 %v3755_v11, %v8936_v7  ;;  %v3842_v11 = vstv %s6121_s22  ;;  %s9357_s22 = sld [smem:[#allocation7 + $0x24]] }
 0x4a5   : > { %3533 = vrot.lane.b32.xlu1 %v3530_v46, %s6477_s0  ;;  %v9068_v51 = vpop.permute.xlu2 %3197  ;;  %v3737_v46 = vmul.f32 %v3734_v31, %v8960_v3  ;;  %v3800_v31 = vstv %s9126_s1  ;;  %s6146_s1 = sld [smem:[#allocation7 + $0x11]] }
 0x4a6   : > { %v3763_v15 = vrot.slane %v3757_v0, 2 }
 0x4a7   : > { %v3744_v42 = vrot.slane %v3737_v46, 2 }
 0x4a9   : > { %v3745_v4 = vsel %vm765_vm4, %v3742_v43, %v3744_v42 }
 0x4ac   : > { %3683 = vrot.lane.b32.xlu0 %v3680_v23, %s10994_s21  ;;  %3662 = vrot.lane.b32.xlu2 %v3659_v21, %s10994_s21  ;;  %v3765_v23 = vrot.slane %v3758_v59, 2  ;;  %v3081_v21 = vrot.slane %v3075_v17, 7  ;;  %v3087_v17 = vrot.slane %v3076_v45, 5 }
 0x4ad   : > { %3641 = vrot.lane.b32.xlu1 %v3638_v8, %s10994_s21 }
 0x4ae   : > { %v9086_v5 = vpop.permute.xlu2 %3213  ;;  %v3766_v61 = vsel %vm765_vm4, %v3763_v15, %v3765_v23  ;;  %v9145_v35 = vsel %vm259_vm2, %v3078_v53, %v3081_v21  ;;  %v9164_v9 = vsel %vm259_vm2, %v3081_v21, %v3082_v58 }
 0x4af   : > { %11264 = vst [vmem:[#allocation41_spill] sm:$0xff] %v9164_v9  ;;  %v3830_v43 = vmul.f32 %v3828_v34, %v9164_v9  ;;  %v3816_v33 = vmul.f32 %v3814_v16, %v9164_v9  ;;  %v3802_v39 = vmul.f32 %v3800_v31, %v9164_v9  ;;  %v3843_v0 = vmul.f32 %v3842_v11, %v9145_v35 }
 0x4b0   : > { %v3829_v59 = vmul.f32 %v3828_v34, %v9145_v35  ;;  %v3858_v23 = vmul.f32 %v3856_v2, %v9164_v9  ;;  %v3844_v42 = vmul.f32 %v3842_v11, %v9164_v9  ;;  %v4108_v1 = vmul.f32 %v4106_v55, %v9164_v9 }
 0x4b4   : > { %3706 = vrot.lane.b32.xlu0 %v3703_v36, %s6477_s0  ;;  %3685 = vrot.lane.b32.xlu2 %v3682_v10, %s10994_s21  ;;  %v3815_v36 = vmul.f32 %v3814_v16, %v9145_v35  ;;  %v3801_v10 = vmul.f32 %v3800_v31, %v9145_v35  ;;  %v3980_v16 = vstv %s6130_s23  ;;  %v3871_v31 = vmul.f32 %v3870_v20, %v9145_v35  ;;  %s9381_s23 = sld [smem:[#allocation7 + $0x27]] }
 0x4b5   : > { %3664 = vrot.lane.b32.xlu1 %v3661_v6, %s10994_s21  ;;  %v3764_v6 = vsel %vm765_vm4, %v3762_v52, %v3763_v15  ;;  %v3872_v15 = vmul.f32 %v3870_v20, %v9164_v9  ;;  %v3982_v45 = vmul.f32 %v3980_v16, %v9164_v9 }
 0x4b6   : > { %v9102_v12 = vpop.permute.xlu2 %3239 }
 0x4bc   : > { %3746 = vrot.lane.b32.xlu0 %v3743_v32, %s6477_s0  ;;  %3725 = vrot.lane.b32.xlu2 %v3722_v27, %s6477_s0  ;;  %v3857_v27 = vmul.f32 %v3856_v2, %v9145_v35  ;;  %v4001_v2 = vstv %s6131_s6  ;;  %s9409_s6 = sld [smem:[#allocation7 + $0x3]] }
 0x4bd   : > { %3704 = vrot.lane.b32.xlu1 %v3701_v47, %s6477_s0  ;;  %v9118_v24 = vpop.permute.xlu0 %3211  ;;  %v4002_v20 = vmul.f32 %v4001_v2, %v9145_v35 }
 0x4be   : > { %v9120_v22 = vpop.permute.xlu2 %3255 }
 0x4c4   : > { %3769 = vrot.lane.b32.xlu0 %v3766_v61, %s6477_s0  ;;  %3748 = vrot.lane.b32.xlu2 %v3745_v4, %s6477_s0  ;;  %v3898_v61 = vstv %s9192_s14  ;;  %v3884_v4 = vstv %s9196_s19  ;;  %s9370_s14 = sld [smem:[#allocation7 + $0x59]] }
 0x4c5   : > { %3727 = vrot.lane.b32.xlu1 %v3724_v48, %s6477_s0  ;;  %v9214_v48 = vsel %vm259_vm2, %v3082_v58, %v3087_v17  ;;  %v3899_v38 = vmul.f32 %v3898_v61, %v9145_v35  ;;  %v3885_v50 = vmul.f32 %v3884_v4, %v9145_v35  ;;  %v3981_v17 = vmul.f32 %v3980_v16, %v9145_v35  ;;  %s9373_s19 = sld [smem:[#allocation7 + $0x35]] }
 0x4c6   : > { %v9136_v8 = vpop.permute.xlu2 %3281  ;;  %v9138_v26 = vpop.permute.xlu0 %3227  ;;  %v3983_v52 = vmul.f32 %v3980_v16, %v9214_v48  ;;  %v4109_v37 = vmul.f32 %v4106_v55, %v9214_v48 }
 0x4c7   : > { %v9147_v19 = vpop.permute.xlu1 %3199 }
 0x4c8   : > { %v3990_v34 = vrot.slane %v3983_v52, 1  ;;  %v4043_v52 = vstv %s6133_s30  ;;  %s9421_s30 = sld [smem:[#allocation7 + $0x7d]] }
 0x4cc   : > { %3819 = vrot.lane.b32.xlu0 %v3815_v36, %s10994_s21  ;;  %3805 = vrot.lane.b32.xlu2 %v3801_v10, %s10994_s21 }
 0x4cd   : > { %3767 = vrot.lane.b32.xlu1 %v3764_v6, %s6477_s0  ;;  %v3988_v6 = vrot.slane %v3982_v45, 1  ;;  %v3987_v45 = vrot.slane %v3981_v17, 1 }
 0x4ce   : > { %v9159_v54 = vpop.permute.xlu2 %3297  ;;  %v9161_v56 = vpop.permute.xlu0 %3253 }
 0x4cf   : > { %v9166_v44 = vpop.permute.xlu1 %3225  ;;  %v3991_v11 = vsel %vm528_vm3, %v3988_v6, %v3990_v34  ;;  %v3989_v16 = vsel %vm528_vm3, %v3987_v45, %v3988_v6 }
 0x4d4   : > { %3835 = vrot.lane.b32.xlu0 %v3830_v43, %s10994_s21  ;;  %3821 = vrot.lane.b32.xlu2 %v3816_v33, %s10994_s21  ;;  %v4022_v43 = vstv %s6132_s26  ;;  %v3900_v33 = vmul.f32 %v3898_v61, %v9164_v9  ;;  %s9395_s26 = sld [smem:[#allocation7 + $0x4b]] }
 0x4d5   : > { %3807 = vrot.lane.b32.xlu1 %v3802_v39, %s10994_s21  ;;  %v4024_v39 = vmul.f32 %v4022_v43, %v9164_v9 }
 0x4d6   : > { %v9174_v60 = vpop.permute.xlu2 %3405  ;;  %v9176_v18 = vpop.permute.xlu0 %3269 }
 0x4d7   : > { %v9178_v32 = vpop.permute.xlu1 %3241 }
 0x4dc   : > { %3861 = vrot.lane.b32.xlu0 %v3857_v27, %s6477_s0  ;;  %3847 = vrot.lane.b32.xlu2 %v3843_v0, %s10994_s21  ;;  %v3886_v27 = vmul.f32 %v3884_v4, %v9164_v9  ;;  %v4003_v0 = vmul.f32 %v4001_v2, %v9164_v9 }
 0x4dd   : > { %3833 = vrot.lane.b32.xlu1 %v3829_v59, %s10994_s21  ;;  %v4023_v59 = vmul.f32 %v4022_v43, %v9145_v35 }
 0x4de   : > { %v9188_v46 = vpop.permute.xlu2 %3428  ;;  %v9190_v47 = vpop.permute.xlu0 %3295  ;;  %v4009_v4 = vrot.slane %v4003_v0, 1 }
 0x4df   : > { %v9194_v49 = vpop.permute.xlu1 %3267 }
 0x4e4   : > { %3877 = vrot.lane.b32.xlu0 %v3872_v15, %s6477_s0  ;;  %3863 = vrot.lane.b32.xlu2 %v3858_v23, %s6477_s0 }
 0x4e5   : > { %3849 = vrot.lane.b32.xlu1 %v3844_v42, %s10994_s21  ;;  %v4030_v42 = vrot.slane %v4024_v39, 1  ;;  %v4025_v39 = vmul.f32 %v4022_v43, %v9214_v48 }
 0x4e6   : > { %v9205_v30 = vpop.permute.xlu2 %3468  ;;  %v9207_v53 = vpop.permute.xlu0 %3386 }
 0x4e7   : > { %v9209_v21 = vpop.permute.xlu1 %3283 }
 0x4ec   : > { %3903 = vrot.lane.b32.xlu0 %v3899_v38, %s6477_s0  ;;  %3889 = vrot.lane.b32.xlu2 %v3885_v50, %s6477_s0  ;;  %v4029_v38 = vrot.slane %v4023_v59, 1  ;;  %v4008_v50 = vrot.slane %v4002_v20, 1 }
 0x4ed   : > { %3875 = vrot.lane.b32.xlu1 %v3871_v31, %s6477_s0 }
 0x4ee   : > { %v9224_v36 = vpop.permute.xlu2 %3491  ;;  %v9226_v10 = vpop.permute.xlu0 %3426  ;;  %v4031_v31 = vsel %vm528_vm3, %v4029_v38, %v4030_v42  ;;  %v4010_v34 = vsel %vm528_vm3, %v4008_v50, %v4009_v4  ;;  %v4032_v50 = vrot.slane %v4025_v39, 1 }
 0x4ef   : > { %11265 = vst [vmem:[#allocation25_spill] sm:$0xff] %v9224_v36  ;;  %v9228_v58 = vpop.permute.xlu1 %3384 }
 0x4f4   : > { %3994 = vrot.lane.b32.xlu0 %v3991_v11, %s10994_s21  ;;  %3905 = vrot.lane.b32.xlu2 %v3900_v33, %s6477_s0  ;;  %v4045_v33 = vmul.f32 %v4043_v52, %v9164_v9  ;;  %v4046_v11 = vmul.f32 %v4043_v52, %v9214_v48 }
 0x4f5   : > { %3891 = vrot.lane.b32.xlu1 %v3886_v27, %s6477_s0  ;;  %v4004_v27 = vmul.f32 %v4001_v2, %v9214_v48  ;;  %v4033_v2 = vsel %vm528_vm3, %v4030_v42, %v4032_v50  ;;  %v4044_v42 = vmul.f32 %v4043_v52, %v9145_v35 }
 0x4f6   : > { %v9240_v15 = vpop.permute.xlu2 %3531  ;;  %v9242_v23 = vpop.permute.xlu0 %3449  ;;  %v4051_v17 = vrot.slane %v4045_v33, 1  ;;  %v4053_v38 = vrot.slane %v4046_v11, 1  ;;  %v4086_v11 = vmul.f32 %v4085_v63, %v9145_v35 }
 0x4f7   : > { %11266 = vst [vmem:[#allocation29_spill] sm:$0xff] %v9240_v15  ;;  %v9245_v61 = vpop.permute.xlu1 %3407  ;;  %v4011_v43 = vrot.slane %v4004_v27, 1  ;;  %v9485_v15 = vstv %s9421_s30  ;;  %s9686_s30 = sld [smem:[#allocation7 + $0x80]] }
 0x4f8   : > { %11267 = vst [vmem:[#allocation118_spill] sm:$0xff] %v9242_v23  ;;  %v4054_v6 = vsel %vm528_vm3, %v4051_v17, %v4053_v38  ;;  %v4092_v41 = vrot.slane %v4086_v11, 1 }
 0x4f9   : > { %v4012_v33 = vsel %vm528_vm3, %v4009_v4, %v4011_v43  ;;  %v4050_v43 = vrot.slane %v4044_v42, 1  ;;  %v4114_v42 = vrot.slane %v4108_v1, 1 }
 0x4fb   : > { %v4052_v52 = vsel %vm528_vm3, %v4050_v43, %v4051_v17 }
 0x4fc   : > { %4034 = vrot.lane.b32.xlu0 %v4031_v31, %s10994_s21  ;;  %4013 = vrot.lane.b32.xlu2 %v4010_v34, %s10994_s21  ;;  %v4087_v31 = vmul.f32 %v4085_v63, %v9164_v9  ;;  %v4064_v34 = vstv %s6134_s29  ;;  %s9507_s29 = sld [smem:[#allocation7 + $0x6]] }
 0x4fd   : > { %3992 = vrot.lane.b32.xlu1 %v3989_v16, %s10994_s21  ;;  %v4066_v45 = vmul.f32 %v4064_v34, %v9164_v9  ;;  %v4065_v39 = vmul.f32 %v4064_v34, %v9145_v35 }
 0x4fe   : > { %v9257_v0 = vpop.permute.xlu2 %3622  ;;  %v9259_v59 = vpop.permute.xlu0 %3489  ;;  %v4093_v38 = vrot.slane %v4087_v31, 1  ;;  %v4088_v31 = vmul.f32 %v4085_v63, %v9214_v48 }
 0x4ff   : > { %11268 = vst [vmem:[#allocation35_spill] sm:$0xff] %v9257_v0  ;;  %v9261_v20 = vpop.permute.xlu1 %3447  ;;  %v4237_v0 = vstv %s6143_s11  ;;  %s9552_s11 = sld [smem:[#allocation7 + $0x2a]] }
 0x500   : > { %11269 = vst [vmem:[#allocation68_spill] sm:$0xff] %v9259_v59  ;;  %v4094_v4 = vsel %vm528_vm3, %v4092_v41, %v4093_v38  ;;  %v4095_v13 = vrot.slane %v4088_v31, 1 }
 0x504   : > { %4057 = vrot.lane.b32.xlu0 %v4054_v6, %s10994_s21  ;;  %4036 = vrot.lane.b32.xlu2 %v4033_v2, %s10994_s21  ;;  %v4072_v6 = vrot.slane %v4066_v45, 1  ;;  %v4071_v2 = vrot.slane %v4065_v39, 1  ;;  %v4067_v45 = vmul.f32 %v4064_v34, %v9214_v48  ;;  %v4096_v34 = vsel %vm528_vm3, %v4093_v38, %v4095_v13 }
 0x505   : > { %4015 = vrot.lane.b32.xlu1 %v4012_v33, %s10994_s21  ;;  %v4107_v13 = vmul.f32 %v4106_v55, %v9145_v35 }
 0x506   : > { %v9273_v16 = vpop.permute.xlu2 %3662  ;;  %v9275_v27 = vpop.permute.xlu0 %3512  ;;  %v4073_v33 = vsel %vm528_vm3, %v4071_v2, %v4072_v6  ;;  %v4116_v2 = vrot.slane %v4109_v37, 1  ;;  %v4074_v63 = vrot.slane %v4067_v45, 1 }
 0x507   : > { %11270 = vst [vmem:[#allocation39_spill] sm:$0xff] %v9273_v16  ;;  %v9278_v50 = vpop.permute.xlu1 %3470  ;;  %v4216_v16 = vstv %s6142_s7  ;;  %s9522_s7 = sld [smem:[#allocation7 + $0x13]] }
 0x508   : > { %11271 = vst [vmem:[#allocation16_spill] sm:$0xff] %v9275_v27  ;;  %v4117_v17 = vsel %vm528_vm3, %v4114_v42, %v4116_v2  ;;  %v4075_v1 = vsel %vm528_vm3, %v4072_v6, %v4074_v63  ;;  %v4217_v37 = vmul.f32 %v4216_v16, %v9145_v35  ;;  %v4113_v63 = vrot.slane %v4107_v13, 1 }
 0x50a   : > { %v4115_v55 = vsel %vm528_vm3, %v4113_v63, %v4114_v42  ;;  %v4258_v42 = vstv %s6144_s10  ;;  %s9585_s10 = sld [smem:[#allocation7 + $0x5b]] }
 0x50c   : > { %4097 = vrot.lane.b32.xlu0 %v4094_v4, %s6477_s0  ;;  %4076 = vrot.lane.b32.xlu2 %v4073_v33, %s6477_s0  ;;  %v4218_v4 = vmul.f32 %v4216_v16, %v9164_v9  ;;  %v4127_v33 = vstv %s6137_s9  ;;  %s9527_s9 = sld [smem:[#allocation7 + $0x4e]] }
 0x50d   : > { %4055 = vrot.lane.b32.xlu1 %v4052_v52, %s10994_s21  ;;  %v4129_v43 = vmul.f32 %v4127_v33, %v9164_v9  ;;  %v4128_v31 = vmul.f32 %v4127_v33, %v9145_v35 }
 0x50e   : > { %v9290_v41 = vpop.permute.xlu2 %3685  ;;  %v9292_v11 = vpop.permute.xlu0 %3620  ;;  %v4224_v2 = vrot.slane %v4218_v4, 2  ;;  %v4219_v4 = vmul.f32 %v4216_v16, %v9214_v48 }
 0x50f   : > { %11272 = vst [vmem:[#allocation124_spill] sm:$0xff] %v9290_v41  ;;  %v9294_v39 = vpop.permute.xlu1 %3510  ;;  %v4223_v41 = vrot.slane %v4217_v37, 2 }
 0x510   : > { %11273 = vst [vmem:[#allocation93_spill] sm:$0xff] %v9292_v11  ;;  %v4226_v11 = vrot.slane %v4219_v4, 2  ;;  %v4238_v4 = vmul.f32 %v4237_v0, %v9145_v35 }
 0x511   : > { %11274 = vst [vmem:[#allocation19_spill] sm:$0xff] %v9294_v39  ;;  %v4225_v6 = vsel %vm765_vm4, %v4223_v41, %v4224_v2 }
 0x512   : > { %v4227_v63 = vsel %vm765_vm4, %v4224_v2, %v4226_v11 }
 0x514   : > { %4120 = vrot.lane.b32.xlu0 %v4117_v17, %s6477_s0  ;;  %4099 = vrot.lane.b32.xlu2 %v4096_v34, %s6477_s0  ;;  %v4135_v17 = vrot.slane %v4129_v43, 1  ;;  %v4134_v34 = vrot.slane %v4128_v31, 1  ;;  %v4130_v43 = vmul.f32 %v4127_v33, %v9214_v48 }
 0x515   : > { %4078 = vrot.lane.b32.xlu1 %v4075_v1, %s6477_s0 }
 0x516   : > { %v9306_v52 = vpop.permute.xlu2 %3725  ;;  %v9308_v45 = vpop.permute.xlu0 %3643  ;;  %v4136_v1 = vsel %vm528_vm3, %v4134_v34, %v4135_v17  ;;  %v4137_v16 = vrot.slane %v4130_v43, 1 }
 0x517   : > { %11275 = vst [vmem:[#allocation31_spill] sm:$0xff] %v9306_v52  ;;  %v9311_v38 = vpop.permute.xlu1 %3533  ;;  %v4239_v52 = vmul.f32 %v4237_v0, %v9164_v9 }
 0x518   : > { %11276 = vst [vmem:[#allocation44_spill] sm:$0xff] %v9308_v45  ;;  %v4240_v45 = vmul.f32 %v4237_v0, %v9214_v48 }
 0x519   : > { %11277 = vst [vmem:[#allocation37_spill] sm:$0xff] %v9311_v38  ;;  %v4245_v13 = vrot.slane %v4239_v52, 2  ;;  %v4138_v52 = vsel %vm528_vm3, %v4135_v17, %v4137_v16 }
 0x51a   : > { %v4247_v34 = vrot.slane %v4240_v45, 2 }
 0x51c   : > { %4228 = vrot.lane.b32.xlu0 %v4225_v6, %s10994_s21  ;;  %4139 = vrot.lane.b32.xlu2 %v4136_v1, %s6477_s0  ;;  %v3111_v6 = vsel %vm249_vm0, %v8995_v29, %v9041_v28  ;;  %v4279_v1 = vstv %s6145_s8  ;;  %v4248_v33 = vsel %vm765_vm4, %v4245_v13, %v4247_v34  ;;  %v4259_v28 = vmul.f32 %v4258_v42, %v9145_v35  ;;  %s9561_s8 = sld [smem:[#allocation7 + $0x72]] }
 0x51d   : > { %4118 = vrot.lane.b32.xlu1 %v4115_v55, %s6477_s0  ;;  %v9335_v55 = vmul.f32 %v4279_v1, %v9164_v9  ;;  %v4280_v29 = vmul.f32 %v4279_v1, %v9145_v35  ;;  %v3113_v11 = vsel %vm252_vm1, %v3111_v6, %v9073_v62  ;;  %v3112_v62 = vsel %vm249_vm0, %v9055_v14, %v9010_v25 }
 0x51e   : > { %v9323_v41 = vpop.permute.xlu2 %3748  ;;  %v9325_v37 = vpop.permute.xlu0 %3683  ;;  %v3116_v16 = vrot.slane %v3113_v11, 1  ;;  %v3114_v6 = vsel %vm252_vm1, %v3112_v62, %v9057_v40  ;;  %v4265_v0 = vrot.slane %v4259_v28, 2  ;;  %v3168_v62 = vstv %s9343_s27  ;;  %s9620_s27 = sld [smem:[#allocation7 + $0x7f]] }
 0x51f   : > { %11278 = vst [vmem:[#allocation121_spill] sm:$0xff] %v9323_v41  ;;  %v9327_v31 = vpop.permute.xlu1 %3641  ;;  %v4287_v43 = vrot.slane %v9335_v55, 2  ;;  %v4300_v55 = vstv %s6146_s1  ;;  %v3120_v28 = vrot.slane %v3114_v6, 7  ;;  %s9613_s1 = sld [smem:[#allocation7 + $0x14]] }
 0x520   : > { %11279 = vst [vmem:[#allocation33_spill] sm:$0xff] %v9325_v37  ;;  %v9338_v37 = vmul.f32 %v4258_v42, %v9164_v9  ;;  %v9378_v40 = vmul.f32 %v4300_v55, %v9164_v9 }
 0x521   : > { %11280 = vst [vmem:[#allocation57_spill] sm:$0xff] %v9327_v31 }
 0x522   : > { %v4266_v34 = vrot.slane %v9338_v37, 2  ;;  %v4282_v37 = vmul.f32 %v4279_v1, %v9214_v48 }
 0x524   : > { %4251 = vrot.lane.b32.xlu0 %v4248_v33, %s10994_s21  ;;  %4230 = vrot.lane.b32.xlu2 %v4227_v63, %s10994_s21  ;;  %v4286_v33 = vrot.slane %v4280_v29, 2  ;;  %v3119_v63 = vrot.slane %v3113_v11, 7  ;;  %v4267_v14 = vsel %vm765_vm4, %v4265_v0, %v4266_v34  ;;  %v4303_v29 = vmul.f32 %v4300_v55, %v9214_v48 }
 0x525   : > { %4141 = vrot.lane.b32.xlu1 %v4138_v52, %s6477_s0  ;;  %v4244_v52 = vrot.slane %v4238_v4, 2  ;;  %v3125_v11 = vrot.slane %v3114_v6, 5  ;;  %v4261_v4 = vmul.f32 %v4258_v42, %v9214_v48  ;;  %v3174_v6 = vstv %s9357_s22  ;;  %s9633_s22 = sld [smem:[#allocation7 + $0x2d]] }
 0x526   : > { %v9352_v45 = vpop.permute.xlu2 %3805  ;;  %v9354_v2 = vpop.permute.xlu0 %3706  ;;  %v4288_v25 = vsel %vm765_vm4, %v4286_v33, %v4287_v43  ;;  %v3186_v33 = vstv %s9350_s28  ;;  %v4289_v42 = vrot.slane %v4282_v37, 2  ;;  %v3176_v31 = vmul.f32 %v3174_v6, %v8936_v7  ;;  %s9628_s28 = sld [smem:[#allocation7 + $0x9]] }
 0x527   : > { %11281 = vst [vmem:[#allocation120_spill] sm:$0xff] %v9352_v45  ;;  %v9359_v17 = vpop.permute.xlu1 %3664  ;;  %v4246_v1 = vsel %vm765_vm4, %v4244_v52, %v4245_v13  ;;  %v4310_v52 = vrot.slane %v4303_v29, 2  ;;  %v3169_v45 = vmul.f32 %v3168_v62, %v8927_v57  ;;  %v3187_v29 = vmul.f32 %v3186_v33, %v8927_v57 }
 0x528   : > { %11282 = vst [vmem:[#allocation26_spill] sm:$0xff] %v9354_v2  ;;  %v4342_v37 = vstv %s9370_s14  ;;  %v3180_v13 = vstv %s9366_s2  ;;  %s9637_s2 = sld [smem:[#allocation7 + $0x75]] }
 0x529   : > { %11283 = vst [vmem:[#allocation24_spill] sm:$0xff] %v9359_v17  ;;  %v9433_v17 = vstv %s9381_s23  ;;  %s9651_s14 = sld [smem:[#allocation7 + $0x51]] }
 0x52a   : > { %s9670_s23 = sld [smem:[#allocation7 + $0x30]] }
 0x52c   : > { %4291 = vrot.lane.b32.xlu0 %v4288_v25, %s10994_s21  ;;  %4270 = vrot.lane.b32.xlu2 %v4267_v14, %s10994_s21  ;;  %v9401_v14 = vsel %vm259_vm2, %v3116_v16, %v3119_v63  ;;  %v3175_v16 = vmul.f32 %v3174_v6, %v8927_v57  ;;  %v3170_v6 = vmul.f32 %v3168_v62, %v8936_v7 }
 0x52d   : > { %4249 = vrot.lane.b32.xlu1 %v4246_v1, %s10994_s21  ;;  %v9404_v1 = vsel %vm259_vm2, %v3119_v63, %v3120_v28  ;;  %v9418_v63 = vmul.f32 %v4342_v37, %v9164_v9 }
 0x52e   : > { %v9390_v0 = vpop.permute.xlu2 %3821  ;;  %v9392_v2 = vpop.permute.xlu0 %3746 }
 0x52f   : > { %11284 = vst [vmem:[#allocation46_spill] sm:$0xff] %v9390_v0  ;;  %v9397_v25 = vpop.permute.xlu1 %3704  ;;  %v9407_v0 = vsel %vm259_vm2, %v3120_v28, %v3125_v11  ;;  %v3203_v28 = vadd.f32 %v9068_v51, %v3169_v45  ;;  %v11288_v11 = vrot.slane %v9378_v40, 2  ;;  %v4343_v45 = vmul.f32 %v4342_v37, %v9145_v35 }
 0x530   : > { %11285 = vst [vmem:[#allocation98_spill] sm:$0xff] %v9392_v2  ;;  %v4268_v2 = vrot.slane %v4261_v4, 2  ;;  %v11292_v38 = vrot.slane %v9418_v63, 2 }
 0x531   : > { %11286 = vst [vmem:[#allocation51_spill] sm:$0xff] %v9397_v25  ;;  %v4321_v25 = vstv %s9373_s19  ;;  %v4311_v4 = vsel %vm765_vm4, %v11288_v11, %v4310_v52  ;;  %v9440_v52 = vadd.f32 %v9086_v5, %v3176_v31  ;;  %v9447_v11 = vadd.f32 %v9102_v12, %v3187_v29  ;;  %s9663_s19 = sld [smem:[#allocation7 + $0x54]] }
 0x532   : > { %11287 = vst [vmem:[#allocation27_spill] sm:$0xff] %v9407_v0  ;;  %v4290_v0 = vsel %vm765_vm4, %v4287_v43, %v4289_v42  ;;  %v9429_v41 = vmul.f32 %v4321_v25, %v9164_v9  ;;  %v4269_v51 = vsel %vm765_vm4, %v4266_v34, %v4268_v2  ;;  %v3182_v43 = vmul.f32 %v3180_v13, %v8936_v7 }
 0x533   : > { %v3181_v42 = vmul.f32 %v3180_v13, %v8927_v57  ;;  %v4322_v62 = vmul.f32 %v4321_v25, %v9145_v35  ;;  %v4301_v31 = vmul.f32 %v4300_v55, %v9145_v35  ;;  %v9459_v13 = vadd.f32 %v9118_v24, %v3175_v16 }
 0x534   : > { %4314 = vrot.lane.b32.xlu0 %v4311_v4, %s6477_s0  ;;  %4293 = vrot.lane.b32.xlu2 %v4290_v0, %s10994_s21  ;;  %v9450_v0 = vmul.f32 %v3186_v33, %v8936_v7  ;;  %v3322_v4 = vmul.f32 %v9433_v17, %v8927_v57  ;;  %v3338_v12 = vstv %s9395_s26  ;;  %v3304_v55 = vstv %s9409_s6  ;;  %s9676_s26 = sld [smem:[#allocation7 + $0x38]] }
 0x535   : > { %4272 = vrot.lane.b32.xlu1 %v4269_v51, %s10994_s21  ;;  %v9469_v51 = vmul.f32 %v9433_v17, %v8936_v7  ;;  %v9472_v5 = vmul.f32 %v3338_v12, %v8936_v7  ;;  %v4349_v24 = vrot.slane %v4343_v45, 2  ;;  %v3204_v16 = vadd.f32 %v9147_v19, %v3170_v6  ;;  %s9680_s6 = sld [smem:[#allocation7 + $0xc]] }
 0x536   : > { %v9452_v2 = vpop.permute.xlu2 %3847  ;;  %v9454_v34 = vpop.permute.xlu0 %3769  ;;  %v3307_v33 = vmul.f32 %v3304_v55, %v8960_v3  ;;  %v4307_v59 = vrot.slane %v4301_v31, 2  ;;  %v11293_v23 = vrot.slane %v9429_v41, 2  ;;  %v9492_v19 = vmul.f32 %v9485_v15, %v9164_v9 }
 0x537   : > { %11289 = vst [vmem:[#allocation38_spill] sm:$0xff] %v9452_v2  ;;  %v9464_v29 = vpop.permute.xlu1 %3727  ;;  %v3341_v2 = vmul.f32 %v3338_v12, %v8960_v3  ;;  %v4351_v39 = vsel %vm765_vm4, %v4349_v24, %v11292_v38  ;;  %v4366_v6 = vmul.f32 %v9485_v15, %v9214_v48  ;;  %v3328_v36 = vrot.slane %v3322_v4, 1 }
 0x538   : > { %11290 = vst [vmem:[#allocation56_spill] sm:$0xff] %v9454_v34  ;;  %v3306_v34 = vmul.f32 %v3304_v55, %v8936_v7  ;;  %v3305_v27 = vmul.f32 %v3304_v55, %v8927_v57  ;;  %v11294_v38 = vrot.slane %v9378_v40, 2  ;;  %v4324_v31 = vmul.f32 %v4321_v25, %v9214_v48 }
 0x539   : > { %11291 = vst [vmem:[#allocation40_spill] sm:$0xff] %v9464_v29  ;;  %v4328_v29 = vrot.slane %v4322_v62, 2  ;;  %v4345_v62 = vmul.f32 %v4342_v37, %v9214_v48  ;;  %v3329_v24 = vrot.slane %v9469_v51, 1  ;;  %v3346_v9 = vrot.slane %v9472_v5, 1 }
 0x53a   : > { %v3348_v37 = vrot.slane %v3341_v2, 1  ;;  %v3259_v40 = vadd.f32 %v9161_v56, %v3203_v28  ;;  %v3312_v4 = vrot.slane %v3306_v34, 1  ;;  %v4371_v5 = vrot.slane %v9492_v19, 2 }
 0x53b   : > { %v4330_v45 = vsel %vm765_vm4, %v4328_v29, %v11293_v23  ;;  %v4309_v23 = vsel %vm765_vm4, %v4307_v59, %v11294_v38  ;;  %v3260_v29 = vadd.f32 %v9120_v22, %v3204_v16  ;;  %v3314_v59 = vrot.slane %v3307_v33, 1 }
 0x53c   : > { %4354 = vrot.lane.b32.xlu0 %v4351_v39, %s6477_s0  ;;  %4333 = vrot.lane.b32.xlu2 %v4330_v45, %s6477_s0  ;;  %v3231_v39 = vadd.f32 %v9166_v44, %v3181_v42  ;;  %v3339_v22 = vmul.f32 %v3338_v12, %v8927_v57  ;;  %v4373_v51 = vrot.slane %v4366_v6, 2  ;;  %v4352_v16 = vrot.slane %v4345_v62, 2 }
 0x53d   : > { %4312 = vrot.lane.b32.xlu1 %v4309_v23, %s6477_s0  ;;  %v3311_v44 = vrot.slane %v3305_v27, 1  ;;  %v3324_v56 = vmul.f32 %v9433_v17, %v8960_v3  ;;  %v3355_v28 = vstv %s9475_s4  ;;  %v4331_v42 = vrot.slane %v4324_v31, 2  ;;  %s9699_s4 = sld [smem:[#allocation7 + $0x5c]] }
 0x53e   : > { %v9512_v55 = vpop.permute.xlu2 %3863  ;;  %v9514_v25 = vpop.permute.xlu0 %3819  ;;  %v3232_v34 = vadd.f32 %v9138_v26, %v3182_v43  ;;  %v3330_v12 = vsel %vm528_vm3, %v3328_v36, %v3329_v24  ;;  %v3357_v33 = vmul.f32 %v3355_v28, %v8936_v7  ;;  %v3358_v45 = vmul.f32 %v3355_v28, %v8960_v3 }
 0x53f   : > { %v9519_v2 = vpop.permute.xlu1 %3767  ;;  %v3287_v6 = vadd.f32 %v9136_v8, %v3231_v39  ;;  %v3349_v62 = vsel %vm528_vm3, %v3346_v9, %v3348_v37  ;;  %v3315_v27 = vsel %vm528_vm3, %v3312_v4, %v3314_v59  ;;  %v3313_v17 = vsel %vm528_vm3, %v3311_v44, %v3312_v4 }
 0x540   : > { %v3246_v38 = vadd.f32 %v9178_v32, %v9450_v0  ;;  %v3345_v23 = vrot.slane %v3339_v22, 1  ;;  %v4374_v26 = vsel %vm765_vm4, %v4371_v5, %v4373_v51  ;;  %v11295_v36 = vrot.slane %v9418_v63, 2 }
 0x541   : > { %v3319_v31 = vadd.f32 %v3315_v27, %v3260_v29  ;;  %v3318_v8 = vadd.f32 %v3313_v17, %v3259_v40  ;;  %v3331_v39 = vrot.slane %v3324_v56, 1  ;;  %v11296_v37 = vrot.slane %v9429_v41, 2 }
 0x542   : > { %v4353_v43 = vsel %vm765_vm4, %v11295_v36, %v4352_v16  ;;  %v3347_v0 = vsel %vm528_vm3, %v3345_v23, %v3346_v9  ;;  %v3363_v4 = vrot.slane %v3357_v33, 1  ;;  %v3365_v63 = vrot.slane %v3358_v45, 1 }
 0x543   : > { %v4332_v32 = vsel %vm765_vm4, %v11296_v37, %v4331_v42  ;;  %v3356_v59 = vmul.f32 %v3355_v28, %v8927_v57  ;;  %v3274_v29 = vadd.f32 %v9176_v18, %v9440_v52  ;;  %v3273_v41 = vadd.f32 %v9194_v49, %v9459_v13 }
 0x544   : > { %4377 = vrot.lane.b32.xlu0 %v4374_v26, %s6477_s0  ;;  %4356 = vrot.lane.b32.xlu2 %v4353_v43, %s6477_s0  ;;  %v9559_v40 = vadd.f32 %v3347_v0, %v3287_v6  ;;  %v4364_v51 = vmul.f32 %v9485_v15, %v9145_v35  ;;  %v3302_v16 = vadd.f32 %v9159_v54, %v3246_v38  ;;  %v3540_v44 = vstv %s9507_s29  ;;  %s9739_s29 = sld [smem:[#allocation7 + $0x16]] }
 0x545   : > { %4335 = vrot.lane.b32.xlu1 %v4332_v32, %s6477_s0  ;;  %v4422_v18 = vstv %s9516_s5  ;;  %v4408_v52 = vstv %s9522_s7  ;;  %v3332_v49 = vsel %vm528_vm3, %v3329_v24, %v3331_v39  ;;  %v9577_v13 = vmul.f32 %v3540_v44, %v8936_v7  ;;  %s9745_s5 = sld [smem:[#allocation7 + $0x78]] }
 0x546   : > { %v9563_v9 = vpop.permute.xlu2 %3889  ;;  %v9565_v22 = vpop.permute.xlu0 %3835  ;;  %v3543_v28 = vmul.f32 %v3540_v44, %v8960_v3  ;;  %v3574_v42 = vstv %s9527_s9  ;;  %v3301_v33 = vadd.f32 %v9190_v47, %v9447_v11  ;;  %v3288_v15 = vadd.f32 %v9209_v21, %v3232_v34  ;;  %s9777_s7 = sld [smem:[#allocation7 + $0x5e]] }
 0x547   : > { %v9571_v56 = vpop.permute.xlu1 %3807  ;;  %v3366_v54 = vsel %vm528_vm3, %v3363_v4, %v3365_v63  ;;  %v3362_v45 = vrot.slane %v3356_v59, 1  ;;  %v3335_v6 = vadd.f32 %v3330_v12, %v3273_v41  ;;  %v4370_v27 = vrot.slane %v4364_v51, 2  ;;  %s9787_s9 = sld [smem:[#allocation7 + $0x3a]] }
 0x548   : > { %v4423_v24 = vmul.f32 %v4422_v18, %v9401_v14  ;;  %v4409_v17 = vmul.f32 %v4408_v52, %v9401_v14  ;;  %v3336_v38 = vadd.f32 %v3332_v49, %v3274_v29  ;;  %v9589_v23 = vadd.f32 %v3366_v54, %v3302_v16 }
 0x549   : > { %v3364_v26 = vsel %vm528_vm3, %v3362_v45, %v3363_v4  ;;  %v3575_v47 = vmul.f32 %v3574_v42, %v8927_v57  ;;  %v3548_v21 = vrot.slane %v9577_v13, 2  ;;  %v3550_v11 = vrot.slane %v3543_v28, 2 }
 0x54a   : > { %v3541_v34 = vmul.f32 %v3540_v44, %v8927_v57  ;;  %v4372_v12 = vsel %vm765_vm4, %v4370_v27, %v4371_v5  ;;  %v3353_v36 = vadd.f32 %v3349_v62, %v3288_v15  ;;  %v3369_v43 = vadd.f32 %v3364_v26, %v3301_v33 }
 0x54b   : > { %v9601_v39 = vmul.f32 %v3574_v42, %v8936_v7  ;;  %v3557_v37 = vstv %s9552_s11  ;;  %v3391_v32 = vadd.f32 %v9207_v53, %v3319_v31  ;;  %v3390_v0 = vadd.f32 %v9228_v58, %v3318_v8  ;;  %s9836_s11 = sld [smem:[#allocation7 + $0x82]] }
 0x54c   : > { %4427 = vrot.lane.b32.xlu0 %v4423_v24, %s10994_s21  ;;  %4413 = vrot.lane.b32.xlu2 %v4409_v17, %s10994_s21  ;;  %v3411_v19 = vadd.f32 %v9174_v60, %v3335_v6  ;;  %v3591_v4 = vstv %s9561_s8  ;;  %v3581_v62 = vrot.slane %v3575_v47, 2  ;;  %v3559_v41 = vmul.f32 %v3557_v37, %v8936_v7  ;;  %s9854_s8 = sld [smem:[#allocation7 + $0xf]] }
 0x54d   : > { %4375 = vrot.lane.b32.xlu1 %v4372_v12, %s6477_s0  ;;  %v3593_v59 = vmul.f32 %v3591_v4, %v8936_v7  ;;  %v3594_v29 = vmul.f32 %v3591_v4, %v8960_v3  ;;  %v3551_v60 = vsel %vm765_vm4, %v3548_v21, %v3550_v11  ;;  %v3547_v58 = vrot.slane %v3541_v34, 2 }
 0x54e   : > { %v9609_v5 = vpop.permute.xlu2 %3905  ;;  %v9611_v63 = vpop.permute.xlu0 %3861  ;;  %v3560_v31 = vmul.f32 %v3557_v37, %v8960_v3  ;;  %v3558_v8 = vmul.f32 %v3557_v37, %v8927_v57  ;;  %v3433_v51 = vadd.f32 %v9188_v46, %v3353_v36  ;;  %v3582_v16 = vrot.slane %v9601_v39, 2  ;;  %v11299_v36 = vld [vmem:[#allocation118_spill] sm:$0xff] }
 0x54f   : > { %v9618_v53 = vpop.permute.xlu1 %3833  ;;  %v3577_v44 = vmul.f32 %v3574_v42, %v8960_v3  ;;  %v4436_v7 = vstv %s9585_s10  ;;  %v3474_v49 = vadd.f32 %v9205_v30, %v3390_v0  ;;  %v3592_v13 = vmul.f32 %v3591_v4, %v8927_v57  ;;  %v11301_v4 = vld [vmem:[#allocation68_spill] sm:$0xff]  ;;  %s9866_s10 = sld [smem:[#allocation7 + $0x3b]] }
 0x550   : > { %v4438_v28 = vmul.f32 %v4436_v7, %v9404_v1  ;;  %v4424_v33 = vmul.f32 %v4422_v18, %v9404_v1  ;;  %v3599_v15 = vrot.slane %v3593_v59, 2  ;;  %v3601_v54 = vrot.slane %v3594_v29, 2 }
 0x551   : > { %v3565_v46 = vrot.slane %v3559_v41, 2  ;;  %v4410_v3 = vmul.f32 %v4408_v52, %v9404_v1  ;;  %v3432_v42 = vadd.f32 %v9226_v10, %v9559_v40  ;;  %v3412_v30 = vadd.f32 %v9245_v61, %v3336_v38  ;;  %v11297_v61 = vld [vmem:[#allocation16_spill] sm:$0xff] }
 0x552   : > { %v3567_v45 = vrot.slane %v3560_v31, 2  ;;  %v3564_v57 = vrot.slane %v3558_v8, 2  ;;  %v3453_v18 = vadd.f32 %v9261_v20, %v3369_v43  ;;  %v3583_v6 = vsel %vm765_vm4, %v3581_v62, %v3582_v16  ;;  %v11302_v8 = vld [vmem:[#allocation19_spill] sm:$0xff] }
 0x553   : > { %v3549_v27 = vsel %vm765_vm4, %v3547_v58, %v3548_v21  ;;  %v3584_v52 = vrot.slane %v3577_v44, 2  ;;  %v3475_v10 = vadd.f32 %v9278_v50, %v3391_v32  ;;  %v3517_v40 = vadd.f32 %v11297_v61, %v3433_v51  ;;  %v11298_v50 = vld [vmem:[#allocation25_spill] sm:$0xff] }
 0x554   : > { %4443 = vrot.lane.b32.xlu0 %v4438_v28, %s10994_s21  ;;  %4429 = vrot.lane.b32.xlu2 %v4424_v33, %s10994_s21  ;;  %v3554_v24 = vadd.f32 %v3549_v27, %v3474_v49  ;;  %v3598_v17 = vrot.slane %v3592_v13, 2  ;;  %v3602_v26 = vsel %vm765_vm4, %v3599_v15, %v3601_v54  ;;  %v3566_v47 = vsel %vm765_vm4, %v3564_v57, %v3565_v46  ;;  %v11300_v32 = vld [vmem:[#allocation29_spill] sm:$0xff]  ;;  %v11304_v33 = vld [vmem:[#allocation24_spill] sm:$0xff] }
 0x555   : > { %4415 = vrot.lane.b32.xlu1 %v4410_v3, %s10994_s21  ;;  %v4464_v11 = vstv %s9613_s1  ;;  %v4450_v34 = vstv %s9620_s27  ;;  %v3496_v12 = vadd.f32 %v11298_v50, %v3412_v30  ;;  %v3454_v43 = vadd.f32 %v11299_v36, %v9589_v23  ;;  %v11305_v3 = vld [vmem:[#allocation41_spill] sm:$0xff]  ;;  %s9882_s1 = sld [smem:[#allocation7 + $0x17]] }
 0x556   : > { %v9653_v38 = vpop.permute.xlu2 %4013  ;;  %v9655_v20 = vpop.permute.xlu0 %3877  ;;  %v3568_v39 = vsel %vm765_vm4, %v3565_v46, %v3567_v45  ;;  %v3600_v37 = vsel %vm765_vm4, %v3598_v17, %v3599_v15  ;;  %v3537_v0 = vadd.f32 %v11300_v32, %v3453_v18  ;;  %v3495_v62 = vadd.f32 %v11301_v4, %v3411_v19  ;;  %v11303_v19 = vld [vmem:[#allocation37_spill] sm:$0xff]  ;;  %v11307_v45 = vld [vmem:[#allocation35_spill] sm:$0xff]  ;;  %s9899_s27 = sld [smem:[#allocation7 + $0x57]] }
 0x557   : > { %v9659_v21 = vpop.permute.xlu1 %3849  ;;  %v3585_v59 = vsel %vm765_vm4, %v3582_v16, %v3584_v52  ;;  %v3776_v29 = vstv %s9628_s28  ;;  %v3555_v41 = vadd.f32 %v3551_v60, %v3475_v10  ;;  %v4465_v23 = vmul.f32 %v4464_v11, %v9401_v14  ;;  %s9924_s28 = sld [smem:[#allocation7 + $0x5f]] }
 0x558   : > { %v3589_v58 = vadd.f32 %v3585_v59, %v3517_v40  ;;  %v4451_v31 = vmul.f32 %v4450_v34, %v9401_v14  ;;  %v3516_v51 = vadd.f32 %v11302_v8, %v3432_v42  ;;  %v3782_v44 = vstv %s9633_s22  ;;  %v11306_v42 = vld [vmem:[#allocation93_spill] sm:$0xff]  ;;  %s9932_s22 = sld [smem:[#allocation7 + $0x33]] }
 0x559   : > { %v3794_v49 = vstv %s9637_s2  ;;  %v4437_v13 = vmul.f32 %v4436_v7, %v9401_v14  ;;  %v3538_v16 = vadd.f32 %v11303_v19, %v3454_v43  ;;  %v3572_v28 = vadd.f32 %v3568_v39, %v3496_v12  ;;  %v11308_v12 = vld [vmem:[#allocation121_spill] sm:$0xff]  ;;  %v11309_v43 = vld [vmem:[#allocation51_spill] sm:$0xff]  ;;  %s9959_s2 = sld [smem:[#allocation7 + $0x7b]] }
 0x55a   : > { %v3669_v60 = vadd.f32 %v11304_v33, %v3589_v58  ;;  %v3571_v15 = vadd.f32 %v3566_v47, %v3495_v62  ;;  %v9692_v54 = vadd.f32 %v3600_v37, %v3537_v0  ;;  %v3777_v46 = vmul.f32 %v3776_v29, %v9145_v35  ;;  %v11310_v37 = vld [vmem:[#allocation44_spill] sm:$0xff] }
 0x55b   : > { %v9696_v7 = vmul.f32 %v3782_v44, %v11305_v3  ;;  %v3626_v30 = vadd.f32 %v11306_v42, %v3554_v24  ;;  %v9703_v57 = vadd.f32 %v11307_v45, %v3555_v41  ;;  %v9706_v18 = vmul.f32 %v3794_v49, %v9145_v35 }
 0x55c   : > { %4469 = vrot.lane.b32.xlu0 %v4465_v23, %s6477_s0  ;;  %4455 = vrot.lane.b32.xlu2 %v4451_v31, %s10994_s21  ;;  %v9709_v27 = vmul.f32 %v3782_v44, %v9145_v35  ;;  %v9715_v61 = vadd.f32 %v3583_v6, %v3516_v51  ;;  %v9718_v40 = vmul.f32 %v3776_v29, %v11305_v3  ;;  %v3788_v24 = vstv %s9651_s14  ;;  %v11311_v44 = vld [vmem:[#allocation124_spill] sm:$0xff]  ;;  %s9976_s14 = sld [smem:[#allocation7 + $0x19]] }
 0x55d   : > { %4441 = vrot.lane.b32.xlu1 %v4437_v13, %s10994_s21  ;;  %v9724_v47 = vstv %s9663_s19  ;;  %v3606_v50 = vadd.f32 %v3602_v26, %v3538_v16  ;;  %v3753_v36 = vadd.f32 %v11308_v12, %v3669_v60  ;;  %v3710_v39 = vadd.f32 %v11309_v43, %v3626_v30  ;;  %s9985_s19 = sld [smem:[#allocation7 + $0x83]] }
 0x55e   : > { %v9711_v52 = vpop.permute.xlu2 %4036  ;;  %v9713_v10 = vpop.permute.xlu0 %3903  ;;  %v9730_v6 = vmul.f32 %v9724_v47, %v11305_v3  ;;  %v3648_v32 = vadd.f32 %v11310_v37, %v3572_v28  ;;  %v3790_v0 = vmul.f32 %v3788_v24, %v11305_v3  ;;  %v4478_v4 = vstv %s9676_s26  ;;  %v11314_v37 = vld [vmem:[#allocation40_spill] sm:$0xff]  ;;  %s10050_s26 = sld [smem:[#allocation7 + $0x85]] }
 0x55f   : > { %v9721_v17 = vpop.permute.xlu1 %3875  ;;  %v3949_v62 = vmul.f32 %v9724_v47, %v9214_v48  ;;  %v3796_v26 = vmul.f32 %v3794_v49, %v11305_v3  ;;  %v4480_v59 = vmul.f32 %v4478_v4, %v9404_v1  ;;  %v4466_v29 = vmul.f32 %v4464_v11, %v9404_v1  ;;  %v11312_v49 = vld [vmem:[#allocation57_spill] sm:$0xff] }
 0x560   : > { %v3912_v41 = vstv %s9680_s6  ;;  %v3929_v58 = vstv %s9670_s23  ;;  %v4452_v23 = vmul.f32 %v4450_v34, %v9404_v1  ;;  %v4506_v8 = vstv %s9686_s30  ;;  %s10024_s23 = sld [smem:[#allocation7 + $0x3d]] }
 0x561   : > { %v9750_v31 = vmul.f32 %v3912_v41, %v11305_v3  ;;  %v3779_v51 = vadd.f32 %v3777_v46, %v3710_v39  ;;  %v3690_v13 = vadd.f32 %v11311_v44, %v3606_v50  ;;  %v3792_v19 = vadd.f32 %v3790_v0, %v3753_v36  ;;  %v11313_v50 = vld [vmem:[#allocation56_spill] sm:$0xff]  ;;  %s6180_s6 = sld [smem:[#allocation7 + $0x61]] }
 0x562   : > { %v10978_v11 = vrot.slane %v9730_v6, 1  ;;  %v3647_v16 = vadd.f32 %v11312_v49, %v3571_v15  ;;  %v3956_v28 = vrot.slane %v3949_v62, 1  ;;  %v4492_v34 = vstv %s9699_s4  ;;  %v11315_v62 = vld [vmem:[#allocation120_spill] sm:$0xff]  ;;  %s6182_s30 = sld [smem:[#allocation7 + $0x1a]] }
 0x563   : > { %v3913_v33 = vmul.f32 %v3912_v41, %v9145_v35  ;;  %v3840_v60 = vadd.f32 %v9565_v22, %v3792_v19  ;;  %v9763_v46 = vmul.f32 %v3929_v58, %v9145_v35  ;;  %v9766_v42 = vmul.f32 %v3929_v58, %v11305_v3  ;;  %s10092_s4 = sld [smem:[#allocation7 + $0x12]] }
 0x564   : > { %4485 = vrot.lane.b32.xlu0 %v4480_v59, %s6477_s0  ;;  %4471 = vrot.lane.b32.xlu2 %v4466_v29, %s6477_s0  ;;  %v9769_v45 = vmul.f32 %v3912_v41, %v9214_v48  ;;  %v3774_v12 = vadd.f32 %v11313_v50, %v3690_v13  ;;  %v10979_v43 = vrot.slane %v9750_v31, 1  ;;  %v4507_v22 = vmul.f32 %v4506_v8, %v9401_v14 }
 0x565   : > { %4457 = vrot.lane.b32.xlu1 %v4452_v23, %s10994_s21  ;;  %v4479_v39 = vmul.f32 %v4478_v4, %v9401_v14  ;;  %v3732_v0 = vadd.f32 %v11314_v37, %v3648_v32  ;;  %v3811_v59 = vadd.f32 %v11315_v62, %v3779_v51  ;;  %v4493_v41 = vmul.f32 %v4492_v34, %v9401_v14  ;;  %v11316_v23 = vld [vmem:[#allocation31_spill] sm:$0xff] }
 0x566   : > { %v4077_v30 = vpop.permute.xlu2 %4076  ;;  %v9771_v15 = vpop.permute.xlu0 %3994  ;;  %v3731_v44 = vadd.f32 %v11316_v23, %v3647_v16  ;;  %v3957_v13 = vsel %vm528_vm3, %v10978_v11, %v3956_v28  ;;  %v3919_v19 = vrot.slane %v3913_v33, 1  ;;  %v4588_v49 = vstv %s9739_s29  ;;  %s6184_s29 = sld [smem:[#allocation7 + $0x62]] }
 0x567   : > { %v3892_v36 = vpop.permute.xlu1 %3891  ;;  %v3867_v4 = vadd.f32 %v9611_v63, %v3811_v59  ;;  %v9791_v32 = vmul.f32 %v4588_v49, %v9404_v1  ;;  %v3963_v51 = vstv %s9745_s5  ;;  %v3932_v16 = vmul.f32 %v3929_v58, %v9214_v48  ;;  %s6183_s5 = sld [smem:[#allocation7 + $0x3e]] }
 0x568   : > { %v3896_v29 = vadd.f32 %v3892_v36, %v3840_v60  ;;  %v3798_v60 = vadd.f32 %v3796_v26, %v3774_v12  ;;  %v11317_v36 = vld [vmem:[#allocation27_spill] sm:$0xff]  ;;  %v9797_v62 = vmul.f32 %v3963_v51, %v11305_v3  ;;  %v3786_v28 = vadd.f32 %v9696_v7, %v3732_v0  ;;  %v11318_v26 = vld [vmem:[#allocation33_spill] sm:$0xff] }
 0x569   : > { %v4591_v37 = vmul.f32 %v4588_v49, %v11317_v36  ;;  %v3937_v33 = vrot.slane %v9766_v42, 1  ;;  %v3966_v63 = vmul.f32 %v3963_v51, %v9214_v48  ;;  %v3689_v58 = vadd.f32 %v11318_v26, %v9692_v54 }
 0x56a   : > { %v3961_v50 = vadd.f32 %v3957_v13, %v3896_v29  ;;  %v3854_v12 = vadd.f32 %v9659_v21, %v3798_v60  ;;  %v3921_v7 = vsel %vm528_vm3, %v3919_v19, %v10979_v43  ;;  %v4508_v42 = vmul.f32 %v4506_v8, %v9404_v1  ;;  %v11319_v8 = vld [vmem:[#allocation46_spill] sm:$0xff] }
 0x56b   : > { %v4494_v54 = vmul.f32 %v4492_v34, %v9404_v1  ;;  %v4598_v23 = vrot.slane %v4591_v37, 1  ;;  %v3971_v13 = vrot.slane %v9797_v62, 1  ;;  %v3773_v19 = vadd.f32 %v9519_v2, %v3689_v58  ;;  %v11320_v37 = vld [vmem:[#allocation26_spill] sm:$0xff] }
 0x56c   : > { %4511 = vrot.lane.b32.xlu0 %v4507_v22, %s6477_s0  ;;  %4497 = vrot.lane.b32.xlu2 %v4493_v41, %s6477_s0  ;;  %v9805_v59 = vadd.f32 %v9711_v52, %v3961_v50  ;;  %v3785_v22 = vadd.f32 %v9709_v27, %v3731_v44  ;;  %v3926_v52 = vadd.f32 %v3921_v7, %v3867_v4  ;;  %v4596_v41 = vrot.slane %v9791_v32, 1 }
 0x56d   : > { %4483 = vrot.lane.b32.xlu1 %v4479_v39, %s6477_s0  ;;  %v3939_v39 = vrot.slane %v3932_v16, 1  ;;  %v4630_v50 = vstv %s9777_s7  ;;  %v3826_v60 = vadd.f32 %v11319_v8, %v3786_v28  ;;  %v3973_v44 = vrot.slane %v3966_v63, 1  ;;  %s10114_s7 = sld [smem:[#allocation7 + $0x36]] }
 0x56e   : > { %v4100_v0 = vpop.permute.xlu2 %4099  ;;  %v9816_v29 = vpop.permute.xlu0 %4034  ;;  %v3910_v4 = vadd.f32 %v9609_v5, %v3854_v12  ;;  %v9826_v26 = vmul.f32 %v4630_v50, %v9404_v1  ;;  %v4609_v7 = vstv %s9787_s9  ;;  %v4589_v34 = vmul.f32 %v4588_v49, %v9401_v14  ;;  %v11321_v12 = vld [vmem:[#allocation39_spill] sm:$0xff]  ;;  %s6185_s9 = sld [smem:[#allocation7 + $0x86]] }
 0x56f   : > { %v3993_v21 = vpop.permute.xlu1 %3992  ;;  %v3711_v16 = vadd.f32 %v11320_v37, %v9703_v57  ;;  %v3882_v11 = vadd.f32 %v9655_v20, %v3826_v60  ;;  %v3964_v2 = vmul.f32 %v3963_v51, %v9145_v35  ;;  %v3825_v28 = vadd.f32 %v9514_v25, %v3785_v22 }
 0x570   : > { %v3998_v27 = vadd.f32 %v3993_v21, %v3926_v52  ;;  %v4599_v5 = vsel %vm528_vm3, %v4596_v41, %v4598_v23  ;;  %v4631_v49 = vmul.f32 %v4630_v50, %v9401_v14  ;;  %v9844_v63 = vmul.f32 %v4609_v7, %v9404_v1 }
 0x571   : > { %v3797_v20 = vadd.f32 %v9706_v18, %v3773_v19  ;;  %v3936_v57 = vrot.slane %v9763_v46, 1  ;;  %v3940_v25 = vsel %vm528_vm3, %v3937_v33, %v3939_v39  ;;  %v3881_v51 = vadd.f32 %v9721_v17, %v3825_v28 }
 0x572   : > { %v9833_v43 = vadd.f32 %v4077_v30, %v3998_v27  ;;  %v3974_v30 = vsel %vm528_vm3, %v3971_v13, %v3973_v44  ;;  %v4638_v18 = vrot.slane %v9826_v26, 1  ;;  %v4610_v46 = vmul.f32 %v4609_v7, %v9401_v14  ;;  %v11322_v27 = vld [vmem:[#allocation38_spill] sm:$0xff] }
 0x573   : > { %v3978_v58 = vadd.f32 %v3974_v30, %v3910_v4  ;;  %v3789_v22 = vmul.f32 %v3788_v24, %v9145_v35  ;;  %v3938_v52 = vsel %vm528_vm3, %v3936_v57, %v3937_v33  ;;  %v3944_v23 = vadd.f32 %v3940_v25, %v3882_v11  ;;  %v11323_v57 = vld [vmem:[#allocation98_spill] sm:$0xff] }
 0x574   : > { %4602 = vrot.lane.b32.xlu0 %v4599_v5, %s10994_s21  ;;  %4513 = vrot.lane.b32.xlu2 %v4508_v42, %s6477_s0  ;;  %v3668_v42 = vadd.f32 %v11321_v12, %v9715_v61  ;;  %v3922_v17 = vrot.slane %v9769_v45, 1  ;;  %v4637_v8 = vrot.slane %v4631_v49, 1  ;;  %v4617_v60 = vrot.slane %v9844_v63, 1 }
 0x575   : > { %4499 = vrot.lane.b32.xlu1 %v4494_v54, %s6477_s0  ;;  %v3780_v61 = vadd.f32 %v9718_v40, %v3711_v16  ;;  %v3853_v24 = vadd.f32 %v11322_v27, %v3797_v20  ;;  %v4595_v33 = vrot.slane %v4589_v34, 1  ;;  %v3943_v4 = vadd.f32 %v3938_v52, %v3881_v51 }
 0x576   : > { %v4140_v21 = vpop.permute.xlu2 %4139  ;;  %v4058_v39 = vpop.permute.xlu0 %4057  ;;  %v4639_v11 = vsel %vm528_vm3, %v4637_v8, %v4638_v18  ;;  %v4616_v37 = vrot.slane %v4610_v46, 1  ;;  %v3970_v45 = vrot.slane %v3964_v2, 1  ;;  %v4651_v49 = vstv %s9836_s11  ;;  %s10140_s11 = sld [smem:[#allocation7 + $0x7e]] }
 0x577   : > { %v4016_v54 = vpop.permute.xlu1 %4015  ;;  %v9869_v19 = vadd.f32 %v4058_v39, %v3978_v58  ;;  %v3909_v28 = vadd.f32 %v9713_v10, %v3853_v24  ;;  %v4633_v63 = vmul.f32 %v4630_v50, %v11317_v36  ;;  %v9886_v34 = vmul.f32 %v4651_v49, %v9404_v1 }
 0x578   : > { %v4020_v44 = vadd.f32 %v4016_v54, %v3944_v23  ;;  %v4618_v40 = vsel %vm528_vm3, %v4616_v37, %v4617_v60  ;;  %v4654_v16 = vmul.f32 %v4651_v49, %v11317_v36  ;;  %v4612_v20 = vmul.f32 %v4609_v7, %v11317_v36 }
 0x579   : > { %v3812_v2 = vadd.f32 %v9571_v56, %v3780_v61  ;;  %v3947_v10 = vmul.f32 %v9724_v47, %v9145_v35  ;;  %v4148_v50 = vstv %s9854_s8  ;;  %v3752_v25 = vadd.f32 %v11323_v57, %v3668_v42  ;;  %s10156_s8 = sld [smem:[#allocation7 + $0x5a]] }
 0x57a   : > { %v9878_v5 = vadd.f32 %v4100_v0, %v4020_v44  ;;  %v4597_v0 = vsel %vm528_vm3, %v4595_v33, %v4596_v41  ;;  %v3972_v56 = vsel %vm528_vm3, %v3970_v45, %v3971_v13  ;;  %v4019_v47 = vadd.f32 %v9653_v38, %v3943_v4 }
 0x57b   : > { %v9908_v7 = vmul.f32 %v4148_v50, %v11305_v3  ;;  %v3977_v32 = vadd.f32 %v3972_v56, %v3909_v28  ;;  %v4640_v51 = vrot.slane %v4633_v63, 1  ;;  %v4151_v58 = vmul.f32 %v4148_v50, %v9214_v48 }
 0x57c   : > { %4642 = vrot.lane.b32.xlu0 %v4639_v11, %s10994_s21  ;;  %4621 = vrot.lane.b32.xlu2 %v4618_v40, %s10994_s21  ;;  %v4693_v46 = vstv %s9866_s10  ;;  %v4659_v62 = vrot.slane %v9886_v34, 1  ;;  %v4661_v13 = vrot.slane %v4654_v16, 1  ;;  %v4619_v52 = vrot.slane %v4612_v20, 1  ;;  %s10173_s10 = sld [smem:[#allocation7 + $0x1c]] }
 0x57d   : > { %4600 = vrot.lane.b32.xlu1 %v4597_v0, %s10994_s21  ;;  %v3868_v38 = vadd.f32 %v9512_v55, %v3812_v2  ;;  %v11324_v23 = vrot.slane %v9750_v31, 1  ;;  %v9922_v8 = vmul.f32 %v4693_v46, %v9404_v1  ;;  %v3791_v61 = vadd.f32 %v3789_v22, %v3752_v25 }
 0x57e   : > { %v9910_v30 = vpop.permute.xlu2 %4230  ;;  %v4098_v41 = vpop.permute.xlu0 %4097  ;;  %v3953_v27 = vrot.slane %v3947_v10, 1  ;;  %v4156_v24 = vrot.slane %v9908_v7, 2  ;;  %v4694_v44 = vmul.f32 %v4693_v46, %v9401_v14  ;;  %v4158_v55 = vrot.slane %v4151_v58, 2 }
 0x57f   : > { %v4056_v12 = vpop.permute.xlu1 %4055  ;;  %v9914_v42 = vadd.f32 %v4098_v41, %v4019_v47  ;;  %v3923_v39 = vsel %vm528_vm3, %v11324_v23, %v3922_v17  ;;  %v4672_v4 = vstv %s9882_s1  ;;  %v4652_v31 = vmul.f32 %v4651_v49, %v9401_v14  ;;  %s10177_s1 = sld [smem:[#allocation7 + $0x40]] }
 0x580   : > { %v4061_v54 = vadd.f32 %v4056_v12, %v3977_v32  ;;  %v4662_v17 = vsel %vm528_vm3, %v4659_v62, %v4661_v13  ;;  %v4641_v22 = vsel %vm528_vm3, %v4638_v18, %v4640_v51  ;;  %v4620_v11 = vsel %vm528_vm3, %v4617_v60, %v4619_v52 }
 0x581   : > { %v9940_v37 = vmul.f32 %v4672_v4, %v9404_v1  ;;  %v3927_v45 = vadd.f32 %v3923_v39, %v3868_v38  ;;  %v4701_v28 = vrot.slane %v9922_v8, 1  ;;  %v9947_v49 = vstv %s9899_s27  ;;  %s10213_s27 = sld [smem:[#allocation7 + $0x64]] }
 0x582   : > { %v9928_v33 = vadd.f32 %v4140_v21, %v4061_v54  ;;  %v3839_v21 = vadd.f32 %v9618_v53, %v3791_v61  ;;  %v11325_v26 = vrot.slane %v9730_v6, 1  ;;  %v4673_v60 = vmul.f32 %v4672_v4, %v9401_v14 }
 0x583   : > { %v4149_v63 = vmul.f32 %v4148_v50, %v9145_v35  ;;  %v3999_v53 = vadd.f32 %v9771_v15, %v3927_v45  ;;  %v4159_v34 = vsel %vm765_vm4, %v4156_v24, %v4158_v55  ;;  %v4700_v20 = vrot.slane %v4694_v44, 1 }
 0x584   : > { %4665 = vrot.lane.b32.xlu0 %v4662_v17, %s10994_s21  ;;  %4644 = vrot.lane.b32.xlu2 %v4641_v22, %s10994_s21  ;;  %v3955_v18 = vsel %vm528_vm3, %v3953_v27, %v11325_v26  ;;  %v4658_v2 = vrot.slane %v4652_v31, 1  ;;  %v4680_v0 = vrot.slane %v9940_v37, 1  ;;  %v4183_v50 = vmul.f32 %v9947_v49, %v9145_v35 }
 0x585   : > { %4623 = vrot.lane.b32.xlu1 %v4620_v11, %s10994_s21  ;;  %v9969_v15 = vmul.f32 %v9947_v49, %v11305_v3  ;;  %v3895_v57 = vadd.f32 %v9563_v9, %v3839_v21  ;;  %v4702_v56 = vsel %vm528_vm3, %v4700_v20, %v4701_v28  ;;  %v4714_v47 = vstv %s9924_s28  ;;  %s10226_s28 = sld [smem:[#allocation7 + $0x88]] }
 0x586   : > { %v9956_v40 = vpop.permute.xlu2 %4270  ;;  %v4121_v16 = vpop.permute.xlu0 %4120  ;;  %v4660_v7 = vsel %vm528_vm3, %v4658_v2, %v4659_v62  ;;  %v4155_v32 = vrot.slane %v4149_v63, 2  ;;  %v9980_v41 = vmul.f32 %v4714_v47, %v9404_v1  ;;  %v4717_v58 = vmul.f32 %v4714_v47, %v11317_v36 }
 0x587   : > { %v4079_v6 = vpop.permute.xlu1 %4078  ;;  %v9962_v10 = vadd.f32 %v4121_v16, %v9805_v59  ;;  %v4679_v59 = vrot.slane %v4673_v60, 1  ;;  %v4696_v9 = vmul.f32 %v4693_v46, %v11317_v36  ;;  %v4165_v12 = vstv %s9932_s22  ;;  %s10236_s22 = sld [smem:[#allocation7 + $0x1d]] }
 0x588   : > { %v4083_v25 = vadd.f32 %v4079_v6, %v3999_v53  ;;  %v4157_v52 = vsel %vm765_vm4, %v4155_v32, %v4156_v24  ;;  %v4675_v38 = vmul.f32 %v4672_v4, %v11317_v36  ;;  %v9991_v62 = vmul.f32 %v4165_v12, %v11305_v3 }
 0x589   : > { %v4681_v13 = vsel %vm528_vm3, %v4679_v59, %v4680_v0  ;;  %v3960_v23 = vadd.f32 %v3955_v18, %v3895_v57  ;;  %v4168_v46 = vmul.f32 %v4165_v12, %v9214_v48  ;;  %v4189_v54 = vrot.slane %v4183_v50, 2 }
 0x58a   : > { %v4163_v51 = vadd.f32 %v4159_v34, %v4083_v25  ;;  %v4190_v61 = vrot.slane %v9969_v15, 2  ;;  %v4162_v27 = vadd.f32 %v4157_v52, %v9833_v43  ;;  %v4722_v24 = vrot.slane %v9980_v41, 1 }
 0x58b   : > { %v4040_v44 = vadd.f32 %v9816_v29, %v3960_v23  ;;  %v4724_v31 = vrot.slane %v4717_v58, 1  ;;  %v4703_v17 = vrot.slane %v4696_v9, 1  ;;  %v4682_v37 = vrot.slane %v4675_v38, 1 }
 0x58c   : > { %4705 = vrot.lane.b32.xlu0 %v4702_v56, %s6477_s0  ;;  %4684 = vrot.lane.b32.xlu2 %v4681_v13, %s6477_s0  ;;  %v9997_v39 = vadd.f32 %v9910_v30, %v4163_v51  ;;  %v4199_v30 = vstv %s9959_s2  ;;  %v4173_v26 = vrot.slane %v9991_v62, 2  ;;  %v4175_v18 = vrot.slane %v4168_v46, 2  ;;  %s6163_s2 = sld [smem:[#allocation7 + $0x39]] }
 0x58d   : > { %4663 = vrot.lane.b32.xlu1 %v4660_v7, %s10994_s21  ;;  %v4201_v21 = vmul.f32 %v4199_v30, %v11305_v3  ;;  %v4202_v43 = vmul.f32 %v4199_v30, %v9214_v48  ;;  %v4824_v29 = vstv %s9976_s14  ;;  %v4191_v60 = vsel %vm765_vm4, %v4189_v54, %v4190_v61  ;;  %s6162_s14 = sld [smem:[#allocation7 + $0x15]] }
 0x58e   : > { %v10004_v55 = vpop.permute.xlu2 %4293  ;;  %v4229_v4 = vpop.permute.xlu0 %4228  ;;  %v10017_v63 = vmul.f32 %v4824_v29, %v9404_v1  ;;  %v4725_v34 = vsel %vm528_vm3, %v4722_v24, %v4724_v31  ;;  %v4704_v3 = vsel %vm528_vm3, %v4701_v28, %v4703_v17  ;;  %v4735_v16 = vstv %s9985_s19  ;;  %s6164_s19 = sld [smem:[#allocation7 + $0x5d]] }
 0x58f   : > { %v4119_v22 = vpop.permute.xlu1 %4118  ;;  %v10007_v11 = vadd.f32 %v4229_v4, %v4162_v27  ;;  %v4683_v20 = vsel %vm528_vm3, %v4680_v0, %v4682_v37  ;;  %v4207_v2 = vrot.slane %v4201_v21, 2  ;;  %v4825_v6 = vmul.f32 %v4824_v29, %v9401_v14 }
 0x590   : > { %v4124_v45 = vadd.f32 %v4119_v22, %v4040_v44  ;;  %v10029_v50 = vmul.f32 %v4735_v16, %v9404_v1  ;;  %v4209_v57 = vrot.slane %v4202_v43, 2  ;;  %v4176_v8 = vsel %vm765_vm4, %v4173_v26, %v4175_v18 }
 0x591   : > { %v4715_v28 = vmul.f32 %v4714_v47, %v9401_v14  ;;  %v4180_v0 = vadd.f32 %v4176_v8, %v9878_v5  ;;  %v4832_v56 = vrot.slane %v10017_v63, 2  ;;  %v4736_v59 = vmul.f32 %v4735_v16, %v9401_v14 }
 0x592   : > { %v4196_v53 = vadd.f32 %v4191_v60, %v4124_v45  ;;  %v4166_v7 = vmul.f32 %v4165_v12, %v9145_v35  ;;  %v4200_v51 = vmul.f32 %v4199_v30, %v9145_v35  ;;  %v4743_v9 = vrot.slane %v10029_v50, 1 }
 0x593   : > { %v4721_v5 = vrot.slane %v4715_v28, 1  ;;  %v4210_v52 = vsel %vm765_vm4, %v4207_v2, %v4209_v57  ;;  %v4742_v62 = vrot.slane %v4736_v59, 1  ;;  %v4845_v54 = vstv %s10024_s23  ;;  %s10262_s23 = sld [smem:[#allocation7 + $0x41]] }
 0x594   : > { %4728 = vrot.lane.b32.xlu0 %v4725_v34, %s6477_s0  ;;  %4707 = vrot.lane.b32.xlu2 %v4704_v3, %s6477_s0  ;;  %v10036_v25 = vadd.f32 %v9956_v40, %v4196_v53  ;;  %v4831_v40 = vrot.slane %v4825_v6, 2  ;;  %v4172_v12 = vrot.slane %v4166_v7, 2  ;;  %v4206_v46 = vrot.slane %v4200_v51, 2 }
 0x595   : > { %4686 = vrot.lane.b32.xlu1 %v4683_v20, %s6477_s0  ;;  %v4723_v35 = vsel %vm528_vm3, %v4721_v5, %v4722_v24  ;;  %v4744_v27 = vsel %vm528_vm3, %v4742_v62, %v4743_v9  ;;  %v10056_v44 = vmul.f32 %v4845_v54, %v9404_v1  ;;  %v4827_v4 = vmul.f32 %v4824_v29, %v11317_v36 }
 0x596   : > { %v4334_v32 = vpop.permute.xlu2 %4333  ;;  %v4252_v41 = vpop.permute.xlu0 %4251  ;;  %v4833_v38 = vsel %vm765_vm4, %v4831_v40, %v4832_v56  ;;  %v4208_v31 = vsel %vm765_vm4, %v4206_v46, %v4207_v2  ;;  %v4738_v24 = vmul.f32 %v4735_v16, %v11317_v36  ;;  %v4174_v30 = vsel %vm765_vm4, %v4172_v12, %v4173_v26 }
 0x597   : > { %v4142_v58 = vpop.permute.xlu1 %4141  ;;  %v10044_v47 = vadd.f32 %v4252_v41, %v4180_v0  ;;  %v4213_v22 = vadd.f32 %v4208_v31, %v9928_v33  ;;  %v4185_v37 = vmul.f32 %v9947_v49, %v9214_v48  ;;  %v4179_v43 = vadd.f32 %v4174_v30, %v9914_v42 }
 0x598   : > { %v4146_v13 = vadd.f32 %v4142_v58, %v9869_v19  ;;  %v4848_v19 = vmul.f32 %v4845_v54, %v11317_v36  ;;  %v4834_v63 = vrot.slane %v4827_v4, 2  ;;  %v4745_v34 = vrot.slane %v4738_v24, 1 }
 0x599   : > { %v4192_v26 = vrot.slane %v4185_v37, 2  ;;  %v4887_v33 = vstv %s10050_s26  ;;  %v4866_v16 = vstv %s6180_s6  ;;  %v4908_v58 = vstv %s6182_s30  ;;  %s10279_s26 = sld [smem:[#allocation7 + $0x65]] }
 0x59a   : > { %v4214_v23 = vadd.f32 %v4210_v52, %v4146_v13  ;;  %v4855_v60 = vrot.slane %v4848_v19, 2  ;;  %v4835_v42 = vsel %vm765_vm4, %v4832_v56, %v4834_v63  ;;  %v4889_v49 = vmul.f32 %v4887_v33, %v9404_v1  ;;  %s10284_s6 = sld [smem:[#allocation7 + $0x89]] }
 0x59b   : > { %v4868_v20 = vmul.f32 %v4866_v16, %v9404_v1  ;;  %v4746_v2 = vsel %vm528_vm3, %v4743_v9, %v4745_v34  ;;  %v4193_v6 = vsel %vm765_vm4, %v4190_v61, %v4192_v26  ;;  %v4888_v50 = vmul.f32 %v4887_v33, %v9401_v14  ;;  %s6202_s30 = sld [smem:[#allocation7 + $0x1f]] }
 0x59c   : > { %4836 = vrot.lane.b32.xlu0 %v4833_v38, %s10994_s21  ;;  %4747 = vrot.lane.b32.xlu2 %v4744_v27, %s6477_s0  ;;  %v10065_v17 = vadd.f32 %v10004_v55, %v4214_v23  ;;  %v4853_v55 = vrot.slane %v10056_v44, 2  ;;  %v4867_v57 = vmul.f32 %v4866_v16, %v9401_v14  ;;  %v4197_v8 = vadd.f32 %v4193_v6, %v9962_v10  ;;  %v11326_v6 = vld [vmem:[#allocation36_spill] sm:$0xff] }
 0x59d   : > { %4726 = vrot.lane.b32.xlu1 %v4723_v35, %s6477_s0  ;;  %v4846_v56 = vmul.f32 %v4845_v54, %v9401_v14  ;;  %v4874_v15 = vrot.slane %v4868_v20, 2  ;;  %v4894_v61 = vrot.slane %v4888_v50, 2  ;;  %v10102_v10 = vmul.f32 %v4908_v58, %v9404_v1  ;;  %v11327_v50 = vld [vmem:[#allocation73_spill] sm:$0xff] }
 0x59e   : > { %v4357_v21 = vpop.permute.xlu2 %4356  ;;  %v4292_v45 = vpop.permute.xlu0 %4291  ;;  %v4856_v48 = vsel %vm765_vm4, %v4853_v55, %v4855_v60  ;;  %v4873_v51 = vrot.slane %v4867_v57, 2  ;;  %v4911_v5 = vmul.f32 %v4908_v58, %v11317_v36  ;;  %v4890_v52 = vmul.f32 %v4887_v33, %v11317_v36 }
 0x59f   : > { %v4250_v18 = vpop.permute.xlu1 %4249  ;;  %v10073_v29 = vadd.f32 %v4292_v45, %v4213_v22  ;;  %v4852_v9 = vrot.slane %v4846_v56, 2  ;;  %v4869_v62 = vmul.f32 %v4866_v16, %v11317_v36  ;;  %v4384_v12 = vstv %s10092_s4  ;;  %s10297_s4 = sld [smem:[#allocation7 + $0x81]] }
 0x5a0   : > { %v4255_v53 = vadd.f32 %v4250_v18, %v4179_v43  ;;  %v4916_v27 = vrot.slane %v10102_v10, 2  ;;  %v4918_v44 = vrot.slane %v4911_v5, 2  ;;  %v4897_v19 = vrot.slane %v4890_v52, 2 }
 0x5a1   : > { %v4854_v38 = vsel %vm765_vm4, %v4852_v9, %v4853_v55  ;;  %v4385_v31 = vmul.f32 %v4384_v12, %v9401_v14  ;;  %v4876_v24 = vrot.slane %v4869_v62, 2  ;;  %v4950_v30 = vstv %s6184_s29  ;;  %s10322_s29 = sld [smem:[#allocation7 + $0x43]] }
 0x5a2   : > { %v10076_v3 = vadd.f32 %v4334_v32, %v4255_v53  ;;  %v4895_v32 = vrot.slane %v4889_v49, 2  ;;  %v10125_v37 = vmul.f32 %v4950_v30, %v9404_v1  ;;  %v4951_v18 = vmul.f32 %v4950_v30, %v9401_v14 }
 0x5a3   : > { %v4390_v63 = vstv %s10114_s7  ;;  %v4909_v33 = vmul.f32 %v4908_v58, %v9401_v14  ;;  %v3149_v57 = vsel %vm249_vm0, %v11327_v50, %v11326_v6  ;;  %v4402_v9 = vstv %s10140_s11  ;;  %s10349_s7 = sld [smem:[#allocation7 + $0x8b]] }
 0x5a4   : > { %4859 = vrot.lane.b32.xlu0 %v4856_v48, %s10994_s21  ;;  %4838 = vrot.lane.b32.xlu2 %v4835_v42, %s10994_s21  ;;  %v4896_v13 = vsel %vm765_vm4, %v4894_v61, %v4895_v32  ;;  %v4898_v43 = vsel %vm765_vm4, %v4895_v32, %v4897_v19  ;;  %v4958_v26 = vrot.slane %v10125_v37, 2  ;;  %v4392_v20 = vmul.f32 %v4390_v63, %v9404_v1  ;;  %s10379_s11 = sld [smem:[#allocation7 + $0x20]] }
 0x5a5   : > { %4749 = vrot.lane.b32.xlu1 %v4746_v2, %s6477_s0  ;;  %v4957_v2 = vrot.slane %v4951_v18, 2  ;;  %v4953_v32 = vmul.f32 %v4950_v30, %v11317_v36 }
 0x5a6   : > { %v4414_v28 = vpop.permute.xlu2 %4413  ;;  %v4315_v0 = vpop.permute.xlu0 %4314 }
 0x5a7   : > { %v4273_v59 = vpop.permute.xlu1 %4272  ;;  %v10097_v7 = vadd.f32 %v4315_v0, %v9997_v39  ;;  %v4875_v39 = vsel %vm765_vm4, %v4873_v51, %v4874_v15  ;;  %v4959_v56 = vsel %vm765_vm4, %v4957_v2, %v4958_v26 }
 0x5a8   : > { %v4277_v41 = vadd.f32 %v4273_v59, %v4197_v8  ;;  %v4971_v59 = vstv %s6185_s9  ;;  %s10373_s9 = sld [smem:[#allocation7 + $0x18]] }
 0x5aa   : > { %v10099_v40 = vadd.f32 %v4357_v21, %v4277_v41  ;;  %v4929_v21 = vstv %s6183_s5  ;;  %v4974_v41 = vmul.f32 %v4971_v59, %v11317_v36  ;;  %s6204_s5 = sld [smem:[#allocation7 + $0x67]] }
 0x5ab   : > { %v10130_v45 = vmul.f32 %v4929_v21, %v9404_v1  ;;  %v4930_v60 = vmul.f32 %v4929_v21, %v9401_v14  ;;  %v4932_v51 = vmul.f32 %v4929_v21, %v11317_v36  ;;  %v4386_v21 = vmul.f32 %v4384_v12, %v9404_v1 }
 0x5ac   : > { %4899 = vrot.lane.b32.xlu0 %v4896_v13, %s10994_s21  ;;  %4878 = vrot.lane.b32.xlu2 %v4875_v39, %s10994_s21  ;;  %v11328_v13 = vld [vmem:[#allocation21_spill] sm:$0xff] }
 0x5ad   : > { %4857 = vrot.lane.b32.xlu1 %v4854_v38, %s10994_s21  ;;  %v4937_v42 = vrot.slane %v10130_v45, 2  ;;  %v4936_v8 = vrot.slane %v4930_v60, 2  ;;  %v3151_v39 = vsel %vm252_vm1, %v3149_v57, %v11328_v13  ;;  %v11329_v45 = vld [vmem:[#allocation30_spill] sm:$0xff] }
 0x5ae   : > { %v4430_v23 = vpop.permute.xlu2 %4429  ;;  %v4355_v35 = vpop.permute.xlu0 %4354  ;;  %v3154_v19 = vrot.slane %v3151_v39, 1 }
 0x5af   : > { %v4313_v46 = vpop.permute.xlu1 %4312  ;;  %v10117_v54 = vadd.f32 %v4355_v35, %v10036_v25  ;;  %v4919_v25 = vsel %vm765_vm4, %v4916_v27, %v4918_v44  ;;  %v4960_v35 = vrot.slane %v4953_v32, 2  ;;  %v4939_v44 = vrot.slane %v4932_v51, 2 }
 0x5b0   : > { %v4318_v4 = vadd.f32 %v4313_v46, %v10007_v11  ;;  %v4877_v11 = vsel %vm765_vm4, %v4874_v15, %v4876_v24  ;;  %v4973_v15 = vmul.f32 %v4971_v59, %v9404_v1  ;;  %v3157_v24 = vrot.slane %v3151_v39, 7 }
 0x5b1   : > { %v4961_v30 = vsel %vm765_vm4, %v4958_v26, %v4960_v35  ;;  %v4972_v26 = vmul.f32 %v4971_v59, %v9401_v14  ;;  %v5058_v35 = vstv %s10226_s28  ;;  %s10436_s28 = sld [smem:[#allocation7 + $0x84]] }
 0x5b2   : > { %v4387_v22 = vadd.f32 %v4385_v31, %v4318_v4  ;;  %v4979_v46 = vrot.slane %v4973_v15, 2  ;;  %v4396_v31 = vstv %s10156_s8  ;;  %s10382_s8 = sld [smem:[#allocation7 + $0x44]] }
 0x5b3   : > { %v4398_v37 = vmul.f32 %v4396_v31, %v9404_v1 }
 0x5b4   : > { %4922 = vrot.lane.b32.xlu0 %v4919_v25, %s6477_s0  ;;  %4901 = vrot.lane.b32.xlu2 %v4898_v43, %s10994_s21  ;;  %v10136_v55 = vadd.f32 %v4414_v28, %v4387_v22  ;;  %v4391_v28 = vmul.f32 %v4390_v63, %v9401_v14  ;;  %v4388_v63 = vadd.f32 %v4386_v21, %v10097_v7  ;;  %v4978_v7 = vrot.slane %v4972_v26, 2 }
 0x5b5   : > { %4880 = vrot.lane.b32.xlu1 %v4877_v11, %s10994_s21  ;;  %v4400_v43 = vadd.f32 %v4398_v37, %v10099_v40  ;;  %v11330_v11 = vld [vmem:[#allocation119_spill] sm:$0xff] }
 0x5b6   : > { %v4456_v53 = vpop.permute.xlu2 %4455  ;;  %v4378_v34 = vpop.permute.xlu0 %4377  ;;  %v4393_v10 = vadd.f32 %v4391_v28, %v10076_v3  ;;  %v4403_v3 = vmul.f32 %v4402_v9, %v9401_v14  ;;  %v3150_v18 = vsel %vm249_vm0, %v11330_v11, %v11329_v45  ;;  %v4397_v28 = vmul.f32 %v4396_v31, %v9401_v14 }
 0x5b7   : > { %v4336_v16 = vpop.permute.xlu1 %4335  ;;  %v10146_v48 = vadd.f32 %v4378_v34, %v10065_v17  ;;  %v4915_v17 = vrot.slane %v4909_v33, 2  ;;  %v10203_v33 = vsel %vm259_vm2, %v3154_v19, %v3157_v24  ;;  %v4554_v11 = vstv %s6164_s19  ;;  %s10522_s19 = sld [smem:[#allocation7 + $0x6a]] }
 0x5b8   : > { %v4340_v49 = vadd.f32 %v4336_v16, %v10044_v47  ;;  %v4938_v47 = vsel %vm765_vm4, %v4936_v8, %v4937_v42  ;;  %v5016_v16 = vstv %s10173_s10  ;;  %v4980_v8 = vsel %vm765_vm4, %v4978_v7, %v4979_v46  ;;  %s10397_s10 = sld [smem:[#allocation7 + $0x60]] }
 0x5b9   : > { %v4917_v61 = vsel %vm765_vm4, %v4915_v17, %v4916_v27  ;;  %v5017_v6 = vmul.f32 %v5016_v16, %v10203_v33  ;;  %v4556_v26 = vmul.f32 %v4554_v11, %v9404_v1 }
 0x5ba   : > { %v4394_v0 = vadd.f32 %v4392_v20, %v4340_v49  ;;  %v11331_v49 = vld [vmem:[#allocation20_spill] sm:$0xff] }
 0x5bb   : > { %v10211_v40 = vsel %vm252_vm1, %v3150_v18, %v11331_v49 }
 0x5bc   : > { %4962 = vrot.lane.b32.xlu0 %v4959_v56, %s6477_s0  ;;  %4941 = vrot.lane.b32.xlu2 %v4938_v47, %s6477_s0  ;;  %v10166_v58 = vadd.f32 %v4430_v23, %v4394_v0  ;;  %v4981_v23 = vrot.slane %v4974_v41, 2  ;;  %v3158_v57 = vrot.slane %v10211_v40, 7  ;;  %v4399_v56 = vadd.f32 %v4397_v28, %v10117_v54 }
 0x5bd   : > { %4920 = vrot.lane.b32.xlu1 %v4917_v61, %s6477_s0  ;;  %v5044_v41 = vstv %s10213_s27  ;;  %v3163_v49 = vrot.slane %v10211_v40, 5  ;;  %v4555_v28 = vmul.f32 %v4554_v11, %v9401_v14  ;;  %v5196_v40 = vstv %s6202_s30  ;;  %s10424_s27 = sld [smem:[#allocation7 + $0x3c]] }
 0x5be   : > { %v4472_v5 = vpop.permute.xlu2 %4471  ;;  %v4428_v52 = vpop.permute.xlu0 %4427  ;;  %v4982_v22 = vsel %vm765_vm4, %v4979_v46, %v4981_v23  ;;  %v10231_v59 = vsel %vm259_vm2, %v3157_v24, %v3158_v57  ;;  %v5072_v46 = vstv %s10236_s22  ;;  %s10449_s22 = sld [smem:[#allocation7 + $0x8c]] }
 0x5bf   : > { %v4376_v38 = vpop.permute.xlu1 %4375  ;;  %v10175_v62 = vadd.f32 %v4428_v52, %v4393_v10  ;;  %v5046_v51 = vmul.f32 %v5044_v41, %v10231_v59  ;;  %v5018_v10 = vmul.f32 %v5016_v16, %v10231_v59  ;;  %s6219_s30 = sld [smem:[#allocation7 + $0x47]] }
 0x5c0   : > { %v4381_v27 = vadd.f32 %v4376_v38, %v10073_v29  ;;  %v4940_v29 = vsel %vm765_vm4, %v4937_v42, %v4939_v44  ;;  %v5030_v42 = vstv %s10177_s1  ;;  %v5073_v44 = vmul.f32 %v5072_v46, %v10203_v33  ;;  %s10420_s1 = sld [smem:[#allocation7 + $0x68]] }
 0x5c1   : > { %v5031_v50 = vmul.f32 %v5030_v42, %v10203_v33  ;;  %v5032_v61 = vmul.f32 %v5030_v42, %v10231_v59 }
 0x5c2   : > { %v4405_v4 = vadd.f32 %v4403_v3, %v4381_v27  ;;  %v10256_v27 = vstv %s6163_s2  ;;  %s10460_s2 = sld [smem:[#allocation7 + $0x22]] }
 0x5c3   : > { %v10260_v3 = vmul.f32 %v10256_v27, %v9404_v1  ;;  %v4538_v19 = vmul.f32 %v10256_v27, %v9401_v14 }
 0x5c4   : > { %4964 = vrot.lane.b32.xlu2 %v4961_v30, %s6477_s0  ;;  %4985 = vrot.lane.b32.xlu0 %v4982_v22, %s6477_s0  ;;  %v10193_v25 = vadd.f32 %v4456_v53, %v4405_v4  ;;  %v4520_v4 = vstv %s6162_s14  ;;  %s10500_s14 = sld [smem:[#allocation7 + $0x46]] }
 0x5c5   : > { %4943 = vrot.lane.b32.xlu1 %v4940_v29, %s6477_s0  ;;  %v10274_v31 = vmul.f32 %v4520_v4, %v9404_v1  ;;  %v4523_v24 = vmul.f32 %v4520_v4, %v11317_v36  ;;  %v4545_v30 = vrot.slane %v10260_v3, 1  ;;  %v4544_v29 = vrot.slane %v4538_v19, 1 }
 0x5c6   : > { %v4498_v60 = vpop.permute.xlu2 %4497  ;;  %v4444_v34 = vpop.permute.xlu0 %4443 }
 0x5c7   : > { %v4416_v12 = vpop.permute.xlu1 %4415  ;;  %v10205_v53 = vadd.f32 %v4444_v34, %v4400_v43  ;;  %v4528_v18 = vrot.slane %v10274_v31, 1  ;;  %v5086_v34 = vstv %s10262_s23  ;;  %v4540_v31 = vmul.f32 %v10256_v27, %v11317_v36  ;;  %s6217_s23 = sld [smem:[#allocation7 + $0x8e]] }
 0x5c8   : > { %v4420_v20 = vadd.f32 %v4416_v12, %v4388_v63  ;;  %v4546_v63 = vsel %vm528_vm3, %v4544_v29, %v4545_v30  ;;  %v4557_v12 = vmul.f32 %v4554_v11, %v11317_v36  ;;  %v5088_v42 = vmul.f32 %v5086_v34, %v10231_v59 }
 0x5ca   : > { %v10215_v2 = vadd.f32 %v4472_v5, %v4420_v20 }
 0x5cc   : > { %5021 = vrot.lane.b32.xlu2 %v5017_v6, %s10994_s21  ;;  %5035 = vrot.lane.b32.xlu0 %v5031_v50, %s10994_s21  ;;  %v4562_v6 = vrot.slane %v4556_v26, 1  ;;  %v4564_v50 = vrot.slane %v4557_v12, 1  ;;  %v5217_v26 = vstv %s10322_s29  ;;  %s10585_s29 = sld [smem:[#allocation7 + $0x3f]] }
 0x5cd   : > { %4983 = vrot.lane.b32.xlu1 %v4980_v8, %s6477_s0 }
 0x5ce   : > { %v4514_v0 = vpop.permute.xlu2 %4513  ;;  %v4470_v17 = vpop.permute.xlu0 %4469 }
 0x5cf   : > { %v4442_v47 = vpop.permute.xlu1 %4441  ;;  %v10234_v32 = vadd.f32 %v4470_v17, %v10136_v55  ;;  %v4404_v55 = vmul.f32 %v4402_v9, %v9404_v1  ;;  %v5100_v17 = vstv %s10279_s26  ;;  %s6218_s26 = sld [smem:[#allocation7 + $0x23]] }
 0x5d0   : > { %v4447_v15 = vadd.f32 %v4442_v47, %v4399_v56  ;;  %v4521_v47 = vmul.f32 %v4520_v4, %v9401_v14  ;;  %v5102_v12 = vmul.f32 %v5100_v17, %v10231_v59 }
 0x5d1   : > { %v4406_v39 = vadd.f32 %v4404_v55, %v10146_v48  ;;  %v5059_v48 = vmul.f32 %v5058_v35, %v10203_v33  ;;  %v5101_v55 = vmul.f32 %v5100_v17, %v10203_v33 }
 0x5d2   : > { %v10239_v54 = vadd.f32 %v4498_v60, %v4447_v15  ;;  %v4530_v60 = vrot.slane %v4523_v24, 1 }
 0x5d4   : > { %5037 = vrot.lane.b32.xlu2 %v5032_v61, %s10994_s21  ;;  %5051 = vrot.lane.b32.xlu0 %v5046_v51, %s10994_s21  ;;  %v4531_v20 = vsel %vm528_vm3, %v4528_v18, %v4530_v60  ;;  %v5114_v61 = vstv %s10284_s6  ;;  %v10316_v51 = vsel %vm259_vm2, %v3158_v57, %v3163_v49  ;;  %s10562_s6 = sld [smem:[#allocation7 + $0x1b]] }
 0x5d5   : > { %5023 = vrot.lane.b32.xlu1 %v5018_v10, %s10994_s21  ;;  %v4535_v8 = vadd.f32 %v4531_v20, %v10215_v2  ;;  %v4565_v2 = vsel %vm528_vm3, %v4562_v6, %v4564_v50  ;;  %v5116_v27 = vmul.f32 %v5114_v61, %v10231_v59 }
 0x5d6   : > { %v4622_v13 = vpop.permute.xlu2 %4621  ;;  %v4486_v5 = vpop.permute.xlu0 %4485 }
 0x5d7   : > { %v4458_v52 = vpop.permute.xlu1 %4457  ;;  %v10252_v38 = vadd.f32 %v4486_v5, %v10166_v58  ;;  %v5045_v58 = vmul.f32 %v5044_v41, %v10203_v33 }
 0x5d8   : > { %v4462_v23 = vadd.f32 %v4458_v52, %v4406_v39  ;;  %v4561_v39 = vrot.slane %v4555_v28, 1  ;;  %v5115_v52 = vmul.f32 %v5114_v61, %v10203_v33 }
 0x5da   : > { %v10264_v9 = vadd.f32 %v4514_v0, %v4462_v23  ;;  %v4563_v57 = vsel %vm528_vm3, %v4561_v39, %v4562_v6  ;;  %v4571_v23 = vstv %s10297_s4  ;;  %v5218_v6 = vmul.f32 %v5217_v26, %v10203_v33  ;;  %s6220_s4 = sld [smem:[#allocation7 + $0x6b]] }
 0x5db   : > { %v4568_v4 = vadd.f32 %v4563_v57, %v10239_v54 }
 0x5dc   : > { %5063 = vrot.lane.b32.xlu2 %v5059_v48, %s10994_s21  ;;  %5077 = vrot.lane.b32.xlu0 %v5073_v44, %s6477_s0  ;;  %v10334_v48 = vmul.f32 %v4571_v23, %v9404_v1  ;;  %v4574_v44 = vmul.f32 %v4571_v23, %v11317_v36  ;;  %v5224_v61 = vrot.slane %v5218_v6, 1 }
 0x5dd   : > { %5049 = vrot.lane.b32.xlu1 %v5045_v58, %s10994_s21 }
 0x5de   : > { %v4645_v22 = vpop.permute.xlu2 %4644  ;;  %v4512_v37 = vpop.permute.xlu0 %4511 }
 0x5df   : > { %v4484_v21 = vpop.permute.xlu1 %4483  ;;  %v10282_v43 = vadd.f32 %v4512_v37, %v10193_v25  ;;  %v5074_v25 = vmul.f32 %v5072_v46, %v10231_v59  ;;  %v10327_v46 = vmul.f32 %v5196_v40, %v10231_v59 }
 0x5e0   : > { %v4489_v45 = vadd.f32 %v4484_v21, %v10175_v62  ;;  %v5060_v62 = vmul.f32 %v5058_v35, %v10231_v59  ;;  %v4527_v35 = vrot.slane %v4521_v47, 1 }
 0x5e2   : > { %v4551_v16 = vadd.f32 %v4546_v63, %v4489_v45  ;;  %v4529_v19 = vsel %vm528_vm3, %v4527_v35, %v4528_v18  ;;  %v4579_v63 = vrot.slane %v10334_v48, 1  ;;  %v4581_v18 = vrot.slane %v4574_v44, 1 }
 0x5e3   : > { %v4534_v37 = vadd.f32 %v4529_v19, %v10234_v32  ;;  %v5238_v32 = vstv %s6204_s5  ;;  %s6221_s5 = sld [smem:[#allocation7 + $0x8f]] }
 0x5e4   : > { %5079 = vrot.lane.b32.xlu2 %v5074_v25, %s6477_s0  ;;  %5093 = vrot.lane.b32.xlu0 %v5088_v42, %s6477_s0  ;;  %v10303_v7 = vadd.f32 %v4622_v13, %v4551_v16  ;;  %v5087_v13 = vmul.f32 %v5086_v34, %v10203_v33  ;;  %v4547_v34 = vrot.slane %v4540_v31, 1  ;;  %v10358_v25 = vmul.f32 %v5217_v26, %v10231_v59 }
 0x5e5   : > { %5065 = vrot.lane.b32.xlu1 %v5060_v62, %s10994_s21  ;;  %v5240_v42 = vmul.f32 %v5238_v32, %v10231_v59  ;;  %v4582_v62 = vsel %vm528_vm3, %v4579_v63, %v4581_v18  ;;  %v5239_v50 = vmul.f32 %v5238_v32, %v10203_v33  ;;  %v4756_v31 = vstv %s10373_s9  ;;  %s6198_s9 = sld [smem:[#allocation7 + $0x1e]] }
 0x5e6   : > { %v4685_v0 = vpop.permute.xlu2 %4684  ;;  %v4603_v56 = vpop.permute.xlu0 %4602  ;;  %v4548_v49 = vsel %vm528_vm3, %v4545_v30, %v4547_v34  ;;  %v4586_v20 = vadd.f32 %v4582_v62, %v10264_v9  ;;  %v5225_v3 = vrot.slane %v10358_v25, 1  ;;  %v4572_v9 = vmul.f32 %v4571_v23, %v9401_v14 }
 0x5e7   : > { %v4500_v15 = vpop.permute.xlu1 %4499  ;;  %v10310_v41 = vadd.f32 %v4603_v56, %v4535_v8  ;;  %v4552_v28 = vadd.f32 %v4548_v49, %v10252_v38  ;;  %v5197_v56 = vmul.f32 %v5196_v40, %v10203_v33  ;;  %v5246_v30 = vrot.slane %v5240_v42, 1 }
 0x5e8   : > { %v4504_v10 = vadd.f32 %v4500_v15, %v10205_v53  ;;  %v5199_v53 = vmul.f32 %v5196_v40, %v10316_v51  ;;  %v4578_v35 = vrot.slane %v4572_v9, 1  ;;  %v4757_v6 = vmul.f32 %v4756_v31, %v9401_v14 }
 0x5ea   : > { %v4569_v5 = vadd.f32 %v4565_v2, %v4504_v10  ;;  %v5206_v11 = vrot.slane %v5199_v53, 1  ;;  %v5245_v10 = vrot.slane %v5239_v50, 1  ;;  %v5259_v2 = vstv %s10349_s7  ;;  %s10604_s7 = sld [smem:[#allocation7 + $0x87]] }
 0x5eb   : > { %v5261_v39 = vmul.f32 %v5259_v2, %v10231_v59  ;;  %v5262_v40 = vmul.f32 %v5259_v2, %v10316_v51  ;;  %v4580_v53 = vsel %vm528_vm3, %v4578_v35, %v4579_v63  ;;  %v5280_v63 = vstv %s10379_s11  ;;  %s6200_s11 = sld [smem:[#allocation7 + $0x66]] }
 0x5ec   : > { %5105 = vrot.lane.b32.xlu2 %v5101_v55, %s6477_s0  ;;  %5119 = vrot.lane.b32.xlu0 %v5115_v52, %s6477_s0  ;;  %v10337_v58 = vadd.f32 %v4645_v22, %v4569_v5  ;;  %v5204_v22 = vrot.slane %v10327_v46, 1  ;;  %v5203_v55 = vrot.slane %v5197_v56, 1  ;;  %v5226_v5 = vsel %vm528_vm3, %v5224_v61, %v5225_v3 }
 0x5ed   : > { %5091 = vrot.lane.b32.xlu1 %v5087_v13, %s6477_s0  ;;  %v5241_v13 = vmul.f32 %v5238_v32, %v10316_v51  ;;  %v5247_v52 = vsel %vm528_vm3, %v5245_v10, %v5246_v30  ;;  %v5220_v46 = vmul.f32 %v5217_v26, %v10316_v51  ;;  %v4585_v48 = vadd.f32 %v4580_v53, %v10282_v43 }
 0x5ee   : > { %v4708_v24 = vpop.permute.xlu2 %4707  ;;  %v4643_v29 = vpop.permute.xlu0 %4642  ;;  %v5207_v16 = vsel %vm528_vm3, %v5204_v22, %v5206_v11  ;;  %v5205_v57 = vsel %vm528_vm3, %v5203_v55, %v5204_v22  ;;  %v4759_v22 = vmul.f32 %v4756_v31, %v11317_v36  ;;  %v10410_v18 = vmul.f32 %v5280_v63, %v10231_v59 }
 0x5ef   : > { %v4601_v21 = vpop.permute.xlu1 %4600  ;;  %v10345_v45 = vadd.f32 %v4643_v29, %v4568_v4  ;;  %v5248_v19 = vrot.slane %v5241_v13, 1  ;;  %v5267_v4 = vrot.slane %v5261_v39, 1  ;;  %v5269_v29 = vrot.slane %v5262_v40, 1 }
 0x5f0   : > { %v4606_v60 = vadd.f32 %v4601_v21, %v4534_v37  ;;  %v4758_v21 = vmul.f32 %v4756_v31, %v9404_v1  ;;  %v5301_v43 = vstv %s10382_s8  ;;  %v5281_v25 = vmul.f32 %v5280_v63, %v10203_v33  ;;  %s6211_s8 = sld [smem:[#allocation7 + $0x45]] }
 0x5f1   : > { %v10418_v26 = vmul.f32 %v5301_v43, %v10231_v59  ;;  %v5270_v32 = vsel %vm528_vm3, %v5267_v4, %v5269_v29  ;;  %v5302_v62 = vmul.f32 %v5301_v43, %v10203_v33  ;;  %v5288_v49 = vrot.slane %v10410_v18, 1 }
 0x5f2   : > { %v10351_v54 = vadd.f32 %v4685_v0, %v4606_v60  ;;  %v5227_v60 = vrot.slane %v5220_v46, 1  ;;  %v5304_v13 = vmul.f32 %v5301_v43, %v10316_v51  ;;  %v4773_v46 = vstv %s10424_s27  ;;  %s6201_s27 = sld [smem:[#allocation7 + $0x8a]] }
 0x5f3   : > { %v5308_v61 = vrot.slane %v5302_v62, 1  ;;  %v10471_v53 = vmul.f32 %v4773_v46, %v9404_v1  ;;  %v5432_v62 = vstv %s10460_s2 }
 0x5f4   : > { %5121 = vrot.lane.b32.xlu2 %v5116_v27, %s6477_s0  ;;  %5210 = vrot.lane.b32.xlu0 %v5207_v16, %s10994_s21  ;;  %v5249_v27 = vsel %vm528_vm3, %v5246_v30, %v5248_v19  ;;  %v4766_v16 = vrot.slane %v4759_v22, 2  ;;  %v5228_v42 = vsel %vm528_vm3, %v5225_v3, %v5227_v60  ;;  %v5287_v30 = vrot.slane %v5281_v25, 1 }
 0x5f5   : > { %5107 = vrot.lane.b32.xlu1 %v5102_v12, %s6477_s0  ;;  %v4764_v12 = vrot.slane %v4758_v21, 2  ;;  %v5311_v31 = vrot.slane %v5304_v13, 1 }
 0x5f6   : > { %v4748_v8 = vpop.permute.xlu2 %4747  ;;  %v4666_v0 = vpop.permute.xlu0 %4665 }
 0x5f7   : > { %v4624_v17 = vpop.permute.xlu1 %4623  ;;  %v10375_v47 = vadd.f32 %v4666_v0, %v4586_v20  ;;  %v10433_v20 = vstv %s10397_s10  ;;  %v5309_v0 = vrot.slane %v10418_v26, 1  ;;  %v4767_v56 = vsel %vm765_vm4, %v4764_v12, %v4766_v16  ;;  %s6210_s10 = sld [smem:[#allocation7 + $0x21]] }
 0x5f8   : > { %v4628_v15 = vadd.f32 %v4624_v17, %v4552_v28  ;;  %v4791_v10 = vmul.f32 %v10433_v20, %v9401_v14  ;;  %v10454_v55 = vmul.f32 %v10433_v20, %v9404_v1 }
 0x5fa   : > { %v10384_v38 = vadd.f32 %v4708_v24, %v4628_v15  ;;  %v4798_v19 = vrot.slane %v10454_v55, 2  ;;  %v4797_v21 = vrot.slane %v4791_v10, 2 }
 0x5fc   : > { %5229 = vrot.lane.b32.xlu2 %v5226_v5, %s10994_s21  ;;  %5250 = vrot.lane.b32.xlu0 %v5247_v52, %s10994_s21  ;;  %v5283_v5 = vmul.f32 %v5280_v63, %v10316_v51  ;;  %v5322_v52 = vstv %s10420_s1  ;;  %s6212_s1 = sld [smem:[#allocation7 + $0x69]] }
 0x5fd   : > { %5208 = vrot.lane.b32.xlu1 %v5205_v57, %s10994_s21  ;;  %v10464_v40 = vmul.f32 %v5322_v52, %v10231_v59  ;;  %v5325_v57 = vmul.f32 %v5322_v52, %v10316_v51 }
 0x5fe   : > { %v10399_v23 = vpop.permute.xlu2 %4838  ;;  %v4706_v44 = vpop.permute.xlu0 %4705 }
 0x5ff   : > { %v4664_v24 = vpop.permute.xlu1 %4663  ;;  %v10404_v37 = vadd.f32 %v4706_v44, %v10303_v7  ;;  %v5260_v7 = vmul.f32 %v5259_v2, %v10203_v33  ;;  %v5289_v2 = vsel %vm528_vm3, %v5287_v30, %v5288_v49  ;;  %v5330_v18 = vrot.slane %v10464_v40, 1 }
 0x600   : > { %v4669_v11 = vadd.f32 %v4664_v24, %v4585_v48  ;;  %v4776_v48 = vmul.f32 %v4773_v46, %v11317_v36  ;;  %v4807_v24 = vstv %s10436_s28  ;;  %v5332_v43 = vrot.slane %v5325_v57, 1  ;;  %s10741_s28 = sld [smem:[#allocation7 + $0x8d]] }
 0x601   : > { %v5266_v28 = vrot.slane %v5260_v7, 1  ;;  %v4809_v60 = vmul.f32 %v4807_v24, %v9404_v1  ;;  %v4781_v7 = vrot.slane %v10471_v53, 2  ;;  %v5312_v1 = vsel %vm528_vm3, %v5309_v0, %v5311_v31 }
 0x602   : > { %v10413_v34 = vadd.f32 %v4748_v8, %v4669_v11  ;;  %v5290_v11 = vrot.slane %v5283_v5, 1  ;;  %v4783_v26 = vrot.slane %v4776_v48, 2  ;;  %v5435_v53 = vmul.f32 %v5432_v62, %v10316_v51 }
 0x603   : > { %v5268_v15 = vsel %vm528_vm3, %v5266_v28, %v5267_v4  ;;  %v5434_v28 = vmul.f32 %v5432_v62, %v10231_v59  ;;  %v5453_v48 = vstv %s10500_s14  ;;  %s6234_s14 = sshll.u32 %s6521_s16, 6 }
 0x604   : > { %5252 = vrot.lane.b32.xlu2 %v5249_v27, %s10994_s21  ;;  %5273 = vrot.lane.b32.xlu0 %v5270_v32, %s10994_s21  ;;  %v4810_v27 = vmul.f32 %v4807_v24, %v11317_v36  ;;  %v5343_v32 = vstv %s10449_s22  ;;  %v5291_v25 = vsel %vm528_vm3, %v5288_v49, %v5290_v11  ;;  %v4784_v49 = vsel %vm765_vm4, %v4781_v7, %v4783_v26  ;;  %s11332_s22 = sshll.u32 %s6600_s17, 6 }
 0x605   : > { %5231 = vrot.lane.b32.xlu1 %v5228_v42, %s10994_s21  ;;  %v10497_v42 = vmul.f32 %v5343_v32, %v10231_v59  ;;  %v4788_v30 = vadd.f32 %v4784_v49, %v10384_v38  ;;  %s10882_s2 = scalar_lea.vmem [#allocation9], %s11332_s22 }
 0x606   : > { %v10438_v50 = vpop.permute.xlu2 %4878  ;;  %v4729_v8 = vpop.permute.xlu0 %4728 }
 0x607   : > { %v4687_v17 = vpop.permute.xlu1 %4686  ;;  %v10443_v3 = vadd.f32 %v4729_v8, %v10337_v58  ;;  %v4763_v58 = vrot.slane %v4757_v6, 2  ;;  %v4815_v6 = vrot.slane %v4809_v60, 2  ;;  %v5344_v8 = vmul.f32 %v5343_v32, %v10203_v33 }
 0x608   : > { %v4691_v9 = vadd.f32 %v4687_v17, %v10310_v41  ;;  %v5310_v41 = vsel %vm528_vm3, %v5308_v61, %v5309_v0  ;;  %v4817_v0 = vrot.slane %v4810_v27, 2  ;;  %v4808_v61 = vmul.f32 %v4807_v24, %v9401_v14 }
 0x609   : > { %v4765_v35 = vsel %vm765_vm4, %v4763_v58, %v4764_v12  ;;  %v4799_v12 = vsel %vm765_vm4, %v4797_v21, %v4798_v19  ;;  %v5351_v58 = vrot.slane %v10497_v42, 1  ;;  %v5350_v38 = vrot.slane %v5344_v8, 1 }
 0x60a   : > { %v4771_v39 = vadd.f32 %v4767_v56, %v4691_v9  ;;  %v4770_v4 = vadd.f32 %v4765_v35, %v10351_v54  ;;  %v5323_v56 = vmul.f32 %v5322_v52, %v10203_v33  ;;  %v5433_v9 = vmul.f32 %v5432_v62, %v10203_v33 }
 0x60b   : > { %v4814_v57 = vrot.slane %v4808_v61, 2  ;;  %v5456_v24 = vmul.f32 %v5453_v48, %v10316_v51 }
 0x60c   : > { %5292 = vrot.lane.b32.xlu2 %v5289_v2, %s6477_s0  ;;  %5313 = vrot.lane.b32.xlu0 %v5310_v41, %s6477_s0  ;;  %v10475_v44 = vadd.f32 %v10399_v23, %v4771_v39  ;;  %v4818_v41 = vsel %vm765_vm4, %v4815_v6, %v4817_v0  ;;  %v5329_v52 = vrot.slane %v5323_v56, 1  ;;  %v5439_v35 = vrot.slane %v5433_v9, 2 }
 0x60d   : > { %5271 = vrot.lane.b32.xlu1 %v5268_v15, %s10994_s21  ;;  %v4774_v15 = vmul.f32 %v4773_v46, %v9401_v14  ;;  %v5352_v46 = vsel %vm528_vm3, %v5350_v38, %v5351_v58  ;;  %v4816_v21 = vsel %vm765_vm4, %v4814_v57, %v4815_v6  ;;  %v5454_v9 = vmul.f32 %v5453_v48, %v10203_v33 }
 0x60e   : > { %v10481_v29 = vpop.permute.xlu2 %4901  ;;  %v4837_v22 = vpop.permute.xlu0 %4836  ;;  %v4992_v57 = vstv %s10562_s6  ;;  %s5819_s6 = sshll.u32 %s10882_s2, 4  ;;  %s5820_s6 = int_to_ptr.vmem [resolvable:$true] %s5819_s6 }
 0x60f   : > { %v4727_v63 = vpop.permute.xlu1 %4726  ;;  %v10484_v23 = vadd.f32 %v4837_v22, %v4770_v4  ;;  %v4780_v40 = vrot.slane %v4774_v15, 2  ;;  %v5331_v4 = vsel %vm528_vm3, %v5329_v52, %v5330_v18  ;;  %v5346_v22 = vmul.f32 %v5343_v32, %v10316_v51 }
 0x610   : > { %v4732_v54 = vadd.f32 %v4727_v63, %v10345_v45  ;;  %v5333_v45 = vsel %vm528_vm3, %v5330_v18, %v5332_v43  ;;  %v4821_v63 = vadd.f32 %v4816_v21, %v10413_v34  ;;  %v4793_v18 = vmul.f32 %v10433_v20, %v11317_v36 }
 0x611   : > { %v4782_v60 = vsel %vm765_vm4, %v4780_v40, %v4781_v7  ;;  %v5442_v32 = vrot.slane %v5435_v53, 2  ;;  %v5474_v7 = vstv %s10522_s19  ;;  %v5495_v34 = vstv %s6217_s23 }
 0x612   : > { %v4804_v16 = vadd.f32 %v4799_v12, %v4732_v54  ;;  %v4787_v27 = vadd.f32 %v4782_v60, %v10404_v37  ;;  %v4800_v42 = vrot.slane %v4793_v18, 2  ;;  %v5476_v37 = vmul.f32 %v5474_v7, %v10231_v59 }
 0x613   : > { %v5496_v0 = vmul.f32 %v5495_v34, %v10203_v33  ;;  %v5477_v40 = vmul.f32 %v5474_v7, %v10316_v51  ;;  %v4993_v21 = vmul.f32 %v4992_v57, %v10203_v33  ;;  %v5537_v60 = vstv %s6219_s30  ;;  %s5807_s30 = scalar_lea.sflag [#allocation4], %s6600_s17 }
 0x614   : > { %5315 = vrot.lane.b32.xlu2 %v5312_v1, %s6477_s0  ;;  %5336 = vrot.lane.b32.xlu0 %v5333_v45, %s6477_s0  ;;  %v10510_v17 = vadd.f32 %v10438_v50, %v4804_v16  ;;  %v5440_v50 = vrot.slane %v5434_v28, 2  ;;  %v5463_v1 = vrot.slane %v5456_v24, 2  ;;  %v5497_v45 = vmul.f32 %v5495_v34, %v10231_v59 }
 0x615   : > { %5294 = vrot.lane.b32.xlu1 %v5291_v25, %s6477_s0  ;;  %v5353_v25 = vrot.slane %v5346_v22, 1  ;;  %v4801_v8 = vsel %vm765_vm4, %v4798_v19, %v4800_v42  ;;  %v5475_v28 = vmul.f32 %v5474_v7, %v10203_v33  ;;  %v5484_v22 = vrot.slane %v5477_v40, 2 }
 0x616   : > { %v4942_v10 = vpop.permute.xlu2 %4941  ;;  %v4860_v2 = vpop.permute.xlu0 %4859  ;;  %v5441_v31 = vsel %vm765_vm4, %v5439_v35, %v5440_v50  ;;  %v5443_v36 = vsel %vm765_vm4, %v5440_v50, %v5442_v32  ;;  %v4805_v49 = vadd.f32 %v4801_v8, %v10443_v3  ;;  %v5503_v55 = vrot.slane %v5497_v45, 2 }
 0x617   : > { %v4750_v13 = vpop.permute.xlu1 %4749  ;;  %v10518_v39 = vadd.f32 %v4860_v2, %v4788_v30  ;;  %v5354_v6 = vsel %vm528_vm3, %v5351_v58, %v5353_v25  ;;  %v5481_v19 = vrot.slane %v5475_v28, 2  ;;  %v5502_v58 = vrot.slane %v5496_v0, 2 }
 0x618   : > { %v4754_v5 = vadd.f32 %v4750_v13, %v10375_v47  ;;  %v5455_v47 = vmul.f32 %v5453_v48, %v10231_v59  ;;  %v5460_v50 = vrot.slane %v5454_v9, 2  ;;  %v5498_v3 = vmul.f32 %v5495_v34, %v10316_v51 }
 0x619   : > { %v5504_v38 = vsel %vm765_vm4, %v5502_v58, %v5503_v55  ;;  %v5539_v18 = vmul.f32 %v5537_v60, %v10231_v59  ;;  %v4998_v7 = vstv %s10585_s29 }
 0x61a   : > { %v4822_v14 = vadd.f32 %v4818_v41, %v4754_v5  ;;  %v5516_v41 = vstv %s6218_s26  ;;  %v5000_v45 = vmul.f32 %v4998_v7, %v10231_v59  ;;  %s5818_s26 = scalar_lea.hbm %s10953_s3, %s6234_s14 }
 0x61b   : > { %v5519_v52 = vmul.f32 %v5516_v41, %v10316_v51  ;;  %v5545_v42 = vrot.slane %v5539_v18, 2  ;;  %s5821_s16 = sshll.u32 %s5818_s26, 4  ;;  %s5822_s16 = int_to_ptr.hbm [resolvable:$true] %s5821_s16 }
 0x61c   : > { %5355 = vrot.lane.b32.xlu2 %v5352_v46, %s6477_s0  ;;  %5444 = vrot.lane.b32.xlu0 %v5441_v31, %s10994_s21  ;;  %v10536_v11 = vadd.f32 %v10481_v29, %v4822_v14  ;;  %v5461_v29 = vrot.slane %v5455_v47, 2 }
 0x61d   : > { %5334 = vrot.lane.b32.xlu1 %v5331_v4, %s6477_s0  ;;  %v5505_v4 = vrot.slane %v5498_v3, 2  ;;  %v5526_v47 = vrot.slane %v5519_v52, 2 }
 0x61e   : > { %v4965_v43 = vpop.permute.xlu2 %4964  ;;  %v4900_v54 = vpop.permute.xlu0 %4899  ;;  %v5464_v20 = vsel %vm765_vm4, %v5461_v29, %v5463_v1  ;;  %v5462_v35 = vsel %vm765_vm4, %v5460_v50, %v5461_v29  ;;  %v5517_v29 = vmul.f32 %v5516_v41, %v10203_v33 }
 0x61f   : > { %v4858_v26 = vpop.permute.xlu1 %4857  ;;  %v10544_v12 = vadd.f32 %v4900_v54, %v4821_v63 }
 0x620   : > { %v4863_v16 = vadd.f32 %v4858_v26, %v4787_v27  ;;  %v5538_v26 = vmul.f32 %v5537_v60, %v10203_v33  ;;  %v5523_v8 = vrot.slane %v5517_v29, 2 }
 0x622   : > { %v10546_v62 = vadd.f32 %v4942_v10, %v4863_v16  ;;  %v5482_v10 = vrot.slane %v5476_v37, 2 }
 0x624   : > { %5446 = vrot.lane.b32.xlu2 %v5443_v36, %s10994_s21  ;;  %5467 = vrot.lane.b32.xlu0 %v5464_v20, %s10994_s21  ;;  %v5483_v5 = vsel %vm765_vm4, %v5481_v19, %v5482_v10  ;;  %v5010_v19 = vstv %s10604_s7 }
 0x625   : > { %5357 = vrot.lane.b32.xlu1 %v5354_v6, %s6477_s0  ;;  %v5544_v6 = vrot.slane %v5538_v26, 2  ;;  %v5011_v40 = vmul.f32 %v5010_v19, %v10203_v33 }
 0x626   : > { %v5022_v56 = vpop.permute.xlu2 %5021  ;;  %v4923_v30 = vpop.permute.xlu0 %4922 }
 0x627   : > { %v4881_v15 = vpop.permute.xlu1 %4880  ;;  %v10567_v61 = vadd.f32 %v4923_v30, %v10475_v44  ;;  %v5518_v44 = vmul.f32 %v5516_v41, %v10231_v59  ;;  %v5579_v30 = vstv %s6221_s5 }
 0x628   : > { %v4885_v2 = vadd.f32 %v4881_v15, %v4805_v49  ;;  %v5546_v49 = vsel %vm765_vm4, %v5544_v6, %v5545_v42  ;;  %v5582_v15 = vmul.f32 %v5579_v30, %v10316_v51  ;;  %v5580_v18 = vmul.f32 %v5579_v30, %v10203_v33 }
 0x629   : > { %v5524_v31 = vrot.slane %v5518_v44, 2 }
 0x62a   : > { %v10569_v13 = vadd.f32 %v4965_v43, %v4885_v2  ;;  %v5558_v43 = vstv %s6220_s4  ;;  %v5589_v52 = vrot.slane %v5582_v15, 2  ;;  %s6408_s4 = sshra.s32 %s5822_s16, 4  ;;  %s6409_s4 = int_to_ptr.hbm [resolvable:$true] %s6408_s4 }
 0x62b   : > { %v5527_v27 = vsel %vm765_vm4, %v5524_v31, %v5526_v47  ;;  %v5560_v54 = vmul.f32 %v5558_v43, %v10231_v59  ;;  %v5559_v1 = vmul.f32 %v5558_v43, %v10203_v33  ;;  %v5561_v9 = vmul.f32 %v5558_v43, %v10316_v51  ;;  %s6410_s29 = scalar_lea.hbm %s6409_s4, 64  ;;  %p6415_p0 = scmp.lt.s32.totalorder %s6409_s4, %s10953_s3 }
 0x62c   : > { %5486 = vrot.lane.b32.xlu2 %v5483_v5, %s10994_s21  ;;  %5507 = vrot.lane.b32.xlu0 %v5504_v38, %s10994_s21  ;;  %p6411_p4 = scmp.ne.s32.totalorder %s6409_s4, %s6410_s29 }
 0x62d   : > { %5465 = vrot.lane.b32.xlu1 %v5462_v35, %s10994_s21  ;;  %v5566_v20 = vrot.slane %v5560_v54, 2  ;;  %v5565_v28 = vrot.slane %v5559_v1, 2  ;;  %v5568_v38 = vrot.slane %v5561_v9, 2 }
 0x62e   : > { %v5038_v14 = vpop.permute.xlu2 %5037  ;;  %v4963_v46 = vpop.permute.xlu0 %4962  ;;  %p6412_p6 = pnand %p6411_p4, %p6552_p11 }
 0x62f   : > { %v4921_v53 = vpop.permute.xlu1 %4920  ;;  %v10583_v48 = vadd.f32 %v4963_v46, %v10510_v17  ;;  %v5506_v17 = vsel %vm765_vm4, %v5503_v55, %v5505_v4  ;;  %v5540_v55 = vmul.f32 %v5537_v60, %v10316_v51  ;;  %v5569_v4 = vsel %vm765_vm4, %v5566_v20, %v5568_v38 }
 0x630   : > { %v4926_v24 = vadd.f32 %v4921_v53, %v10484_v23  ;;  %v5485_v23 = vsel %vm765_vm4, %v5482_v10, %v5484_v22  ;;  %v5525_v10 = vsel %vm765_vm4, %v5523_v8, %v5524_v31  ;;  %p6413_p13 = pneg %p6412_p6 }
 0x631   : > { %v5547_v46 = vrot.slane %v5540_v55, 2 }
 0x632   : > { %v4995_v63 = vadd.f32 %v4993_v21, %v4926_v24 }
 0x633   : > { %v5548_v47 = vsel %vm765_vm4, %v5545_v42, %v5547_v46 }
 0x634   : > { %5509 = vrot.lane.b32.xlu2 %v5506_v17, %s10994_s21  ;;  %5530 = vrot.lane.b32.xlu0 %v5527_v27, %s6477_s0  ;;  %v10599_v32 = vadd.f32 %v5022_v56, %v4995_v63  ;;  %v4999_v56 = vmul.f32 %v4998_v7, %v10203_v33  ;;  %v5012_v7 = vmul.f32 %v5010_v19, %v10231_v59 }
 0x635   : > { %5488 = vrot.lane.b32.xlu1 %v5485_v23, %s10994_s21  ;;  %s10614_s21 = sld [smem:[#allocation7 + $0x63]]  ;;  %v5586_v23 = vrot.slane %v5580_v18, 2  ;;  %v10709_v18 = vstv %s6211_s8 }
 0x636   : > { %v5064_v16 = vpop.permute.xlu2 %5063  ;;  %v4986_v25 = vpop.permute.xlu0 %4985  ;;  %v5001_v58 = vadd.f32 %v4999_v56, %v10546_v62 }
 0x637   : > { %v4944_v34 = vpop.permute.xlu1 %4943  ;;  %v10608_v36 = vadd.f32 %v4986_v25, %v10536_v11  ;;  %v5567_v11 = vsel %vm765_vm4, %v5565_v28, %v5566_v20 }
 0x638   : > { %v4948_v37 = vadd.f32 %v4944_v34, %v10518_v39  ;;  %v5581_v39 = vmul.f32 %v5579_v30, %v10231_v59 }
 0x639   : > { %v5014_v20 = vadd.f32 %v5012_v7, %v10608_v36 }
 0x63a   : > { %v5002_v0 = vadd.f32 %v5000_v45, %v4948_v37  ;;  %v5587_v44 = vrot.slane %v5581_v39, 2 }
 0x63b   : > { %v5004_v53 = vstv %s10614_s21  ;;  %s6414_s21 = scalar_lea.hbm %s10953_s3, 128 }
 0x63c   : > { %5549 = vrot.lane.b32.xlu2 %v5546_v49, %s6477_s0  ;;  %5570 = vrot.lane.b32.xlu0 %v5567_v11, %s6477_s0  ;;  %v5042_v2 = vadd.f32 %v5038_v14, %v5002_v0  ;;  %v5590_v62 = vsel %vm765_vm4, %v5587_v44, %v5589_v52  ;;  %v5006_v31 = vmul.f32 %v5004_v53, %v10231_v59  ;;  %p6416_p7 = scmp.lt.s32.totalorder %s6414_s21, %s6410_s29 }
 0x63d   : > { %5528 = vrot.lane.b32.xlu1 %v5525_v10, %s6477_s0  ;;  %v5005_v26 = vmul.f32 %v5004_v53, %v10203_v33 }
 0x63e   : > { %v5080_v50 = vpop.permute.xlu2 %5079  ;;  %v5036_v3 = vpop.permute.xlu0 %5035  ;;  %v5008_v21 = vadd.f32 %v5006_v31, %v10569_v13  ;;  %p6417_p5 = por %p6416_p7, %p6415_p0 }
 0x63f   : > { %v4984_v41 = vpop.permute.xlu1 %4983  ;;  %v10627_v5 = vadd.f32 %v5036_v3, %v5001_v58  ;;  %v5007_v29 = vadd.f32 %v5005_v26, %v10583_v48 }
 0x640   : > { %v4989_v35 = vadd.f32 %v4984_v41, %v10544_v12  ;;  %v4994_v12 = vmul.f32 %v4992_v57, %v10231_v59  ;;  %v5588_v57 = vsel %vm765_vm4, %v5586_v23, %v5587_v44  ;;  %p6418_p8 = pnand %p6417_p5, %p6413_p13 }
 0x642   : > { %v5013_v14 = vadd.f32 %v5011_v40, %v4989_v35  ;;  %v4996_v60 = vadd.f32 %v4994_v12, %v10567_v61  ;;  %v5128_v35 = vstv %s6198_s9 }
 0x643   : > { %v5131_v53 = vmul.f32 %v5128_v35, %v10316_v51 }
 0x644   : > { %5572 = vrot.lane.b32.xlu2 %v5569_v4, %s6477_s0  ;;  %5593 = vrot.lane.b32.xlu0 %v5590_v62, %s6477_s0  ;;  %v5069_v24 = vadd.f32 %v5064_v16, %v5013_v14  ;;  %v5130_v14 = vmul.f32 %v5128_v35, %v10231_v59 }
 0x645   : > { %5551 = vrot.lane.b32.xlu1 %v5548_v47, %s6477_s0  ;;  %v5162_v47 = vstv %s6200_s11 }
 0x646   : > { %v5106_v22 = vpop.permute.xlu2 %5105  ;;  %v5052_v63 = vpop.permute.xlu0 %5051  ;;  %v5164_v12 = vmul.f32 %v5162_v47, %v10231_v59 }
 0x647   : > { %v5024_v43 = vpop.permute.xlu1 %5023  ;;  %v10645_v17 = vadd.f32 %v5052_v63, %v5008_v21 }
 0x648   : > { %v5028_v27 = vadd.f32 %v5024_v43, %v4996_v60  ;;  %v5138_v60 = vrot.slane %v5131_v53, 1 }
 0x64a   : > { %v10647_v54 = vadd.f32 %v5080_v50, %v5028_v27  ;;  %v5170_v27 = vrot.slane %v5164_v12, 1 }
 0x64d   : > { %5591 = vrot.lane.b32.xlu1 %v5588_v57, %s6477_s0  ;;  %s6199_s0 = sld [smem:[#allocation7 + $0x42]] }
 0x64e   : > { %v5122_v13 = vpop.permute.xlu2 %5121  ;;  %v5078_v61 = vpop.permute.xlu0 %5077 }
 0x64f   : > { %v5050_v1 = vpop.permute.xlu1 %5049  ;;  %v10654_v16 = vadd.f32 %v5078_v61, %v10599_v32 }
 0x650   : > { %v5055_v25 = vadd.f32 %v5050_v1, %v5007_v29  ;;  %v5364_v29 = vstv %s6210_s10  ;;  %v5382_v1 = vmul.f32 %v10709_v18, %v10203_v33 }
 0x652   : > { %v10656_v42 = vadd.f32 %v5106_v22, %v5055_v25  ;;  %v5136_v22 = vrot.slane %v5130_v14, 1  ;;  %v5388_v53 = vrot.slane %v5382_v1, 2 }
 0x653   : > { %v5145_v41 = vstv %s6199_s0 }
 0x654   : > { %v10691_v38 = vmul.f32 %v5145_v41, %v10231_v59  ;;  %v5146_v52 = vmul.f32 %v5145_v41, %v10203_v33  ;;  %v5139_v26 = vsel %vm528_vm3, %v5136_v22, %v5138_v60 }
 0x656   : > { %v10659_v34 = vpop.permute.xlu2 %5229  ;;  %v5094_v37 = vpop.permute.xlu0 %5093  ;;  %v5153_v46 = vrot.slane %v10691_v38, 1  ;;  %v5152_v31 = vrot.slane %v5146_v52, 1 }
 0x657   : > { %v5066_v45 = vpop.permute.xlu1 %5065  ;;  %v10662_v6 = vadd.f32 %v5094_v37, %v5042_v2  ;;  %v5367_v37 = vmul.f32 %v5364_v29, %v10316_v51 }
 0x658   : > { %v5070_v8 = vadd.f32 %v5066_v45, %v5014_v20  ;;  %v5154_v21 = vsel %vm528_vm3, %v5152_v31, %v5153_v46  ;;  %v10728_v20 = vmul.f32 %v5364_v29, %v10231_v59  ;;  %v5143_v45 = vadd.f32 %v5139_v26, %v10647_v54 }
 0x65a   : > { %v10664_v48 = vadd.f32 %v5122_v13, %v5070_v8  ;;  %v5129_v13 = vmul.f32 %v5128_v35, %v10203_v33 }
 0x65c   : > { %v5135_v14 = vrot.slane %v5129_v13, 1 }
 0x65e   : > { %v10666_v28 = vpop.permute.xlu2 %5252  ;;  %v5120_v32 = vpop.permute.xlu0 %5119  ;;  %v5137_v60 = vsel %vm528_vm3, %v5135_v14, %v5136_v22 }
 0x65f   : > { %v5092_v0 = vpop.permute.xlu1 %5091  ;;  %v10668_v49 = vadd.f32 %v5120_v32, %v5069_v24  ;;  %v5165_v24 = vmul.f32 %v5162_v47, %v10316_v51  ;;  %v5163_v32 = vmul.f32 %v5162_v47, %v10203_v33 }
 0x660   : > { %v5097_v62 = vadd.f32 %v5092_v0, %v10627_v5  ;;  %v10715_v5 = vmul.f32 %v10709_v18, %v10231_v59 }
 0x661   : > { %v5172_v23 = vrot.slane %v5165_v24, 1  ;;  %v5179_v24 = vstv %s6201_s27 }
 0x662   : > { %v5159_v63 = vadd.f32 %v5154_v21, %v5097_v62  ;;  %v5389_v8 = vrot.slane %v10715_v5, 2  ;;  %v5398_v62 = vstv %s6212_s1 }
 0x663   : > { %v5173_v52 = vsel %vm528_vm3, %v5170_v27, %v5172_v23  ;;  %v5400_v12 = vmul.f32 %v5398_v62, %v10231_v59  ;;  %v5401_v47 = vmul.f32 %v5398_v62, %v10316_v51  ;;  %v5182_v23 = vmul.f32 %v5179_v24, %v10316_v51 }
 0x664   : > { %v5235_v7 = vadd.f32 %v10659_v34, %v5159_v63  ;;  %v5372_v34 = vrot.slane %v10728_v20, 2  ;;  %v5390_v54 = vsel %vm765_vm4, %v5388_v53, %v5389_v8  ;;  %v5148_v63 = vmul.f32 %v5145_v41, %v10316_v51 }
 0x665   : > { %v5406_v41 = vrot.slane %v5400_v12, 2 }
 0x666   : > { %v10670_v56 = vpop.permute.xlu2 %5292  ;;  %v5211_v30 = vpop.permute.xlu0 %5210  ;;  %v5155_v53 = vrot.slane %v5148_v63, 1 }
 0x667   : > { %v5108_v11 = vpop.permute.xlu1 %5107  ;;  %v5215_v35 = vadd.f32 %v5211_v30, %v5143_v45 }
 0x668   : > { %v5112_v25 = vadd.f32 %v5108_v11, %v10645_v17  ;;  %v5374_v11 = vrot.slane %v5367_v37, 2 }
 0x66a   : > { %v5177_v17 = vadd.f32 %v5173_v52, %v5112_v25  ;;  %v5375_v25 = vsel %vm765_vm4, %v5372_v34, %v5374_v11 }
 0x66e   : > { %v10672_v9 = vpop.permute.xlu2 %5315  ;;  %v10674_v36 = vpop.permute.xlu0 %5250 }
 0x66f   : > { %v10676_v39 = vpop.permute.xlu1 %5208 }
 0x676   : > { %v10678_v15 = vpop.permute.xlu0 %5273  ;;  %v10680_v10 = vpop.permute.xlu2 %5355 }
 0x677   : > { %v10682_v55 = vpop.permute.xlu1 %5231 }
 0x67e   : > { %v5314_v2 = vpop.permute.xlu0 %5313  ;;  %v10686_v58 = vpop.permute.xlu2 %5446 }
 0x67f   : > { %v10684_v19 = vpop.permute.xlu1 %5271  ;;  %v5319_v0 = vadd.f32 %v5314_v2, %v5235_v7  ;;  %v5169_v2 = vrot.slane %v5163_v32, 1  ;;  %v5257_v7 = vadd.f32 %v10666_v28, %v5177_v17  ;;  %v5408_v32 = vrot.slane %v5401_v47, 2 }
 0x680   : > { %v5189_v17 = vrot.slane %v5182_v23, 1 }
 0x681   : > { %v5395_v30 = vadd.f32 %v5390_v54, %v5319_v0  ;;  %v5171_v1 = vsel %vm528_vm3, %v5169_v2, %v5170_v27  ;;  %v5142_v0 = vadd.f32 %v5137_v60, %v10654_v16 }
 0x682   : > { %v5176_v22 = vadd.f32 %v5171_v1, %v10656_v42  ;;  %v5180_v1 = vmul.f32 %v5179_v24, %v10203_v33 }
 0x683   : > { %v5214_v42 = vadd.f32 %v10676_v39, %v5142_v0  ;;  %v5156_v39 = vsel %vm528_vm3, %v5153_v46, %v5155_v53 }
 0x684   : > { %v5256_v14 = vadd.f32 %v10674_v36, %v5176_v22  ;;  %v5415_v36 = vstv %s10741_s28 }
 0x685   : > { %v5298_v60 = vadd.f32 %v10670_v56, %v5214_v42  ;;  %v5418_v63 = vmul.f32 %v5415_v36, %v10316_v51 }
 0x686   : > { %v10688_v50 = vpop.permute.xlu0 %5336  ;;  %v10693_v44 = vpop.permute.xlu2 %5486 }
 0x687   : > { %v5295_v3 = vpop.permute.xlu1 %5294  ;;  %v5341_v52 = vadd.f32 %v10688_v50, %v5257_v7  ;;  %v5409_v50 = vsel %vm765_vm4, %v5406_v41, %v5408_v32  ;;  %v5186_v32 = vrot.slane %v5180_v1, 1 }
 0x688   : > { %v5299_v31 = vadd.f32 %v5295_v3, %v5215_v35  ;;  %v10748_v3 = vmul.f32 %v5179_v24, %v10231_v59  ;;  %v5399_v35 = vmul.f32 %v5398_v62, %v10203_v33 }
 0x689   : > { %v5413_v54 = vadd.f32 %v5409_v50, %v5341_v52 }
 0x68a   : > { %v5379_v45 = vadd.f32 %v5375_v25, %v5299_v31  ;;  %v5187_v28 = vrot.slane %v10748_v3, 1  ;;  %v5365_v31 = vmul.f32 %v5364_v29, %v10203_v33  ;;  %v5405_v12 = vrot.slane %v5399_v35, 2 }
 0x68c   : > { %v5451_v62 = vadd.f32 %v10686_v58, %v5379_v45  ;;  %v5190_v2 = vsel %vm528_vm3, %v5187_v28, %v5189_v17  ;;  %v5407_v58 = vsel %vm765_vm4, %v5405_v12, %v5406_v41 }
 0x68d   : > { %v5194_v23 = vadd.f32 %v5190_v2, %v10664_v48 }
 0x68e   : > { %v10696_v40 = vpop.permute.xlu0 %5444  ;;  %v10711_v43 = vpop.permute.xlu2 %5509 }
 0x68f   : > { %v10701_v4 = vpop.permute.xlu1 %5334  ;;  %v5278_v56 = vadd.f32 %v10678_v15, %v5194_v23 }
 0x690   : > { %v5340_v16 = vadd.f32 %v10701_v4, %v5256_v14  ;;  %v5188_v14 = vsel %vm528_vm3, %v5186_v32, %v5187_v28 }
 0x692   : > { %v5412_v38 = vadd.f32 %v5407_v58, %v5340_v16  ;;  %v5416_v16 = vmul.f32 %v5415_v36, %v10203_v33 }
 0x694   : > { %v5492_v15 = vadd.f32 %v10693_v44, %v5412_v38 }
 0x696   : > { %v10717_v57 = vpop.permute.xlu0 %5467  ;;  %v5550_v26 = vpop.permute.xlu2 %5549 }
 0x697   : > { %v10721_v61 = vpop.permute.xlu1 %5357 }
 0x698   : > { %v5362_v41 = vadd.f32 %v10721_v61, %v5278_v56 }
 0x69e   : > { %v10743_v21 = vpop.permute.xlu0 %5507  ;;  %v5573_v46 = vpop.permute.xlu2 %5572 }
 0x69f   : > { %v5466_v13 = vpop.permute.xlu1 %5465 }
 0x6a0   : > { %v5471_v37 = vadd.f32 %v5466_v13, %v5395_v30  ;;  %v10777_v30 = vmul.f32 %v5415_v36, %v10231_v59  ;;  %v5160_v59 = vadd.f32 %v5156_v39, %v10662_v6  ;;  %v5425_v6 = vrot.slane %v5418_v63, 2 }
 0x6a2   : > { %v10760_v27 = vadd.f32 %v5550_v26, %v5471_v37  ;;  %v5371_v26 = vrot.slane %v5365_v31, 2  ;;  %v5423_v48 = vrot.slane %v10777_v30, 2  ;;  %v5384_v37 = vmul.f32 %v10709_v18, %v10316_v51 }
 0x6a3   : > { %v5236_v22 = vadd.f32 %v10682_v55, %v5160_v59 }
 0x6a4   : > { %v5650_v11 = vsel %vm2818_vm5, %v10760_v27, 0.0  ;;  %v5373_v7 = vsel %vm765_vm4, %v5371_v26, %v5372_v34  ;;  %v5391_v0 = vrot.slane %v5384_v37, 2  ;;  %v5426_v55 = vsel %vm765_vm4, %v5423_v48, %v5425_v6 }
 0x6a5   : > { %5651 = vadd.xlane.f32.xlu0 %v5650_v11  ;;  %v5378_v45 = vadd.f32 %v5373_v7, %v5298_v60  ;;  %v5320_v51 = vadd.f32 %v10672_v9, %v5236_v22  ;;  %v5430_v61 = vadd.f32 %v5426_v55, %v5362_v41 }
 0x6a6   : > { %v5531_v47 = vpop.permute.xlu0 %5530  ;;  %v5392_v9 = vsel %vm765_vm4, %v5389_v8, %v5391_v0 }
 0x6a7   : > { %v5489_v4 = vpop.permute.xlu1 %5488  ;;  %v10779_v29 = vadd.f32 %v5531_v47, %v5451_v62  ;;  %v5450_v20 = vadd.f32 %v10696_v40, %v5378_v45  ;;  %v5193_v40 = vadd.f32 %v5188_v14, %v10668_v49  ;;  %v5396_v42 = vadd.f32 %v5392_v9, %v5320_v51 }
 0x6a8   : > { %v5493_v3 = vadd.f32 %v5489_v4, %v5413_v54  ;;  %v5514_v49 = vadd.f32 %v10711_v43, %v5430_v61  ;;  %v5422_v54 = vrot.slane %v5416_v16, 2 }
 0x6a9   : > { %v5602_v13 = vsel %vm2818_vm5, %v10779_v29, 0.0  ;;  %v5277_v28 = vadd.f32 %v10684_v19, %v5193_v40  ;;  %v5472_v31 = vadd.f32 %v10717_v57, %v5396_v42 }
 0x6aa   : > { %v10789_v25 = vadd.f32 %v5573_v46, %v5493_v3  ;;  %5603 = vadd.xlane.f32.xlu1 %v5602_v13  ;;  %v5424_v57 = vsel %vm765_vm4, %v5422_v54, %v5423_v48 }
 0x6ab   : > { %v5361_v5 = vadd.f32 %v10680_v10, %v5277_v28  ;;  %v5663_v10 = vmul.f32 %v10760_v27, %v10760_v27 }
 0x6ac   : > { %v5705_v24 = vsel %vm2818_vm5, %v10789_v25, 0.0  ;;  %v5716_v3 = vmul.f32 %v10789_v25, %v10789_v25 }
 0x6ad   : > { %5706 = vadd.xlane.f32.xlu0 %v5705_v24  ;;  %v5429_v36 = vadd.f32 %v5424_v57, %v5361_v5  ;;  %v5665_v4 = vsel %vm2818_vm5, %v5663_v10, 0.0 }
 0x6ae   : > { %v5571_v34 = vpop.permute.xlu0 %5570  ;;  %v5720_v23 = vsel %vm2818_vm5, %v5716_v3, 0.0 }
 0x6af   : > { %v5529_v52 = vpop.permute.xlu1 %5528  ;;  %v10804_v35 = vadd.f32 %v5571_v34, %v5492_v15  ;;  %v5513_v39 = vadd.f32 %v10743_v21, %v5429_v36  ;;  %v5613_v21 = vmul.f32 %v10779_v29, %v10779_v29 }
 0x6b0   : > { %v10808_v18 = vadd.f32 %v5529_v52, %v5450_v20 }
 0x6b1   : > { %v5702_v44 = vsel %vm2818_vm5, %v10804_v35, 0.0  ;;  %v5617_v38 = vsel %vm2818_vm5, %v5613_v21, 0.0  ;;  %v5715_v26 = vmul.f32 %v10804_v35, %v10804_v35 }
 0x6b2   : > { %v5599_v53 = vsel %vm2818_vm5, %v10808_v18, 0.0  ;;  %5703 = vadd.xlane.f32.xlu1 %v5702_v44  ;;  %v5612_v17 = vmul.f32 %v10808_v18, %v10808_v18 }
 0x6b3   : > { %5600 = vadd.xlane.f32.xlu2 %v5599_v53  ;;  %v5717_v46 = vsel %vm2818_vm5, %v5715_v26, 0.0 }
 0x6b4   : > { %v5614_v11 = vsel %vm2818_vm5, %v5612_v17, 0.0 }
 0x6b5   : > { %5615 = vadd.xlane.f32.xlu0 %v5614_v11 }
 0x6b6   : > { %v5594_v50 = vpop.permute.xlu0 %5593 }
 0x6b7   : > { %v5552_v62 = vpop.permute.xlu1 %5551  ;;  %v10826_v12 = vadd.f32 %v5594_v50, %v5514_v49 }
 0x6b8   : > { %v10829_v8 = vadd.f32 %v5552_v62, %v5472_v31 }
 0x6b9   : > { %v5757_v19 = vsel %vm2818_vm5, %v10826_v12, 0.0  ;;  %v5768_v13 = vmul.f32 %v10826_v12, %v10826_v12 }
 0x6ba   : > { %v5653_v33 = vsel %vm2818_vm5, %v10829_v8, 0.0  ;;  %5758 = vadd.xlane.f32.xlu1 %v5757_v19  ;;  %v5664_v43 = vmul.f32 %v10829_v8, %v10829_v8 }
 0x6bb   : > { %5654 = vadd.xlane.f32.xlu2 %v5653_v33  ;;  %v5772_v59 = vsel %vm2818_vm5, %v5768_v13, 0.0 }
 0x6bc   : > { %v5668_v47 = vsel %vm2818_vm5, %v5664_v43, 0.0 }
 0x6bd   : > { %5669 = vadd.xlane.f32.xlu0 %v5668_v47 }
 0x6bf   : > { %v5592_v2 = vpop.permute.xlu1 %5591 }
 0x6c0   : > { %v10842_v30 = vadd.f32 %v5592_v2, %v5513_v39 }
 0x6c2   : > { %v5754_v60 = vsel %vm2818_vm5, %v10842_v30, 0.0  ;;  %5666 = vadd.xlane.f32.xlu1 %v5665_v4  ;;  %v5767_v58 = vmul.f32 %v10842_v30, %v10842_v30 }
 0x6c3   : > { %5755 = vadd.xlane.f32.xlu2 %v5754_v60 }
 0x6c4   : > { %v5769_v63 = vsel %vm2818_vm5, %v5767_v58, 0.0 }
 0x6c5   : > { %5770 = vadd.xlane.f32.xlu0 %v5769_v63 }
 0x6ca   : > { %5721 = vadd.xlane.f32.xlu1 %v5720_v23 }
 0x6cb   : > { %5618 = vadd.xlane.f32.xlu2 %v5617_v38 }
 0x6d3   : > { %5718 = vadd.xlane.f32.xlu2 %v5717_v46 }
 0x6db   : > { %5773 = vadd.xlane.f32.xlu2 %v5772_v59 }
 0x718   : > { %v5652_v1 = vpop.xlane.xlu0 %5651 }
 0x71d   : > { %v5604_v56 = vpop.xlane.xlu1 %5603 }
 0x720   : > { %v5707_v7 = vpop.xlane.xlu0 %5706 }
 0x725   : > { %v5704_v48 = vpop.xlane.xlu1 %5703 }
 0x726   : > { %v5601_v37 = vpop.xlane.xlu2 %5600  ;;  %v5708_v17 = vadd.f32 %v5707_v7, %v5704_v48 }
 0x727   : > { %v5605_v41 = vadd.f32 %v5604_v56, %v5601_v37 }
 0x728   : > { %v5616_v22 = vpop.xlane.xlu0 %5615  ;;  %v5709_v16 = vrot.slane %v5708_v17, 4 }
 0x729   : > { %v5606_v34 = vrot.slane %v5605_v41, 4 }
 0x72a   : > { %v5710_v19 = vadd.f32 %v5709_v16, %v5708_v17 }
 0x72b   : > { %v5607_v61 = vadd.f32 %v5606_v34, %v5605_v41 }
 0x72c   : > { %v5711_v39 = vrot.slane %v5710_v19, 2 }
 0x72d   : > { %v5759_v45 = vpop.xlane.xlu1 %5758  ;;  %v5608_v9 = vrot.slane %v5607_v61, 2 }
 0x72e   : > { %v5655_v6 = vpop.xlane.xlu2 %5654  ;;  %v5712_v3 = vadd.f32 %v5711_v39, %v5710_v19 }
 0x72f   : > { %v5656_v24 = vadd.f32 %v5655_v6, %v5652_v1  ;;  %v5609_v49 = vadd.f32 %v5608_v9, %v5607_v61 }
 0x730   : > { %v5670_v0 = vpop.xlane.xlu0 %5669  ;;  %v5713_v1 = vrot.slane %v5712_v3, 1 }
 0x731   : > { %v5657_v15 = vrot.slane %v5656_v24, 4  ;;  %v5610_v33 = vrot.slane %v5609_v49, 1 }
 0x732   : > { %v5714_v41 = vadd.f32 %v5713_v1, %v5712_v3 }
 0x733   : > { %v5658_v20 = vadd.f32 %v5657_v15, %v5656_v24  ;;  %v5611_v4 = vadd.f32 %v5610_v33, %v5609_v49 }
 0x735   : > { %v5659_v32 = vrot.slane %v5658_v20, 2  ;;  %v5667_v52 = vpop.xlane.xlu1 %5666  ;;  %v10866_v23 = vmul.f32 0.00390625, %v5611_v4 }
 0x736   : > { %v5671_v51 = vadd.f32 %v5670_v0, %v5667_v52  ;;  %v5756_v14 = vpop.xlane.xlu2 %5755 }
 0x737   : > { %v5660_v55 = vadd.f32 %v5659_v32, %v5658_v20  ;;  %v5760_v2 = vadd.f32 %v5759_v45, %v5756_v14  ;;  %v5629_v37 = vmul.f32 %v10866_v23, %v10866_v23 }
 0x738   : > { %v5672_v44 = vrot.slane %v5671_v51, 4 }
 0x739   : > { %v5661_v40 = vrot.slane %v5660_v55, 1  ;;  %v5761_v21 = vrot.slane %v5760_v2, 4 }
 0x73a   : > { %v5673_v53 = vadd.f32 %v5672_v44, %v5671_v51  ;;  %v10870_v51 = vmul.f32 0.00390625, %v5714_v41 }
 0x73b   : > { %v5662_v28 = vadd.f32 %v5661_v40, %v5660_v55  ;;  %v5762_v56 = vadd.f32 %v5761_v21, %v5760_v2  ;;  %v5771_v40 = vpop.xlane.xlu0 %5770 }
 0x73c   : > { %v5674_v42 = vrot.slane %v5673_v53, 2  ;;  %v5732_v49 = vmul.f32 %v10870_v51, %v10870_v51 }
 0x73d   : > { %v10862_v31 = vmul.f32 0.00390625, %v5662_v28  ;;  %v5722_v26 = vpop.xlane.xlu1 %5721  ;;  %v5763_v15 = vrot.slane %v5762_v56, 2 }
 0x73e   : > { %v5675_v11 = vadd.f32 %v5674_v42, %v5673_v53  ;;  %v5619_v62 = vpop.xlane.xlu2 %5618 }
 0x73f   : > { %v5620_v54 = vadd.f32 %v5619_v62, %v5616_v22  ;;  %v5680_v57 = vmul.f32 %v10862_v31, %v10862_v31  ;;  %v5764_v55 = vadd.f32 %v5763_v15, %v5762_v56  ;;  %v5682_v17 = vsub.f32 %v10760_v27, %v10862_v31  ;;  %v6326_v27 = vld [vmem:[%s6606_s20 + $0x10] sm:$0xff] }
 0x740   : > { %v5676_v50 = vrot.slane %v5675_v11, 1  ;;  %v5683_v9 = vsub.f32 %v10829_v8, %v10862_v31 }
 0x741   : > { %v5621_v36 = vrot.slane %v5620_v54, 4 }
 0x742   : > { %v5677_v5 = vadd.f32 %v5676_v50, %v5675_v11  ;;  %v5765_v11 = vrot.slane %v5764_v55, 1 }
 0x743   : > { %v5622_v10 = vadd.f32 %v5621_v36, %v5620_v54 }
 0x744   : > { %v5679_v43 = vmul.f32 0.00390625, %v5677_v5 }
 0x745   : > { %v5623_v58 = vrot.slane %v5622_v10, 2 }
 0x746   : > { %v5681_v47 = vsub.f32 %v5679_v43, %v5680_v57  ;;  %v5719_v46 = vpop.xlane.xlu2 %5718  ;;  %v6327_v57 = vld [vmem:[%s6606_s20 + $0x18] sm:$0xff] }
 0x747   : > { %v5624_v63 = vadd.f32 %v5623_v58, %v5622_v10  ;;  %v5723_v59 = vadd.f32 %v5722_v26, %v5719_v46  ;;  %v5766_v10 = vadd.f32 %v5765_v11, %v5764_v55  ;;  %v5632_v26 = vsub.f32 %v10779_v29, %v10866_v23 }
 0x748   : > { %v5684_v60 = vadd.f32 1e-05, %v5681_v47 }
 0x749   : > { %v5625_v38 = vrot.slane %v5624_v63, 1  ;;  %v5724_v22 = vrot.slane %v5723_v59, 4 }
 0x74a   : > { %6318 = vrsqrt.f32 %v5684_v60  ;;  %vm5691_vm1 = vweird.f32 %v5684_v60 }
 0x74b   : > { %v5626_v13 = vadd.f32 %v5625_v38, %v5624_v63  ;;  %v5725_v24 = vadd.f32 %v5724_v22, %v5723_v59  ;;  %v5782_v63 = vmul.f32 0.00390625, %v5766_v10  ;;  %v5631_v38 = vsub.f32 %v10808_v18, %v10866_v23  ;;  %v6328_v22 = vld [vmem:[%s6606_s20] sm:$0xff] }
 0x74d   : > { %v5628_v48 = vmul.f32 0.00390625, %v5626_v13  ;;  %v5726_v32 = vrot.slane %v5725_v24, 2 }
 0x74e   : > { %v5774_v53 = vpop.xlane.xlu2 %5773 }
 0x74f   : > { %v5630_v6 = vsub.f32 %v5628_v48, %v5629_v37  ;;  %v5727_v52 = vadd.f32 %v5726_v32, %v5725_v24  ;;  %v5775_v42 = vadd.f32 %v5774_v53, %v5771_v40  ;;  %v5784_v48 = vmul.f32 %v5782_v63, %v5782_v63  ;;  %v6331_v53 = vld [vmem:[%s6606_s20 + $0x28] sm:$0xff] }
 0x750   : > { %v6319_v7 = vpop.eup %6318  ;;  %v5735_v32 = vsub.f32 %v10789_v25, %v10870_v51 }
 0x751   : > { %v5686_v45 = vmul.f32 %v6319_v7, %v5684_v60  ;;  %v5633_v34 = vadd.f32 1e-05, %v5630_v6  ;;  %vm5692_vm0 = vweird.f32 %v6319_v7  ;;  %v5728_v61 = vrot.slane %v5727_v52, 1  ;;  %v6329_v6 = vld [vmem:[%s6606_s20 + $0x8] sm:$0xff] }
 0x752   : > { %vm5693_vm2 = vmor %vm5691_vm1, %vm5692_vm0  ;;  %v5776_v19 = vrot.slane %v5775_v42, 4 }
 0x753   : > { %v5687_v20 = vmul.f32 %v6319_v7, %v5686_v45  ;;  %6320 = vrsqrt.f32 %v5633_v34  ;;  %v5729_v28 = vadd.f32 %v5728_v61, %v5727_v52  ;;  %vm5640_vm4 = vweird.f32 %v5633_v34 }
 0x754   : > { %v5777_v31 = vadd.f32 %v5776_v19, %v5775_v42  ;;  %v5787_v42 = vsub.f32 %v10826_v12, %v5782_v63 }
 0x755   : > { %v5688_v0 = vmul.f32 0.5, %v5687_v20  ;;  %v5731_v54 = vmul.f32 0.00390625, %v5729_v28  ;;  %v5786_v28 = vsub.f32 %v10842_v30, %v5782_v63 }
 0x756   : > { %v5778_v2 = vrot.slane %v5777_v31, 2 }
 0x757   : > { %v5689_v14 = vsub.f32 1.5, %v5688_v0  ;;  %v5733_v8 = vsub.f32 %v5731_v54, %v5732_v49 }
 0x758   : > { %v5779_v60 = vadd.f32 %v5778_v2, %v5777_v31 }
 0x759   : > { %v5690_v44 = vmul.f32 %v6319_v7, %v5689_v14  ;;  %v6321_v50 = vpop.eup %6320  ;;  %v5736_v39 = vadd.f32 1e-05, %v5733_v8 }
 0x75a   : > { %v5635_v33 = vmul.f32 %v6321_v50, %v5633_v34  ;;  %vm5641_vm3 = vweird.f32 %v6321_v50  ;;  %v5780_v3 = vrot.slane %v5779_v60, 1  ;;  %v5734_v34 = vsub.f32 %v10804_v35, %v10870_v51 }
 0x75b   : > { %v5694_v16 = vsel %vm5693_vm2, %v6319_v7, %v5690_v44  ;;  %6322 = vrsqrt.f32 %v5736_v39  ;;  %vm5642_vm8 = vmor %vm5640_vm4, %vm5641_vm3  ;;  %vm5743_vm10 = vweird.f32 %v5736_v39  ;;  %v6330_v44 = vld [vmem:[%s6606_s20 + $0x20] sm:$0xff] }
 0x75c   : > { %v5695_v62 = vmul.f32 %v5694_v16, %v5682_v17  ;;  %v5696_v5 = vmul.f32 %v5694_v16, %v5683_v9  ;;  %v5636_v47 = vmul.f32 %v6321_v50, %v5635_v33  ;;  %v5781_v46 = vadd.f32 %v5780_v3, %v5779_v60 }
 0x75e   : > { %v5697_v43 = vadd.f32 %v6326_v27, %v5695_v62  ;;  %v5698_v36 = vadd.f32 %v6327_v57, %v5696_v5  ;;  %v5637_v4 = vmul.f32 0.5, %v5636_v47  ;;  %v5783_v7 = vmul.f32 0.00390625, %v5781_v46  ;;  %v6333_v5 = vld [vmem:[%s6606_s20 + $0x38] sm:$0xff] }
 0x760   : > { %6222 = vst.msk [vmem:[%s10882_s2 + $0x10] sm:$0xff] %vm2818_vm5, %v5697_v43  ;;  %v5638_v58 = vsub.f32 1.5, %v5637_v4  ;;  %v5785_v41 = vsub.f32 %v5783_v7, %v5784_v48 }
 0x761   : > { %6223 = vst.msk [vmem:[%s10882_s2 + $0x18] sm:$0xff] %vm2818_vm5, %v5698_v36  ;;  %v6323_v59 = vpop.eup %6322 }
 0x762   : > { %v5639_v21 = vmul.f32 %v6321_v50, %v5638_v58  ;;  %v5738_v37 = vmul.f32 %v6323_v59, %v5736_v39  ;;  %v5788_v29 = vadd.f32 1e-05, %v5785_v41  ;;  %vm5744_vm9 = vweird.f32 %v6323_v59 }
 0x763   : > { %vm5745_vm11 = vmor %vm5743_vm10, %vm5744_vm9 }
 0x764   : > { %v5643_v13 = vsel %vm5642_vm8, %v6321_v50, %v5639_v21  ;;  %v5739_v18 = vmul.f32 %v6323_v59, %v5738_v37  ;;  %6324 = vrsqrt.f32 %v5788_v29  ;;  %vm5795_vm13 = vweird.f32 %v5788_v29  ;;  %v6332_v50 = vld [vmem:[%s6606_s20 + $0x30] sm:$0xff] }
 0x765   : > { %v5644_v1 = vmul.f32 %v5643_v13, %v5631_v38  ;;  %v5645_v56 = vmul.f32 %v5643_v13, %v5632_v26 }
 0x766   : > { %v5740_v23 = vmul.f32 0.5, %v5739_v18 }
 0x767   : > { %v5646_v45 = vadd.f32 %v6328_v22, %v5644_v1  ;;  %v5647_v24 = vadd.f32 %v6329_v6, %v5645_v56 }
 0x768   : > { %v5741_v15 = vsub.f32 1.5, %v5740_v23 }
 0x769   : > { %5648 = vst.msk [vmem:[%s10882_s2] sm:$0xff] %vm2818_vm5, %v5646_v45 }
 0x76a   : > { %5649 = vst.msk [vmem:[%s10882_s2 + $0x8] sm:$0xff] %vm2818_vm5, %v5647_v24  ;;  %v5742_v20 = vmul.f32 %v6323_v59, %v5741_v15  ;;  %v6325_v52 = vpop.eup %6324 }
 0x76b   : > { %v5790_v61 = vmul.f32 %v6325_v52, %v5788_v29  ;;  %vm5796_vm12 = vweird.f32 %v6325_v52 }
 0x76c   : > { %v5746_v0 = vsel %vm5745_vm11, %v6323_v59, %v5742_v20  ;;  %vm5797_vm14 = vmor %vm5795_vm13, %vm5796_vm12 }
 0x76d   : > { %v5747_v55 = vmul.f32 %v5746_v0, %v5734_v34  ;;  %v5748_v14 = vmul.f32 %v5746_v0, %v5735_v32  ;;  %v5791_v9 = vmul.f32 %v6325_v52, %v5790_v61 }
 0x76f   : > { %v5749_v40 = vadd.f32 %v6330_v44, %v5747_v55  ;;  %v5750_v17 = vadd.f32 %v6331_v53, %v5748_v14  ;;  %v5792_v35 = vmul.f32 0.5, %v5791_v9 }
 0x771   : > { %6224 = vst.msk [vmem:[%s10882_s2 + $0x20] sm:$0xff] %vm2818_vm5, %v5749_v40  ;;  %v5793_v25 = vsub.f32 1.5, %v5792_v35 }
 0x772   : > { %6225 = vst.msk [vmem:[%s10882_s2 + $0x28] sm:$0xff] %vm2818_vm5, %v5750_v17 }
 0x773   : > { %v5794_v51 = vmul.f32 %v6325_v52, %v5793_v25 }
 0x775   : > { %v5798_v11 = vsel %vm5797_vm14, %v6325_v52, %v5794_v51 }
 0x776   : > { %v5799_v16 = vmul.f32 %v5798_v11, %v5786_v28  ;;  %v5800_v49 = vmul.f32 %v5798_v11, %v5787_v42 }
 0x778   : > { %v5801_v62 = vadd.f32 %v6332_v50, %v5799_v16  ;;  %v5802_v54 = vadd.f32 %v6333_v5, %v5800_v49 }
 0x77a   : > { %6226 = vst.msk [vmem:[%s10882_s2 + $0x30] sm:$0xff] %vm2818_vm5, %v5801_v62 }
 0x77b   : > { %6227 = vst.msk [vmem:[%s10882_s2 + $0x38] sm:$0xff] %vm2818_vm5, %v5802_v54 }
 0x77c   : > { %6421 = shalt.err (!%p6418_p8)
}
 0x77d   : > { %s6478_s17 = smov 128   ;;  %s6479_s9 = smov 8  }
 0x77e   : > { %6245 = dma.vmem_to_hbm [thread:$0]  (%p6552_p11), %s5820_s6, 1024, %s5822_s16, %s5807_s30, %s6478_s17, %s6478_s17, %s6479_s9  }
 0x77f PF: > { %s5836_s11 = sand.u32 1, %s6456_s12   ;;  %p11333_p9 = scmp.ge.s32.totalorder %s6468_s15, 2 }
 0x780   : > { %s5837_s8 = scalar_lea.sflag [#allocation4], %s5836_s11 }
 0x781   : > { %p6259_p10 = pnand %p11333_p9, %p6556_p12 }
 0x783   : > { %p6260_p1 = pneg %p6259_p10 }
 0x785   : > { %6451 = dma.done.wait (%p6260_p1), %s5837_s8, 1024  }
 0x786   : > { %6453 = vsyncadd (%p6260_p1), %s5837_s8, 4294966272  ;;  %s11334_s10 = sld [smem:[#allocation14_spill]]  ;;  %p18_p2 = scmp.ge.s32.totalorder %s6525_s18, 4  }
 0x787   : > { %s11335_s14 = sld [smem:[#allocation15_spill]]  ;;  %s11336_s12 = smov %s6460_s13 }
 0x788   : > { %s11338_s15 = smov %s6525_s18  ;;  %20 = sbr.rel (!%p18_p2) target bundleno = 11 (0xb), region = 92 }
 0x78c   : > { %s11337_s13 = smov %s11334_s10 }
 0x78d   :  { %5843 = vsyncpa [#allocation3], 1 }
 0x78e   :  { %5845 = vsyncpa [#allocation3 + $0x1], 1 }
 0x78f   :  { %5846 = vsyncpa [#allocation4], 1 }
 0x790   :  { %5848 = vsyncpa [#allocation4 + $0x1], 1 }
 0x791   :  { %5849 = vsyncpa [#allocation5], 1 }
 0x792   :  { %5851 = vsyncpa [#allocation5 + $0x1], 1 }
 0x793   :  { %5852 = vsyncpa [#allocation8], 1 }

</bundles_post_ra>
